<compile_context>
chip_gen: v7x
topology: tpu7x:2x2x1
jax: 0.10.0
libtpu: 0.0.40
codegen_flags: <defaults>
</compile_context>

<pallas_src>
import functools
import math

import jax
import jax.numpy as jnp
from jax.experimental import pallas as pl
from jax.experimental.pallas import tpu as pltpu


# ----------------------------- Pallas kernels ------------------------------ #

def _encoder_layer_kernel(*refs, nbatch, seq, nhead, self_value, use_mask,
                          fuse_out, ff_chunk, eps):
    """One full post-norm transformer encoder layer, fused.

    Activations are 2-D [nbatch*seq, E] with rows ordered (batch, seq).
    self_value=True  -> q/k/v all from src (standard encoder layer).
    self_value=False -> q/k from src, v from val (qk variant).
    fuse_out=True    -> also apply the final bias-free Linear(E, 1) and emit
                        only the [rows, 1] logits.
    """
    it = iter(refs)
    src_ref = next(it)
    val_ref = src_ref if self_value else next(it)
    mask_ref = next(it) if use_mask else None
    wq_ref = next(it); bq_ref = next(it)
    wk_ref = next(it); bk_ref = next(it)
    wv_ref = next(it); bv_ref = next(it)
    wo_ref = next(it); bo_ref = next(it)
    ln1g_ref = next(it); ln1b_ref = next(it)
    wff1_ref = next(it); bff1_ref = next(it)
    wff2_ref = next(it); bff2_ref = next(it)
    ln2g_ref = next(it); ln2b_ref = next(it)
    wout_ref = next(it) if fuse_out else None
    o_ref = next(it)

    R, E = src_ref.shape
    hd = E // nhead

    x = src_ref[...]                                          # [R, E] f32
    xv = x if self_value else val_ref[...]
    mask = mask_ref[...] if use_mask else None

    # Multi-head attention.  1/sqrt(hd) is folded into Wq/bq at pack time.
    # Head combine is folded into per-head row-slabs of Wo -> no concat of
    # activations and no activation lane-slicing anywhere.
    attn_acc = jnp.zeros((R, E), jnp.float32)
    for h in range(nhead):                                    # fixed, small unroll
        c0, c1 = h * hd, (h + 1) * hd
        qh = jnp.dot(x, wq_ref[:, c0:c1],
                     preferred_element_type=jnp.float32) + bq_ref[:, c0:c1]
        kh = jnp.dot(x, wk_ref[:, c0:c1],
                     preferred_element_type=jnp.float32) + bk_ref[:, c0:c1]
        vh = jnp.dot(xv, wv_ref[:, c0:c1],
                     preferred_element_type=jnp.float32) + bv_ref[:, c0:c1]
        # batched over the batch dim (no per-batch Python unrolling, no .T)
        q3 = qh.reshape(nbatch, seq, hd)
        k3 = kh.reshape(nbatch, seq, hd)
        v3 = vh.reshape(nbatch, seq, hd)
        s = jnp.einsum('bqd,bkd->bqk', q3, k3,
                       preferred_element_type=jnp.float32)    # [B, S, S]
        if use_mask:
            s = s + mask                                      # [S, S] broadcast
        m = jnp.max(s, axis=-1, keepdims=True)
        p = jnp.exp(s - m)
        denom = jnp.sum(p, axis=-1, keepdims=True)
        p = p * pl.reciprocal(denom, approx=True)
        ctx = jnp.einsum('bqk,bkd->bqd', p, v3,
                         preferred_element_type=jnp.float32)  # [B, S, hd]
        attn_acc = attn_acc + jnp.dot(ctx.reshape(R, hd), wo_ref[c0:c1, :],
                                      preferred_element_type=jnp.float32)
    proj = attn_acc + bo_ref[...]

    def layer_norm(z, g, b):
        mu = jnp.mean(z, axis=-1, keepdims=True)
        var = jnp.mean((z - mu) ** 2, axis=-1, keepdims=True)
        return (z - mu) * jax.lax.rsqrt(var + eps) * g + b

    y1 = layer_norm(x + proj, ln1g_ref[...], ln1b_ref[...])   # residual + LN1

    # Feed-forward, statically chunked over dim_ff: only a [R, ff_chunk]
    # intermediate is live at a time (bf16 weights/activations on the MXU,
    # f32 accumulation; all elementwise math stays f32 for v5e).
    y1c = y1.astype(wff1_ref.dtype)
    FF = wff1_ref.shape[-1]
    ff_acc = jnp.zeros((R, E), jnp.float32)
    for c in range(FF // ff_chunk):
        a0, a1 = c * ff_chunk, (c + 1) * ff_chunk
        hc = jnp.dot(y1c, wff1_ref[:, a0:a1],
                     preferred_element_type=jnp.float32) + bff1_ref[:, a0:a1]
        hc = jnp.maximum(hc, 0.0)
        ff_acc = ff_acc + jnp.dot(hc.astype(wff2_ref.dtype), wff2_ref[a0:a1, :],
                                  preferred_element_type=jnp.float32)
    h2 = ff_acc + bff2_ref[...]

    y2 = layer_norm(y1 + h2, ln2g_ref[...], ln2b_ref[...])    # residual + LN2

    if fuse_out:
        # final Linear(E, 1, bias=False) as VPU multiply + lane reduce
        # (no MXU pass with a single output column, no extra kernel launch).
        o_ref[...] = jnp.sum(y2 * wout_ref[...], axis=-1, keepdims=True)
    else:
        o_ref[...] = y2


# ------------------------------ glue wrappers ------------------------------ #

def _const_spec(a):
    return pl.BlockSpec(a.shape, lambda i: (0, 0))


def _pick_batch_block(nbatch, seq, target_rows=256):
    """Largest batch sub-block giving >=2 grid steps (megacore split on v7x)
    while keeping rows-per-step near `target_rows` (MXU fill / per-step
    overhead on v5e/v6e) and the row block tile-aligned (multiple of 8)."""
    best = nbatch
    for bb in range(1, nbatch // 2 + 1):
        if nbatch % bb:
            continue
        rows = bb * seq
        if rows % 8:
            continue
        if rows <= max(target_rows, seq):
            best = bb
    return best


def encoder_layer(src2, val2, mask, pp, *, nbatch, seq, nhead,
                  batch_block=None, wout=None, eps=1e-5, ff_chunk=512):
    """Run one fused encoder layer.  src2/val2: [nbatch*seq, E] (batch-major).
    If wout is given, the final bias-free output projection is fused and the
    result is [nbatch*seq, 1] logits instead of [nbatch*seq, E]."""
    M, E = src2.shape
    self_value = val2 is None
    use_mask = mask is not None
    fuse_out = wout is not None
    if batch_block is None:
        batch_block = _pick_batch_block(nbatch, seq)
    assert nbatch % batch_block == 0
    nblk = nbatch // batch_block
    rows = batch_block * seq

    FF = pp['wff1'].shape[-1]
    ff_chunk = min(ff_chunk, FF)
    assert FF % ff_chunk == 0

    row_spec = pl.BlockSpec((rows, E), lambda i: (i, 0))

    args, specs = [src2], [row_spec]
    if not self_value:
        args.append(val2)
        specs.append(row_spec)
    if use_mask:
        args.append(mask)
        specs.append(_const_spec(mask))

    weights = [pp['wq'], pp['bq'], pp['wk'], pp['bk'], pp['wv'], pp['bv'],
               pp['wo'], pp['bo'], pp['ln1g'], pp['ln1b'],
               pp['wff1'], pp['bff1'], pp['wff2'], pp['bff2'],
               pp['ln2g'], pp['ln2b']]
    if fuse_out:
        weights.append(wout)
    for w in weights:
        args.append(w)
        specs.append(_const_spec(w))

    if fuse_out:
        out_shape = jax.ShapeDtypeStruct((M, 1), jnp.float32)
        out_spec = pl.BlockSpec((rows, 1), lambda i: (i, 0))
    else:
        out_shape = jax.ShapeDtypeStruct((M, E), jnp.float32)
        out_spec = row_spec

    kernel = functools.partial(
        _encoder_layer_kernel, nbatch=batch_block, seq=seq, nhead=nhead,
        self_value=self_value, use_mask=use_mask, fuse_out=fuse_out,
        ff_chunk=ff_chunk, eps=eps)

    return pl.pallas_call(
        kernel,
        out_shape=out_shape,
        grid=(nblk,),
        in_specs=specs,
        out_specs=out_spec,
        compiler_params=pltpu.CompilerParams(
            dimension_semantics=("parallel",),       # sharded across v7x's 2 TCs
            vmem_limit_bytes=48 * 1024 * 1024),      # <= v7x's 64 MiB, fine on v5e/v6e
    )(*args)


def pack_layer_params(lp, nhead):
    """Pre-transpose weights once, fold 1/sqrt(hd) into Wq/bq, bf16 FF weights."""
    d = lp['out_w'].shape[0]
    hd = d // nhead
    scale = 1.0 / math.sqrt(hd)
    return dict(
        wq=lp['in_w'][:d].T * scale,
        bq=(lp['in_b'][:d] * scale).reshape(1, -1),
        wk=lp['in_w'][d:2 * d].T,
        bk=lp['in_b'][d:2 * d].reshape(1, -1),
        wv=lp['in_w'][2 * d:].T,
        bv=lp['in_b'][2 * d:].reshape(1, -1),
        wo=lp['out_w'].T, bo=lp['out_b'].reshape(1, -1),
        ln1g=lp['ln1_w'].reshape(1, -1), ln1b=lp['ln1_b'].reshape(1, -1),
        wff1=lp['ff1_w'].T.astype(jnp.bfloat16), bff1=lp['ff1_b'].reshape(1, -1),
        wff2=lp['ff2_w'].T.astype(jnp.bfloat16), bff2=lp['ff2_b'].reshape(1, -1),
        ln2g=lp['ln2_w'].reshape(1, -1), ln2b=lp['ln2_b'].reshape(1, -1),
    )


def sthg_forward(tpe, params, nhead, attn_wnd):
    """tpe: [time_steps, n_pairs, 2*hidden]  ->  [time_steps, n_pairs]."""
    T, N, E = tpe.shape

    enc_std = [pack_layer_params(lp, nhead) for lp in params['enc_std']]
    enc_qk = [pack_layer_params(lp, nhead) for lp in params['enc_qk']]

    # 1) standard transformer_encoder: attention over the N pairs within each
    #    timestep (seq = N, batch = T); rows ordered (t, n) -> free flatten.
    z = tpe.reshape(T * N, E)
    for pp in enc_std:
        z = encoder_layer(z, None, None, pp, nbatch=T, seq=N, nhead=nhead)
    outs_zs = z.reshape(T, N, E)                                  # [T, N, E]

    # 2) Time2Vec (SineActivation(1, E)) positional signal added to embeddings.
    taus = jnp.arange(1, T + 1, dtype=jnp.float32).reshape(T, 1)
    t2v_sin = jnp.sin(taus @ params['t2v_w'] + params['t2v_b'])   # [T, E-1]
    t2v_lin = taus @ params['t2v_w0'] + params['t2v_b0']          # [T, 1]
    t2v = jnp.concatenate([t2v_sin, t2v_lin], axis=-1)[:, None, :]
    x_t2v = tpe + t2v                                             # [T, N, E]

    # 3) causal + windowed mask, built with where (no -inf + -inf arithmetic).
    ii = jnp.arange(T)[:, None]
    jj = jnp.arange(T)[None, :]
    allowed = (jj <= ii) & (jj > ii - attn_wnd)
    masks = jnp.where(allowed, 0.0, -jnp.inf).astype(jnp.float32)

    # 4) qk transformer encoder: attention over T timesteps within each pair
    #    (seq = T, batch = N); query/key from x_t2v, value from outs_zs.
    #    The final bias-free output projection is fused into the LAST layer.
    # TODO(synk): the (t,n)->(n,t) reorder stays in the XLA wrapper; moving it
    # into the kernel would need a major-dim transpose Mosaic may not lower at E=32.
    q_rows = x_t2v.transpose(1, 0, 2).reshape(N * T, E)
    v_rows = outs_zs.transpose(1, 0, 2).reshape(N * T, E)
    out = q_rows
    assert params['out_w'].shape[0] == 1
    last = len(enc_qk) - 1
    for li, pp in enumerate(enc_qk):
        out = encoder_layer(out, v_rows, masks, pp, nbatch=N, seq=T, nhead=nhead,
                            wout=params['out_w'] if li == last else None)

    # out: [N*T, 1] fused logits -> reorder the tiny result back to [T, N].
    return out.reshape(N, T).transpose(1, 0)


# ------------------------------ parameter init ----------------------------- #

def init_layer_params(key, d, ff, scale=0.05):
    ks = jax.random.split(key, 6)
    return dict(
        in_w=jax.random.normal(ks[0], (3 * d, d), jnp.float32) * scale,
        in_b=jax.random.normal(ks[1], (3 * d,), jnp.float32) * scale,
        out_w=jax.random.normal(ks[2], (d, d), jnp.float32) * scale,
        out_b=jax.random.normal(ks[3], (d,), jnp.float32) * scale,
        ff1_w=jax.random.normal(ks[4], (ff, d), jnp.float32) * scale,
        ff1_b=jnp.zeros((ff,), jnp.float32),
        ff2_w=jax.random.normal(ks[5], (d, ff), jnp.float32) * scale,
        ff2_b=jnp.zeros((d,), jnp.float32),
        ln1_w=jnp.ones((d,), jnp.float32), ln1_b=jnp.zeros((d,), jnp.float32),
        ln2_w=jnp.ones((d,), jnp.float32), ln2_b=jnp.zeros((d,), jnp.float32),
    )


def init_sthg_params(key, d_model, out_dim, dim_ff, num_layers_qk):
    k_std, k_qk, k_out, k_t0, k_t1, k_t2, k_t3 = jax.random.split(key, 7)
    return dict(
        enc_std=[init_layer_params(k_std, d_model, dim_ff)],          # num_layers=1
        enc_qk=[init_layer_params(k, d_model, dim_ff)
                for k in jax.random.split(k_qk, num_layers_qk)],
        out_w=jax.random.normal(k_out, (out_dim, d_model), jnp.float32) * 0.05,
        # SineActivation(1, d_model): sin branch [1, d-1] + linear branch [1, 1]
        t2v_w=jax.random.normal(k_t0, (1, d_model - 1), jnp.float32) * 0.5,
        t2v_b=jax.random.normal(k_t1, (d_model - 1,), jnp.float32) * 0.5,
        t2v_w0=jax.random.normal(k_t2, (1, 1), jnp.float32) * 0.5,
        t2v_b0=jax.random.normal(k_t3, (1,), jnp.float32) * 0.5,
    )


# ----------------------------------- main ----------------------------------- #

if __name__ == "__main__":
    hidden_dim = 16
    d_model = 2 * hidden_dim          # 32
    nhead = 4
    time_steps = 8
    attn_wnd = 4
    num_layers_qk = 2
    out_dim = 1
    n_pairs = 8
    dim_ff = 2048                     # PyTorch nn.TransformerEncoderLayer default

    key = jax.random.PRNGKey(0)
    kx, kp = jax.random.split(key)

    # TODO(synk): SAGE GNN over DGL blocks + torch.unique pair gathering have no
    # Pallas equivalent; we synthesize the concat of two L2-normalized halves
    # ([T, N, 2*hidden]) that the graph stage would produce.
    raw = jax.random.normal(kx, (time_steps, n_pairs, d_model), jnp.float32)
    a = raw[..., :hidden_dim]
    b = raw[..., hidden_dim:]
    a = a / jnp.linalg.norm(a, axis=-1, keepdims=True)
    b = b / jnp.linalg.norm(b, axis=-1, keepdims=True)
    temporal_pairs_embeddings = jnp.concatenate([a, b], axis=-1)

    params = init_sthg_params(kp, d_model, out_dim, dim_ff, num_layers_qk)

    fwd = jax.jit(lambda x, p: sthg_forward(x, p, nhead, attn_wnd))
    out = fwd(temporal_pairs_embeddings, params)
    out = jax.block_until_ready(out)

    assert out.shape == (time_steps, n_pairs), out.shape
    assert bool(jnp.all(jnp.isfinite(out)))
    print("KERNEL_OK")
</pallas_src>

<mosaic_0001>
module attributes {stable_mosaic.version = 11 : i64} {
  func.func @_encoder_layer_kernel(%arg0: i32, %arg1: memref<32x32xf32, #tpu.memory_space<vmem>>, %arg2: memref<32x32xf32, #tpu.memory_space<vmem>>, %arg3: memref<1x32xf32, #tpu.memory_space<vmem>>, %arg4: memref<32x32xf32, #tpu.memory_space<vmem>>, %arg5: memref<1x32xf32, #tpu.memory_space<vmem>>, %arg6: memref<32x32xf32, #tpu.memory_space<vmem>>, %arg7: memref<1x32xf32, #tpu.memory_space<vmem>>, %arg8: memref<32x32xf32, #tpu.memory_space<vmem>>, %arg9: memref<1x32xf32, #tpu.memory_space<vmem>>, %arg10: memref<1x32xf32, #tpu.memory_space<vmem>>, %arg11: memref<1x32xf32, #tpu.memory_space<vmem>>, %arg12: memref<32x2048xbf16, #tpu.memory_space<vmem>>, %arg13: memref<1x2048xf32, #tpu.memory_space<vmem>>, %arg14: memref<2048x32xbf16, #tpu.memory_space<vmem>>, %arg15: memref<1x32xf32, #tpu.memory_space<vmem>>, %arg16: memref<1x32xf32, #tpu.memory_space<vmem>>, %arg17: memref<1x32xf32, #tpu.memory_space<vmem>>, %arg18: memref<32x32xf32, #tpu.memory_space<vmem>>) attributes {dimension_semantics = [#tpu.dimension_semantics<parallel>], iteration_bounds = array<i64: 2>, scalar_prefetch = 0 : i64, scratch_operands = 0 : i64, tpu.core_type = #tpu.core_type<tc>, window_params = [{transform_indices = @transform_0, window_bounds = array<i64: 32, 32>}, {pipeline_mode = #tpu.pipeline_mode<synchronous>, transform_indices = @transform_1, window_bounds = array<i64: 32, 32>}, {pipeline_mode = #tpu.pipeline_mode<synchronous>, transform_indices = @transform_2, window_bounds = array<i64: 1, 32>}, {pipeline_mode = #tpu.pipeline_mode<synchronous>, transform_indices = @transform_3, window_bounds = array<i64: 32, 32>}, {pipeline_mode = #tpu.pipeline_mode<synchronous>, transform_indices = @transform_4, window_bounds = array<i64: 1, 32>}, {pipeline_mode = #tpu.pipeline_mode<synchronous>, transform_indices = @transform_5, window_bounds = array<i64: 32, 32>}, {pipeline_mode = #tpu.pipeline_mode<synchronous>, transform_indices = @transform_6, window_bounds = array<i64: 1, 32>}, {pipeline_mode = #tpu.pipeline_mode<synchronous>, transform_indices = @transform_7, window_bounds = array<i64: 32, 32>}, {pipeline_mode = #tpu.pipeline_mode<synchronous>, transform_indices = @transform_8, window_bounds = array<i64: 1, 32>}, {pipeline_mode = #tpu.pipeline_mode<synchronous>, transform_indices = @transform_9, window_bounds = array<i64: 1, 32>}, {pipeline_mode = #tpu.pipeline_mode<synchronous>, transform_indices = @transform_10, window_bounds = array<i64: 1, 32>}, {pipeline_mode = #tpu.pipeline_mode<synchronous>, transform_indices = @transform_11, window_bounds = array<i64: 32, 2048>}, {pipeline_mode = #tpu.pipeline_mode<synchronous>, transform_indices = @transform_12, window_bounds = array<i64: 1, 2048>}, {pipeline_mode = #tpu.pipeline_mode<synchronous>, transform_indices = @transform_13, window_bounds = array<i64: 2048, 32>}, {pipeline_mode = #tpu.pipeline_mode<synchronous>, transform_indices = @transform_14, window_bounds = array<i64: 1, 32>}, {pipeline_mode = #tpu.pipeline_mode<synchronous>, transform_indices = @transform_15, window_bounds = array<i64: 1, 32>}, {pipeline_mode = #tpu.pipeline_mode<synchronous>, transform_indices = @transform_16, window_bounds = array<i64: 1, 32>}, {transform_indices = @transform_17, window_bounds = array<i64: 32, 32>}]} {
    %c0 = arith.constant 0 : index
    %c0_0 = arith.constant 0 : index
    %0 = vector.load %arg1[%c0, %c0_0] : memref<32x32xf32, #tpu.memory_space<vmem>>, vector<32x32xf32>
    %cst = arith.constant 0.000000e+00 : f32
    %1 = vector.broadcast %cst : f32 to vector<32x32xf32>
    %c0_1 = arith.constant 0 : index
    %c0_2 = arith.constant 0 : index
    %2 = vector.load %arg2[%c0_1, %c0_2] : memref<32x32xf32, #tpu.memory_space<vmem>>, vector<32x8xf32>
    %cst_3 = arith.constant dense<0.000000e+00> : vector<32x8xf32>
    %3 = tpu.matmul %0, %2, %cst_3 {dimension_numbers = #tpu.dot_dimension_numbers<[1], [0], [0], [1], [0, 0, 1, 1], [], []>} : vector<32x32xf32>, vector<32x8xf32>, vector<32x8xf32> -> vector<32x8xf32>
    %c0_4 = arith.constant 0 : index
    %c0_5 = arith.constant 0 : index
    %4 = vector.load %arg3[%c0_4, %c0_5] : memref<1x32xf32, #tpu.memory_space<vmem>>, vector<1x8xf32>
    %5 = vector.broadcast %4 : vector<1x8xf32> to vector<32x8xf32>
    %6 = arith.addf %3, %5 : vector<32x8xf32>
    %c0_6 = arith.constant 0 : index
    %c0_7 = arith.constant 0 : index
    %7 = vector.load %arg4[%c0_6, %c0_7] : memref<32x32xf32, #tpu.memory_space<vmem>>, vector<32x8xf32>
    %cst_8 = arith.constant dense<0.000000e+00> : vector<32x8xf32>
    %8 = tpu.matmul %0, %7, %cst_8 {dimension_numbers = #tpu.dot_dimension_numbers<[1], [0], [0], [1], [0, 0, 1, 1], [], []>} : vector<32x32xf32>, vector<32x8xf32>, vector<32x8xf32> -> vector<32x8xf32>
    %c0_9 = arith.constant 0 : index
    %c0_10 = arith.constant 0 : index
    %9 = vector.load %arg5[%c0_9, %c0_10] : memref<1x32xf32, #tpu.memory_space<vmem>>, vector<1x8xf32>
    %10 = vector.broadcast %9 : vector<1x8xf32> to vector<32x8xf32>
    %11 = arith.addf %8, %10 : vector<32x8xf32>
    %c0_11 = arith.constant 0 : index
    %c0_12 = arith.constant 0 : index
    %12 = vector.load %arg6[%c0_11, %c0_12] : memref<32x32xf32, #tpu.memory_space<vmem>>, vector<32x8xf32>
    %cst_13 = arith.constant dense<0.000000e+00> : vector<32x8xf32>
    %13 = tpu.matmul %0, %12, %cst_13 {dimension_numbers = #tpu.dot_dimension_numbers<[1], [0], [0], [1], [0, 0, 1, 1], [], []>} : vector<32x32xf32>, vector<32x8xf32>, vector<32x8xf32> -> vector<32x8xf32>
    %c0_14 = arith.constant 0 : index
    %c0_15 = arith.constant 0 : index
    %14 = vector.load %arg7[%c0_14, %c0_15] : memref<1x32xf32, #tpu.memory_space<vmem>>, vector<1x8xf32>
    %15 = vector.broadcast %14 : vector<1x8xf32> to vector<32x8xf32>
    %16 = arith.addf %13, %15 : vector<32x8xf32>
    %17 = vector.shape_cast %6 : vector<32x8xf32> to vector<4x8x8xf32>
    %18 = vector.shape_cast %11 : vector<32x8xf32> to vector<4x8x8xf32>
    %19 = vector.shape_cast %16 : vector<32x8xf32> to vector<4x8x8xf32>
    "tpu.trace_start"() <{level = 10 : i32, message = "bqd,bkd->bqk"}> : () -> ()
    %cst_16 = arith.constant dense<0.000000e+00> : vector<4x8x8xf32>
    %20 = tpu.matmul %17, %18, %cst_16 {dimension_numbers = #tpu.dot_dimension_numbers<[2], [2], [1], [1], [0, 0, 0, 1, 1, 1], [0], [0]>} : vector<4x8x8xf32>, vector<4x8x8xf32>, vector<4x8x8xf32> -> vector<4x8x8xf32>
    "tpu.trace_stop"() : () -> ()
    %cst_17 = arith.constant dense<0xFF800000> : vector<4x8xf32>
    %21 = vector.multi_reduction <maximumf>, %20, %cst_17 [2] : vector<4x8x8xf32> to vector<4x8xf32>
    %22 = vector.shape_cast %21 : vector<4x8xf32> to vector<4x8x1xf32>
    %23 = vector.broadcast %22 : vector<4x8x1xf32> to vector<4x8x8xf32>
    %24 = arith.subf %20, %23 : vector<4x8x8xf32>
    %25 = math.exp %24 : vector<4x8x8xf32>
    %cst_18 = arith.constant dense<0.000000e+00> : vector<4x8xf32>
    %26 = vector.multi_reduction <add>, %25, %cst_18 [2] : vector<4x8x8xf32> to vector<4x8xf32>
    %27 = vector.shape_cast %26 : vector<4x8xf32> to vector<4x8x1xf32>
    %28 = tpu.reciprocal %27 {approx = true} : vector<4x8x1xf32> -> vector<4x8x1xf32>
    %29 = vector.broadcast %28 : vector<4x8x1xf32> to vector<4x8x8xf32>
    %30 = arith.mulf %25, %29 : vector<4x8x8xf32>
    "tpu.trace_start"() <{level = 10 : i32, message = "bqk,bkd->bqd"}> : () -> ()
    %cst_19 = arith.constant dense<0.000000e+00> : vector<4x8x8xf32>
    %31 = tpu.matmul %30, %19, %cst_19 {dimension_numbers = #tpu.dot_dimension_numbers<[2], [1], [1], [2], [0, 0, 0, 1, 1, 2], [0], [0]>} : vector<4x8x8xf32>, vector<4x8x8xf32>, vector<4x8x8xf32> -> vector<4x8x8xf32>
    "tpu.trace_stop"() : () -> ()
    %32 = vector.shape_cast %31 : vector<4x8x8xf32> to vector<32x8xf32>
    %c0_20 = arith.constant 0 : index
    %c0_21 = arith.constant 0 : index
    %33 = vector.load %arg8[%c0_20, %c0_21] : memref<32x32xf32, #tpu.memory_space<vmem>>, vector<8x32xf32>
    %cst_22 = arith.constant dense<0.000000e+00> : vector<32x32xf32>
    %34 = tpu.matmul %32, %33, %cst_22 {dimension_numbers = #tpu.dot_dimension_numbers<[1], [0], [0], [1], [0, 0, 1, 1], [], []>} : vector<32x8xf32>, vector<8x32xf32>, vector<32x32xf32> -> vector<32x32xf32>
    %35 = arith.addf %1, %34 : vector<32x32xf32>
    %c0_23 = arith.constant 0 : index
    %c8 = arith.constant 8 : index
    %36 = vector.load %arg2[%c0_23, %c8] : memref<32x32xf32, #tpu.memory_space<vmem>>, vector<32x8xf32>
    %cst_24 = arith.constant dense<0.000000e+00> : vector<32x8xf32>
    %37 = tpu.matmul %0, %36, %cst_24 {dimension_numbers = #tpu.dot_dimension_numbers<[1], [0], [0], [1], [0, 0, 1, 1], [], []>} : vector<32x32xf32>, vector<32x8xf32>, vector<32x8xf32> -> vector<32x8xf32>
    %c0_25 = arith.constant 0 : index
    %c8_26 = arith.constant 8 : index
    %38 = vector.load %arg3[%c0_25, %c8_26] : memref<1x32xf32, #tpu.memory_space<vmem>>, vector<1x8xf32>
    %39 = vector.broadcast %38 : vector<1x8xf32> to vector<32x8xf32>
    %40 = arith.addf %37, %39 : vector<32x8xf32>
    %c0_27 = arith.constant 0 : index
    %c8_28 = arith.constant 8 : index
    %41 = vector.load %arg4[%c0_27, %c8_28] : memref<32x32xf32, #tpu.memory_space<vmem>>, vector<32x8xf32>
    %cst_29 = arith.constant dense<0.000000e+00> : vector<32x8xf32>
    %42 = tpu.matmul %0, %41, %cst_29 {dimension_numbers = #tpu.dot_dimension_numbers<[1], [0], [0], [1], [0, 0, 1, 1], [], []>} : vector<32x32xf32>, vector<32x8xf32>, vector<32x8xf32> -> vector<32x8xf32>
    %c0_30 = arith.constant 0 : index
    %c8_31 = arith.constant 8 : index
    %43 = vector.load %arg5[%c0_30, %c8_31] : memref<1x32xf32, #tpu.memory_space<vmem>>, vector<1x8xf32>
    %44 = vector.broadcast %43 : vector<1x8xf32> to vector<32x8xf32>
    %45 = arith.addf %42, %44 : vector<32x8xf32>
    %c0_32 = arith.constant 0 : index
    %c8_33 = arith.constant 8 : index
    %46 = vector.load %arg6[%c0_32, %c8_33] : memref<32x32xf32, #tpu.memory_space<vmem>>, vector<32x8xf32>
    %cst_34 = arith.constant dense<0.000000e+00> : vector<32x8xf32>
    %47 = tpu.matmul %0, %46, %cst_34 {dimension_numbers = #tpu.dot_dimension_numbers<[1], [0], [0], [1], [0, 0, 1, 1], [], []>} : vector<32x32xf32>, vector<32x8xf32>, vector<32x8xf32> -> vector<32x8xf32>
    %c0_35 = arith.constant 0 : index
    %c8_36 = arith.constant 8 : index
    %48 = vector.load %arg7[%c0_35, %c8_36] : memref<1x32xf32, #tpu.memory_space<vmem>>, vector<1x8xf32>
    %49 = vector.broadcast %48 : vector<1x8xf32> to vector<32x8xf32>
    %50 = arith.addf %47, %49 : vector<32x8xf32>
    %51 = vector.shape_cast %40 : vector<32x8xf32> to vector<4x8x8xf32>
    %52 = vector.shape_cast %45 : vector<32x8xf32> to vector<4x8x8xf32>
    %53 = vector.shape_cast %50 : vector<32x8xf32> to vector<4x8x8xf32>
    "tpu.trace_start"() <{level = 10 : i32, message = "bqd,bkd->bqk"}> : () -> ()
    %cst_37 = arith.constant dense<0.000000e+00> : vector<4x8x8xf32>
    %54 = tpu.matmul %51, %52, %cst_37 {dimension_numbers = #tpu.dot_dimension_numbers<[2], [2], [1], [1], [0, 0, 0, 1, 1, 1], [0], [0]>} : vector<4x8x8xf32>, vector<4x8x8xf32>, vector<4x8x8xf32> -> vector<4x8x8xf32>
    "tpu.trace_stop"() : () -> ()
    %cst_38 = arith.constant dense<0xFF800000> : vector<4x8xf32>
    %55 = vector.multi_reduction <maximumf>, %54, %cst_38 [2] : vector<4x8x8xf32> to vector<4x8xf32>
    %56 = vector.shape_cast %55 : vector<4x8xf32> to vector<4x8x1xf32>
    %57 = vector.broadcast %56 : vector<4x8x1xf32> to vector<4x8x8xf32>
    %58 = arith.subf %54, %57 : vector<4x8x8xf32>
    %59 = math.exp %58 : vector<4x8x8xf32>
    %cst_39 = arith.constant dense<0.000000e+00> : vector<4x8xf32>
    %60 = vector.multi_reduction <add>, %59, %cst_39 [2] : vector<4x8x8xf32> to vector<4x8xf32>
    %61 = vector.shape_cast %60 : vector<4x8xf32> to vector<4x8x1xf32>
    %62 = tpu.reciprocal %61 {approx = true} : vector<4x8x1xf32> -> vector<4x8x1xf32>
    %63 = vector.broadcast %62 : vector<4x8x1xf32> to vector<4x8x8xf32>
    %64 = arith.mulf %59, %63 : vector<4x8x8xf32>
    "tpu.trace_start"() <{level = 10 : i32, message = "bqk,bkd->bqd"}> : () -> ()
    %cst_40 = arith.constant dense<0.000000e+00> : vector<4x8x8xf32>
    %65 = tpu.matmul %64, %53, %cst_40 {dimension_numbers = #tpu.dot_dimension_numbers<[2], [1], [1], [2], [0, 0, 0, 1, 1, 2], [0], [0]>} : vector<4x8x8xf32>, vector<4x8x8xf32>, vector<4x8x8xf32> -> vector<4x8x8xf32>
    "tpu.trace_stop"() : () -> ()
    %66 = vector.shape_cast %65 : vector<4x8x8xf32> to vector<32x8xf32>
    %c8_41 = arith.constant 8 : index
    %c0_42 = arith.constant 0 : index
    %67 = vector.load %arg8[%c8_41, %c0_42] : memref<32x32xf32, #tpu.memory_space<vmem>>, vector<8x32xf32>
    %cst_43 = arith.constant dense<0.000000e+00> : vector<32x32xf32>
    %68 = tpu.matmul %66, %67, %cst_43 {dimension_numbers = #tpu.dot_dimension_numbers<[1], [0], [0], [1], [0, 0, 1, 1], [], []>} : vector<32x8xf32>, vector<8x32xf32>, vector<32x32xf32> -> vector<32x32xf32>
    %69 = arith.addf %35, %68 : vector<32x32xf32>
    %c0_44 = arith.constant 0 : index
    %c16 = arith.constant 16 : index
    %70 = vector.load %arg2[%c0_44, %c16] : memref<32x32xf32, #tpu.memory_space<vmem>>, vector<32x8xf32>
    %cst_45 = arith.constant dense<0.000000e+00> : vector<32x8xf32>
    %71 = tpu.matmul %0, %70, %cst_45 {dimension_numbers = #tpu.dot_dimension_numbers<[1], [0], [0], [1], [0, 0, 1, 1], [], []>} : vector<32x32xf32>, vector<32x8xf32>, vector<32x8xf32> -> vector<32x8xf32>
    %c0_46 = arith.constant 0 : index
    %c16_47 = arith.constant 16 : index
    %72 = vector.load %arg3[%c0_46, %c16_47] : memref<1x32xf32, #tpu.memory_space<vmem>>, vector<1x8xf32>
    %73 = vector.broadcast %72 : vector<1x8xf32> to vector<32x8xf32>
    %74 = arith.addf %71, %73 : vector<32x8xf32>
    %c0_48 = arith.constant 0 : index
    %c16_49 = arith.constant 16 : index
    %75 = vector.load %arg4[%c0_48, %c16_49] : memref<32x32xf32, #tpu.memory_space<vmem>>, vector<32x8xf32>
    %cst_50 = arith.constant dense<0.000000e+00> : vector<32x8xf32>
    %76 = tpu.matmul %0, %75, %cst_50 {dimension_numbers = #tpu.dot_dimension_numbers<[1], [0], [0], [1], [0, 0, 1, 1], [], []>} : vector<32x32xf32>, vector<32x8xf32>, vector<32x8xf32> -> vector<32x8xf32>
    %c0_51 = arith.constant 0 : index
    %c16_52 = arith.constant 16 : index
    %77 = vector.load %arg5[%c0_51, %c16_52] : memref<1x32xf32, #tpu.memory_space<vmem>>, vector<1x8xf32>
    %78 = vector.broadcast %77 : vector<1x8xf32> to vector<32x8xf32>
    %79 = arith.addf %76, %78 : vector<32x8xf32>
    %c0_53 = arith.constant 0 : index
    %c16_54 = arith.constant 16 : index
    %80 = vector.load %arg6[%c0_53, %c16_54] : memref<32x32xf32, #tpu.memory_space<vmem>>, vector<32x8xf32>
    %cst_55 = arith.constant dense<0.000000e+00> : vector<32x8xf32>
    %81 = tpu.matmul %0, %80, %cst_55 {dimension_numbers = #tpu.dot_dimension_numbers<[1], [0], [0], [1], [0, 0, 1, 1], [], []>} : vector<32x32xf32>, vector<32x8xf32>, vector<32x8xf32> -> vector<32x8xf32>
    %c0_56 = arith.constant 0 : index
    %c16_57 = arith.constant 16 : index
    %82 = vector.load %arg7[%c0_56, %c16_57] : memref<1x32xf32, #tpu.memory_space<vmem>>, vector<1x8xf32>
    %83 = vector.broadcast %82 : vector<1x8xf32> to vector<32x8xf32>
    %84 = arith.addf %81, %83 : vector<32x8xf32>
    %85 = vector.shape_cast %74 : vector<32x8xf32> to vector<4x8x8xf32>
    %86 = vector.shape_cast %79 : vector<32x8xf32> to vector<4x8x8xf32>
    %87 = vector.shape_cast %84 : vector<32x8xf32> to vector<4x8x8xf32>
    "tpu.trace_start"() <{level = 10 : i32, message = "bqd,bkd->bqk"}> : () -> ()
    %cst_58 = arith.constant dense<0.000000e+00> : vector<4x8x8xf32>
    %88 = tpu.matmul %85, %86, %cst_58 {dimension_numbers = #tpu.dot_dimension_numbers<[2], [2], [1], [1], [0, 0, 0, 1, 1, 1], [0], [0]>} : vector<4x8x8xf32>, vector<4x8x8xf32>, vector<4x8x8xf32> -> vector<4x8x8xf32>
    "tpu.trace_stop"() : () -> ()
    %cst_59 = arith.constant dense<0xFF800000> : vector<4x8xf32>
    %89 = vector.multi_reduction <maximumf>, %88, %cst_59 [2] : vector<4x8x8xf32> to vector<4x8xf32>
    %90 = vector.shape_cast %89 : vector<4x8xf32> to vector<4x8x1xf32>
    %91 = vector.broadcast %90 : vector<4x8x1xf32> to vector<4x8x8xf32>
    %92 = arith.subf %88, %91 : vector<4x8x8xf32>
    %93 = math.exp %92 : vector<4x8x8xf32>
    %cst_60 = arith.constant dense<0.000000e+00> : vector<4x8xf32>
    %94 = vector.multi_reduction <add>, %93, %cst_60 [2] : vector<4x8x8xf32> to vector<4x8xf32>
    %95 = vector.shape_cast %94 : vector<4x8xf32> to vector<4x8x1xf32>
    %96 = tpu.reciprocal %95 {approx = true} : vector<4x8x1xf32> -> vector<4x8x1xf32>
    %97 = vector.broadcast %96 : vector<4x8x1xf32> to vector<4x8x8xf32>
    %98 = arith.mulf %93, %97 : vector<4x8x8xf32>
    "tpu.trace_start"() <{level = 10 : i32, message = "bqk,bkd->bqd"}> : () -> ()
    %cst_61 = arith.constant dense<0.000000e+00> : vector<4x8x8xf32>
    %99 = tpu.matmul %98, %87, %cst_61 {dimension_numbers = #tpu.dot_dimension_numbers<[2], [1], [1], [2], [0, 0, 0, 1, 1, 2], [0], [0]>} : vector<4x8x8xf32>, vector<4x8x8xf32>, vector<4x8x8xf32> -> vector<4x8x8xf32>
    "tpu.trace_stop"() : () -> ()
    %100 = vector.shape_cast %99 : vector<4x8x8xf32> to vector<32x8xf32>
    %c16_62 = arith.constant 16 : index
    %c0_63 = arith.constant 0 : index
    %101 = vector.load %arg8[%c16_62, %c0_63] : memref<32x32xf32, #tpu.memory_space<vmem>>, vector<8x32xf32>
    %cst_64 = arith.constant dense<0.000000e+00> : vector<32x32xf32>
    %102 = tpu.matmul %100, %101, %cst_64 {dimension_numbers = #tpu.dot_dimension_numbers<[1], [0], [0], [1], [0, 0, 1, 1], [], []>} : vector<32x8xf32>, vector<8x32xf32>, vector<32x32xf32> -> vector<32x32xf32>
    %103 = arith.addf %69, %102 : vector<32x32xf32>
    %c0_65 = arith.constant 0 : index
    %c24 = arith.constant 24 : index
    %104 = vector.load %arg2[%c0_65, %c24] : memref<32x32xf32, #tpu.memory_space<vmem>>, vector<32x8xf32>
    %cst_66 = arith.constant dense<0.000000e+00> : vector<32x8xf32>
    %105 = tpu.matmul %0, %104, %cst_66 {dimension_numbers = #tpu.dot_dimension_numbers<[1], [0], [0], [1], [0, 0, 1, 1], [], []>} : vector<32x32xf32>, vector<32x8xf32>, vector<32x8xf32> -> vector<32x8xf32>
    %c0_67 = arith.constant 0 : index
    %c24_68 = arith.constant 24 : index
    %106 = vector.load %arg3[%c0_67, %c24_68] : memref<1x32xf32, #tpu.memory_space<vmem>>, vector<1x8xf32>
    %107 = vector.broadcast %106 : vector<1x8xf32> to vector<32x8xf32>
    %108 = arith.addf %105, %107 : vector<32x8xf32>
    %c0_69 = arith.constant 0 : index
    %c24_70 = arith.constant 24 : index
    %109 = vector.load %arg4[%c0_69, %c24_70] : memref<32x32xf32, #tpu.memory_space<vmem>>, vector<32x8xf32>
    %cst_71 = arith.constant dense<0.000000e+00> : vector<32x8xf32>
    %110 = tpu.matmul %0, %109, %cst_71 {dimension_numbers = #tpu.dot_dimension_numbers<[1], [0], [0], [1], [0, 0, 1, 1], [], []>} : vector<32x32xf32>, vector<32x8xf32>, vector<32x8xf32> -> vector<32x8xf32>
    %c0_72 = arith.constant 0 : index
    %c24_73 = arith.constant 24 : index
    %111 = vector.load %arg5[%c0_72, %c24_73] : memref<1x32xf32, #tpu.memory_space<vmem>>, vector<1x8xf32>
    %112 = vector.broadcast %111 : vector<1x8xf32> to vector<32x8xf32>
    %113 = arith.addf %110, %112 : vector<32x8xf32>
    %c0_74 = arith.constant 0 : index
    %c24_75 = arith.constant 24 : index
    %114 = vector.load %arg6[%c0_74, %c24_75] : memref<32x32xf32, #tpu.memory_space<vmem>>, vector<32x8xf32>
    %cst_76 = arith.constant dense<0.000000e+00> : vector<32x8xf32>
    %115 = tpu.matmul %0, %114, %cst_76 {dimension_numbers = #tpu.dot_dimension_numbers<[1], [0], [0], [1], [0, 0, 1, 1], [], []>} : vector<32x32xf32>, vector<32x8xf32>, vector<32x8xf32> -> vector<32x8xf32>
    %c0_77 = arith.constant 0 : index
    %c24_78 = arith.constant 24 : index
    %116 = vector.load %arg7[%c0_77, %c24_78] : memref<1x32xf32, #tpu.memory_space<vmem>>, vector<1x8xf32>
    %117 = vector.broadcast %116 : vector<1x8xf32> to vector<32x8xf32>
    %118 = arith.addf %115, %117 : vector<32x8xf32>
    %119 = vector.shape_cast %108 : vector<32x8xf32> to vector<4x8x8xf32>
    %120 = vector.shape_cast %113 : vector<32x8xf32> to vector<4x8x8xf32>
    %121 = vector.shape_cast %118 : vector<32x8xf32> to vector<4x8x8xf32>
    "tpu.trace_start"() <{level = 10 : i32, message = "bqd,bkd->bqk"}> : () -> ()
    %cst_79 = arith.constant dense<0.000000e+00> : vector<4x8x8xf32>
    %122 = tpu.matmul %119, %120, %cst_79 {dimension_numbers = #tpu.dot_dimension_numbers<[2], [2], [1], [1], [0, 0, 0, 1, 1, 1], [0], [0]>} : vector<4x8x8xf32>, vector<4x8x8xf32>, vector<4x8x8xf32> -> vector<4x8x8xf32>
    "tpu.trace_stop"() : () -> ()
    %cst_80 = arith.constant dense<0xFF800000> : vector<4x8xf32>
    %123 = vector.multi_reduction <maximumf>, %122, %cst_80 [2] : vector<4x8x8xf32> to vector<4x8xf32>
    %124 = vector.shape_cast %123 : vector<4x8xf32> to vector<4x8x1xf32>
    %125 = vector.broadcast %124 : vector<4x8x1xf32> to vector<4x8x8xf32>
    %126 = arith.subf %122, %125 : vector<4x8x8xf32>
    %127 = math.exp %126 : vector<4x8x8xf32>
    %cst_81 = arith.constant dense<0.000000e+00> : vector<4x8xf32>
    %128 = vector.multi_reduction <add>, %127, %cst_81 [2] : vector<4x8x8xf32> to vector<4x8xf32>
    %129 = vector.shape_cast %128 : vector<4x8xf32> to vector<4x8x1xf32>
    %130 = tpu.reciprocal %129 {approx = true} : vector<4x8x1xf32> -> vector<4x8x1xf32>
    %131 = vector.broadcast %130 : vector<4x8x1xf32> to vector<4x8x8xf32>
    %132 = arith.mulf %127, %131 : vector<4x8x8xf32>
    "tpu.trace_start"() <{level = 10 : i32, message = "bqk,bkd->bqd"}> : () -> ()
    %cst_82 = arith.constant dense<0.000000e+00> : vector<4x8x8xf32>
    %133 = tpu.matmul %132, %121, %cst_82 {dimension_numbers = #tpu.dot_dimension_numbers<[2], [1], [1], [2], [0, 0, 0, 1, 1, 2], [0], [0]>} : vector<4x8x8xf32>, vector<4x8x8xf32>, vector<4x8x8xf32> -> vector<4x8x8xf32>
    "tpu.trace_stop"() : () -> ()
    %134 = vector.shape_cast %133 : vector<4x8x8xf32> to vector<32x8xf32>
    %c24_83 = arith.constant 24 : index
    %c0_84 = arith.constant 0 : index
    %135 = vector.load %arg8[%c24_83, %c0_84] : memref<32x32xf32, #tpu.memory_space<vmem>>, vector<8x32xf32>
    %cst_85 = arith.constant dense<0.000000e+00> : vector<32x32xf32>
    %136 = tpu.matmul %134, %135, %cst_85 {dimension_numbers = #tpu.dot_dimension_numbers<[1], [0], [0], [1], [0, 0, 1, 1], [], []>} : vector<32x8xf32>, vector<8x32xf32>, vector<32x32xf32> -> vector<32x32xf32>
    %137 = arith.addf %103, %136 : vector<32x32xf32>
    %c0_86 = arith.constant 0 : index
    %c0_87 = arith.constant 0 : index
    %138 = vector.load %arg9[%c0_86, %c0_87] : memref<1x32xf32, #tpu.memory_space<vmem>>, vector<1x32xf32>
    %139 = vector.broadcast %138 : vector<1x32xf32> to vector<32x32xf32>
    %140 = arith.addf %137, %139 : vector<32x32xf32>
    %141 = arith.addf %0, %140 : vector<32x32xf32>
    %c0_88 = arith.constant 0 : index
    %c0_89 = arith.constant 0 : index
    %142 = vector.load %arg10[%c0_88, %c0_89] : memref<1x32xf32, #tpu.memory_space<vmem>>, vector<1x32xf32>
    %c0_90 = arith.constant 0 : index
    %c0_91 = arith.constant 0 : index
    %143 = vector.load %arg11[%c0_90, %c0_91] : memref<1x32xf32, #tpu.memory_space<vmem>>, vector<1x32xf32>
    %cst_92 = arith.constant dense<0.000000e+00> : vector<32xf32>
    %144 = vector.multi_reduction <add>, %141, %cst_92 [1] : vector<32x32xf32> to vector<32xf32>
    %145 = vector.shape_cast %144 : vector<32xf32> to vector<32x1xf32>
    %cst_93 = arith.constant 3.200000e+01 : f32
    %146 = vector.broadcast %cst_93 : f32 to vector<32x1xf32>
    %147 = arith.divf %145, %146 : vector<32x1xf32>
    %148 = vector.broadcast %147 : vector<32x1xf32> to vector<32x32xf32>
    %149 = arith.subf %141, %148 : vector<32x32xf32>
    %150 = arith.mulf %149, %149 : vector<32x32xf32>
    %cst_94 = arith.constant dense<0.000000e+00> : vector<32xf32>
    %151 = vector.multi_reduction <add>, %150, %cst_94 [1] : vector<32x32xf32> to vector<32xf32>
    %152 = vector.shape_cast %151 : vector<32xf32> to vector<32x1xf32>
    %cst_95 = arith.constant 3.200000e+01 : f32
    %153 = vector.broadcast %cst_95 : f32 to vector<32x1xf32>
    %154 = arith.divf %152, %153 : vector<32x1xf32>
    %155 = vector.broadcast %147 : vector<32x1xf32> to vector<32x32xf32>
    %156 = arith.subf %141, %155 : vector<32x32xf32>
    %cst_96 = arith.constant 9.99999974E-6 : f32
    %157 = vector.broadcast %cst_96 : f32 to vector<32x1xf32>
    %158 = arith.addf %154, %157 : vector<32x1xf32>
    %159 = math.rsqrt %158 : vector<32x1xf32>
    %160 = vector.broadcast %159 : vector<32x1xf32> to vector<32x32xf32>
    %161 = arith.mulf %156, %160 : vector<32x32xf32>
    %162 = vector.broadcast %142 : vector<1x32xf32> to vector<32x32xf32>
    %163 = arith.mulf %161, %162 : vector<32x32xf32>
    %164 = vector.broadcast %143 : vector<1x32xf32> to vector<32x32xf32>
    %165 = arith.addf %163, %164 : vector<32x32xf32>
    %166 = arith.truncf %165 : vector<32x32xf32> to vector<32x32xbf16>
    %cst_97 = arith.constant 0.000000e+00 : f32
    %167 = vector.broadcast %cst_97 : f32 to vector<32x32xf32>
    %c0_98 = arith.constant 0 : index
    %c0_99 = arith.constant 0 : index
    %168 = vector.load %arg12[%c0_98, %c0_99] : memref<32x2048xbf16, #tpu.memory_space<vmem>>, vector<32x512xbf16>
    %cst_100 = arith.constant dense<0.000000e+00> : vector<32x512xf32>
    %169 = tpu.matmul %166, %168, %cst_100 {dimension_numbers = #tpu.dot_dimension_numbers<[1], [0], [0], [1], [0, 0, 1, 1], [], []>} : vector<32x32xbf16>, vector<32x512xbf16>, vector<32x512xf32> -> vector<32x512xf32>
    %c0_101 = arith.constant 0 : index
    %c0_102 = arith.constant 0 : index
    %170 = vector.load %arg13[%c0_101, %c0_102] : memref<1x2048xf32, #tpu.memory_space<vmem>>, vector<1x512xf32>
    %171 = vector.broadcast %170 : vector<1x512xf32> to vector<32x512xf32>
    %172 = arith.addf %169, %171 : vector<32x512xf32>
    %cst_103 = arith.constant 0.000000e+00 : f32
    %173 = vector.broadcast %cst_103 : f32 to vector<32x512xf32>
    %174 = arith.maximumf %172, %173 : vector<32x512xf32>
    %175 = arith.truncf %174 : vector<32x512xf32> to vector<32x512xbf16>
    %c0_104 = arith.constant 0 : index
    %c0_105 = arith.constant 0 : index
    %176 = vector.load %arg14[%c0_104, %c0_105] : memref<2048x32xbf16, #tpu.memory_space<vmem>>, vector<512x32xbf16>
    %cst_106 = arith.constant dense<0.000000e+00> : vector<32x32xf32>
    %177 = tpu.matmul %175, %176, %cst_106 {dimension_numbers = #tpu.dot_dimension_numbers<[1], [0], [0], [1], [0, 0, 1, 1], [], []>} : vector<32x512xbf16>, vector<512x32xbf16>, vector<32x32xf32> -> vector<32x32xf32>
    %178 = arith.addf %167, %177 : vector<32x32xf32>
    %c0_107 = arith.constant 0 : index
    %c512 = arith.constant 512 : index
    %179 = vector.load %arg12[%c0_107, %c512] : memref<32x2048xbf16, #tpu.memory_space<vmem>>, vector<32x512xbf16>
    %cst_108 = arith.constant dense<0.000000e+00> : vector<32x512xf32>
    %180 = tpu.matmul %166, %179, %cst_108 {dimension_numbers = #tpu.dot_dimension_numbers<[1], [0], [0], [1], [0, 0, 1, 1], [], []>} : vector<32x32xbf16>, vector<32x512xbf16>, vector<32x512xf32> -> vector<32x512xf32>
    %c0_109 = arith.constant 0 : index
    %c512_110 = arith.constant 512 : index
    %181 = vector.load %arg13[%c0_109, %c512_110] : memref<1x2048xf32, #tpu.memory_space<vmem>>, vector<1x512xf32>
    %182 = vector.broadcast %181 : vector<1x512xf32> to vector<32x512xf32>
    %183 = arith.addf %180, %182 : vector<32x512xf32>
    %cst_111 = arith.constant 0.000000e+00 : f32
    %184 = vector.broadcast %cst_111 : f32 to vector<32x512xf32>
    %185 = arith.maximumf %183, %184 : vector<32x512xf32>
    %186 = arith.truncf %185 : vector<32x512xf32> to vector<32x512xbf16>
    %c512_112 = arith.constant 512 : index
    %c0_113 = arith.constant 0 : index
    %187 = vector.load %arg14[%c512_112, %c0_113] : memref<2048x32xbf16, #tpu.memory_space<vmem>>, vector<512x32xbf16>
    %cst_114 = arith.constant dense<0.000000e+00> : vector<32x32xf32>
    %188 = tpu.matmul %186, %187, %cst_114 {dimension_numbers = #tpu.dot_dimension_numbers<[1], [0], [0], [1], [0, 0, 1, 1], [], []>} : vector<32x512xbf16>, vector<512x32xbf16>, vector<32x32xf32> -> vector<32x32xf32>
    %189 = arith.addf %178, %188 : vector<32x32xf32>
    %c0_115 = arith.constant 0 : index
    %c1024 = arith.constant 1024 : index
    %190 = vector.load %arg12[%c0_115, %c1024] : memref<32x2048xbf16, #tpu.memory_space<vmem>>, vector<32x512xbf16>
    %cst_116 = arith.constant dense<0.000000e+00> : vector<32x512xf32>
    %191 = tpu.matmul %166, %190, %cst_116 {dimension_numbers = #tpu.dot_dimension_numbers<[1], [0], [0], [1], [0, 0, 1, 1], [], []>} : vector<32x32xbf16>, vector<32x512xbf16>, vector<32x512xf32> -> vector<32x512xf32>
    %c0_117 = arith.constant 0 : index
    %c1024_118 = arith.constant 1024 : index
    %192 = vector.load %arg13[%c0_117, %c1024_118] : memref<1x2048xf32, #tpu.memory_space<vmem>>, vector<1x512xf32>
    %193 = vector.broadcast %192 : vector<1x512xf32> to vector<32x512xf32>
    %194 = arith.addf %191, %193 : vector<32x512xf32>
    %cst_119 = arith.constant 0.000000e+00 : f32
    %195 = vector.broadcast %cst_119 : f32 to vector<32x512xf32>
    %196 = arith.maximumf %194, %195 : vector<32x512xf32>
    %197 = arith.truncf %196 : vector<32x512xf32> to vector<32x512xbf16>
    %c1024_120 = arith.constant 1024 : index
    %c0_121 = arith.constant 0 : index
    %198 = vector.load %arg14[%c1024_120, %c0_121] : memref<2048x32xbf16, #tpu.memory_space<vmem>>, vector<512x32xbf16>
    %cst_122 = arith.constant dense<0.000000e+00> : vector<32x32xf32>
    %199 = tpu.matmul %197, %198, %cst_122 {dimension_numbers = #tpu.dot_dimension_numbers<[1], [0], [0], [1], [0, 0, 1, 1], [], []>} : vector<32x512xbf16>, vector<512x32xbf16>, vector<32x32xf32> -> vector<32x32xf32>
    %200 = arith.addf %189, %199 : vector<32x32xf32>
    %c0_123 = arith.constant 0 : index
    %c1536 = arith.constant 1536 : index
    %201 = vector.load %arg12[%c0_123, %c1536] : memref<32x2048xbf16, #tpu.memory_space<vmem>>, vector<32x512xbf16>
    %cst_124 = arith.constant dense<0.000000e+00> : vector<32x512xf32>
    %202 = tpu.matmul %166, %201, %cst_124 {dimension_numbers = #tpu.dot_dimension_numbers<[1], [0], [0], [1], [0, 0, 1, 1], [], []>} : vector<32x32xbf16>, vector<32x512xbf16>, vector<32x512xf32> -> vector<32x512xf32>
    %c0_125 = arith.constant 0 : index
    %c1536_126 = arith.constant 1536 : index
    %203 = vector.load %arg13[%c0_125, %c1536_126] : memref<1x2048xf32, #tpu.memory_space<vmem>>, vector<1x512xf32>
    %204 = vector.broadcast %203 : vector<1x512xf32> to vector<32x512xf32>
    %205 = arith.addf %202, %204 : vector<32x512xf32>
    %cst_127 = arith.constant 0.000000e+00 : f32
    %206 = vector.broadcast %cst_127 : f32 to vector<32x512xf32>
    %207 = arith.maximumf %205, %206 : vector<32x512xf32>
    %208 = arith.truncf %207 : vector<32x512xf32> to vector<32x512xbf16>
    %c1536_128 = arith.constant 1536 : index
    %c0_129 = arith.constant 0 : index
    %209 = vector.load %arg14[%c1536_128, %c0_129] : memref<2048x32xbf16, #tpu.memory_space<vmem>>, vector<512x32xbf16>
    %cst_130 = arith.constant dense<0.000000e+00> : vector<32x32xf32>
    %210 = tpu.matmul %208, %209, %cst_130 {dimension_numbers = #tpu.dot_dimension_numbers<[1], [0], [0], [1], [0, 0, 1, 1], [], []>} : vector<32x512xbf16>, vector<512x32xbf16>, vector<32x32xf32> -> vector<32x32xf32>
    %211 = arith.addf %200, %210 : vector<32x32xf32>
    %c0_131 = arith.constant 0 : index
    %c0_132 = arith.constant 0 : index
    %212 = vector.load %arg15[%c0_131, %c0_132] : memref<1x32xf32, #tpu.memory_space<vmem>>, vector<1x32xf32>
    %213 = vector.broadcast %212 : vector<1x32xf32> to vector<32x32xf32>
    %214 = arith.addf %211, %213 : vector<32x32xf32>
    %215 = arith.addf %165, %214 : vector<32x32xf32>
    %c0_133 = arith.constant 0 : index
    %c0_134 = arith.constant 0 : index
    %216 = vector.load %arg16[%c0_133, %c0_134] : memref<1x32xf32, #tpu.memory_space<vmem>>, vector<1x32xf32>
    %c0_135 = arith.constant 0 : index
    %c0_136 = arith.constant 0 : index
    %217 = vector.load %arg17[%c0_135, %c0_136] : memref<1x32xf32, #tpu.memory_space<vmem>>, vector<1x32xf32>
    %cst_137 = arith.constant dense<0.000000e+00> : vector<32xf32>
    %218 = vector.multi_reduction <add>, %215, %cst_137 [1] : vector<32x32xf32> to vector<32xf32>
    %219 = vector.shape_cast %218 : vector<32xf32> to vector<32x1xf32>
    %cst_138 = arith.constant 3.200000e+01 : f32
    %220 = vector.broadcast %cst_138 : f32 to vector<32x1xf32>
    %221 = arith.divf %219, %220 : vector<32x1xf32>
    %222 = vector.broadcast %221 : vector<32x1xf32> to vector<32x32xf32>
    %223 = arith.subf %215, %222 : vector<32x32xf32>
    %224 = arith.mulf %223, %223 : vector<32x32xf32>
    %cst_139 = arith.constant dense<0.000000e+00> : vector<32xf32>
    %225 = vector.multi_reduction <add>, %224, %cst_139 [1] : vector<32x32xf32> to vector<32xf32>
    %226 = vector.shape_cast %225 : vector<32xf32> to vector<32x1xf32>
    %cst_140 = arith.constant 3.200000e+01 : f32
    %227 = vector.broadcast %cst_140 : f32 to vector<32x1xf32>
    %228 = arith.divf %226, %227 : vector<32x1xf32>
    %229 = vector.broadcast %221 : vector<32x1xf32> to vector<32x32xf32>
    %230 = arith.subf %215, %229 : vector<32x32xf32>
    %cst_141 = arith.constant 9.99999974E-6 : f32
    %231 = vector.broadcast %cst_141 : f32 to vector<32x1xf32>
    %232 = arith.addf %228, %231 : vector<32x1xf32>
    %233 = math.rsqrt %232 : vector<32x1xf32>
    %234 = vector.broadcast %233 : vector<32x1xf32> to vector<32x32xf32>
    %235 = arith.mulf %230, %234 : vector<32x32xf32>
    %236 = vector.broadcast %216 : vector<1x32xf32> to vector<32x32xf32>
    %237 = arith.mulf %235, %236 : vector<32x32xf32>
    %238 = vector.broadcast %217 : vector<1x32xf32> to vector<32x32xf32>
    %239 = arith.addf %237, %238 : vector<32x32xf32>
    %c0_142 = arith.constant 0 : index
    %c0_143 = arith.constant 0 : index
    %240 = vector.load %arg18[%c0_142, %c0_143] : memref<32x32xf32, #tpu.memory_space<vmem>>, vector<32x32xf32>
    tpu.vector_store %arg18[%c0_142, %c0_143], %239 {strides = array<i32>} : memref<32x32xf32, #tpu.memory_space<vmem>>, vector<32x32xf32>,
    return
  }
  func.func @transform_0(%arg0: i32) -> (i32, i32) {
    %c0_i32 = arith.constant 0 : i32
    %c0_i32_0 = arith.constant 0 : i32
    return %arg0, %c0_i32 : i32, i32
  }
  func.func @transform_1(%arg0: i32) -> (i32, i32) {
    %c0_i32 = arith.constant 0 : i32
    %c0_i32_0 = arith.constant 0 : i32
    %c0_i32_1 = arith.constant 0 : i32
    return %c0_i32, %c0_i32_0 : i32, i32
  }
  func.func @transform_2(%arg0: i32) -> (i32, i32) {
    %c0_i32 = arith.constant 0 : i32
    %c0_i32_0 = arith.constant 0 : i32
    %c0_i32_1 = arith.constant 0 : i32
    return %c0_i32, %c0_i32_0 : i32, i32
  }
  func.func @transform_3(%arg0: i32) -> (i32, i32) {
    %c0_i32 = arith.constant 0 : i32
    %c0_i32_0 = arith.constant 0 : i32
    %c0_i32_1 = arith.constant 0 : i32
    return %c0_i32, %c0_i32_0 : i32, i32
  }
  func.func @transform_4(%arg0: i32) -> (i32, i32) {
    %c0_i32 = arith.constant 0 : i32
    %c0_i32_0 = arith.constant 0 : i32
    %c0_i32_1 = arith.constant 0 : i32
    return %c0_i32, %c0_i32_0 : i32, i32
  }
  func.func @transform_5(%arg0: i32) -> (i32, i32) {
    %c0_i32 = arith.constant 0 : i32
    %c0_i32_0 = arith.constant 0 : i32
    %c0_i32_1 = arith.constant 0 : i32
    return %c0_i32, %c0_i32_0 : i32, i32
  }
  func.func @transform_6(%arg0: i32) -> (i32, i32) {
    %c0_i32 = arith.constant 0 : i32
    %c0_i32_0 = arith.constant 0 : i32
    %c0_i32_1 = arith.constant 0 : i32
    return %c0_i32, %c0_i32_0 : i32, i32
  }
  func.func @transform_7(%arg0: i32) -> (i32, i32) {
    %c0_i32 = arith.constant 0 : i32
    %c0_i32_0 = arith.constant 0 : i32
    %c0_i32_1 = arith.constant 0 : i32
    return %c0_i32, %c0_i32_0 : i32, i32
  }
  func.func @transform_8(%arg0: i32) -> (i32, i32) {
    %c0_i32 = arith.constant 0 : i32
    %c0_i32_0 = arith.constant 0 : i32
    %c0_i32_1 = arith.constant 0 : i32
    return %c0_i32, %c0_i32_0 : i32, i32
  }
  func.func @transform_9(%arg0: i32) -> (i32, i32) {
    %c0_i32 = arith.constant 0 : i32
    %c0_i32_0 = arith.constant 0 : i32
    %c0_i32_1 = arith.constant 0 : i32
    return %c0_i32, %c0_i32_0 : i32, i32
  }
  func.func @transform_10(%arg0: i32) -> (i32, i32) {
    %c0_i32 = arith.constant 0 : i32
    %c0_i32_0 = arith.constant 0 : i32
    %c0_i32_1 = arith.constant 0 : i32
    return %c0_i32, %c0_i32_0 : i32, i32
  }
  func.func @transform_11(%arg0: i32) -> (i32, i32) {
    %c0_i32 = arith.constant 0 : i32
    %c0_i32_0 = arith.constant 0 : i32
    %c0_i32_1 = arith.constant 0 : i32
    return %c0_i32, %c0_i32_0 : i32, i32
  }
  func.func @transform_12(%arg0: i32) -> (i32, i32) {
    %c0_i32 = arith.constant 0 : i32
    %c0_i32_0 = arith.constant 0 : i32
    %c0_i32_1 = arith.constant 0 : i32
    return %c0_i32, %c0_i32_0 : i32, i32
  }
  func.func @transform_13(%arg0: i32) -> (i32, i32) {
    %c0_i32 = arith.constant 0 : i32
    %c0_i32_0 = arith.constant 0 : i32
    %c0_i32_1 = arith.constant 0 : i32
    return %c0_i32, %c0_i32_0 : i32, i32
  }
  func.func @transform_14(%arg0: i32) -> (i32, i32) {
    %c0_i32 = arith.constant 0 : i32
    %c0_i32_0 = arith.constant 0 : i32
    %c0_i32_1 = arith.constant 0 : i32
    return %c0_i32, %c0_i32_0 : i32, i32
  }
  func.func @transform_15(%arg0: i32) -> (i32, i32) {
    %c0_i32 = arith.constant 0 : i32
    %c0_i32_0 = arith.constant 0 : i32
    %c0_i32_1 = arith.constant 0 : i32
    return %c0_i32, %c0_i32_0 : i32, i32
  }
  func.func @transform_16(%arg0: i32) -> (i32, i32) {
    %c0_i32 = arith.constant 0 : i32
    %c0_i32_0 = arith.constant 0 : i32
    %c0_i32_1 = arith.constant 0 : i32
    return %c0_i32, %c0_i32_0 : i32, i32
  }
  func.func @transform_17(%arg0: i32) -> (i32, i32) {
    %c0_i32 = arith.constant 0 : i32
    %c0_i32_0 = arith.constant 0 : i32
    return %arg0, %c0_i32 : i32, i32
  }
}

module attributes {stable_mosaic.version = 11 : i64} {
  func.func @_encoder_layer_kernel(%arg0: i32, %arg1: memref<32x32xf32, #tpu.memory_space<vmem>>, %arg2: memref<32x32xf32, #tpu.memory_space<vmem>>, %arg3: memref<8x8xf32, #tpu.memory_space<vmem>>, %arg4: memref<32x32xf32, #tpu.memory_space<vmem>>, %arg5: memref<1x32xf32, #tpu.memory_space<vmem>>, %arg6: memref<32x32xf32, #tpu.memory_space<vmem>>, %arg7: memref<1x32xf32, #tpu.memory_space<vmem>>, %arg8: memref<32x32xf32, #tpu.memory_space<vmem>>, %arg9: memref<1x32xf32, #tpu.memory_space<vmem>>, %arg10: memref<32x32xf32, #tpu.memory_space<vmem>>, %arg11: memref<1x32xf32, #tpu.memory_space<vmem>>, %arg12: memref<1x32xf32, #tpu.memory_space<vmem>>, %arg13: memref<1x32xf32, #tpu.memory_space<vmem>>, %arg14: memref<32x2048xbf16, #tpu.memory_space<vmem>>, %arg15: memref<1x2048xf32, #tpu.memory_space<vmem>>, %arg16: memref<2048x32xbf16, #tpu.memory_space<vmem>>, %arg17: memref<1x32xf32, #tpu.memory_space<vmem>>, %arg18: memref<1x32xf32, #tpu.memory_space<vmem>>, %arg19: memref<1x32xf32, #tpu.memory_space<vmem>>, %arg20: memref<1x32xf32, #tpu.memory_space<vmem>>, %arg21: memref<32x1xf32, #tpu.memory_space<vmem>>) attributes {dimension_semantics = [#tpu.dimension_semantics<parallel>], iteration_bounds = array<i64: 2>, scalar_prefetch = 0 : i64, scratch_operands = 0 : i64, tpu.core_type = #tpu.core_type<tc>, window_params = [{transform_indices = @transform_0, window_bounds = array<i64: 32, 32>}, {transform_indices = @transform_1, window_bounds = array<i64: 32, 32>}, {pipeline_mode = #tpu.pipeline_mode<synchronous>, transform_indices = @transform_2, window_bounds = array<i64: 8, 8>}, {pipeline_mode = #tpu.pipeline_mode<synchronous>, transform_indices = @transform_3, window_bounds = array<i64: 32, 32>}, {pipeline_mode = #tpu.pipeline_mode<synchronous>, transform_indices = @transform_4, window_bounds = array<i64: 1, 32>}, {pipeline_mode = #tpu.pipeline_mode<synchronous>, transform_indices = @transform_5, window_bounds = array<i64: 32, 32>}, {pipeline_mode = #tpu.pipeline_mode<synchronous>, transform_indices = @transform_6, window_bounds = array<i64: 1, 32>}, {pipeline_mode = #tpu.pipeline_mode<synchronous>, transform_indices = @transform_7, window_bounds = array<i64: 32, 32>}, {pipeline_mode = #tpu.pipeline_mode<synchronous>, transform_indices = @transform_8, window_bounds = array<i64: 1, 32>}, {pipeline_mode = #tpu.pipeline_mode<synchronous>, transform_indices = @transform_9, window_bounds = array<i64: 32, 32>}, {pipeline_mode = #tpu.pipeline_mode<synchronous>, transform_indices = @transform_10, window_bounds = array<i64: 1, 32>}, {pipeline_mode = #tpu.pipeline_mode<synchronous>, transform_indices = @transform_11, window_bounds = array<i64: 1, 32>}, {pipeline_mode = #tpu.pipeline_mode<synchronous>, transform_indices = @transform_12, window_bounds = array<i64: 1, 32>}, {pipeline_mode = #tpu.pipeline_mode<synchronous>, transform_indices = @transform_13, window_bounds = array<i64: 32, 2048>}, {pipeline_mode = #tpu.pipeline_mode<synchronous>, transform_indices = @transform_14, window_bounds = array<i64: 1, 2048>}, {pipeline_mode = #tpu.pipeline_mode<synchronous>, transform_indices = @transform_15, window_bounds = array<i64: 2048, 32>}, {pipeline_mode = #tpu.pipeline_mode<synchronous>, transform_indices = @transform_16, window_bounds = array<i64: 1, 32>}, {pipeline_mode = #tpu.pipeline_mode<synchronous>, transform_indices = @transform_17, window_bounds = array<i64: 1, 32>}, {pipeline_mode = #tpu.pipeline_mode<synchronous>, transform_indices = @transform_18, window_bounds = array<i64: 1, 32>}, {pipeline_mode = #tpu.pipeline_mode<synchronous>, transform_indices = @transform_19, window_bounds = array<i64: 1, 32>}, {transform_indices = @transform_20, window_bounds = array<i64: 32, 1>}]} {
    %c0 = arith.constant 0 : index
    %c0_0 = arith.constant 0 : index
    %0 = vector.load %arg1[%c0, %c0_0] : memref<32x32xf32, #tpu.memory_space<vmem>>, vector<32x32xf32>
    %c0_1 = arith.constant 0 : index
    %c0_2 = arith.constant 0 : index
    %1 = vector.load %arg2[%c0_1, %c0_2] : memref<32x32xf32, #tpu.memory_space<vmem>>, vector<32x32xf32>
    %c0_3 = arith.constant 0 : index
    %c0_4 = arith.constant 0 : index
    %2 = vector.load %arg3[%c0_3, %c0_4] : memref<8x8xf32, #tpu.memory_space<vmem>>, vector<8x8xf32>
    %cst = arith.constant 0.000000e+00 : f32
    %3 = vector.broadcast %cst : f32 to vector<32x32xf32>
    %c0_5 = arith.constant 0 : index
    %c0_6 = arith.constant 0 : index
    %4 = vector.load %arg4[%c0_5, %c0_6] : memref<32x32xf32, #tpu.memory_space<vmem>>, vector<32x8xf32>
    %cst_7 = arith.constant dense<0.000000e+00> : vector<32x8xf32>
    %5 = tpu.matmul %0, %4, %cst_7 {dimension_numbers = #tpu.dot_dimension_numbers<[1], [0], [0], [1], [0, 0, 1, 1], [], []>} : vector<32x32xf32>, vector<32x8xf32>, vector<32x8xf32> -> vector<32x8xf32>
    %c0_8 = arith.constant 0 : index
    %c0_9 = arith.constant 0 : index
    %6 = vector.load %arg5[%c0_8, %c0_9] : memref<1x32xf32, #tpu.memory_space<vmem>>, vector<1x8xf32>
    %7 = vector.broadcast %6 : vector<1x8xf32> to vector<32x8xf32>
    %8 = arith.addf %5, %7 : vector<32x8xf32>
    %c0_10 = arith.constant 0 : index
    %c0_11 = arith.constant 0 : index
    %9 = vector.load %arg6[%c0_10, %c0_11] : memref<32x32xf32, #tpu.memory_space<vmem>>, vector<32x8xf32>
    %cst_12 = arith.constant dense<0.000000e+00> : vector<32x8xf32>
    %10 = tpu.matmul %0, %9, %cst_12 {dimension_numbers = #tpu.dot_dimension_numbers<[1], [0], [0], [1], [0, 0, 1, 1], [], []>} : vector<32x32xf32>, vector<32x8xf32>, vector<32x8xf32> -> vector<32x8xf32>
    %c0_13 = arith.constant 0 : index
    %c0_14 = arith.constant 0 : index
    %11 = vector.load %arg7[%c0_13, %c0_14] : memref<1x32xf32, #tpu.memory_space<vmem>>, vector<1x8xf32>
    %12 = vector.broadcast %11 : vector<1x8xf32> to vector<32x8xf32>
    %13 = arith.addf %10, %12 : vector<32x8xf32>
    %c0_15 = arith.constant 0 : index
    %c0_16 = arith.constant 0 : index
    %14 = vector.load %arg8[%c0_15, %c0_16] : memref<32x32xf32, #tpu.memory_space<vmem>>, vector<32x8xf32>
    %cst_17 = arith.constant dense<0.000000e+00> : vector<32x8xf32>
    %15 = tpu.matmul %1, %14, %cst_17 {dimension_numbers = #tpu.dot_dimension_numbers<[1], [0], [0], [1], [0, 0, 1, 1], [], []>} : vector<32x32xf32>, vector<32x8xf32>, vector<32x8xf32> -> vector<32x8xf32>
    %c0_18 = arith.constant 0 : index
    %c0_19 = arith.constant 0 : index
    %16 = vector.load %arg9[%c0_18, %c0_19] : memref<1x32xf32, #tpu.memory_space<vmem>>, vector<1x8xf32>
    %17 = vector.broadcast %16 : vector<1x8xf32> to vector<32x8xf32>
    %18 = arith.addf %15, %17 : vector<32x8xf32>
    %19 = vector.shape_cast %8 : vector<32x8xf32> to vector<4x8x8xf32>
    %20 = vector.shape_cast %13 : vector<32x8xf32> to vector<4x8x8xf32>
    %21 = vector.shape_cast %18 : vector<32x8xf32> to vector<4x8x8xf32>
    "tpu.trace_start"() <{level = 10 : i32, message = "bqd,bkd->bqk"}> : () -> ()
    %cst_20 = arith.constant dense<0.000000e+00> : vector<4x8x8xf32>
    %22 = tpu.matmul %19, %20, %cst_20 {dimension_numbers = #tpu.dot_dimension_numbers<[2], [2], [1], [1], [0, 0, 0, 1, 1, 1], [0], [0]>} : vector<4x8x8xf32>, vector<4x8x8xf32>, vector<4x8x8xf32> -> vector<4x8x8xf32>
    "tpu.trace_stop"() : () -> ()
    %23 = vector.shape_cast %2 : vector<8x8xf32> to vector<1x8x8xf32>
    %24 = vector.broadcast %23 : vector<1x8x8xf32> to vector<4x8x8xf32>
    %25 = arith.addf %22, %24 : vector<4x8x8xf32>
    %cst_21 = arith.constant dense<0xFF800000> : vector<4x8xf32>
    %26 = vector.multi_reduction <maximumf>, %25, %cst_21 [2] : vector<4x8x8xf32> to vector<4x8xf32>
    %27 = vector.shape_cast %26 : vector<4x8xf32> to vector<4x8x1xf32>
    %28 = vector.broadcast %27 : vector<4x8x1xf32> to vector<4x8x8xf32>
    %29 = arith.subf %25, %28 : vector<4x8x8xf32>
    %30 = math.exp %29 : vector<4x8x8xf32>
    %cst_22 = arith.constant dense<0.000000e+00> : vector<4x8xf32>
    %31 = vector.multi_reduction <add>, %30, %cst_22 [2] : vector<4x8x8xf32> to vector<4x8xf32>
    %32 = vector.shape_cast %31 : vector<4x8xf32> to vector<4x8x1xf32>
    %33 = tpu.reciprocal %32 {approx = true} : vector<4x8x1xf32> -> vector<4x8x1xf32>
    %34 = vector.broadcast %33 : vector<4x8x1xf32> to vector<4x8x8xf32>
    %35 = arith.mulf %30, %34 : vector<4x8x8xf32>
    "tpu.trace_start"() <{level = 10 : i32, message = "bqk,bkd->bqd"}> : () -> ()
    %cst_23 = arith.constant dense<0.000000e+00> : vector<4x8x8xf32>
    %36 = tpu.matmul %35, %21, %cst_23 {dimension_numbers = #tpu.dot_dimension_numbers<[2], [1], [1], [2], [0, 0, 0, 1, 1, 2], [0], [0]>} : vector<4x8x8xf32>, vector<4x8x8xf32>, vector<4x8x8xf32> -> vector<4x8x8xf32>
    "tpu.trace_stop"() : () -> ()
    %37 = vector.shape_cast %36 : vector<4x8x8xf32> to vector<32x8xf32>
    %c0_24 = arith.constant 0 : index
    %c0_25 = arith.constant 0 : index
    %38 = vector.load %arg10[%c0_24, %c0_25] : memref<32x32xf32, #tpu.memory_space<vmem>>, vector<8x32xf32>
    %cst_26 = arith.constant dense<0.000000e+00> : vector<32x32xf32>
    %39 = tpu.matmul %37, %38, %cst_26 {dimension_numbers = #tpu.dot_dimension_numbers<[1], [0], [0], [1], [0, 0, 1, 1], [], []>} : vector<32x8xf32>, vector<8x32xf32>, vector<32x32xf32> -> vector<32x32xf32>
    %40 = arith.addf %3, %39 : vector<32x32xf32>
    %c0_27 = arith.constant 0 : index
    %c8 = arith.constant 8 : index
    %41 = vector.load %arg4[%c0_27, %c8] : memref<32x32xf32, #tpu.memory_space<vmem>>, vector<32x8xf32>
    %cst_28 = arith.constant dense<0.000000e+00> : vector<32x8xf32>
    %42 = tpu.matmul %0, %41, %cst_28 {dimension_numbers = #tpu.dot_dimension_numbers<[1], [0], [0], [1], [0, 0, 1, 1], [], []>} : vector<32x32xf32>, vector<32x8xf32>, vector<32x8xf32> -> vector<32x8xf32>
    %c0_29 = arith.constant 0 : index
    %c8_30 = arith.constant 8 : index
    %43 = vector.load %arg5[%c0_29, %c8_30] : memref<1x32xf32, #tpu.memory_space<vmem>>, vector<1x8xf32>
    %44 = vector.broadcast %43 : vector<1x8xf32> to vector<32x8xf32>
    %45 = arith.addf %42, %44 : vector<32x8xf32>
    %c0_31 = arith.constant 0 : index
    %c8_32 = arith.constant 8 : index
    %46 = vector.load %arg6[%c0_31, %c8_32] : memref<32x32xf32, #tpu.memory_space<vmem>>, vector<32x8xf32>
    %cst_33 = arith.constant dense<0.000000e+00> : vector<32x8xf32>
    %47 = tpu.matmul %0, %46, %cst_33 {dimension_numbers = #tpu.dot_dimension_numbers<[1], [0], [0], [1], [0, 0, 1, 1], [], []>} : vector<32x32xf32>, vector<32x8xf32>, vector<32x8xf32> -> vector<32x8xf32>
    %c0_34 = arith.constant 0 : index
    %c8_35 = arith.constant 8 : index
    %48 = vector.load %arg7[%c0_34, %c8_35] : memref<1x32xf32, #tpu.memory_space<vmem>>, vector<1x8xf32>
    %49 = vector.broadcast %48 : vector<1x8xf32> to vector<32x8xf32>
    %50 = arith.addf %47, %49 : vector<32x8xf32>
    %c0_36 = arith.constant 0 : index
    %c8_37 = arith.constant 8 : index
    %51 = vector.load %arg8[%c0_36, %c8_37] : memref<32x32xf32, #tpu.memory_space<vmem>>, vector<32x8xf32>
    %cst_38 = arith.constant dense<0.000000e+00> : vector<32x8xf32>
    %52 = tpu.matmul %1, %51, %cst_38 {dimension_numbers = #tpu.dot_dimension_numbers<[1], [0], [0], [1], [0, 0, 1, 1], [], []>} : vector<32x32xf32>, vector<32x8xf32>, vector<32x8xf32> -> vector<32x8xf32>
    %c0_39 = arith.constant 0 : index
    %c8_40 = arith.constant 8 : index
    %53 = vector.load %arg9[%c0_39, %c8_40] : memref<1x32xf32, #tpu.memory_space<vmem>>, vector<1x8xf32>
    %54 = vector.broadcast %53 : vector<1x8xf32> to vector<32x8xf32>
    %55 = arith.addf %52, %54 : vector<32x8xf32>
    %56 = vector.shape_cast %45 : vector<32x8xf32> to vector<4x8x8xf32>
    %57 = vector.shape_cast %50 : vector<32x8xf32> to vector<4x8x8xf32>
    %58 = vector.shape_cast %55 : vector<32x8xf32> to vector<4x8x8xf32>
    "tpu.trace_start"() <{level = 10 : i32, message = "bqd,bkd->bqk"}> : () -> ()
    %cst_41 = arith.constant dense<0.000000e+00> : vector<4x8x8xf32>
    %59 = tpu.matmul %56, %57, %cst_41 {dimension_numbers = #tpu.dot_dimension_numbers<[2], [2], [1], [1], [0, 0, 0, 1, 1, 1], [0], [0]>} : vector<4x8x8xf32>, vector<4x8x8xf32>, vector<4x8x8xf32> -> vector<4x8x8xf32>
    "tpu.trace_stop"() : () -> ()
    %60 = vector.shape_cast %2 : vector<8x8xf32> to vector<1x8x8xf32>
    %61 = vector.broadcast %60 : vector<1x8x8xf32> to vector<4x8x8xf32>
    %62 = arith.addf %59, %61 : vector<4x8x8xf32>
    %cst_42 = arith.constant dense<0xFF800000> : vector<4x8xf32>
    %63 = vector.multi_reduction <maximumf>, %62, %cst_42 [2] : vector<4x8x8xf32> to vector<4x8xf32>
    %64 = vector.shape_cast %63 : vector<4x8xf32> to vector<4x8x1xf32>
    %65 = vector.broadcast %64 : vector<4x8x1xf32> to vector<4x8x8xf32>
    %66 = arith.subf %62, %65 : vector<4x8x8xf32>
    %67 = math.exp %66 : vector<4x8x8xf32>
    %cst_43 = arith.constant dense<0.000000e+00> : vector<4x8xf32>
    %68 = vector.multi_reduction <add>, %67, %cst_43 [2] : vector<4x8x8xf32> to vector<4x8xf32>
    %69 = vector.shape_cast %68 : vector<4x8xf32> to vector<4x8x1xf32>
    %70 = tpu.reciprocal %69 {approx = true} : vector<4x8x1xf32> -> vector<4x8x1xf32>
    %71 = vector.broadcast %70 : vector<4x8x1xf32> to vector<4x8x8xf32>
    %72 = arith.mulf %67, %71 : vector<4x8x8xf32>
    "tpu.trace_start"() <{level = 10 : i32, message = "bqk,bkd->bqd"}> : () -> ()
    %cst_44 = arith.constant dense<0.000000e+00> : vector<4x8x8xf32>
    %73 = tpu.matmul %72, %58, %cst_44 {dimension_numbers = #tpu.dot_dimension_numbers<[2], [1], [1], [2], [0, 0, 0, 1, 1, 2], [0], [0]>} : vector<4x8x8xf32>, vector<4x8x8xf32>, vector<4x8x8xf32> -> vector<4x8x8xf32>
    "tpu.trace_stop"() : () -> ()
    %74 = vector.shape_cast %73 : vector<4x8x8xf32> to vector<32x8xf32>
    %c8_45 = arith.constant 8 : index
    %c0_46 = arith.constant 0 : index
    %75 = vector.load %arg10[%c8_45, %c0_46] : memref<32x32xf32, #tpu.memory_space<vmem>>, vector<8x32xf32>
    %cst_47 = arith.constant dense<0.000000e+00> : vector<32x32xf32>
    %76 = tpu.matmul %74, %75, %cst_47 {dimension_numbers = #tpu.dot_dimension_numbers<[1], [0], [0], [1], [0, 0, 1, 1], [], []>} : vector<32x8xf32>, vector<8x32xf32>, vector<32x32xf32> -> vector<32x32xf32>
    %77 = arith.addf %40, %76 : vector<32x32xf32>
    %c0_48 = arith.constant 0 : index
    %c16 = arith.constant 16 : index
    %78 = vector.load %arg4[%c0_48, %c16] : memref<32x32xf32, #tpu.memory_space<vmem>>, vector<32x8xf32>
    %cst_49 = arith.constant dense<0.000000e+00> : vector<32x8xf32>
    %79 = tpu.matmul %0, %78, %cst_49 {dimension_numbers = #tpu.dot_dimension_numbers<[1], [0], [0], [1], [0, 0, 1, 1], [], []>} : vector<32x32xf32>, vector<32x8xf32>, vector<32x8xf32> -> vector<32x8xf32>
    %c0_50 = arith.constant 0 : index
    %c16_51 = arith.constant 16 : index
    %80 = vector.load %arg5[%c0_50, %c16_51] : memref<1x32xf32, #tpu.memory_space<vmem>>, vector<1x8xf32>
    %81 = vector.broadcast %80 : vector<1x8xf32> to vector<32x8xf32>
    %82 = arith.addf %79, %81 : vector<32x8xf32>
    %c0_52 = arith.constant 0 : index
    %c16_53 = arith.constant 16 : index
    %83 = vector.load %arg6[%c0_52, %c16_53] : memref<32x32xf32, #tpu.memory_space<vmem>>, vector<32x8xf32>
    %cst_54 = arith.constant dense<0.000000e+00> : vector<32x8xf32>
    %84 = tpu.matmul %0, %83, %cst_54 {dimension_numbers = #tpu.dot_dimension_numbers<[1], [0], [0], [1], [0, 0, 1, 1], [], []>} : vector<32x32xf32>, vector<32x8xf32>, vector<32x8xf32> -> vector<32x8xf32>
    %c0_55 = arith.constant 0 : index
    %c16_56 = arith.constant 16 : index
    %85 = vector.load %arg7[%c0_55, %c16_56] : memref<1x32xf32, #tpu.memory_space<vmem>>, vector<1x8xf32>
    %86 = vector.broadcast %85 : vector<1x8xf32> to vector<32x8xf32>
    %87 = arith.addf %84, %86 : vector<32x8xf32>
    %c0_57 = arith.constant 0 : index
    %c16_58 = arith.constant 16 : index
    %88 = vector.load %arg8[%c0_57, %c16_58] : memref<32x32xf32, #tpu.memory_space<vmem>>, vector<32x8xf32>
    %cst_59 = arith.constant dense<0.000000e+00> : vector<32x8xf32>
    %89 = tpu.matmul %1, %88, %cst_59 {dimension_numbers = #tpu.dot_dimension_numbers<[1], [0], [0], [1], [0, 0, 1, 1], [], []>} : vector<32x32xf32>, vector<32x8xf32>, vector<32x8xf32> -> vector<32x8xf32>
    %c0_60 = arith.constant 0 : index
    %c16_61 = arith.constant 16 : index
    %90 = vector.load %arg9[%c0_60, %c16_61] : memref<1x32xf32, #tpu.memory_space<vmem>>, vector<1x8xf32>
    %91 = vector.broadcast %90 : vector<1x8xf32> to vector<32x8xf32>
    %92 = arith.addf %89, %91 : vector<32x8xf32>
    %93 = vector.shape_cast %82 : vector<32x8xf32> to vector<4x8x8xf32>
    %94 = vector.shape_cast %87 : vector<32x8xf32> to vector<4x8x8xf32>
    %95 = vector.shape_cast %92 : vector<32x8xf32> to vector<4x8x8xf32>
    "tpu.trace_start"() <{level = 10 : i32, message = "bqd,bkd->bqk"}> : () -> ()
    %cst_62 = arith.constant dense<0.000000e+00> : vector<4x8x8xf32>
    %96 = tpu.matmul %93, %94, %cst_62 {dimension_numbers = #tpu.dot_dimension_numbers<[2], [2], [1], [1], [0, 0, 0, 1, 1, 1], [0], [0]>} : vector<4x8x8xf32>, vector<4x8x8xf32>, vector<4x8x8xf32> -> vector<4x8x8xf32>
    "tpu.trace_stop"() : () -> ()
    %97 = vector.shape_cast %2 : vector<8x8xf32> to vector<1x8x8xf32>
    %98 = vector.broadcast %97 : vector<1x8x8xf32> to vector<4x8x8xf32>
    %99 = arith.addf %96, %98 : vector<4x8x8xf32>
    %cst_63 = arith.constant dense<0xFF800000> : vector<4x8xf32>
    %100 = vector.multi_reduction <maximumf>, %99, %cst_63 [2] : vector<4x8x8xf32> to vector<4x8xf32>
    %101 = vector.shape_cast %100 : vector<4x8xf32> to vector<4x8x1xf32>
    %102 = vector.broadcast %101 : vector<4x8x1xf32> to vector<4x8x8xf32>
    %103 = arith.subf %99, %102 : vector<4x8x8xf32>
    %104 = math.exp %103 : vector<4x8x8xf32>
    %cst_64 = arith.constant dense<0.000000e+00> : vector<4x8xf32>
    %105 = vector.multi_reduction <add>, %104, %cst_64 [2] : vector<4x8x8xf32> to vector<4x8xf32>
    %106 = vector.shape_cast %105 : vector<4x8xf32> to vector<4x8x1xf32>
    %107 = tpu.reciprocal %106 {approx = true} : vector<4x8x1xf32> -> vector<4x8x1xf32>
    %108 = vector.broadcast %107 : vector<4x8x1xf32> to vector<4x8x8xf32>
    %109 = arith.mulf %104, %108 : vector<4x8x8xf32>
    "tpu.trace_start"() <{level = 10 : i32, message = "bqk,bkd->bqd"}> : () -> ()
    %cst_65 = arith.constant dense<0.000000e+00> : vector<4x8x8xf32>
    %110 = tpu.matmul %109, %95, %cst_65 {dimension_numbers = #tpu.dot_dimension_numbers<[2], [1], [1], [2], [0, 0, 0, 1, 1, 2], [0], [0]>} : vector<4x8x8xf32>, vector<4x8x8xf32>, vector<4x8x8xf32> -> vector<4x8x8xf32>
    "tpu.trace_stop"() : () -> ()
    %111 = vector.shape_cast %110 : vector<4x8x8xf32> to vector<32x8xf32>
    %c16_66 = arith.constant 16 : index
    %c0_67 = arith.constant 0 : index
    %112 = vector.load %arg10[%c16_66, %c0_67] : memref<32x32xf32, #tpu.memory_space<vmem>>, vector<8x32xf32>
    %cst_68 = arith.constant dense<0.000000e+00> : vector<32x32xf32>
    %113 = tpu.matmul %111, %112, %cst_68 {dimension_numbers = #tpu.dot_dimension_numbers<[1], [0], [0], [1], [0, 0, 1, 1], [], []>} : vector<32x8xf32>, vector<8x32xf32>, vector<32x32xf32> -> vector<32x32xf32>
    %114 = arith.addf %77, %113 : vector<32x32xf32>
    %c0_69 = arith.constant 0 : index
    %c24 = arith.constant 24 : index
    %115 = vector.load %arg4[%c0_69, %c24] : memref<32x32xf32, #tpu.memory_space<vmem>>, vector<32x8xf32>
    %cst_70 = arith.constant dense<0.000000e+00> : vector<32x8xf32>
    %116 = tpu.matmul %0, %115, %cst_70 {dimension_numbers = #tpu.dot_dimension_numbers<[1], [0], [0], [1], [0, 0, 1, 1], [], []>} : vector<32x32xf32>, vector<32x8xf32>, vector<32x8xf32> -> vector<32x8xf32>
    %c0_71 = arith.constant 0 : index
    %c24_72 = arith.constant 24 : index
    %117 = vector.load %arg5[%c0_71, %c24_72] : memref<1x32xf32, #tpu.memory_space<vmem>>, vector<1x8xf32>
    %118 = vector.broadcast %117 : vector<1x8xf32> to vector<32x8xf32>
    %119 = arith.addf %116, %118 : vector<32x8xf32>
    %c0_73 = arith.constant 0 : index
    %c24_74 = arith.constant 24 : index
    %120 = vector.load %arg6[%c0_73, %c24_74] : memref<32x32xf32, #tpu.memory_space<vmem>>, vector<32x8xf32>
    %cst_75 = arith.constant dense<0.000000e+00> : vector<32x8xf32>
    %121 = tpu.matmul %0, %120, %cst_75 {dimension_numbers = #tpu.dot_dimension_numbers<[1], [0], [0], [1], [0, 0, 1, 1], [], []>} : vector<32x32xf32>, vector<32x8xf32>, vector<32x8xf32> -> vector<32x8xf32>
    %c0_76 = arith.constant 0 : index
    %c24_77 = arith.constant 24 : index
    %122 = vector.load %arg7[%c0_76, %c24_77] : memref<1x32xf32, #tpu.memory_space<vmem>>, vector<1x8xf32>
    %123 = vector.broadcast %122 : vector<1x8xf32> to vector<32x8xf32>
    %124 = arith.addf %121, %123 : vector<32x8xf32>
    %c0_78 = arith.constant 0 : index
    %c24_79 = arith.constant 24 : index
    %125 = vector.load %arg8[%c0_78, %c24_79] : memref<32x32xf32, #tpu.memory_space<vmem>>, vector<32x8xf32>
    %cst_80 = arith.constant dense<0.000000e+00> : vector<32x8xf32>
    %126 = tpu.matmul %1, %125, %cst_80 {dimension_numbers = #tpu.dot_dimension_numbers<[1], [0], [0], [1], [0, 0, 1, 1], [], []>} : vector<32x32xf32>, vector<32x8xf32>, vector<32x8xf32> -> vector<32x8xf32>
    %c0_81 = arith.constant 0 : index
    %c24_82 = arith.constant 24 : index
    %127 = vector.load %arg9[%c0_81, %c24_82] : memref<1x32xf32, #tpu.memory_space<vmem>>, vector<1x8xf32>
    %128 = vector.broadcast %127 : vector<1x8xf32> to vector<32x8xf32>
    %129 = arith.addf %126, %128 : vector<32x8xf32>
    %130 = vector.shape_cast %119 : vector<32x8xf32> to vector<4x8x8xf32>
    %131 = vector.shape_cast %124 : vector<32x8xf32> to vector<4x8x8xf32>
    %132 = vector.shape_cast %129 : vector<32x8xf32> to vector<4x8x8xf32>
    "tpu.trace_start"() <{level = 10 : i32, message = "bqd,bkd->bqk"}> : () -> ()
    %cst_83 = arith.constant dense<0.000000e+00> : vector<4x8x8xf32>
    %133 = tpu.matmul %130, %131, %cst_83 {dimension_numbers = #tpu.dot_dimension_numbers<[2], [2], [1], [1], [0, 0, 0, 1, 1, 1], [0], [0]>} : vector<4x8x8xf32>, vector<4x8x8xf32>, vector<4x8x8xf32> -> vector<4x8x8xf32>
    "tpu.trace_stop"() : () -> ()
    %134 = vector.shape_cast %2 : vector<8x8xf32> to vector<1x8x8xf32>
    %135 = vector.broadcast %134 : vector<1x8x8xf32> to vector<4x8x8xf32>
    %136 = arith.addf %133, %135 : vector<4x8x8xf32>
    %cst_84 = arith.constant dense<0xFF800000> : vector<4x8xf32>
    %137 = vector.multi_reduction <maximumf>, %136, %cst_84 [2] : vector<4x8x8xf32> to vector<4x8xf32>
    %138 = vector.shape_cast %137 : vector<4x8xf32> to vector<4x8x1xf32>
    %139 = vector.broadcast %138 : vector<4x8x1xf32> to vector<4x8x8xf32>
    %140 = arith.subf %136, %139 : vector<4x8x8xf32>
    %141 = math.exp %140 : vector<4x8x8xf32>
    %cst_85 = arith.constant dense<0.000000e+00> : vector<4x8xf32>
    %142 = vector.multi_reduction <add>, %141, %cst_85 [2] : vector<4x8x8xf32> to vector<4x8xf32>
    %143 = vector.shape_cast %142 : vector<4x8xf32> to vector<4x8x1xf32>
    %144 = tpu.reciprocal %143 {approx = true} : vector<4x8x1xf32> -> vector<4x8x1xf32>
    %145 = vector.broadcast %144 : vector<4x8x1xf32> to vector<4x8x8xf32>
    %146 = arith.mulf %141, %145 : vector<4x8x8xf32>
    "tpu.trace_start"() <{level = 10 : i32, message = "bqk,bkd->bqd"}> : () -> ()
    %cst_86 = arith.constant dense<0.000000e+00> : vector<4x8x8xf32>
    %147 = tpu.matmul %146, %132, %cst_86 {dimension_numbers = #tpu.dot_dimension_numbers<[2], [1], [1], [2], [0, 0, 0, 1, 1, 2], [0], [0]>} : vector<4x8x8xf32>, vector<4x8x8xf32>, vector<4x8x8xf32> -> vector<4x8x8xf32>
    "tpu.trace_stop"() : () -> ()
    %148 = vector.shape_cast %147 : vector<4x8x8xf32> to vector<32x8xf32>
    %c24_87 = arith.constant 24 : index
    %c0_88 = arith.constant 0 : index
    %149 = vector.load %arg10[%c24_87, %c0_88] : memref<32x32xf32, #tpu.memory_space<vmem>>, vector<8x32xf32>
    %cst_89 = arith.constant dense<0.000000e+00> : vector<32x32xf32>
    %150 = tpu.matmul %148, %149, %cst_89 {dimension_numbers = #tpu.dot_dimension_numbers<[1], [0], [0], [1], [0, 0, 1, 1], [], []>} : vector<32x8xf32>, vector<8x32xf32>, vector<32x32xf32> -> vector<32x32xf32>
    %151 = arith.addf %114, %150 : vector<32x32xf32>
    %c0_90 = arith.constant 0 : index
    %c0_91 = arith.constant 0 : index
    %152 = vector.load %arg11[%c0_90, %c0_91] : memref<1x32xf32, #tpu.memory_space<vmem>>, vector<1x32xf32>
    %153 = vector.broadcast %152 : vector<1x32xf32> to vector<32x32xf32>
    %154 = arith.addf %151, %153 : vector<32x32xf32>
    %155 = arith.addf %0, %154 : vector<32x32xf32>
    %c0_92 = arith.constant 0 : index
    %c0_93 = arith.constant 0 : index
    %156 = vector.load %arg12[%c0_92, %c0_93] : memref<1x32xf32, #tpu.memory_space<vmem>>, vector<1x32xf32>
    %c0_94 = arith.constant 0 : index
    %c0_95 = arith.constant 0 : index
    %157 = vector.load %arg13[%c0_94, %c0_95] : memref<1x32xf32, #tpu.memory_space<vmem>>, vector<1x32xf32>
    %cst_96 = arith.constant dense<0.000000e+00> : vector<32xf32>
    %158 = vector.multi_reduction <add>, %155, %cst_96 [1] : vector<32x32xf32> to vector<32xf32>
    %159 = vector.shape_cast %158 : vector<32xf32> to vector<32x1xf32>
    %cst_97 = arith.constant 3.200000e+01 : f32
    %160 = vector.broadcast %cst_97 : f32 to vector<32x1xf32>
    %161 = arith.divf %159, %160 : vector<32x1xf32>
    %162 = vector.broadcast %161 : vector<32x1xf32> to vector<32x32xf32>
    %163 = arith.subf %155, %162 : vector<32x32xf32>
    %164 = arith.mulf %163, %163 : vector<32x32xf32>
    %cst_98 = arith.constant dense<0.000000e+00> : vector<32xf32>
    %165 = vector.multi_reduction <add>, %164, %cst_98 [1] : vector<32x32xf32> to vector<32xf32>
    %166 = vector.shape_cast %165 : vector<32xf32> to vector<32x1xf32>
    %cst_99 = arith.constant 3.200000e+01 : f32
    %167 = vector.broadcast %cst_99 : f32 to vector<32x1xf32>
    %168 = arith.divf %166, %167 : vector<32x1xf32>
    %169 = vector.broadcast %161 : vector<32x1xf32> to vector<32x32xf32>
    %170 = arith.subf %155, %169 : vector<32x32xf32>
    %cst_100 = arith.constant 9.99999974E-6 : f32
    %171 = vector.broadcast %cst_100 : f32 to vector<32x1xf32>
    %172 = arith.addf %168, %171 : vector<32x1xf32>
    %173 = math.rsqrt %172 : vector<32x1xf32>
    %174 = vector.broadcast %173 : vector<32x1xf32> to vector<32x32xf32>
    %175 = arith.mulf %170, %174 : vector<32x32xf32>
    %176 = vector.broadcast %156 : vector<1x32xf32> to vector<32x32xf32>
    %177 = arith.mulf %175, %176 : vector<32x32xf32>
    %178 = vector.broadcast %157 : vector<1x32xf32> to vector<32x32xf32>
    %179 = arith.addf %177, %178 : vector<32x32xf32>
    %180 = arith.truncf %179 : vector<32x32xf32> to vector<32x32xbf16>
    %cst_101 = arith.constant 0.000000e+00 : f32
    %181 = vector.broadcast %cst_101 : f32 to vector<32x32xf32>
    %c0_102 = arith.constant 0 : index
    %c0_103 = arith.constant 0 : index
    %182 = vector.load %arg14[%c0_102, %c0_103] : memref<32x2048xbf16, #tpu.memory_space<vmem>>, vector<32x512xbf16>
    %cst_104 = arith.constant dense<0.000000e+00> : vector<32x512xf32>
    %183 = tpu.matmul %180, %182, %cst_104 {dimension_numbers = #tpu.dot_dimension_numbers<[1], [0], [0], [1], [0, 0, 1, 1], [], []>} : vector<32x32xbf16>, vector<32x512xbf16>, vector<32x512xf32> -> vector<32x512xf32>
    %c0_105 = arith.constant 0 : index
    %c0_106 = arith.constant 0 : index
    %184 = vector.load %arg15[%c0_105, %c0_106] : memref<1x2048xf32, #tpu.memory_space<vmem>>, vector<1x512xf32>
    %185 = vector.broadcast %184 : vector<1x512xf32> to vector<32x512xf32>
    %186 = arith.addf %183, %185 : vector<32x512xf32>
    %cst_107 = arith.constant 0.000000e+00 : f32
    %187 = vector.broadcast %cst_107 : f32 to vector<32x512xf32>
    %188 = arith.maximumf %186, %187 : vector<32x512xf32>
    %189 = arith.truncf %188 : vector<32x512xf32> to vector<32x512xbf16>
    %c0_108 = arith.constant 0 : index
    %c0_109 = arith.constant 0 : index
    %190 = vector.load %arg16[%c0_108, %c0_109] : memref<2048x32xbf16, #tpu.memory_space<vmem>>, vector<512x32xbf16>
    %cst_110 = arith.constant dense<0.000000e+00> : vector<32x32xf32>
    %191 = tpu.matmul %189, %190, %cst_110 {dimension_numbers = #tpu.dot_dimension_numbers<[1], [0], [0], [1], [0, 0, 1, 1], [], []>} : vector<32x512xbf16>, vector<512x32xbf16>, vector<32x32xf32> -> vector<32x32xf32>
    %192 = arith.addf %181, %191 : vector<32x32xf32>
    %c0_111 = arith.constant 0 : index
    %c512 = arith.constant 512 : index
    %193 = vector.load %arg14[%c0_111, %c512] : memref<32x2048xbf16, #tpu.memory_space<vmem>>, vector<32x512xbf16>
    %cst_112 = arith.constant dense<0.000000e+00> : vector<32x512xf32>
    %194 = tpu.matmul %180, %193, %cst_112 {dimension_numbers = #tpu.dot_dimension_numbers<[1], [0], [0], [1], [0, 0, 1, 1], [], []>} : vector<32x32xbf16>, vector<32x512xbf16>, vector<32x512xf32> -> vector<32x512xf32>
    %c0_113 = arith.constant 0 : index
    %c512_114 = arith.constant 512 : index
    %195 = vector.load %arg15[%c0_113, %c512_114] : memref<1x2048xf32, #tpu.memory_space<vmem>>, vector<1x512xf32>
    %196 = vector.broadcast %195 : vector<1x512xf32> to vector<32x512xf32>
    %197 = arith.addf %194, %196 : vector<32x512xf32>
    %cst_115 = arith.constant 0.000000e+00 : f32
    %198 = vector.broadcast %cst_115 : f32 to vector<32x512xf32>
    %199 = arith.maximumf %197, %198 : vector<32x512xf32>
    %200 = arith.truncf %199 : vector<32x512xf32> to vector<32x512xbf16>
    %c512_116 = arith.constant 512 : index
    %c0_117 = arith.constant 0 : index
    %201 = vector.load %arg16[%c512_116, %c0_117] : memref<2048x32xbf16, #tpu.memory_space<vmem>>, vector<512x32xbf16>
    %cst_118 = arith.constant dense<0.000000e+00> : vector<32x32xf32>
    %202 = tpu.matmul %200, %201, %cst_118 {dimension_numbers = #tpu.dot_dimension_numbers<[1], [0], [0], [1], [0, 0, 1, 1], [], []>} : vector<32x512xbf16>, vector<512x32xbf16>, vector<32x32xf32> -> vector<32x32xf32>
    %203 = arith.addf %192, %202 : vector<32x32xf32>
    %c0_119 = arith.constant 0 : index
    %c1024 = arith.constant 1024 : index
    %204 = vector.load %arg14[%c0_119, %c1024] : memref<32x2048xbf16, #tpu.memory_space<vmem>>, vector<32x512xbf16>
    %cst_120 = arith.constant dense<0.000000e+00> : vector<32x512xf32>
    %205 = tpu.matmul %180, %204, %cst_120 {dimension_numbers = #tpu.dot_dimension_numbers<[1], [0], [0], [1], [0, 0, 1, 1], [], []>} : vector<32x32xbf16>, vector<32x512xbf16>, vector<32x512xf32> -> vector<32x512xf32>
    %c0_121 = arith.constant 0 : index
    %c1024_122 = arith.constant 1024 : index
    %206 = vector.load %arg15[%c0_121, %c1024_122] : memref<1x2048xf32, #tpu.memory_space<vmem>>, vector<1x512xf32>
    %207 = vector.broadcast %206 : vector<1x512xf32> to vector<32x512xf32>
    %208 = arith.addf %205, %207 : vector<32x512xf32>
    %cst_123 = arith.constant 0.000000e+00 : f32
    %209 = vector.broadcast %cst_123 : f32 to vector<32x512xf32>
    %210 = arith.maximumf %208, %209 : vector<32x512xf32>
    %211 = arith.truncf %210 : vector<32x512xf32> to vector<32x512xbf16>
    %c1024_124 = arith.constant 1024 : index
    %c0_125 = arith.constant 0 : index
    %212 = vector.load %arg16[%c1024_124, %c0_125] : memref<2048x32xbf16, #tpu.memory_space<vmem>>, vector<512x32xbf16>
    %cst_126 = arith.constant dense<0.000000e+00> : vector<32x32xf32>
    %213 = tpu.matmul %211, %212, %cst_126 {dimension_numbers = #tpu.dot_dimension_numbers<[1], [0], [0], [1], [0, 0, 1, 1], [], []>} : vector<32x512xbf16>, vector<512x32xbf16>, vector<32x32xf32> -> vector<32x32xf32>
    %214 = arith.addf %203, %213 : vector<32x32xf32>
    %c0_127 = arith.constant 0 : index
    %c1536 = arith.constant 1536 : index
    %215 = vector.load %arg14[%c0_127, %c1536] : memref<32x2048xbf16, #tpu.memory_space<vmem>>, vector<32x512xbf16>
    %cst_128 = arith.constant dense<0.000000e+00> : vector<32x512xf32>
    %216 = tpu.matmul %180, %215, %cst_128 {dimension_numbers = #tpu.dot_dimension_numbers<[1], [0], [0], [1], [0, 0, 1, 1], [], []>} : vector<32x32xbf16>, vector<32x512xbf16>, vector<32x512xf32> -> vector<32x512xf32>
    %c0_129 = arith.constant 0 : index
    %c1536_130 = arith.constant 1536 : index
    %217 = vector.load %arg15[%c0_129, %c1536_130] : memref<1x2048xf32, #tpu.memory_space<vmem>>, vector<1x512xf32>
    %218 = vector.broadcast %217 : vector<1x512xf32> to vector<32x512xf32>
    %219 = arith.addf %216, %218 : vector<32x512xf32>
    %cst_131 = arith.constant 0.000000e+00 : f32
    %220 = vector.broadcast %cst_131 : f32 to vector<32x512xf32>
    %221 = arith.maximumf %219, %220 : vector<32x512xf32>
    %222 = arith.truncf %221 : vector<32x512xf32> to vector<32x512xbf16>
    %c1536_132 = arith.constant 1536 : index
    %c0_133 = arith.constant 0 : index
    %223 = vector.load %arg16[%c1536_132, %c0_133] : memref<2048x32xbf16, #tpu.memory_space<vmem>>, vector<512x32xbf16>
    %cst_134 = arith.constant dense<0.000000e+00> : vector<32x32xf32>
    %224 = tpu.matmul %222, %223, %cst_134 {dimension_numbers = #tpu.dot_dimension_numbers<[1], [0], [0], [1], [0, 0, 1, 1], [], []>} : vector<32x512xbf16>, vector<512x32xbf16>, vector<32x32xf32> -> vector<32x32xf32>
    %225 = arith.addf %214, %224 : vector<32x32xf32>
    %c0_135 = arith.constant 0 : index
    %c0_136 = arith.constant 0 : index
    %226 = vector.load %arg17[%c0_135, %c0_136] : memref<1x32xf32, #tpu.memory_space<vmem>>, vector<1x32xf32>
    %227 = vector.broadcast %226 : vector<1x32xf32> to vector<32x32xf32>
    %228 = arith.addf %225, %227 : vector<32x32xf32>
    %229 = arith.addf %179, %228 : vector<32x32xf32>
    %c0_137 = arith.constant 0 : index
    %c0_138 = arith.constant 0 : index
    %230 = vector.load %arg18[%c0_137, %c0_138] : memref<1x32xf32, #tpu.memory_space<vmem>>, vector<1x32xf32>
    %c0_139 = arith.constant 0 : index
    %c0_140 = arith.constant 0 : index
    %231 = vector.load %arg19[%c0_139, %c0_140] : memref<1x32xf32, #tpu.memory_space<vmem>>, vector<1x32xf32>
    %cst_141 = arith.constant dense<0.000000e+00> : vector<32xf32>
    %232 = vector.multi_reduction <add>, %229, %cst_141 [1] : vector<32x32xf32> to vector<32xf32>
    %233 = vector.shape_cast %232 : vector<32xf32> to vector<32x1xf32>
    %cst_142 = arith.constant 3.200000e+01 : f32
    %234 = vector.broadcast %cst_142 : f32 to vector<32x1xf32>
    %235 = arith.divf %233, %234 : vector<32x1xf32>
    %236 = vector.broadcast %235 : vector<32x1xf32> to vector<32x32xf32>
    %237 = arith.subf %229, %236 : vector<32x32xf32>
    %238 = arith.mulf %237, %237 : vector<32x32xf32>
    %cst_143 = arith.constant dense<0.000000e+00> : vector<32xf32>
    %239 = vector.multi_reduction <add>, %238, %cst_143 [1] : vector<32x32xf32> to vector<32xf32>
    %240 = vector.shape_cast %239 : vector<32xf32> to vector<32x1xf32>
    %cst_144 = arith.constant 3.200000e+01 : f32
    %241 = vector.broadcast %cst_144 : f32 to vector<32x1xf32>
    %242 = arith.divf %240, %241 : vector<32x1xf32>
    %243 = vector.broadcast %235 : vector<32x1xf32> to vector<32x32xf32>
    %244 = arith.subf %229, %243 : vector<32x32xf32>
    %cst_145 = arith.constant 9.99999974E-6 : f32
    %245 = vector.broadcast %cst_145 : f32 to vector<32x1xf32>
    %246 = arith.addf %242, %245 : vector<32x1xf32>
    %247 = math.rsqrt %246 : vector<32x1xf32>
    %248 = vector.broadcast %247 : vector<32x1xf32> to vector<32x32xf32>
    %249 = arith.mulf %244, %248 : vector<32x32xf32>
    %250 = vector.broadcast %230 : vector<1x32xf32> to vector<32x32xf32>
    %251 = arith.mulf %249, %250 : vector<32x32xf32>
    %252 = vector.broadcast %231 : vector<1x32xf32> to vector<32x32xf32>
    %253 = arith.addf %251, %252 : vector<32x32xf32>
    %c0_146 = arith.constant 0 : index
    %c0_147 = arith.constant 0 : index
    %254 = vector.load %arg20[%c0_146, %c0_147] : memref<1x32xf32, #tpu.memory_space<vmem>>, vector<1x32xf32>
    %255 = vector.broadcast %254 : vector<1x32xf32> to vector<32x32xf32>
    %256 = arith.mulf %253, %255 : vector<32x32xf32>
    %cst_148 = arith.constant dense<0.000000e+00> : vector<32xf32>
    %257 = vector.multi_reduction <add>, %256, %cst_148 [1] : vector<32x32xf32> to vector<32xf32>
    %258 = vector.shape_cast %257 : vector<32xf32> to vector<32x1xf32>
    %c0_149 = arith.constant 0 : index
    %c0_150 = arith.constant 0 : index
    %259 = vector.load %arg21[%c0_149, %c0_150] : memref<32x1xf32, #tpu.memory_space<vmem>>, vector<32x1xf32>
    tpu.vector_store %arg21[%c0_149, %c0_150], %258 {strides = array<i32>} : memref<32x1xf32, #tpu.memory_space<vmem>>, vector<32x1xf32>,
    return
  }
  func.func @transform_0(%arg0: i32) -> (i32, i32) {
    %c0_i32 = arith.constant 0 : i32
    %c0_i32_0 = arith.constant 0 : i32
    return %arg0, %c0_i32 : i32, i32
  }
  func.func @transform_1(%arg0: i32) -> (i32, i32) {
    %c0_i32 = arith.constant 0 : i32
    %c0_i32_0 = arith.constant 0 : i32
    return %arg0, %c0_i32 : i32, i32
  }
  func.func @transform_2(%arg0: i32) -> (i32, i32) {
    %c0_i32 = arith.constant 0 : i32
    %c0_i32_0 = arith.constant 0 : i32
    %c0_i32_1 = arith.constant 0 : i32
    return %c0_i32, %c0_i32_0 : i32, i32
  }
  func.func @transform_3(%arg0: i32) -> (i32, i32) {
    %c0_i32 = arith.constant 0 : i32
    %c0_i32_0 = arith.constant 0 : i32
    %c0_i32_1 = arith.constant 0 : i32
    return %c0_i32, %c0_i32_0 : i32, i32
  }
  func.func @transform_4(%arg0: i32) -> (i32, i32) {
    %c0_i32 = arith.constant 0 : i32
    %c0_i32_0 = arith.constant 0 : i32
    %c0_i32_1 = arith.constant 0 : i32
    return %c0_i32, %c0_i32_0 : i32, i32
  }
  func.func @transform_5(%arg0: i32) -> (i32, i32) {
    %c0_i32 = arith.constant 0 : i32
    %c0_i32_0 = arith.constant 0 : i32
    %c0_i32_1 = arith.constant 0 : i32
    return %c0_i32, %c0_i32_0 : i32, i32
  }
  func.func @transform_6(%arg0: i32) -> (i32, i32) {
    %c0_i32 = arith.constant 0 : i32
    %c0_i32_0 = arith.constant 0 : i32
    %c0_i32_1 = arith.constant 0 : i32
    return %c0_i32, %c0_i32_0 : i32, i32
  }
  func.func @transform_7(%arg0: i32) -> (i32, i32) {
    %c0_i32 = arith.constant 0 : i32
    %c0_i32_0 = arith.constant 0 : i32
    %c0_i32_1 = arith.constant 0 : i32
    return %c0_i32, %c0_i32_0 : i32, i32
  }
  func.func @transform_8(%arg0: i32) -> (i32, i32) {
    %c0_i32 = arith.constant 0 : i32
    %c0_i32_0 = arith.constant 0 : i32
    %c0_i32_1 = arith.constant 0 : i32
    return %c0_i32, %c0_i32_0 : i32, i32
  }
  func.func @transform_9(%arg0: i32) -> (i32, i32) {
    %c0_i32 = arith.constant 0 : i32
    %c0_i32_0 = arith.constant 0 : i32
    %c0_i32_1 = arith.constant 0 : i32
    return %c0_i32, %c0_i32_0 : i32, i32
  }
  func.func @transform_10(%arg0: i32) -> (i32, i32) {
    %c0_i32 = arith.constant 0 : i32
    %c0_i32_0 = arith.constant 0 : i32
    %c0_i32_1 = arith.constant 0 : i32
    return %c0_i32, %c0_i32_0 : i32, i32
  }
  func.func @transform_11(%arg0: i32) -> (i32, i32) {
    %c0_i32 = arith.constant 0 : i32
    %c0_i32_0 = arith.constant 0 : i32
    %c0_i32_1 = arith.constant 0 : i32
    return %c0_i32, %c0_i32_0 : i32, i32
  }
  func.func @transform_12(%arg0: i32) -> (i32, i32) {
    %c0_i32 = arith.constant 0 : i32
    %c0_i32_0 = arith.constant 0 : i32
    %c0_i32_1 = arith.constant 0 : i32
    return %c0_i32, %c0_i32_0 : i32, i32
  }
  func.func @transform_13(%arg0: i32) -> (i32, i32) {
    %c0_i32 = arith.constant 0 : i32
    %c0_i32_0 = arith.constant 0 : i32
    %c0_i32_1 = arith.constant 0 : i32
    return %c0_i32, %c0_i32_0 : i32, i32
  }
  func.func @transform_14(%arg0: i32) -> (i32, i32) {
    %c0_i32 = arith.constant 0 : i32
    %c0_i32_0 = arith.constant 0 : i32
    %c0_i32_1 = arith.constant 0 : i32
    return %c0_i32, %c0_i32_0 : i32, i32
  }
  func.func @transform_15(%arg0: i32) -> (i32, i32) {
    %c0_i32 = arith.constant 0 : i32
    %c0_i32_0 = arith.constant 0 : i32
    %c0_i32_1 = arith.constant 0 : i32
    return %c0_i32, %c0_i32_0 : i32, i32
  }
  func.func @transform_16(%arg0: i32) -> (i32, i32) {
    %c0_i32 = arith.constant 0 : i32
    %c0_i32_0 = arith.constant 0 : i32
    %c0_i32_1 = arith.constant 0 : i32
    return %c0_i32, %c0_i32_0 : i32, i32
  }
  func.func @transform_17(%arg0: i32) -> (i32, i32) {
    %c0_i32 = arith.constant 0 : i32
    %c0_i32_0 = arith.constant 0 : i32
    %c0_i32_1 = arith.constant 0 : i32
    return %c0_i32, %c0_i32_0 : i32, i32
  }
  func.func @transform_18(%arg0: i32) -> (i32, i32) {
    %c0_i32 = arith.constant 0 : i32
    %c0_i32_0 = arith.constant 0 : i32
    %c0_i32_1 = arith.constant 0 : i32
    return %c0_i32, %c0_i32_0 : i32, i32
  }
  func.func @transform_19(%arg0: i32) -> (i32, i32) {
    %c0_i32 = arith.constant 0 : i32
    %c0_i32_0 = arith.constant 0 : i32
    %c0_i32_1 = arith.constant 0 : i32
    return %c0_i32, %c0_i32_0 : i32, i32
  }
  func.func @transform_20(%arg0: i32) -> (i32, i32) {
    %c0_i32 = arith.constant 0 : i32
    %c0_i32_0 = arith.constant 0 : i32
    return %arg0, %c0_i32 : i32, i32
  }
}

module attributes {stable_mosaic.version = 11 : i64} {
  func.func @_encoder_layer_kernel(%arg0: i32, %arg1: memref<32x32xf32, #tpu.memory_space<vmem>>, %arg2: memref<32x32xf32, #tpu.memory_space<vmem>>, %arg3: memref<8x8xf32, #tpu.memory_space<vmem>>, %arg4: memref<32x32xf32, #tpu.memory_space<vmem>>, %arg5: memref<1x32xf32, #tpu.memory_space<vmem>>, %arg6: memref<32x32xf32, #tpu.memory_space<vmem>>, %arg7: memref<1x32xf32, #tpu.memory_space<vmem>>, %arg8: memref<32x32xf32, #tpu.memory_space<vmem>>, %arg9: memref<1x32xf32, #tpu.memory_space<vmem>>, %arg10: memref<32x32xf32, #tpu.memory_space<vmem>>, %arg11: memref<1x32xf32, #tpu.memory_space<vmem>>, %arg12: memref<1x32xf32, #tpu.memory_space<vmem>>, %arg13: memref<1x32xf32, #tpu.memory_space<vmem>>, %arg14: memref<32x2048xbf16, #tpu.memory_space<vmem>>, %arg15: memref<1x2048xf32, #tpu.memory_space<vmem>>, %arg16: memref<2048x32xbf16, #tpu.memory_space<vmem>>, %arg17: memref<1x32xf32, #tpu.memory_space<vmem>>, %arg18: memref<1x32xf32, #tpu.memory_space<vmem>>, %arg19: memref<1x32xf32, #tpu.memory_space<vmem>>, %arg20: memref<32x32xf32, #tpu.memory_space<vmem>>) attributes {dimension_semantics = [#tpu.dimension_semantics<parallel>], iteration_bounds = array<i64: 2>, scalar_prefetch = 0 : i64, scratch_operands = 0 : i64, tpu.core_type = #tpu.core_type<tc>, window_params = [{transform_indices = @transform_0, window_bounds = array<i64: 32, 32>}, {transform_indices = @transform_1, window_bounds = array<i64: 32, 32>}, {pipeline_mode = #tpu.pipeline_mode<synchronous>, transform_indices = @transform_2, window_bounds = array<i64: 8, 8>}, {pipeline_mode = #tpu.pipeline_mode<synchronous>, transform_indices = @transform_3, window_bounds = array<i64: 32, 32>}, {pipeline_mode = #tpu.pipeline_mode<synchronous>, transform_indices = @transform_4, window_bounds = array<i64: 1, 32>}, {pipeline_mode = #tpu.pipeline_mode<synchronous>, transform_indices = @transform_5, window_bounds = array<i64: 32, 32>}, {pipeline_mode = #tpu.pipeline_mode<synchronous>, transform_indices = @transform_6, window_bounds = array<i64: 1, 32>}, {pipeline_mode = #tpu.pipeline_mode<synchronous>, transform_indices = @transform_7, window_bounds = array<i64: 32, 32>}, {pipeline_mode = #tpu.pipeline_mode<synchronous>, transform_indices = @transform_8, window_bounds = array<i64: 1, 32>}, {pipeline_mode = #tpu.pipeline_mode<synchronous>, transform_indices = @transform_9, window_bounds = array<i64: 32, 32>}, {pipeline_mode = #tpu.pipeline_mode<synchronous>, transform_indices = @transform_10, window_bounds = array<i64: 1, 32>}, {pipeline_mode = #tpu.pipeline_mode<synchronous>, transform_indices = @transform_11, window_bounds = array<i64: 1, 32>}, {pipeline_mode = #tpu.pipeline_mode<synchronous>, transform_indices = @transform_12, window_bounds = array<i64: 1, 32>}, {pipeline_mode = #tpu.pipeline_mode<synchronous>, transform_indices = @transform_13, window_bounds = array<i64: 32, 2048>}, {pipeline_mode = #tpu.pipeline_mode<synchronous>, transform_indices = @transform_14, window_bounds = array<i64: 1, 2048>}, {pipeline_mode = #tpu.pipeline_mode<synchronous>, transform_indices = @transform_15, window_bounds = array<i64: 2048, 32>}, {pipeline_mode = #tpu.pipeline_mode<synchronous>, transform_indices = @transform_16, window_bounds = array<i64: 1, 32>}, {pipeline_mode = #tpu.pipeline_mode<synchronous>, transform_indices = @transform_17, window_bounds = array<i64: 1, 32>}, {pipeline_mode = #tpu.pipeline_mode<synchronous>, transform_indices = @transform_18, window_bounds = array<i64: 1, 32>}, {transform_indices = @transform_19, window_bounds = array<i64: 32, 32>}]} {
    %c0 = arith.constant 0 : index
    %c0_0 = arith.constant 0 : index
    %0 = vector.load %arg1[%c0, %c0_0] : memref<32x32xf32, #tpu.memory_space<vmem>>, vector<32x32xf32>
    %c0_1 = arith.constant 0 : index
    %c0_2 = arith.constant 0 : index
    %1 = vector.load %arg2[%c0_1, %c0_2] : memref<32x32xf32, #tpu.memory_space<vmem>>, vector<32x32xf32>
    %c0_3 = arith.constant 0 : index
    %c0_4 = arith.constant 0 : index
    %2 = vector.load %arg3[%c0_3, %c0_4] : memref<8x8xf32, #tpu.memory_space<vmem>>, vector<8x8xf32>
    %cst = arith.constant 0.000000e+00 : f32
    %3 = vector.broadcast %cst : f32 to vector<32x32xf32>
    %c0_5 = arith.constant 0 : index
    %c0_6 = arith.constant 0 : index
    %4 = vector.load %arg4[%c0_5, %c0_6] : memref<32x32xf32, #tpu.memory_space<vmem>>, vector<32x8xf32>
    %cst_7 = arith.constant dense<0.000000e+00> : vector<32x8xf32>
    %5 = tpu.matmul %0, %4, %cst_7 {dimension_numbers = #tpu.dot_dimension_numbers<[1], [0], [0], [1], [0, 0, 1, 1], [], []>} : vector<32x32xf32>, vector<32x8xf32>, vector<32x8xf32> -> vector<32x8xf32>
    %c0_8 = arith.constant 0 : index
    %c0_9 = arith.constant 0 : index
    %6 = vector.load %arg5[%c0_8, %c0_9] : memref<1x32xf32, #tpu.memory_space<vmem>>, vector<1x8xf32>
    %7 = vector.broadcast %6 : vector<1x8xf32> to vector<32x8xf32>
    %8 = arith.addf %5, %7 : vector<32x8xf32>
    %c0_10 = arith.constant 0 : index
    %c0_11 = arith.constant 0 : index
    %9 = vector.load %arg6[%c0_10, %c0_11] : memref<32x32xf32, #tpu.memory_space<vmem>>, vector<32x8xf32>
    %cst_12 = arith.constant dense<0.000000e+00> : vector<32x8xf32>
    %10 = tpu.matmul %0, %9, %cst_12 {dimension_numbers = #tpu.dot_dimension_numbers<[1], [0], [0], [1], [0, 0, 1, 1], [], []>} : vector<32x32xf32>, vector<32x8xf32>, vector<32x8xf32> -> vector<32x8xf32>
    %c0_13 = arith.constant 0 : index
    %c0_14 = arith.constant 0 : index
    %11 = vector.load %arg7[%c0_13, %c0_14] : memref<1x32xf32, #tpu.memory_space<vmem>>, vector<1x8xf32>
    %12 = vector.broadcast %11 : vector<1x8xf32> to vector<32x8xf32>
    %13 = arith.addf %10, %12 : vector<32x8xf32>
    %c0_15 = arith.constant 0 : index
    %c0_16 = arith.constant 0 : index
    %14 = vector.load %arg8[%c0_15, %c0_16] : memref<32x32xf32, #tpu.memory_space<vmem>>, vector<32x8xf32>
    %cst_17 = arith.constant dense<0.000000e+00> : vector<32x8xf32>
    %15 = tpu.matmul %1, %14, %cst_17 {dimension_numbers = #tpu.dot_dimension_numbers<[1], [0], [0], [1], [0, 0, 1, 1], [], []>} : vector<32x32xf32>, vector<32x8xf32>, vector<32x8xf32> -> vector<32x8xf32>
    %c0_18 = arith.constant 0 : index
    %c0_19 = arith.constant 0 : index
    %16 = vector.load %arg9[%c0_18, %c0_19] : memref<1x32xf32, #tpu.memory_space<vmem>>, vector<1x8xf32>
    %17 = vector.broadcast %16 : vector<1x8xf32> to vector<32x8xf32>
    %18 = arith.addf %15, %17 : vector<32x8xf32>
    %19 = vector.shape_cast %8 : vector<32x8xf32> to vector<4x8x8xf32>
    %20 = vector.shape_cast %13 : vector<32x8xf32> to vector<4x8x8xf32>
    %21 = vector.shape_cast %18 : vector<32x8xf32> to vector<4x8x8xf32>
    "tpu.trace_start"() <{level = 10 : i32, message = "bqd,bkd->bqk"}> : () -> ()
    %cst_20 = arith.constant dense<0.000000e+00> : vector<4x8x8xf32>
    %22 = tpu.matmul %19, %20, %cst_20 {dimension_numbers = #tpu.dot_dimension_numbers<[2], [2], [1], [1], [0, 0, 0, 1, 1, 1], [0], [0]>} : vector<4x8x8xf32>, vector<4x8x8xf32>, vector<4x8x8xf32> -> vector<4x8x8xf32>
    "tpu.trace_stop"() : () -> ()
    %23 = vector.shape_cast %2 : vector<8x8xf32> to vector<1x8x8xf32>
    %24 = vector.broadcast %23 : vector<1x8x8xf32> to vector<4x8x8xf32>
    %25 = arith.addf %22, %24 : vector<4x8x8xf32>
    %cst_21 = arith.constant dense<0xFF800000> : vector<4x8xf32>
    %26 = vector.multi_reduction <maximumf>, %25, %cst_21 [2] : vector<4x8x8xf32> to vector<4x8xf32>
    %27 = vector.shape_cast %26 : vector<4x8xf32> to vector<4x8x1xf32>
    %28 = vector.broadcast %27 : vector<4x8x1xf32> to vector<4x8x8xf32>
    %29 = arith.subf %25, %28 : vector<4x8x8xf32>
    %30 = math.exp %29 : vector<4x8x8xf32>
    %cst_22 = arith.constant dense<0.000000e+00> : vector<4x8xf32>
    %31 = vector.multi_reduction <add>, %30, %cst_22 [2] : vector<4x8x8xf32> to vector<4x8xf32>
    %32 = vector.shape_cast %31 : vector<4x8xf32> to vector<4x8x1xf32>
    %33 = tpu.reciprocal %32 {approx = true} : vector<4x8x1xf32> -> vector<4x8x1xf32>
    %34 = vector.broadcast %33 : vector<4x8x1xf32> to vector<4x8x8xf32>
    %35 = arith.mulf %30, %34 : vector<4x8x8xf32>
    "tpu.trace_start"() <{level = 10 : i32, message = "bqk,bkd->bqd"}> : () -> ()
    %cst_23 = arith.constant dense<0.000000e+00> : vector<4x8x8xf32>
    %36 = tpu.matmul %35, %21, %cst_23 {dimension_numbers = #tpu.dot_dimension_numbers<[2], [1], [1], [2], [0, 0, 0, 1, 1, 2], [0], [0]>} : vector<4x8x8xf32>, vector<4x8x8xf32>, vector<4x8x8xf32> -> vector<4x8x8xf32>
    "tpu.trace_stop"() : () -> ()
    %37 = vector.shape_cast %36 : vector<4x8x8xf32> to vector<32x8xf32>
    %c0_24 = arith.constant 0 : index
    %c0_25 = arith.constant 0 : index
    %38 = vector.load %arg10[%c0_24, %c0_25] : memref<32x32xf32, #tpu.memory_space<vmem>>, vector<8x32xf32>
    %cst_26 = arith.constant dense<0.000000e+00> : vector<32x32xf32>
    %39 = tpu.matmul %37, %38, %cst_26 {dimension_numbers = #tpu.dot_dimension_numbers<[1], [0], [0], [1], [0, 0, 1, 1], [], []>} : vector<32x8xf32>, vector<8x32xf32>, vector<32x32xf32> -> vector<32x32xf32>
    %40 = arith.addf %3, %39 : vector<32x32xf32>
    %c0_27 = arith.constant 0 : index
    %c8 = arith.constant 8 : index
    %41 = vector.load %arg4[%c0_27, %c8] : memref<32x32xf32, #tpu.memory_space<vmem>>, vector<32x8xf32>
    %cst_28 = arith.constant dense<0.000000e+00> : vector<32x8xf32>
    %42 = tpu.matmul %0, %41, %cst_28 {dimension_numbers = #tpu.dot_dimension_numbers<[1], [0], [0], [1], [0, 0, 1, 1], [], []>} : vector<32x32xf32>, vector<32x8xf32>, vector<32x8xf32> -> vector<32x8xf32>
    %c0_29 = arith.constant 0 : index
    %c8_30 = arith.constant 8 : index
    %43 = vector.load %arg5[%c0_29, %c8_30] : memref<1x32xf32, #tpu.memory_space<vmem>>, vector<1x8xf32>
    %44 = vector.broadcast %43 : vector<1x8xf32> to vector<32x8xf32>
    %45 = arith.addf %42, %44 : vector<32x8xf32>
    %c0_31 = arith.constant 0 : index
    %c8_32 = arith.constant 8 : index
    %46 = vector.load %arg6[%c0_31, %c8_32] : memref<32x32xf32, #tpu.memory_space<vmem>>, vector<32x8xf32>
    %cst_33 = arith.constant dense<0.000000e+00> : vector<32x8xf32>
    %47 = tpu.matmul %0, %46, %cst_33 {dimension_numbers = #tpu.dot_dimension_numbers<[1], [0], [0], [1], [0, 0, 1, 1], [], []>} : vector<32x32xf32>, vector<32x8xf32>, vector<32x8xf32> -> vector<32x8xf32>
    %c0_34 = arith.constant 0 : index
    %c8_35 = arith.constant 8 : index
    %48 = vector.load %arg7[%c0_34, %c8_35] : memref<1x32xf32, #tpu.memory_space<vmem>>, vector<1x8xf32>
    %49 = vector.broadcast %48 : vector<1x8xf32> to vector<32x8xf32>
    %50 = arith.addf %47, %49 : vector<32x8xf32>
    %c0_36 = arith.constant 0 : index
    %c8_37 = arith.constant 8 : index
    %51 = vector.load %arg8[%c0_36, %c8_37] : memref<32x32xf32, #tpu.memory_space<vmem>>, vector<32x8xf32>
    %cst_38 = arith.constant dense<0.000000e+00> : vector<32x8xf32>
    %52 = tpu.matmul %1, %51, %cst_38 {dimension_numbers = #tpu.dot_dimension_numbers<[1], [0], [0], [1], [0, 0, 1, 1], [], []>} : vector<32x32xf32>, vector<32x8xf32>, vector<32x8xf32> -> vector<32x8xf32>
    %c0_39 = arith.constant 0 : index
    %c8_40 = arith.constant 8 : index
    %53 = vector.load %arg9[%c0_39, %c8_40] : memref<1x32xf32, #tpu.memory_space<vmem>>, vector<1x8xf32>
    %54 = vector.broadcast %53 : vector<1x8xf32> to vector<32x8xf32>
    %55 = arith.addf %52, %54 : vector<32x8xf32>
    %56 = vector.shape_cast %45 : vector<32x8xf32> to vector<4x8x8xf32>
    %57 = vector.shape_cast %50 : vector<32x8xf32> to vector<4x8x8xf32>
    %58 = vector.shape_cast %55 : vector<32x8xf32> to vector<4x8x8xf32>
    "tpu.trace_start"() <{level = 10 : i32, message = "bqd,bkd->bqk"}> : () -> ()
    %cst_41 = arith.constant dense<0.000000e+00> : vector<4x8x8xf32>
    %59 = tpu.matmul %56, %57, %cst_41 {dimension_numbers = #tpu.dot_dimension_numbers<[2], [2], [1], [1], [0, 0, 0, 1, 1, 1], [0], [0]>} : vector<4x8x8xf32>, vector<4x8x8xf32>, vector<4x8x8xf32> -> vector<4x8x8xf32>
    "tpu.trace_stop"() : () -> ()
    %60 = vector.shape_cast %2 : vector<8x8xf32> to vector<1x8x8xf32>
    %61 = vector.broadcast %60 : vector<1x8x8xf32> to vector<4x8x8xf32>
    %62 = arith.addf %59, %61 : vector<4x8x8xf32>
    %cst_42 = arith.constant dense<0xFF800000> : vector<4x8xf32>
    %63 = vector.multi_reduction <maximumf>, %62, %cst_42 [2] : vector<4x8x8xf32> to vector<4x8xf32>
    %64 = vector.shape_cast %63 : vector<4x8xf32> to vector<4x8x1xf32>
    %65 = vector.broadcast %64 : vector<4x8x1xf32> to vector<4x8x8xf32>
    %66 = arith.subf %62, %65 : vector<4x8x8xf32>
    %67 = math.exp %66 : vector<4x8x8xf32>
    %cst_43 = arith.constant dense<0.000000e+00> : vector<4x8xf32>
    %68 = vector.multi_reduction <add>, %67, %cst_43 [2] : vector<4x8x8xf32> to vector<4x8xf32>
    %69 = vector.shape_cast %68 : vector<4x8xf32> to vector<4x8x1xf32>
    %70 = tpu.reciprocal %69 {approx = true} : vector<4x8x1xf32> -> vector<4x8x1xf32>
    %71 = vector.broadcast %70 : vector<4x8x1xf32> to vector<4x8x8xf32>
    %72 = arith.mulf %67, %71 : vector<4x8x8xf32>
    "tpu.trace_start"() <{level = 10 : i32, message = "bqk,bkd->bqd"}> : () -> ()
    %cst_44 = arith.constant dense<0.000000e+00> : vector<4x8x8xf32>
    %73 = tpu.matmul %72, %58, %cst_44 {dimension_numbers = #tpu.dot_dimension_numbers<[2], [1], [1], [2], [0, 0, 0, 1, 1, 2], [0], [0]>} : vector<4x8x8xf32>, vector<4x8x8xf32>, vector<4x8x8xf32> -> vector<4x8x8xf32>
    "tpu.trace_stop"() : () -> ()
    %74 = vector.shape_cast %73 : vector<4x8x8xf32> to vector<32x8xf32>
    %c8_45 = arith.constant 8 : index
    %c0_46 = arith.constant 0 : index
    %75 = vector.load %arg10[%c8_45, %c0_46] : memref<32x32xf32, #tpu.memory_space<vmem>>, vector<8x32xf32>
    %cst_47 = arith.constant dense<0.000000e+00> : vector<32x32xf32>
    %76 = tpu.matmul %74, %75, %cst_47 {dimension_numbers = #tpu.dot_dimension_numbers<[1], [0], [0], [1], [0, 0, 1, 1], [], []>} : vector<32x8xf32>, vector<8x32xf32>, vector<32x32xf32> -> vector<32x32xf32>
    %77 = arith.addf %40, %76 : vector<32x32xf32>
    %c0_48 = arith.constant 0 : index
    %c16 = arith.constant 16 : index
    %78 = vector.load %arg4[%c0_48, %c16] : memref<32x32xf32, #tpu.memory_space<vmem>>, vector<32x8xf32>
    %cst_49 = arith.constant dense<0.000000e+00> : vector<32x8xf32>
    %79 = tpu.matmul %0, %78, %cst_49 {dimension_numbers = #tpu.dot_dimension_numbers<[1], [0], [0], [1], [0, 0, 1, 1], [], []>} : vector<32x32xf32>, vector<32x8xf32>, vector<32x8xf32> -> vector<32x8xf32>
    %c0_50 = arith.constant 0 : index
    %c16_51 = arith.constant 16 : index
    %80 = vector.load %arg5[%c0_50, %c16_51] : memref<1x32xf32, #tpu.memory_space<vmem>>, vector<1x8xf32>
    %81 = vector.broadcast %80 : vector<1x8xf32> to vector<32x8xf32>
    %82 = arith.addf %79, %81 : vector<32x8xf32>
    %c0_52 = arith.constant 0 : index
    %c16_53 = arith.constant 16 : index
    %83 = vector.load %arg6[%c0_52, %c16_53] : memref<32x32xf32, #tpu.memory_space<vmem>>, vector<32x8xf32>
    %cst_54 = arith.constant dense<0.000000e+00> : vector<32x8xf32>
    %84 = tpu.matmul %0, %83, %cst_54 {dimension_numbers = #tpu.dot_dimension_numbers<[1], [0], [0], [1], [0, 0, 1, 1], [], []>} : vector<32x32xf32>, vector<32x8xf32>, vector<32x8xf32> -> vector<32x8xf32>
    %c0_55 = arith.constant 0 : index
    %c16_56 = arith.constant 16 : index
    %85 = vector.load %arg7[%c0_55, %c16_56] : memref<1x32xf32, #tpu.memory_space<vmem>>, vector<1x8xf32>
    %86 = vector.broadcast %85 : vector<1x8xf32> to vector<32x8xf32>
    %87 = arith.addf %84, %86 : vector<32x8xf32>
    %c0_57 = arith.constant 0 : index
    %c16_58 = arith.constant 16 : index
    %88 = vector.load %arg8[%c0_57, %c16_58] : memref<32x32xf32, #tpu.memory_space<vmem>>, vector<32x8xf32>
    %cst_59 = arith.constant dense<0.000000e+00> : vector<32x8xf32>
    %89 = tpu.matmul %1, %88, %cst_59 {dimension_numbers = #tpu.dot_dimension_numbers<[1], [0], [0], [1], [0, 0, 1, 1], [], []>} : vector<32x32xf32>, vector<32x8xf32>, vector<32x8xf32> -> vector<32x8xf32>
    %c0_60 = arith.constant 0 : index
    %c16_61 = arith.constant 16 : index
    %90 = vector.load %arg9[%c0_60, %c16_61] : memref<1x32xf32, #tpu.memory_space<vmem>>, vector<1x8xf32>
    %91 = vector.broadcast %90 : vector<1x8xf32> to vector<32x8xf32>
    %92 = arith.addf %89, %91 : vector<32x8xf32>
    %93 = vector.shape_cast %82 : vector<32x8xf32> to vector<4x8x8xf32>
    %94 = vector.shape_cast %87 : vector<32x8xf32> to vector<4x8x8xf32>
    %95 = vector.shape_cast %92 : vector<32x8xf32> to vector<4x8x8xf32>
    "tpu.trace_start"() <{level = 10 : i32, message = "bqd,bkd->bqk"}> : () -> ()
    %cst_62 = arith.constant dense<0.000000e+00> : vector<4x8x8xf32>
    %96 = tpu.matmul %93, %94, %cst_62 {dimension_numbers = #tpu.dot_dimension_numbers<[2], [2], [1], [1], [0, 0, 0, 1, 1, 1], [0], [0]>} : vector<4x8x8xf32>, vector<4x8x8xf32>, vector<4x8x8xf32> -> vector<4x8x8xf32>
    "tpu.trace_stop"() : () -> ()
    %97 = vector.shape_cast %2 : vector<8x8xf32> to vector<1x8x8xf32>
    %98 = vector.broadcast %97 : vector<1x8x8xf32> to vector<4x8x8xf32>
    %99 = arith.addf %96, %98 : vector<4x8x8xf32>
    %cst_63 = arith.constant dense<0xFF800000> : vector<4x8xf32>
    %100 = vector.multi_reduction <maximumf>, %99, %cst_63 [2] : vector<4x8x8xf32> to vector<4x8xf32>
    %101 = vector.shape_cast %100 : vector<4x8xf32> to vector<4x8x1xf32>
    %102 = vector.broadcast %101 : vector<4x8x1xf32> to vector<4x8x8xf32>
    %103 = arith.subf %99, %102 : vector<4x8x8xf32>
    %104 = math.exp %103 : vector<4x8x8xf32>
    %cst_64 = arith.constant dense<0.000000e+00> : vector<4x8xf32>
    %105 = vector.multi_reduction <add>, %104, %cst_64 [2] : vector<4x8x8xf32> to vector<4x8xf32>
    %106 = vector.shape_cast %105 : vector<4x8xf32> to vector<4x8x1xf32>
    %107 = tpu.reciprocal %106 {approx = true} : vector<4x8x1xf32> -> vector<4x8x1xf32>
    %108 = vector.broadcast %107 : vector<4x8x1xf32> to vector<4x8x8xf32>
    %109 = arith.mulf %104, %108 : vector<4x8x8xf32>
    "tpu.trace_start"() <{level = 10 : i32, message = "bqk,bkd->bqd"}> : () -> ()
    %cst_65 = arith.constant dense<0.000000e+00> : vector<4x8x8xf32>
    %110 = tpu.matmul %109, %95, %cst_65 {dimension_numbers = #tpu.dot_dimension_numbers<[2], [1], [1], [2], [0, 0, 0, 1, 1, 2], [0], [0]>} : vector<4x8x8xf32>, vector<4x8x8xf32>, vector<4x8x8xf32> -> vector<4x8x8xf32>
    "tpu.trace_stop"() : () -> ()
    %111 = vector.shape_cast %110 : vector<4x8x8xf32> to vector<32x8xf32>
    %c16_66 = arith.constant 16 : index
    %c0_67 = arith.constant 0 : index
    %112 = vector.load %arg10[%c16_66, %c0_67] : memref<32x32xf32, #tpu.memory_space<vmem>>, vector<8x32xf32>
    %cst_68 = arith.constant dense<0.000000e+00> : vector<32x32xf32>
    %113 = tpu.matmul %111, %112, %cst_68 {dimension_numbers = #tpu.dot_dimension_numbers<[1], [0], [0], [1], [0, 0, 1, 1], [], []>} : vector<32x8xf32>, vector<8x32xf32>, vector<32x32xf32> -> vector<32x32xf32>
    %114 = arith.addf %77, %113 : vector<32x32xf32>
    %c0_69 = arith.constant 0 : index
    %c24 = arith.constant 24 : index
    %115 = vector.load %arg4[%c0_69, %c24] : memref<32x32xf32, #tpu.memory_space<vmem>>, vector<32x8xf32>
    %cst_70 = arith.constant dense<0.000000e+00> : vector<32x8xf32>
    %116 = tpu.matmul %0, %115, %cst_70 {dimension_numbers = #tpu.dot_dimension_numbers<[1], [0], [0], [1], [0, 0, 1, 1], [], []>} : vector<32x32xf32>, vector<32x8xf32>, vector<32x8xf32> -> vector<32x8xf32>
    %c0_71 = arith.constant 0 : index
    %c24_72 = arith.constant 24 : index
    %117 = vector.load %arg5[%c0_71, %c24_72] : memref<1x32xf32, #tpu.memory_space<vmem>>, vector<1x8xf32>
    %118 = vector.broadcast %117 : vector<1x8xf32> to vector<32x8xf32>
    %119 = arith.addf %116, %118 : vector<32x8xf32>
    %c0_73 = arith.constant 0 : index
    %c24_74 = arith.constant 24 : index
    %120 = vector.load %arg6[%c0_73, %c24_74] : memref<32x32xf32, #tpu.memory_space<vmem>>, vector<32x8xf32>
    %cst_75 = arith.constant dense<0.000000e+00> : vector<32x8xf32>
    %121 = tpu.matmul %0, %120, %cst_75 {dimension_numbers = #tpu.dot_dimension_numbers<[1], [0], [0], [1], [0, 0, 1, 1], [], []>} : vector<32x32xf32>, vector<32x8xf32>, vector<32x8xf32> -> vector<32x8xf32>
    %c0_76 = arith.constant 0 : index
    %c24_77 = arith.constant 24 : index
    %122 = vector.load %arg7[%c0_76, %c24_77] : memref<1x32xf32, #tpu.memory_space<vmem>>, vector<1x8xf32>
    %123 = vector.broadcast %122 : vector<1x8xf32> to vector<32x8xf32>
    %124 = arith.addf %121, %123 : vector<32x8xf32>
    %c0_78 = arith.constant 0 : index
    %c24_79 = arith.constant 24 : index
    %125 = vector.load %arg8[%c0_78, %c24_79] : memref<32x32xf32, #tpu.memory_space<vmem>>, vector<32x8xf32>
    %cst_80 = arith.constant dense<0.000000e+00> : vector<32x8xf32>
    %126 = tpu.matmul %1, %125, %cst_80 {dimension_numbers = #tpu.dot_dimension_numbers<[1], [0], [0], [1], [0, 0, 1, 1], [], []>} : vector<32x32xf32>, vector<32x8xf32>, vector<32x8xf32> -> vector<32x8xf32>
    %c0_81 = arith.constant 0 : index
    %c24_82 = arith.constant 24 : index
    %127 = vector.load %arg9[%c0_81, %c24_82] : memref<1x32xf32, #tpu.memory_space<vmem>>, vector<1x8xf32>
    %128 = vector.broadcast %127 : vector<1x8xf32> to vector<32x8xf32>
    %129 = arith.addf %126, %128 : vector<32x8xf32>
    %130 = vector.shape_cast %119 : vector<32x8xf32> to vector<4x8x8xf32>
    %131 = vector.shape_cast %124 : vector<32x8xf32> to vector<4x8x8xf32>
    %132 = vector.shape_cast %129 : vector<32x8xf32> to vector<4x8x8xf32>
    "tpu.trace_start"() <{level = 10 : i32, message = "bqd,bkd->bqk"}> : () -> ()
    %cst_83 = arith.constant dense<0.000000e+00> : vector<4x8x8xf32>
    %133 = tpu.matmul %130, %131, %cst_83 {dimension_numbers = #tpu.dot_dimension_numbers<[2], [2], [1], [1], [0, 0, 0, 1, 1, 1], [0], [0]>} : vector<4x8x8xf32>, vector<4x8x8xf32>, vector<4x8x8xf32> -> vector<4x8x8xf32>
    "tpu.trace_stop"() : () -> ()
    %134 = vector.shape_cast %2 : vector<8x8xf32> to vector<1x8x8xf32>
    %135 = vector.broadcast %134 : vector<1x8x8xf32> to vector<4x8x8xf32>
    %136 = arith.addf %133, %135 : vector<4x8x8xf32>
    %cst_84 = arith.constant dense<0xFF800000> : vector<4x8xf32>
    %137 = vector.multi_reduction <maximumf>, %136, %cst_84 [2] : vector<4x8x8xf32> to vector<4x8xf32>
    %138 = vector.shape_cast %137 : vector<4x8xf32> to vector<4x8x1xf32>
    %139 = vector.broadcast %138 : vector<4x8x1xf32> to vector<4x8x8xf32>
    %140 = arith.subf %136, %139 : vector<4x8x8xf32>
    %141 = math.exp %140 : vector<4x8x8xf32>
    %cst_85 = arith.constant dense<0.000000e+00> : vector<4x8xf32>
    %142 = vector.multi_reduction <add>, %141, %cst_85 [2] : vector<4x8x8xf32> to vector<4x8xf32>
    %143 = vector.shape_cast %142 : vector<4x8xf32> to vector<4x8x1xf32>
    %144 = tpu.reciprocal %143 {approx = true} : vector<4x8x1xf32> -> vector<4x8x1xf32>
    %145 = vector.broadcast %144 : vector<4x8x1xf32> to vector<4x8x8xf32>
    %146 = arith.mulf %141, %145 : vector<4x8x8xf32>
    "tpu.trace_start"() <{level = 10 : i32, message = "bqk,bkd->bqd"}> : () -> ()
    %cst_86 = arith.constant dense<0.000000e+00> : vector<4x8x8xf32>
    %147 = tpu.matmul %146, %132, %cst_86 {dimension_numbers = #tpu.dot_dimension_numbers<[2], [1], [1], [2], [0, 0, 0, 1, 1, 2], [0], [0]>} : vector<4x8x8xf32>, vector<4x8x8xf32>, vector<4x8x8xf32> -> vector<4x8x8xf32>
    "tpu.trace_stop"() : () -> ()
    %148 = vector.shape_cast %147 : vector<4x8x8xf32> to vector<32x8xf32>
    %c24_87 = arith.constant 24 : index
    %c0_88 = arith.constant 0 : index
    %149 = vector.load %arg10[%c24_87, %c0_88] : memref<32x32xf32, #tpu.memory_space<vmem>>, vector<8x32xf32>
    %cst_89 = arith.constant dense<0.000000e+00> : vector<32x32xf32>
    %150 = tpu.matmul %148, %149, %cst_89 {dimension_numbers = #tpu.dot_dimension_numbers<[1], [0], [0], [1], [0, 0, 1, 1], [], []>} : vector<32x8xf32>, vector<8x32xf32>, vector<32x32xf32> -> vector<32x32xf32>
    %151 = arith.addf %114, %150 : vector<32x32xf32>
    %c0_90 = arith.constant 0 : index
    %c0_91 = arith.constant 0 : index
    %152 = vector.load %arg11[%c0_90, %c0_91] : memref<1x32xf32, #tpu.memory_space<vmem>>, vector<1x32xf32>
    %153 = vector.broadcast %152 : vector<1x32xf32> to vector<32x32xf32>
    %154 = arith.addf %151, %153 : vector<32x32xf32>
    %155 = arith.addf %0, %154 : vector<32x32xf32>
    %c0_92 = arith.constant 0 : index
    %c0_93 = arith.constant 0 : index
    %156 = vector.load %arg12[%c0_92, %c0_93] : memref<1x32xf32, #tpu.memory_space<vmem>>, vector<1x32xf32>
    %c0_94 = arith.constant 0 : index
    %c0_95 = arith.constant 0 : index
    %157 = vector.load %arg13[%c0_94, %c0_95] : memref<1x32xf32, #tpu.memory_space<vmem>>, vector<1x32xf32>
    %cst_96 = arith.constant dense<0.000000e+00> : vector<32xf32>
    %158 = vector.multi_reduction <add>, %155, %cst_96 [1] : vector<32x32xf32> to vector<32xf32>
    %159 = vector.shape_cast %158 : vector<32xf32> to vector<32x1xf32>
    %cst_97 = arith.constant 3.200000e+01 : f32
    %160 = vector.broadcast %cst_97 : f32 to vector<32x1xf32>
    %161 = arith.divf %159, %160 : vector<32x1xf32>
    %162 = vector.broadcast %161 : vector<32x1xf32> to vector<32x32xf32>
    %163 = arith.subf %155, %162 : vector<32x32xf32>
    %164 = arith.mulf %163, %163 : vector<32x32xf32>
    %cst_98 = arith.constant dense<0.000000e+00> : vector<32xf32>
    %165 = vector.multi_reduction <add>, %164, %cst_98 [1] : vector<32x32xf32> to vector<32xf32>
    %166 = vector.shape_cast %165 : vector<32xf32> to vector<32x1xf32>
    %cst_99 = arith.constant 3.200000e+01 : f32
    %167 = vector.broadcast %cst_99 : f32 to vector<32x1xf32>
    %168 = arith.divf %166, %167 : vector<32x1xf32>
    %169 = vector.broadcast %161 : vector<32x1xf32> to vector<32x32xf32>
    %170 = arith.subf %155, %169 : vector<32x32xf32>
    %cst_100 = arith.constant 9.99999974E-6 : f32
    %171 = vector.broadcast %cst_100 : f32 to vector<32x1xf32>
    %172 = arith.addf %168, %171 : vector<32x1xf32>
    %173 = math.rsqrt %172 : vector<32x1xf32>
    %174 = vector.broadcast %173 : vector<32x1xf32> to vector<32x32xf32>
    %175 = arith.mulf %170, %174 : vector<32x32xf32>
    %176 = vector.broadcast %156 : vector<1x32xf32> to vector<32x32xf32>
    %177 = arith.mulf %175, %176 : vector<32x32xf32>
    %178 = vector.broadcast %157 : vector<1x32xf32> to vector<32x32xf32>
    %179 = arith.addf %177, %178 : vector<32x32xf32>
    %180 = arith.truncf %179 : vector<32x32xf32> to vector<32x32xbf16>
    %cst_101 = arith.constant 0.000000e+00 : f32
    %181 = vector.broadcast %cst_101 : f32 to vector<32x32xf32>
    %c0_102 = arith.constant 0 : index
    %c0_103 = arith.constant 0 : index
    %182 = vector.load %arg14[%c0_102, %c0_103] : memref<32x2048xbf16, #tpu.memory_space<vmem>>, vector<32x512xbf16>
    %cst_104 = arith.constant dense<0.000000e+00> : vector<32x512xf32>
    %183 = tpu.matmul %180, %182, %cst_104 {dimension_numbers = #tpu.dot_dimension_numbers<[1], [0], [0], [1], [0, 0, 1, 1], [], []>} : vector<32x32xbf16>, vector<32x512xbf16>, vector<32x512xf32> -> vector<32x512xf32>
    %c0_105 = arith.constant 0 : index
    %c0_106 = arith.constant 0 : index
    %184 = vector.load %arg15[%c0_105, %c0_106] : memref<1x2048xf32, #tpu.memory_space<vmem>>, vector<1x512xf32>
    %185 = vector.broadcast %184 : vector<1x512xf32> to vector<32x512xf32>
    %186 = arith.addf %183, %185 : vector<32x512xf32>
    %cst_107 = arith.constant 0.000000e+00 : f32
    %187 = vector.broadcast %cst_107 : f32 to vector<32x512xf32>
    %188 = arith.maximumf %186, %187 : vector<32x512xf32>
    %189 = arith.truncf %188 : vector<32x512xf32> to vector<32x512xbf16>
    %c0_108 = arith.constant 0 : index
    %c0_109 = arith.constant 0 : index
    %190 = vector.load %arg16[%c0_108, %c0_109] : memref<2048x32xbf16, #tpu.memory_space<vmem>>, vector<512x32xbf16>
    %cst_110 = arith.constant dense<0.000000e+00> : vector<32x32xf32>
    %191 = tpu.matmul %189, %190, %cst_110 {dimension_numbers = #tpu.dot_dimension_numbers<[1], [0], [0], [1], [0, 0, 1, 1], [], []>} : vector<32x512xbf16>, vector<512x32xbf16>, vector<32x32xf32> -> vector<32x32xf32>
    %192 = arith.addf %181, %191 : vector<32x32xf32>
    %c0_111 = arith.constant 0 : index
    %c512 = arith.constant 512 : index
    %193 = vector.load %arg14[%c0_111, %c512] : memref<32x2048xbf16, #tpu.memory_space<vmem>>, vector<32x512xbf16>
    %cst_112 = arith.constant dense<0.000000e+00> : vector<32x512xf32>
    %194 = tpu.matmul %180, %193, %cst_112 {dimension_numbers = #tpu.dot_dimension_numbers<[1], [0], [0], [1], [0, 0, 1, 1], [], []>} : vector<32x32xbf16>, vector<32x512xbf16>, vector<32x512xf32> -> vector<32x512xf32>
    %c0_113 = arith.constant 0 : index
    %c512_114 = arith.constant 512 : index
    %195 = vector.load %arg15[%c0_113, %c512_114] : memref<1x2048xf32, #tpu.memory_space<vmem>>, vector<1x512xf32>
    %196 = vector.broadcast %195 : vector<1x512xf32> to vector<32x512xf32>
    %197 = arith.addf %194, %196 : vector<32x512xf32>
    %cst_115 = arith.constant 0.000000e+00 : f32
    %198 = vector.broadcast %cst_115 : f32 to vector<32x512xf32>
    %199 = arith.maximumf %197, %198 : vector<32x512xf32>
    %200 = arith.truncf %199 : vector<32x512xf32> to vector<32x512xbf16>
    %c512_116 = arith.constant 512 : index
    %c0_117 = arith.constant 0 : index
    %201 = vector.load %arg16[%c512_116, %c0_117] : memref<2048x32xbf16, #tpu.memory_space<vmem>>, vector<512x32xbf16>
    %cst_118 = arith.constant dense<0.000000e+00> : vector<32x32xf32>
    %202 = tpu.matmul %200, %201, %cst_118 {dimension_numbers = #tpu.dot_dimension_numbers<[1], [0], [0], [1], [0, 0, 1, 1], [], []>} : vector<32x512xbf16>, vector<512x32xbf16>, vector<32x32xf32> -> vector<32x32xf32>
    %203 = arith.addf %192, %202 : vector<32x32xf32>
    %c0_119 = arith.constant 0 : index
    %c1024 = arith.constant 1024 : index
    %204 = vector.load %arg14[%c0_119, %c1024] : memref<32x2048xbf16, #tpu.memory_space<vmem>>, vector<32x512xbf16>
    %cst_120 = arith.constant dense<0.000000e+00> : vector<32x512xf32>
    %205 = tpu.matmul %180, %204, %cst_120 {dimension_numbers = #tpu.dot_dimension_numbers<[1], [0], [0], [1], [0, 0, 1, 1], [], []>} : vector<32x32xbf16>, vector<32x512xbf16>, vector<32x512xf32> -> vector<32x512xf32>
    %c0_121 = arith.constant 0 : index
    %c1024_122 = arith.constant 1024 : index
    %206 = vector.load %arg15[%c0_121, %c1024_122] : memref<1x2048xf32, #tpu.memory_space<vmem>>, vector<1x512xf32>
    %207 = vector.broadcast %206 : vector<1x512xf32> to vector<32x512xf32>
    %208 = arith.addf %205, %207 : vector<32x512xf32>
    %cst_123 = arith.constant 0.000000e+00 : f32
    %209 = vector.broadcast %cst_123 : f32 to vector<32x512xf32>
    %210 = arith.maximumf %208, %209 : vector<32x512xf32>
    %211 = arith.truncf %210 : vector<32x512xf32> to vector<32x512xbf16>
    %c1024_124 = arith.constant 1024 : index
    %c0_125 = arith.constant 0 : index
    %212 = vector.load %arg16[%c1024_124, %c0_125] : memref<2048x32xbf16, #tpu.memory_space<vmem>>, vector<512x32xbf16>
    %cst_126 = arith.constant dense<0.000000e+00> : vector<32x32xf32>
    %213 = tpu.matmul %211, %212, %cst_126 {dimension_numbers = #tpu.dot_dimension_numbers<[1], [0], [0], [1], [0, 0, 1, 1], [], []>} : vector<32x512xbf16>, vector<512x32xbf16>, vector<32x32xf32> -> vector<32x32xf32>
    %214 = arith.addf %203, %213 : vector<32x32xf32>
    %c0_127 = arith.constant 0 : index
    %c1536 = arith.constant 1536 : index
    %215 = vector.load %arg14[%c0_127, %c1536] : memref<32x2048xbf16, #tpu.memory_space<vmem>>, vector<32x512xbf16>
    %cst_128 = arith.constant dense<0.000000e+00> : vector<32x512xf32>
    %216 = tpu.matmul %180, %215, %cst_128 {dimension_numbers = #tpu.dot_dimension_numbers<[1], [0], [0], [1], [0, 0, 1, 1], [], []>} : vector<32x32xbf16>, vector<32x512xbf16>, vector<32x512xf32> -> vector<32x512xf32>
    %c0_129 = arith.constant 0 : index
    %c1536_130 = arith.constant 1536 : index
    %217 = vector.load %arg15[%c0_129, %c1536_130] : memref<1x2048xf32, #tpu.memory_space<vmem>>, vector<1x512xf32>
    %218 = vector.broadcast %217 : vector<1x512xf32> to vector<32x512xf32>
    %219 = arith.addf %216, %218 : vector<32x512xf32>
    %cst_131 = arith.constant 0.000000e+00 : f32
    %220 = vector.broadcast %cst_131 : f32 to vector<32x512xf32>
    %221 = arith.maximumf %219, %220 : vector<32x512xf32>
    %222 = arith.truncf %221 : vector<32x512xf32> to vector<32x512xbf16>
    %c1536_132 = arith.constant 1536 : index
    %c0_133 = arith.constant 0 : index
    %223 = vector.load %arg16[%c1536_132, %c0_133] : memref<2048x32xbf16, #tpu.memory_space<vmem>>, vector<512x32xbf16>
    %cst_134 = arith.constant dense<0.000000e+00> : vector<32x32xf32>
    %224 = tpu.matmul %222, %223, %cst_134 {dimension_numbers = #tpu.dot_dimension_numbers<[1], [0], [0], [1], [0, 0, 1, 1], [], []>} : vector<32x512xbf16>, vector<512x32xbf16>, vector<32x32xf32> -> vector<32x32xf32>
    %225 = arith.addf %214, %224 : vector<32x32xf32>
    %c0_135 = arith.constant 0 : index
    %c0_136 = arith.constant 0 : index
    %226 = vector.load %arg17[%c0_135, %c0_136] : memref<1x32xf32, #tpu.memory_space<vmem>>, vector<1x32xf32>
    %227 = vector.broadcast %226 : vector<1x32xf32> to vector<32x32xf32>
    %228 = arith.addf %225, %227 : vector<32x32xf32>
    %229 = arith.addf %179, %228 : vector<32x32xf32>
    %c0_137 = arith.constant 0 : index
    %c0_138 = arith.constant 0 : index
    %230 = vector.load %arg18[%c0_137, %c0_138] : memref<1x32xf32, #tpu.memory_space<vmem>>, vector<1x32xf32>
    %c0_139 = arith.constant 0 : index
    %c0_140 = arith.constant 0 : index
    %231 = vector.load %arg19[%c0_139, %c0_140] : memref<1x32xf32, #tpu.memory_space<vmem>>, vector<1x32xf32>
    %cst_141 = arith.constant dense<0.000000e+00> : vector<32xf32>
    %232 = vector.multi_reduction <add>, %229, %cst_141 [1] : vector<32x32xf32> to vector<32xf32>
    %233 = vector.shape_cast %232 : vector<32xf32> to vector<32x1xf32>
    %cst_142 = arith.constant 3.200000e+01 : f32
    %234 = vector.broadcast %cst_142 : f32 to vector<32x1xf32>
    %235 = arith.divf %233, %234 : vector<32x1xf32>
    %236 = vector.broadcast %235 : vector<32x1xf32> to vector<32x32xf32>
    %237 = arith.subf %229, %236 : vector<32x32xf32>
    %238 = arith.mulf %237, %237 : vector<32x32xf32>
    %cst_143 = arith.constant dense<0.000000e+00> : vector<32xf32>
    %239 = vector.multi_reduction <add>, %238, %cst_143 [1] : vector<32x32xf32> to vector<32xf32>
    %240 = vector.shape_cast %239 : vector<32xf32> to vector<32x1xf32>
    %cst_144 = arith.constant 3.200000e+01 : f32
    %241 = vector.broadcast %cst_144 : f32 to vector<32x1xf32>
    %242 = arith.divf %240, %241 : vector<32x1xf32>
    %243 = vector.broadcast %235 : vector<32x1xf32> to vector<32x32xf32>
    %244 = arith.subf %229, %243 : vector<32x32xf32>
    %cst_145 = arith.constant 9.99999974E-6 : f32
    %245 = vector.broadcast %cst_145 : f32 to vector<32x1xf32>
    %246 = arith.addf %242, %245 : vector<32x1xf32>
    %247 = math.rsqrt %246 : vector<32x1xf32>
    %248 = vector.broadcast %247 : vector<32x1xf32> to vector<32x32xf32>
    %249 = arith.mulf %244, %248 : vector<32x32xf32>
    %250 = vector.broadcast %230 : vector<1x32xf32> to vector<32x32xf32>
    %251 = arith.mulf %249, %250 : vector<32x32xf32>
    %252 = vector.broadcast %231 : vector<1x32xf32> to vector<32x32xf32>
    %253 = arith.addf %251, %252 : vector<32x32xf32>
    %c0_146 = arith.constant 0 : index
    %c0_147 = arith.constant 0 : index
    %254 = vector.load %arg20[%c0_146, %c0_147] : memref<32x32xf32, #tpu.memory_space<vmem>>, vector<32x32xf32>
    tpu.vector_store %arg20[%c0_146, %c0_147], %253 {strides = array<i32>} : memref<32x32xf32, #tpu.memory_space<vmem>>, vector<32x32xf32>,
    return
  }
  func.func @transform_0(%arg0: i32) -> (i32, i32) {
    %c0_i32 = arith.constant 0 : i32
    %c0_i32_0 = arith.constant 0 : i32
    return %arg0, %c0_i32 : i32, i32
  }
  func.func @transform_1(%arg0: i32) -> (i32, i32) {
    %c0_i32 = arith.constant 0 : i32
    %c0_i32_0 = arith.constant 0 : i32
    return %arg0, %c0_i32 : i32, i32
  }
  func.func @transform_2(%arg0: i32) -> (i32, i32) {
    %c0_i32 = arith.constant 0 : i32
    %c0_i32_0 = arith.constant 0 : i32
    %c0_i32_1 = arith.constant 0 : i32
    return %c0_i32, %c0_i32_0 : i32, i32
  }
  func.func @transform_3(%arg0: i32) -> (i32, i32) {
    %c0_i32 = arith.constant 0 : i32
    %c0_i32_0 = arith.constant 0 : i32
    %c0_i32_1 = arith.constant 0 : i32
    return %c0_i32, %c0_i32_0 : i32, i32
  }
  func.func @transform_4(%arg0: i32) -> (i32, i32) {
    %c0_i32 = arith.constant 0 : i32
    %c0_i32_0 = arith.constant 0 : i32
    %c0_i32_1 = arith.constant 0 : i32
    return %c0_i32, %c0_i32_0 : i32, i32
  }
  func.func @transform_5(%arg0: i32) -> (i32, i32) {
    %c0_i32 = arith.constant 0 : i32
    %c0_i32_0 = arith.constant 0 : i32
    %c0_i32_1 = arith.constant 0 : i32
    return %c0_i32, %c0_i32_0 : i32, i32
  }
  func.func @transform_6(%arg0: i32) -> (i32, i32) {
    %c0_i32 = arith.constant 0 : i32
    %c0_i32_0 = arith.constant 0 : i32
    %c0_i32_1 = arith.constant 0 : i32
    return %c0_i32, %c0_i32_0 : i32, i32
  }
  func.func @transform_7(%arg0: i32) -> (i32, i32) {
    %c0_i32 = arith.constant 0 : i32
    %c0_i32_0 = arith.constant 0 : i32
    %c0_i32_1 = arith.constant 0 : i32
    return %c0_i32, %c0_i32_0 : i32, i32
  }
  func.func @transform_8(%arg0: i32) -> (i32, i32) {
    %c0_i32 = arith.constant 0 : i32
    %c0_i32_0 = arith.constant 0 : i32
    %c0_i32_1 = arith.constant 0 : i32
    return %c0_i32, %c0_i32_0 : i32, i32
  }
  func.func @transform_9(%arg0: i32) -> (i32, i32) {
    %c0_i32 = arith.constant 0 : i32
    %c0_i32_0 = arith.constant 0 : i32
    %c0_i32_1 = arith.constant 0 : i32
    return %c0_i32, %c0_i32_0 : i32, i32
  }
  func.func @transform_10(%arg0: i32) -> (i32, i32) {
    %c0_i32 = arith.constant 0 : i32
    %c0_i32_0 = arith.constant 0 : i32
    %c0_i32_1 = arith.constant 0 : i32
    return %c0_i32, %c0_i32_0 : i32, i32
  }
  func.func @transform_11(%arg0: i32) -> (i32, i32) {
    %c0_i32 = arith.constant 0 : i32
    %c0_i32_0 = arith.constant 0 : i32
    %c0_i32_1 = arith.constant 0 : i32
    return %c0_i32, %c0_i32_0 : i32, i32
  }
  func.func @transform_12(%arg0: i32) -> (i32, i32) {
    %c0_i32 = arith.constant 0 : i32
    %c0_i32_0 = arith.constant 0 : i32
    %c0_i32_1 = arith.constant 0 : i32
    return %c0_i32, %c0_i32_0 : i32, i32
  }
  func.func @transform_13(%arg0: i32) -> (i32, i32) {
    %c0_i32 = arith.constant 0 : i32
    %c0_i32_0 = arith.constant 0 : i32
    %c0_i32_1 = arith.constant 0 : i32
    return %c0_i32, %c0_i32_0 : i32, i32
  }
  func.func @transform_14(%arg0: i32) -> (i32, i32) {
    %c0_i32 = arith.constant 0 : i32
    %c0_i32_0 = arith.constant 0 : i32
    %c0_i32_1 = arith.constant 0 : i32
    return %c0_i32, %c0_i32_0 : i32, i32
  }
  func.func @transform_15(%arg0: i32) -> (i32, i32) {
    %c0_i32 = arith.constant 0 : i32
    %c0_i32_0 = arith.constant 0 : i32
    %c0_i32_1 = arith.constant 0 : i32
    return %c0_i32, %c0_i32_0 : i32, i32
  }
  func.func @transform_16(%arg0: i32) -> (i32, i32) {
    %c0_i32 = arith.constant 0 : i32
    %c0_i32_0 = arith.constant 0 : i32
    %c0_i32_1 = arith.constant 0 : i32
    return %c0_i32, %c0_i32_0 : i32, i32
  }
  func.func @transform_17(%arg0: i32) -> (i32, i32) {
    %c0_i32 = arith.constant 0 : i32
    %c0_i32_0 = arith.constant 0 : i32
    %c0_i32_1 = arith.constant 0 : i32
    return %c0_i32, %c0_i32_0 : i32, i32
  }
  func.func @transform_18(%arg0: i32) -> (i32, i32) {
    %c0_i32 = arith.constant 0 : i32
    %c0_i32_0 = arith.constant 0 : i32
    %c0_i32_1 = arith.constant 0 : i32
    return %c0_i32, %c0_i32_0 : i32, i32
  }
  func.func @transform_19(%arg0: i32) -> (i32, i32) {
    %c0_i32 = arith.constant 0 : i32
    %c0_i32_0 = arith.constant 0 : i32
    return %arg0, %c0_i32 : i32, i32
  }
}

</mosaic_0001>

<bundles_post_ra>
// kernel: _lambda_.3
= control target key start
LH: loop header
LB: loop body
LE: loop exit
PB: predicated region body
PF: predicated region fallthrough
CT: control target
= control target key end

     0   :  { %s8925_s24 = smov 0   ;;  %s10270_s0 = inlined_call_operand.vmem [shape: f32[64,32], index: 0, kind: input, shape index: {}]   ;;  %s10271_s1 = inlined_call_operand.vmem [shape: f32[32,32], index: 1, kind: input, shape index: {}]   ;;  %s10272_s2 = inlined_call_operand.vmem [shape: f32[1,32], index: 2, kind: input, shape index: {}]   ;;  %s10273_s3 = inlined_call_operand.vmem [shape: f32[32,32], index: 3, kind: input, shape index: {}]   ;;  %s10274_s4 = inlined_call_operand.vmem [shape: f32[1,32], index: 4, kind: input, shape index: {}]   ;;  %s10275_s5 = inlined_call_operand.vmem [shape: f32[32,32], index: 5, kind: input, shape index: {}]   ;;  %s10276_s6 = inlined_call_operand.vmem [shape: f32[1,32], index: 6, kind: input, shape index: {}]   ;;  %s10277_s7 = inlined_call_operand.vmem [shape: f32[32,32], index: 7, kind: input, shape index: {}]   ;;  %s10278_s8 = inlined_call_operand.vmem [shape: f32[1,32], index: 8, kind: input, shape index: {}]   ;;  %s10279_s9 = inlined_call_operand.vmem [shape: f32[1,32], index: 9, kind: input, shape index: {}]   ;;  %s10280_s10 = inlined_call_operand.vmem [shape: f32[1,32], index: 10, kind: input, shape index: {}]   ;;  %s10281_s11 = inlined_call_operand.vmem [shape: bf16[32,2048], index: 11, kind: input, shape index: {}]   ;;  %s10282_s12 = inlined_call_operand.vmem [shape: f32[1,2048], index: 12, kind: input, shape index: {}]   ;;  %s10283_s13 = inlined_call_operand.vmem [shape: bf16[2048,32], index: 13, kind: input, shape index: {}]   ;;  %s10284_s14 = inlined_call_operand.vmem [shape: f32[1,32], index: 14, kind: input, shape index: {}]   ;;  %s10285_s15 = inlined_call_operand.vmem [shape: f32[1,32], index: 15, kind: input, shape index: {}]   ;;  %s10286_s16 = inlined_call_operand.vmem [shape: f32[1,32], index: 16, kind: input, shape index: {}]   ;;  %s10287_s17 = inlined_call_operand.vmem [shape: f32[64,32], index: 17, kind: output, shape index: {}]  }
   0x1   :  { %10290 = sst [smem:[#allocation2_spill]] %s10270_s0 }
   0x2   :  { %10291 = sst [smem:[#allocation3_spill]] %s10271_s1 }
   0x3 LB: > { %s7316_s25 = sadd.s32 4294967295, %s8827_s24   ;;  %p7320_p0 = scmp.ge.s32.totalorder %s8827_s24, 1  ;;  %s8827_s24 = sphi %s8925_s24, %s27_s24  }
   0x4   : > { %p488_p1 = scmp.lt.s32.totalorder %s8827_s24, 3 }
   0x6   : > { %p489_p2 = pnand %p7320_p0, %p488_p1 }
   0x7   : > { %v8936_v0 = vld [vmem:[%s10273_s3] sm:$0xff] (!%p489_p2)  ;;  %v8941_v1 = vld [vmem:[%s10273_s3 + $0x8] sm:$0xff] (!%p489_p2)  ;;  %s10292_s18 = sld [smem:[#allocation3_spill]] (!%p489_p2)  ;;  %s7321_s19 = sshll.u32 (!%p489_p2), %s7316_s25, 2  ;;  %v8958_v5 = vld [vmem:[%s10273_s3 + $0x10] sm:$0xff] (!%p489_p2)  ;;  %vm568_vm0 = vcmask (!%p489_p2), 261120  }
   0x8   : > { %492 = sbr.rel (%p489_p2) target bundleno = 5313 (0x14c1), region = 88  ;;  %v8405_v3 = vpack.c.bf16 (!%p489_p2), %v8941_v1, %v8936_v0  ;;  %v8963_v6 = vld [vmem:[%s10273_s3 + $0x18] sm:$0xff] (!%p489_p2)  ;;  %p541_p3 = scmp.lt.s32.totalorder (!%p489_p2), %s7321_s19, 7  ;;  %v8982_v11 = vld [vmem:[%s10275_s5] sm:$0xff] (!%p489_p2)  ;;  %v8991_v13 = vld [vmem:[%s10275_s5 + $0x8] sm:$0xff] (!%p489_p2)  ;;  %v8829_v22 = vmov (!%p489_p2), 0.0  }
   0x9   : > { %v8409_v8 = vpack.c.bf16 (!%p489_p2), %v8963_v6, %v8958_v5  ;;  %s10293_s26 = sld [smem:[#allocation2_spill]] (!%p489_p2)  ;;  %v8413_v14 = vpack.c.bf16 (!%p489_p2), %v8991_v13, %v8982_v11  ;;  %v9036_v19 = vld [vmem:[%s10275_s5 + $0x10] sm:$0xff] (!%p489_p2)  ;;  %v9041_v20 = vld [vmem:[%s10275_s5 + $0x18] sm:$0xff] (!%p489_p2)  ;;  %vm8830_vm1 = vmmov (!%p489_p2), 0   ;;  %v9060_v23 = vld [vmem:[%s10274_s4] ss:$0 sm:$0xff] (!%p489_p2) }
   0xa   : > { %8406 = vmatprep.subr.bf16.mxu1 (!%p489_p2), %v8405_v3  ;;  %v8417_v21 = vpack.c.bf16 (!%p489_p2), %v9041_v20, %v9036_v19  ;;  %v9065_v25 = vld [vmem:[%s10272_s2] ss:$0 sm:$0xff] (!%p489_p2)  ;;  %vm858_vm2 = vcmask (!%p489_p2), 64512   ;;  %s8831_s27 = smov (!%p489_p2), 120   ;;  %s8832_s28 = smov (!%p489_p2), 112  }
   0xb   : > { %8408 = vmatpush3.bf16.msra.mxu1 (!%p489_p2), %v8405_v3  ;;  %v9098_v42 = vld [vmem:[%s10276_s6] ss:$0 sm:$0xff] (!%p489_p2)  ;;  %s8833_s20 = smov (!%p489_p2), 104  }
   0xc   : > { %8410 = vmatprep.subr.bf16.mxu1 (!%p489_p2), %v8409_v8 }
   0xd   : > { %v8946_v2 = vld [vmem:[%s10292_s18] sm:$0xff] (!%p489_p2)  ;;  %v8953_v4 = vld [vmem:[%s10292_s18 + $0x8] sm:$0xff] (!%p489_p2)  ;;  %v8972_v9 = vld [vmem:[%s10292_s18 + $0x10] sm:$0xff] (!%p489_p2) }
   0xe   : > { %v8397_v7 = vpack.c.bf16 (!%p489_p2), %v8953_v4, %v8946_v2  ;;  %v8977_v10 = vld [vmem:[%s10292_s18 + $0x18] sm:$0xff] (!%p489_p2) }
   0xf   : > { %v8401_v12 = vpack.c.bf16 %v8977_v10, %v8972_v9  ;;  %s10296_s19 = smov (!%p541_p3, %s7321_s19), 7  ;;  %8412 = vmatpush3.bf16.msra.mxu1 %v8409_v8 }
  0x10   : > { %8398 = vmatprep.subr.bf16.mxu0 %v8397_v7  ;;  %s10289_s21 = sshll.u32 %s10296_s19, 3  ;;  %8079 = vmatprep.subr.mxu1 %v8829_v22  ;;  %s10294_s30 = sshll.u32 %s10296_s19, 3 }
  0x11   : > { %8400 = vmatpush3.bf16.msra.mxu0 %v8397_v7  ;;  %s8999_s25 = scalar_lea.vmem %s10293_s26, %s10289_s21 }
  0x12   : > { %8402 = vmatprep.subr.bf16.mxu0 %v8401_v12  ;;  %v9004_v15 = vld [vmem:[%s8999_s25] sm:$0xff]  ;;  %v9007_v16 = vld [vmem:[%s8999_s25 + $0x8] sm:$0xff]  ;;  %v9012_v17 = vld [vmem:[%s8999_s25 + $0x10] sm:$0xff] }
  0x13   : > { %8059 = vmatprep.mubr.msk.f32.mxu1 %vm568_vm0, %v9004_v15  ;;  %8045 = vmatprep.mubr.msk.f32.mxu0 %vm568_vm0, %v9004_v15  ;;  %v9017_v18 = vld [vmem:[%s8999_s25 + $0x18] sm:$0xff] }
  0x14   : > { %8060 = vmatmul.mubr.msk.f32.vlgmr.msra.gmra.mrb[0].mxu1 %vm568_vm0, %v9007_v16 }
  0x15   : > { %8404 = vmatpush3.bf16.msra.mxu0 %v8401_v12  ;;  %8062 = vmatprep.mubr.msk.f32.mxu1 %vm568_vm0, %v9012_v17 }
  0x16   : > { %8414 = vmatprep.subr.bf16.mxu0 %v8413_v14 }
  0x18   : > { %8046 = vmatmul.mubr.msk.f32.vlgmr.msra.gmra.mrb[0].mxu0 %vm568_vm0, %v9007_v16  ;;  %8063 = vmatmul.mubr.msk.f32.gmra.mrb[2].mxu1 %vm568_vm0, %v9017_v18 }
  0x19   : > { %8048 = vmatprep.mubr.msk.f32.mxu0 %vm568_vm0, %v9012_v17  ;;  %8416 = vmatpush3.bf16.msra.mxu0 %v8413_v14 }
  0x1a   : > { %8418 = vmatprep.subr.bf16.mxu0 %v8417_v21  ;;  %8081 = vmatprep.mubr.msk.f32.mxu1 %vm8830_vm1, %v8829_v22 }
  0x1c   : > { %8049 = vmatmul.mubr.msk.f32.gmra.mrb[2].mxu0 %vm568_vm0, %v9017_v18 }
  0x1d   : > { %8073 = vmatprep.mubr.msk.f32.mxu0 %vm568_vm0, %v9004_v15  ;;  %8420 = vmatpush3.bf16.msra.mxu0 %v8417_v21 }
  0x1e   : > { %8089 = vmatprep.subr.mxu0 %v8829_v22 }
  0x20   : > { %8074 = vmatmul.mubr.msk.f32.vlgmr.msra.gmra.mrb[4].mxu0 %vm568_vm0, %v9007_v16 }
  0x21   : > { %8076 = vmatprep.mubr.msk.f32.mxu0 %vm568_vm0, %v9012_v17 }
  0x24   : > { %8077 = vmatmul.mubr.msk.f32.gmra.mrb[6].mxu0 %vm568_vm0, %v9017_v18 }
  0x25   : > { %8091 = vmatprep.mubr.msk.f32.mxu0 %vm8830_vm1, %v8829_v22 }
  0xe7   : > { %v8061_v24 = vpop.f32.mrb[0].mxu1 }
  0xe8   : > { %v743_v26 = vpop.f32.mrb[1].mxu1  ;;  %v749_v34 = vadd.f32 %v8061_v24, %v9060_v23 }
  0xe9   : > { %v744_v28 = vadd.f32 %v9060_v23, %v743_v26 }
  0xeb   : > { %v8047_v27 = vpop.f32.mrb[0].mxu0  ;;  %8080 = vmatpush3.xpose.msk.msra.mxu1 %vm858_vm2, %v744_v28  ;;  %v8064_v31 = vpop.f32.mrb[2].mxu1 }
  0xec   : > { %v647_v29 = vpop.f32.mrb[1].mxu0  ;;  %8084 = vmatprep.subr.mxu1 %v8829_v22  ;;  %v753_v32 = vpop.f32.mrb[3].mxu1  ;;  %v759_v37 = vadd.f32 %v8064_v31, %v9060_v23  ;;  %v653_v39 = vadd.f32 %v8047_v27, %v9065_v25 }
  0xed   : > { %v648_v30 = vadd.f32 %v9065_v25, %v647_v29  ;;  %v754_v35 = vadd.f32 %v9060_v23, %v753_v32 }
  0xef   : > { %v8050_v33 = vpop.f32.mrb[2].mxu0  ;;  %8082 = vmatmul.mubr.msk.f32.vlgmr.msra.gmra.mrb[4].mxu1 %vm858_vm2, %v648_v30  ;;  %8090 = vmatpush3.xpose.msk.msra.mxu0 %vm858_vm2, %v754_v35  ;;  %v9118_v35 = vpack.i.bf16 %v8953_v4, %v8946_v2  ;;  %v9136_v2 = vpack.i.bf16 %v8977_v10, %v8972_v9 }
  0xf0   : > { %v657_v36 = vpop.f32.mrb[3].mxu0  ;;  %8085 = vmatpush3.xpose.msk.msra.mxu1 %vm858_vm2, %v749_v34  ;;  %8086 = vmatprep.mubr.msk.f32.mxu1 %vm8830_vm1, %v8829_v22  ;;  %v663_v40 = vadd.f32 %v8050_v33, %v9065_v25 }
  0xf1   : > { %v658_v38 = vadd.f32 %v9065_v25, %v657_v36  ;;  %8094 = vmatprep.subr.mxu1 %v8829_v22  ;;  %8099 = vmatprep.subr.mxu0 %v8829_v22  ;;  %v9122_v36 = vpack.i.bf16 %v8941_v1, %v8936_v0  ;;  %v9142_v0 = vpack.i.bf16 %v8991_v13, %v8982_v11 }
  0xf2   : > { %v9146_v1 = vpack.i.bf16 %v9041_v20, %v9036_v19 }
  0xf3   : > { %8087 = vmatmul.mubr.msk.f32.vlgmr.msra.gmra.mrb[6].mxu1 %vm858_vm2, %v653_v39  ;;  %8092 = vmatmul.mubr.msk.f32.vlgmr.msra.gmra.mrb[8].mxu0 %vm858_vm2, %v658_v38  ;;  %v8075_v41 = vpop.f32.mrb[4].mxu0 }
  0xf4   : > { %8095 = vmatpush3.xpose.msk.msra.mxu1 %vm858_vm2, %v759_v37  ;;  %8096 = vmatprep.mubr.msk.f32.mxu1 %vm8830_vm1, %v8829_v22  ;;  %v845_v43 = vadd.f32 %v8075_v41, %v9098_v42  ;;  %v839_v44 = vpop.f32.mrb[5].mxu0  ;;  %v9128_v37 = vpack.i.bf16 %v8963_v6, %v8958_v5 }
  0xf5   : > { %8104 = vmatprep.subr.mxu1 %v8829_v22  ;;  %8101 = vmatprep.mubr.msk.f32.mxu0 %vm8830_vm1, %v8829_v22  ;;  %v840_v45 = vadd.f32 %v9098_v42, %v839_v44 }
  0xf7   : > { %8097 = vmatmul.mubr.msk.f32.vlgmr.msra.gmra.mrb[8].mxu1 %vm858_vm2, %v663_v40  ;;  %v9102_v46 = vpop.f32.mrb[6].mxu0  ;;  %8100 = vmatpush3.msra.mxu0 %v840_v45 }
  0xf8   : > { %8106 = vmatprep.mubr.msk.f32.mxu1 %vm8830_vm1, %v8829_v22  ;;  %8105 = vmatpush3.msra.mxu1 %v845_v43  ;;  %v9104_v47 = vpop.f32.mrb[7].mxu0  ;;  %v855_v40 = vadd.f32 %v9102_v46, %v9098_v42 }
  0xf9   : > { %8114 = vmatprep.subr.mxu1 %v8829_v22  ;;  %8109 = vmatprep.subr.mxu0 %v8829_v22 }
 0x1c2   : > { %v931_v48 = vpop.f32.mrb[4].mxu1 }
 0x1c3   : > { %v8083_v49 = vpop.f32.mrb[5].mxu1  ;;  %v1163_v57 = vsel %vm858_vm2, %v931_v48, -inf }
 0x1c6   : > { %v1007_v50 = vpop.f32.mrb[6].mxu1  ;;  %v1083_v53 = vpop.f32.mrb[8].mxu0 }
 0x1c7   : > { %v8088_v51 = vpop.f32.mrb[7].mxu1  ;;  %v1166_v52 = vsel %vm858_vm2, %v1007_v50, -inf  ;;  %v8093_v54 = vpop.f32.mrb[9].mxu0  ;;  %v1169_v59 = vsel %vm858_vm2, %v1083_v53, -inf }
 0x1c8   : > { %1167 = vmax.xlane.f32.xlu0 %v1166_v52 }
 0x1ca   : > { %v1159_v55 = vpop.f32.mrb[8].mxu1 }
 0x1cb   : > { %v8098_v56 = vpop.f32.mrb[9].mxu1  ;;  %v1172_v58 = vsel %vm858_vm2, %v1159_v55, -inf }
 0x1cc   : > { %1164 = vmax.xlane.f32.xlu0 %v1163_v57  ;;  %1173 = vmax.xlane.f32.xlu1 %v1172_v58 }
 0x1d0   : > { %1170 = vmax.xlane.f32.xlu1 %v1169_v59 }
 0x255   : > { %v1168_v60 = vpop.xlane.xlu0 %1167 }
 0x256   : > { %v1176_v61 = vsub.f32 %v1007_v50, %v1168_v60  ;;  %v850_v50 = vadd.f32 %v9098_v42, %v9104_v47 }
 0x258   : > { %v1181_v62 = vmul.f32 1.442695, %v1176_v61 }
 0x259   : > { %v1165_v63 = vpop.xlane.xlu0 %1164  ;;  %v1174_v3 = vpop.xlane.xlu1 %1173 }
 0x25a   : > { %8737 = vpow2.f32 %v1181_v62  ;;  %v1175_v7 = vsub.f32 %v931_v48, %v1165_v63  ;;  %v1178_v8 = vsub.f32 %v1159_v55, %v1174_v3 }
 0x25c   : > { %v1179_v12 = vmul.f32 1.442695, %v1175_v7  ;;  %v1185_v14 = vmul.f32 1.442695, %v1178_v8 }
 0x25d   : > { %v1171_v21 = vpop.xlane.xlu1 %1170 }
 0x25e   : > { %8739 = vpow2.f32 %v1179_v12  ;;  %v1177_v24 = vsub.f32 %v1083_v53, %v1171_v21 }
 0x25f   : > { %8741 = vpow2.f32 %v1185_v14 }
 0x260   : > { %v1183_v26 = vmul.f32 1.442695, %v1177_v24 }
 0x262   : > { %8743 = vpow2.f32 %v1183_v26 }
 0x264   : > { %v8738_v27 = vpop.eup %8737 }
 0x265   : > { %v1190_v28 = vsel %vm858_vm2, %v8738_v27, 0.0 }
 0x266   : > { %1191 = vadd.xlane.f32.xlu0 %v1190_v28 }
 0x268   : > { %v8740_v29 = vpop.eup %8739 }
 0x269   : > { %v8742_v30 = vpop.eup %8741  ;;  %v1187_v31 = vsel %vm858_vm2, %v8740_v29, 0.0 }
 0x26a   : > { %1188 = vadd.xlane.f32.xlu1 %v1187_v31  ;;  %v1196_v32 = vsel %vm858_vm2, %v8742_v30, 0.0 }
 0x26b   : > { %1197 = vadd.xlane.f32.xlu0 %v1196_v32 }
 0x26c   : > { %v8744_v33 = vpop.eup %8743 }
 0x26d   : > { %v1193_v34 = vsel %vm858_vm2, %v8744_v33, 0.0 }
 0x26e   : > { %1194 = vadd.xlane.f32.xlu1 %v1193_v34 }
 0x27f   : > { %8525 = vrot.lane.b32.xlu1 %v9118_v35, %s8831_s27 }
 0x281   : > { %8520 = vrot.lane.b32.xlu0 %v9122_v36, %s8831_s27 }
 0x283   : > { %8530 = vrot.lane.b32.xlu1 %v9128_v37, %s8831_s27 }
 0x285   : > { %8540 = vrot.lane.b32.xlu0 %v9142_v0, %s8831_s27 }
 0x287   : > { %8535 = vrot.lane.b32.xlu1 %v9136_v2, %s8831_s27 }
 0x289   : > { %1640 = vrot.lane.b32.xlu0 %v9060_v23, %s8831_s27 }
 0x28b   : > { %8545 = vrot.lane.b32.xlu1 %v9146_v1, %s8831_s27 }
 0x28f   : > { %1526 = vrot.lane.b32.xlu1 %v9065_v25, %s8831_s27 }
 0x2f3   : > { %v1192_v4 = vpop.xlane.xlu0 %1191 }
 0x2f4   : > { %8745 = vrcp.f32 %v1192_v4 }
 0x2f7   : > { %v1189_v5 = vpop.xlane.xlu1 %1188 }
 0x2f8   : > { %v1198_v6 = vpop.xlane.xlu0 %1197  ;;  %8747 = vrcp.f32 %v1189_v5 }
 0x2f9   : > { %8749 = vrcp.f32 %v1198_v6 }
 0x2fb   : > { %v1195_v9 = vpop.xlane.xlu1 %1194 }
 0x2fc   : > { %8751 = vrcp.f32 %v1195_v9  ;;  %v8521_v10 = vpop.permute.xlu0 %8520 }
 0x2fd   : > { %v8523_v11 = vunpack.i.h.bf16 %v8521_v10  ;;  %v8522_v13 = vunpack.i.l.bf16 %v8521_v10 }
 0x2fe   : > { %v8746_v19 = vpop.eup %8745 }
 0x2ff   : > { %v1204_v20 = vmul.f32 %v8746_v19, %v8738_v27  ;;  %v8429_v38 = vpack.c.bf16 %v8523_v11, %v8522_v13  ;;  %v8526_v39 = vpop.permute.xlu1 %8525 }
 0x300   : > { %v8528_v41 = vunpack.i.h.bf16 %v8526_v39  ;;  %v8527_v43 = vunpack.i.l.bf16 %v8526_v39  ;;  %v8541_v47 = vpop.permute.xlu0 %8540 }
 0x301   : > { %8107 = vmatmul.mubr.msk.f32.vlgmr.msra.gmra.mrb[10].mxu1 %vm858_vm2, %v1204_v20  ;;  %v8543_v61 = vunpack.i.h.bf16 %v8541_v47  ;;  %v8542_v62 = vunpack.i.l.bf16 %v8541_v47 }
 0x302   : > { %v8748_v44 = vpop.eup %8747  ;;  %8115 = vmatpush3.msra.mxu1 %v855_v40  ;;  %8116 = vmatprep.mubr.msk.f32.mxu1 %vm8830_vm1, %v8829_v22  ;;  %v8421_v46 = vpack.c.bf16 %v8528_v41, %v8527_v43 }
 0x303   : > { %v8750_v45 = vpop.eup %8749  ;;  %v1203_v48 = vmul.f32 %v8748_v44, %v8740_v29  ;;  %v8531_v49 = vpop.permute.xlu1 %8530  ;;  %8430 = vmatprep.subr.bf16.mxu1 %v8429_v38  ;;  %v8437_v63 = vpack.c.bf16 %v8543_v61, %v8542_v62 }
 0x304   : > { %v1206_v51 = vmul.f32 %v8750_v45, %v8742_v30  ;;  %v8533_v52 = vunpack.i.h.bf16 %v8531_v49  ;;  %v8532_v53 = vunpack.i.l.bf16 %v8531_v49  ;;  %v1641_v29 = vpop.permute.xlu0 %1640 }
 0x305   : > { %8102 = vmatmul.mubr.msk.f32.vlgmr.msra.gmra.mrb[10].mxu0 %vm858_vm2, %v1203_v48 }
 0x306   : > { %v8752_v54 = vpop.eup %8751  ;;  %v8433_v55 = vpack.c.bf16 %v8533_v52, %v8532_v53  ;;  %8110 = vmatpush3.msra.mxu0 %v850_v50  ;;  %8117 = vmatmul.mubr.msk.f32.vlgmr.msra.gmra.mrb[12].mxu1 %vm858_vm2, %v1206_v51 }
 0x307   : > { %v1205_v56 = vmul.f32 %v8752_v54, %v8744_v33  ;;  %8432 = vmatpush3.bf16.msra.mxu1 %v8429_v38  ;;  %8422 = vmatprep.subr.bf16.mxu0 %v8421_v46  ;;  %v8536_v57 = vpop.permute.xlu1 %8535 }
 0x308   : > { %v8538_v58 = vunpack.i.h.bf16 %v8536_v57  ;;  %v8537_v59 = vunpack.i.l.bf16 %v8536_v57  ;;  %8111 = vmatprep.mubr.msk.f32.mxu0 %vm8830_vm1, %v8829_v22  ;;  %8434 = vmatprep.subr.bf16.mxu1 %v8433_v55 }
 0x309   : > { %8112 = vmatmul.mubr.msk.f32.vlgmr.msra.gmra.mrb[12].mxu0 %vm858_vm2, %v1205_v56  ;;  %8141 = vmatprep.mubr.msk.f32.mxu1 %vm568_vm0, %v9004_v15 }
 0x30a   : > { %v8425_v60 = vpack.c.bf16 %v8538_v58, %v8537_v59  ;;  %8424 = vmatpush3.bf16.msra.mxu0 %v8421_v46  ;;  %8127 = vmatprep.mubr.msk.f32.mxu0 %vm568_vm0, %v9004_v15 }
 0x30b   : > { %8436 = vmatpush3.bf16.msra.mxu1 %v8433_v55  ;;  %v8546_v3 = vpop.permute.xlu1 %8545 }
 0x30c   : > { %8426 = vmatprep.subr.bf16.mxu0 %v8425_v60  ;;  %8161 = vmatprep.subr.mxu1 %v8829_v22  ;;  %v8548_v7 = vunpack.i.h.bf16 %v8546_v3  ;;  %v8547_v8 = vunpack.i.l.bf16 %v8546_v3 }
 0x30e   : > { %8142 = vmatmul.mubr.msk.f32.vlgmr.msra.gmra.mrb[14].mxu1 %vm568_vm0, %v9007_v16  ;;  %8428 = vmatpush3.bf16.msra.mxu0 %v8425_v60  ;;  %v8441_v12 = vpack.c.bf16 %v8548_v7, %v8547_v8 }
 0x30f   : > { %8144 = vmatprep.mubr.msk.f32.mxu1 %vm568_vm0, %v9012_v17  ;;  %8438 = vmatprep.subr.bf16.mxu0 %v8437_v63 }
 0x311   : > { %8128 = vmatmul.mubr.msk.f32.vlgmr.msra.gmra.mrb[14].mxu0 %vm568_vm0, %v9007_v16 }
 0x312   : > { %8145 = vmatmul.mubr.msk.f32.gmra.mrb[16].mxu1 %vm568_vm0, %v9017_v18  ;;  %8130 = vmatprep.mubr.msk.f32.mxu0 %vm568_vm0, %v9012_v17 }
 0x313   : > { %8440 = vmatpush3.bf16.msra.mxu0 %v8437_v63  ;;  %8163 = vmatprep.mubr.msk.f32.mxu1 %vm8830_vm1, %v8829_v22 }
 0x314   : > { %8442 = vmatprep.subr.bf16.mxu0 %v8441_v12 }
 0x315   : > { %8131 = vmatmul.mubr.msk.f32.gmra.mrb[16].mxu0 %vm568_vm0, %v9017_v18 }
 0x316   : > { %8155 = vmatprep.mubr.msk.f32.mxu0 %vm568_vm0, %v9004_v15 }
 0x317   : > { %8444 = vmatpush3.bf16.msra.mxu0 %v8441_v12 }
 0x318   : > { %8171 = vmatprep.subr.mxu0 %v8829_v22 }
 0x31a   : > { %8156 = vmatmul.mubr.msk.f32.vlgmr.msra.gmra.mrb[18].mxu0 %vm568_vm0, %v9007_v16 }
 0x31b   : > { %8158 = vmatprep.mubr.msk.f32.mxu0 %vm568_vm0, %v9012_v17 }
 0x31e   : > { %8159 = vmatmul.mubr.msk.f32.gmra.mrb[20].mxu0 %vm568_vm0, %v9017_v18  ;;  %v1527_v18 = vpop.permute.xlu1 %1526 }
 0x31f   : > { %8173 = vmatprep.mubr.msk.f32.mxu0 %vm8830_vm1, %v8829_v22 }
 0x3d4   : > { %v9198_v15 = vpop.f32.mrb[10].mxu1 }
 0x3d5   : > { %v8108_v14 = vpop.f32.mrb[11].mxu1 }
 0x3d8   : > { %v9200_v21 = vpop.f32.mrb[10].mxu0 }
 0x3d9   : > { %v9202_v24 = vpop.f32.mrb[12].mxu1  ;;  %v8103_v26 = vpop.f32.mrb[11].mxu0 }
 0x3da   : > { %v8118_v27 = vpop.f32.mrb[13].mxu1 }
 0x3dc   : > { %v9204_v28 = vpop.f32.mrb[12].mxu0 }
 0x3dd   : > { %v8113_v16 = vpop.f32.mrb[13].mxu0 }
 0x3e1   : > { %v8143_v17 = vpop.f32.mrb[14].mxu1 }
 0x3e2   : > { %v1709_v30 = vpop.f32.mrb[15].mxu1  ;;  %v1715_v6 = vadd.f32 %v8143_v17, %v1641_v29 }
 0x3e3   : > { %v1710_v31 = vadd.f32 %v1709_v30, %v1641_v29 }
 0x3e4   : > { %v8129_v32 = vpop.f32.mrb[14].mxu0 }
 0x3e5   : > { %v8146_v33 = vpop.f32.mrb[16].mxu1  ;;  %8162 = vmatpush3.xpose.msk.msra.mxu1 %vm858_vm2, %v1710_v31  ;;  %v1595_v34 = vpop.f32.mrb[15].mxu0  ;;  %v1601_v13 = vadd.f32 %v8129_v32, %v1527_v18 }
 0x3e6   : > { %v1596_v4 = vadd.f32 %v1595_v34, %v1527_v18  ;;  %v1719_v5 = vpop.f32.mrb[17].mxu1  ;;  %8166 = vmatprep.subr.mxu1 %v8829_v22  ;;  %v1725_v20 = vadd.f32 %v8146_v33, %v1641_v29 }
 0x3e7   : > { %v1720_v9 = vadd.f32 %v1719_v5, %v1641_v29 }
 0x3e8   : > { %v8132_v10 = vpop.f32.mrb[16].mxu0  ;;  %8164 = vmatmul.mubr.msk.f32.vlgmr.msra.gmra.mrb[18].mxu1 %vm858_vm2, %v1596_v4 }
 0x3e9   : > { %8167 = vmatpush3.xpose.msk.msra.mxu1 %vm858_vm2, %v1715_v6  ;;  %8172 = vmatpush3.xpose.msk.msra.mxu0 %vm858_vm2, %v1720_v9  ;;  %v1605_v11 = vpop.f32.mrb[17].mxu0  ;;  %v1611_v38 = vadd.f32 %v8132_v10, %v1527_v18 }
 0x3ea   : > { %v1606_v19 = vadd.f32 %v1605_v11, %v1527_v18  ;;  %8168 = vmatprep.mubr.msk.f32.mxu1 %vm8830_vm1, %v8829_v22  ;;  %8176 = vmatprep.subr.mxu1 %v8829_v22 }
 0x3eb   : > { %8181 = vmatprep.subr.mxu0 %v8829_v22 }
 0x3ec   : > { %8169 = vmatmul.mubr.msk.f32.vlgmr.msra.gmra.mrb[20].mxu1 %vm858_vm2, %v1601_v13  ;;  %8174 = vmatmul.mubr.msk.f32.vlgmr.msra.gmra.mrb[22].mxu0 %vm858_vm2, %v1606_v19 }
 0x3ed   : > { %8177 = vmatpush3.xpose.msk.msra.mxu1 %vm858_vm2, %v1725_v20  ;;  %8178 = vmatprep.mubr.msk.f32.mxu1 %vm8830_vm1, %v8829_v22  ;;  %v9226_v39 = vpop.f32.mrb[18].mxu0 }
 0x3ee   : > { %8186 = vmatprep.subr.mxu1 %v8829_v22  ;;  %8183 = vmatprep.mubr.msk.f32.mxu0 %vm8830_vm1, %v8829_v22  ;;  %v9228_v40 = vpop.f32.mrb[19].mxu0 }
 0x3f0   : > { %8179 = vmatmul.mubr.msk.f32.vlgmr.msra.gmra.mrb[22].mxu1 %vm858_vm2, %v1611_v38 }
 0x3f1   : > { %8188 = vmatprep.mubr.msk.f32.mxu1 %vm8830_vm1, %v8829_v22  ;;  %v9230_v41 = vpop.f32.mrb[20].mxu0 }
 0x3f2   : > { %v9232_v43 = vpop.f32.mrb[21].mxu0 }
 0x4bb   : > { %v1914_v44 = vpop.f32.mrb[18].mxu1 }
 0x4bc   : > { %v8165_v45 = vpop.f32.mrb[19].mxu1  ;;  %v2146_v48 = vsel %vm858_vm2, %v1914_v44, -inf }
 0x4bd   : > { %2147 = vmax.xlane.f32.xlu1 %v2146_v48 }
 0x4bf   : > { %v1990_v49 = vpop.f32.mrb[20].mxu1  ;;  %v2066_v50 = vpop.f32.mrb[22].mxu0 }
 0x4c0   : > { %v8170_v51 = vpop.f32.mrb[21].mxu1  ;;  %v8175_v52 = vpop.f32.mrb[23].mxu0  ;;  %v2149_v53 = vsel %vm858_vm2, %v1990_v49, -inf  ;;  %v2152_v56 = vsel %vm858_vm2, %v2066_v50, -inf }
 0x4c1   : > { %2150 = vmax.xlane.f32.xlu0 %v2149_v53 }
 0x4c3   : > { %v2142_v46 = vpop.f32.mrb[22].mxu1 }
 0x4c4   : > { %v8180_v54 = vpop.f32.mrb[23].mxu1  ;;  %v2155_v55 = vsel %vm858_vm2, %v2142_v46, -inf }
 0x4c5   : > { %2156 = vmax.xlane.f32.xlu0 %v2155_v55  ;;  %v9285_v54 = vld [vmem:[%s8999_s25 + $0x10] sm:$0xff]  ;;  %v9290_v55 = vld [vmem:[%s8999_s25 + $0x18] sm:$0xff] }
 0x4c9   : > { %2153 = vmax.xlane.f32.xlu0 %v2152_v56  ;;  %v2482_v56 = vld [vmem:[%s10277_s7 + $0x8] sm:$0xff] }
 0x54a   : > { %v2148_v57 = vpop.xlane.xlu1 %2147 }
 0x54b   : > { %v2158_v58 = vsub.f32 %v1914_v44, %v2148_v57  ;;  %v1499_v57 = vld [vmem:[%s10277_s7] sm:$0xff] }
 0x54d   : > { %v2162_v59 = vmul.f32 1.442695, %v2158_v58 }
 0x54e   : > { %v2151_v47 = vpop.xlane.xlu0 %2150 }
 0x54f   : > { %8753 = vpow2.f32 %v2162_v59  ;;  %v2159_v60 = vsub.f32 %v1990_v49, %v2151_v47 }
 0x551   : > { %v2164_v61 = vmul.f32 1.442695, %v2159_v60 }
 0x552   : > { %v2157_v62 = vpop.xlane.xlu0 %2156 }
 0x553   : > { %8755 = vpow2.f32 %v2164_v61  ;;  %v2161_v63 = vsub.f32 %v2142_v46, %v2157_v62  ;;  %v9280_v46 = vld [vmem:[%s8999_s25 + $0x8] sm:$0xff] }
 0x555   : > { %v2168_v3 = vmul.f32 1.442695, %v2161_v63 }
 0x556   : > { %v2154_v7 = vpop.xlane.xlu0 %2153 }
 0x557   : > { %8757 = vpow2.f32 %v2168_v3  ;;  %v2160_v8 = vsub.f32 %v2066_v50, %v2154_v7 }
 0x559   : > { %v8754_v12 = vpop.eup %8753  ;;  %v2166_v14 = vmul.f32 1.442695, %v2160_v8 }
 0x55a   : > { %v2170_v26 = vsel %vm858_vm2, %v8754_v12, 0.0 }
 0x55b   : > { %8759 = vpow2.f32 %v2166_v14  ;;  %2171 = vadd.xlane.f32.xlu1 %v2170_v26 }
 0x55d   : > { %v8756_v27 = vpop.eup %8755 }
 0x55e   : > { %v2173_v16 = vsel %vm858_vm2, %v8756_v27, 0.0 }
 0x55f   : > { %2174 = vadd.xlane.f32.xlu0 %v2173_v16 }
 0x561   : > { %v8758_v29 = vpop.eup %8757 }
 0x562   : > { %v2179_v17 = vsel %vm858_vm2, %v8758_v29, 0.0 }
 0x563   : > { %2180 = vadd.xlane.f32.xlu0 %v2179_v17 }
 0x565   : > { %v8760_v30 = vpop.eup %8759 }
 0x566   : > { %v2176_v31 = vsel %vm858_vm2, %v8760_v30, 0.0 }
 0x567   : > { %2177 = vadd.xlane.f32.xlu1 %v2176_v31 }
 0x578   : > { %8550 = vrot.lane.b32.xlu1 %v9118_v35, %s8832_s28 }
 0x579   : > { %1754 = vrot.lane.b32.xlu0 %v9098_v42, %s8831_s27 }
 0x57c   : > { %8555 = vrot.lane.b32.xlu1 %v9136_v2, %s8832_s28 }
 0x57d   : > { %8565 = vrot.lane.b32.xlu0 %v9128_v37, %s8832_s28 }
 0x580   : > { %8560 = vrot.lane.b32.xlu1 %v9122_v36, %s8832_s28 }
 0x581   : > { %8575 = vrot.lane.b32.xlu0 %v9146_v1, %s8832_s28 }
 0x584   : > { %8570 = vrot.lane.b32.xlu1 %v9142_v0, %s8832_s28 }
 0x585   : > { %2703 = vrot.lane.b32.xlu0 %v9065_v25, %s8832_s28 }
 0x588   : > { %2817 = vrot.lane.b32.xlu1 %v9060_v23, %s8832_s28 }
 0x5e8   : > { %v2172_v35 = vpop.xlane.xlu1 %2171 }
 0x5e9   : > { %8761 = vrcp.f32 %v2172_v35 }
 0x5ec   : > { %v2175_v2 = vpop.xlane.xlu0 %2174 }
 0x5ed   : > { %8763 = vrcp.f32 %v2175_v2 }
 0x5f0   : > { %v2181_v37 = vpop.xlane.xlu0 %2180 }
 0x5f1   : > { %8765 = vrcp.f32 %v2181_v37 }
 0x5f3   : > { %v8762_v18 = vpop.eup %8761 }
 0x5f4   : > { %v2178_v36 = vpop.xlane.xlu1 %2177  ;;  %v1755_v32 = vpop.permute.xlu0 %1754  ;;  %v2186_v33 = vmul.f32 %v8762_v18, %v8754_v12 }
 0x5f5   : > { %8767 = vrcp.f32 %v2178_v36  ;;  %v1824_v1 = vadd.f32 %v9228_v40, %v1755_v32  ;;  %v1829_v0 = vadd.f32 %v9226_v39, %v1755_v32  ;;  %v1834_v25 = vadd.f32 %v9232_v43, %v1755_v32  ;;  %v9274_v43 = vld [vmem:[%s8999_s25] sm:$0xff] }
 0x5f6   : > { %v1839_v5 = vadd.f32 %v9230_v41, %v1755_v32 }
 0x5f7   : > { %v8764_v34 = vpop.eup %8763  ;;  %8182 = vmatpush3.msra.mxu0 %v1824_v1  ;;  %8187 = vmatpush3.msra.mxu1 %v1829_v0 }
 0x5f8   : > { %v2187_v23 = vmul.f32 %v8764_v34, %v8756_v27  ;;  %v8551_v4 = vpop.permute.xlu1 %8550  ;;  %8184 = vmatmul.mubr.msk.f32.vlgmr.msra.gmra.mrb[24].mxu0 %vm858_vm2, %v2186_v33  ;;  %8191 = vmatprep.subr.mxu0 %v8829_v22  ;;  %v8566_v39 = vpop.permute.xlu0 %8565 }
 0x5f9   : > { %v8553_v6 = vunpack.i.h.bf16 %v8551_v4  ;;  %v8552_v9 = vunpack.i.l.bf16 %v8551_v4  ;;  %8192 = vmatpush3.msra.mxu0 %v1834_v25  ;;  %8196 = vmatprep.subr.mxu1 %v8829_v22  ;;  %v8568_v48 = vunpack.i.h.bf16 %v8566_v39  ;;  %v8567_v49 = vunpack.i.l.bf16 %v8566_v39 }
 0x5fa   : > { %8189 = vmatmul.mubr.msk.f32.vlgmr.msra.gmra.mrb[24].mxu1 %vm858_vm2, %v2187_v23  ;;  %8193 = vmatprep.mubr.msk.f32.mxu0 %vm8830_vm1, %v8829_v22 }
 0x5fb   : > { %v8766_v10 = vpop.eup %8765  ;;  %v8445_v11 = vpack.c.bf16 %v8553_v6, %v8552_v9  ;;  %8197 = vmatpush3.msra.mxu1 %v1839_v5  ;;  %8198 = vmatprep.mubr.msk.f32.mxu1 %vm8830_vm1, %v8829_v22  ;;  %v8457_v53 = vpack.c.bf16 %v8568_v48, %v8567_v49 }
 0x5fc   : > { %v2189_v13 = vmul.f32 %v8766_v10, %v8758_v29  ;;  %v8556_v19 = vpop.permute.xlu1 %8555  ;;  %8201 = vmatprep.subr.mxu0 %v2482_v56  ;;  %v8576_v12 = vpop.permute.xlu0 %8575 }
 0x5fd   : > { %v8558_v20 = vunpack.i.h.bf16 %v8556_v19  ;;  %v8557_v38 = vunpack.i.l.bf16 %v8556_v19  ;;  %8446 = vmatprep.subr.bf16.mxu1 %v8445_v11  ;;  %v8578_v26 = vunpack.i.h.bf16 %v8576_v12  ;;  %v8577_v27 = vunpack.i.l.bf16 %v8576_v12 }
 0x5fe   : > { %8199 = vmatmul.mubr.msk.f32.vlgmr.msra.gmra.mrb[26].mxu1 %vm858_vm2, %v2189_v13 }
 0x5ff   : > { %v8768_v40 = vpop.eup %8767  ;;  %v8449_v41 = vpack.c.bf16 %v8558_v20, %v8557_v38  ;;  %8448 = vmatpush3.bf16.msra.mxu1 %v8445_v11  ;;  %8225 = vmatprep.mubr.msk.f32.mxu1 %vm568_vm0, %v9274_v43  ;;  %v8465_v29 = vpack.c.bf16 %v8578_v26, %v8577_v27  ;;  %v3761_v26 = vld [vmem:[%s10292_s18] sm:$0xff]  ;;  %v3762_v27 = vld [vmem:[%s10292_s18 + $0x8] sm:$0xff] }
 0x600   : > { %v2188_v44 = vmul.f32 %v8768_v40, %v8760_v30  ;;  %v8561_v45 = vpop.permute.xlu1 %8560 }
 0x601   : > { %v8563_v50 = vunpack.i.h.bf16 %v8561_v45  ;;  %v8562_v51 = vunpack.i.l.bf16 %v8561_v45  ;;  %8450 = vmatprep.subr.bf16.mxu1 %v8449_v41 }
 0x602   : > { %8194 = vmatmul.mubr.msk.f32.vlgmr.msra.gmra.mrb[26].mxu0 %vm858_vm2, %v2188_v44 }
 0x603   : > { %v8453_v52 = vpack.c.bf16 %v8563_v50, %v8562_v51  ;;  %8452 = vmatpush3.bf16.msra.mxu1 %v8449_v41  ;;  %8202 = vmatpush3.msra.mxu0 %v2482_v56 }
 0x604   : > { %8209 = vmatprep.subr.mxu0 %v1499_v57  ;;  %v8571_v58 = vpop.permute.xlu1 %8570 }
 0x605   : > { %8454 = vmatprep.subr.bf16.mxu1 %v8453_v52  ;;  %v8573_v59 = vunpack.i.h.bf16 %v8571_v58  ;;  %v8572_v47 = vunpack.i.l.bf16 %v8571_v58 }
 0x606   : > { %8226 = vmatmul.mubr.msk.f32.vlgmr.msra.gmra.mrb[28].mxu1 %vm568_vm0, %v9280_v46 }
 0x607   : > { %8456 = vmatpush3.bf16.msra.mxu1 %v8453_v52  ;;  %8228 = vmatprep.mubr.msk.f32.mxu1 %vm568_vm0, %v9285_v54  ;;  %v8461_v62 = vpack.c.bf16 %v8573_v59, %v8572_v47 }
 0x608   : > { %8458 = vmatprep.subr.bf16.mxu1 %v8457_v53  ;;  %v2818_v2 = vpop.permute.xlu1 %2817 }
 0x60a   : > { %8229 = vmatmul.mubr.msk.f32.gmra.mrb[30].mxu1 %vm568_vm0, %v9290_v55 }
 0x60b   : > { %8460 = vmatpush3.bf16.msra.mxu1 %v8457_v53  ;;  %8239 = vmatprep.mubr.msk.f32.mxu1 %vm568_vm0, %v9274_v43 }
 0x60c   : > { %8259 = vmatprep.subr.mxu1 %v8829_v22 }
 0x60e   : > { %8240 = vmatmul.mubr.msk.f32.vlgmr.msra.gmra.mrb[32].mxu1 %vm568_vm0, %v9280_v46 }
 0x60f   : > { %8242 = vmatprep.mubr.msk.f32.mxu1 %vm568_vm0, %v9285_v54 }
 0x612   : > { %8243 = vmatmul.mubr.msk.f32.gmra.mrb[34].mxu1 %vm568_vm0, %v9290_v55 }
 0x613   : > { %8261 = vmatprep.mubr.msk.f32.mxu1 %vm8830_vm1, %v8829_v22 }
 0x6cb   : > { %v2259_v60 = vpop.f32.mrb[24].mxu0 }
 0x6cc   : > { %v8185_v61 = vpop.f32.mrb[25].mxu0  ;;  %8203 = vmatprep.mubr.msk.f32.mxu0 %vm858_vm2, %v2259_v60 }
 0x6cd   : > { %v2332_v63 = vpop.f32.mrb[24].mxu1 }
 0x6ce   : > { %v8190_v3 = vpop.f32.mrb[25].mxu1  ;;  %8204 = vmatmul.mubr.msk.f32.vlgmr.msra.gmra.mrb[28].mxu0 %vm858_vm2, %v2332_v63 }
 0x6cf   : > { %8210 = vmatpush3.msra.mxu0 %v1499_v57 }
 0x6d0   : > { %8462 = vmatprep.subr.bf16.mxu0 %v8461_v62 }
 0x6d1   : > { %v2478_v7 = vpop.f32.mrb[26].mxu1 }
 0x6d2   : > { %v8200_v8 = vpop.f32.mrb[27].mxu1 }
 0x6d5   : > { %v2405_v14 = vpop.f32.mrb[26].mxu0 }
 0x6d6   : > { %v8195_v16 = vpop.f32.mrb[27].mxu0  ;;  %8206 = vmatprep.mubr.msk.f32.mxu0 %vm858_vm2, %v2405_v14 }
 0x6d7   : > { %8207 = vmatmul.mubr.msk.f32.gmra.mrb[30].mxu0 %vm858_vm2, %v2478_v7  ;;  %v3875_v16 = vld [vmem:[%s10273_s3] sm:$0xff] }
 0x6d8   : > { %8211 = vmatprep.mubr.msk.f32.mxu0 %vm858_vm2, %v9200_v21 }
 0x6d9   : > { %v8227_v17 = vpop.f32.mrb[28].mxu1 }
 0x6da   : > { %v2772_v30 = vpop.f32.mrb[29].mxu1 }
 0x6db   : > { %8212 = vmatmul.mubr.msk.f32.vlgmr.msra.gmra.mrb[28].mxu0 %vm858_vm2, %v9198_v15  ;;  %v2704_v15 = vpop.permute.xlu0 %2703 }
 0x6dc   : > { %8464 = vmatpush3.bf16.msra.mxu0 %v8461_v62  ;;  %8214 = vmatprep.mubr.msk.f32.mxu0 %vm858_vm2, %v9204_v28  ;;  %v2778_v0 = vadd.f32 %v8227_v17, %v2704_v15  ;;  %v3876_v17 = vld [vmem:[%s10273_s3 + $0x8] sm:$0xff] }
 0x6dd   : > { %v8230_v31 = vpop.f32.mrb[30].mxu1  ;;  %8466 = vmatprep.subr.bf16.mxu0 %v8465_v29 }
 0x6de   : > { %v2782_v35 = vpop.f32.mrb[31].mxu1  ;;  %v2788_v25 = vadd.f32 %v8230_v31, %v2704_v15  ;;  %v8579_v31 = vpack.i.bf16 %v3876_v17, %v3875_v16 }
 0x6df   : > { %8215 = vmatmul.mubr.msk.f32.gmra.mrb[30].mxu0 %vm858_vm2, %v9202_v24  ;;  %v2773_v24 = vadd.f32 %v2772_v30, %v2704_v15  ;;  %v2783_v33 = vadd.f32 %v2782_v35, %v2704_v15  ;;  %v3878_v30 = vld [vmem:[%s10273_s3 + $0x18] sm:$0xff] }
 0x6e0   : > { %8468 = vmatpush3.bf16.msra.mxu0 %v8465_v29  ;;  %8253 = vmatprep.mubr.msk.f32.mxu0 %vm568_vm0, %v9274_v43  ;;  %v8584_v29 = vpack.i.bf16 %v3762_v27, %v3761_v26 }
 0x6e1   : > { %v8241_v21 = vpop.f32.mrb[32].mxu1  ;;  %8264 = vmatprep.subr.mxu0 %v8829_v22 }
 0x6e2   : > { %v2886_v37 = vpop.f32.mrb[33].mxu1  ;;  %v2892_v28 = vadd.f32 %v8241_v21, %v2818_v2  ;;  %v3764_v21 = vld [vmem:[%s10292_s18 + $0x18] sm:$0xff] }
 0x6e3   : > { %v2887_v18 = vadd.f32 %v2886_v37, %v2818_v2  ;;  %8254 = vmatmul.mubr.msk.f32.vlgmr.msra.gmra.mrb[32].mxu0 %vm568_vm0, %v9280_v46 }
 0x6e4   : > { %8256 = vmatprep.mubr.msk.f32.mxu0 %vm568_vm0, %v9285_v54 }
 0x6e5   : > { %v8244_v36 = vpop.f32.mrb[34].mxu1  ;;  %8260 = vmatpush3.xpose.msk.msra.mxu1 %vm858_vm2, %v2887_v18 }
 0x6e6   : > { %v2896_v32 = vpop.f32.mrb[35].mxu1  ;;  %8269 = vmatprep.subr.mxu1 %v8829_v22  ;;  %v2902_v34 = vadd.f32 %v8244_v36, %v2818_v2 }
 0x6e7   : > { %v2897_v1 = vadd.f32 %v2896_v32, %v2818_v2  ;;  %8257 = vmatmul.mubr.msk.f32.gmra.mrb[34].mxu0 %vm568_vm0, %v9290_v55  ;;  %v3763_v2 = vld [vmem:[%s10292_s18 + $0x10] sm:$0xff] }
 0x6e8   : > { %8262 = vmatmul.mubr.msk.f32.vlgmr.msra.gmra.mrb[36].mxu1 %vm858_vm2, %v2773_v24  ;;  %8266 = vmatprep.mubr.msk.f32.mxu0 %vm8830_vm1, %v8829_v22  ;;  %v8594_v37 = vpack.i.bf16 %v3764_v21, %v3763_v2 }
 0x6e9   : > { %8265 = vmatpush3.xpose.msk.msra.mxu0 %vm858_vm2, %v2892_v28  ;;  %8270 = vmatpush3.xpose.msk.msra.mxu1 %vm858_vm2, %v2897_v1 }
 0x6ea   : > { %8271 = vmatprep.mubr.msk.f32.mxu1 %vm8830_vm1, %v8829_v22  ;;  %8274 = vmatprep.subr.mxu0 %v8829_v22 }
 0x6eb   : > { %8279 = vmatprep.subr.mxu1 %v8829_v22 }
 0x6ec   : > { %8267 = vmatmul.mubr.msk.f32.vlgmr.msra.gmra.mrb[36].mxu0 %vm858_vm2, %v2778_v0  ;;  %8272 = vmatmul.mubr.msk.f32.vlgmr.msra.gmra.mrb[38].mxu1 %vm858_vm2, %v2783_v33 }
 0x6ed   : > { %8275 = vmatpush3.xpose.msk.msra.mxu0 %vm858_vm2, %v2902_v34  ;;  %8276 = vmatprep.mubr.msk.f32.mxu0 %vm8830_vm1, %v8829_v22 }
 0x6ee   : > { %8284 = vmatprep.subr.mxu0 %v8829_v22  ;;  %8281 = vmatprep.mubr.msk.f32.mxu1 %vm8830_vm1, %v8829_v22 }
 0x6f0   : > { %8277 = vmatmul.mubr.msk.f32.vlgmr.msra.gmra.mrb[38].mxu0 %vm858_vm2, %v2788_v25 }
 0x6f1   : > { %8286 = vmatprep.mubr.msk.f32.mxu0 %vm8830_vm1, %v8829_v22 }
 0x7b6   : > { %v9354_v23 = vpop.f32.mrb[32].mxu0 }
 0x7b7   : > { %v9356_v4 = vpop.f32.mrb[33].mxu0 }
 0x7ba   : > { %v9358_v5 = vpop.f32.mrb[34].mxu0 }
 0x7bb   : > { %v3091_v6 = vpop.f32.mrb[36].mxu1  ;;  %v9360_v9 = vpop.f32.mrb[35].mxu0 }
 0x7bc   : > { %v8263_v10 = vpop.f32.mrb[37].mxu1  ;;  %v3323_v11 = vsel %vm858_vm2, %v3091_v6, -inf }
 0x7bd   : > { %3324 = vmax.xlane.f32.xlu1 %v3323_v11 }
 0x7bf   : > { %v3167_v13 = vpop.f32.mrb[36].mxu0  ;;  %v3243_v19 = vpop.f32.mrb[38].mxu1 }
 0x7c0   : > { %v8268_v20 = vpop.f32.mrb[37].mxu0  ;;  %v8273_v38 = vpop.f32.mrb[39].mxu1  ;;  %v3326_v39 = vsel %vm858_vm2, %v3167_v13, -inf  ;;  %v3329_v44 = vsel %vm858_vm2, %v3243_v19, -inf }
 0x7c1   : > { %3327 = vmax.xlane.f32.xlu0 %v3326_v39  ;;  %v3659_v20 = vld [vmem:[%s10277_s7 + $0x10] sm:$0xff] }
 0x7c3   : > { %v3319_v40 = vpop.f32.mrb[38].mxu0 }
 0x7c4   : > { %v8278_v41 = vpop.f32.mrb[39].mxu0  ;;  %v3332_v45 = vsel %vm858_vm2, %v3319_v40, -inf }
 0x7c5   : > { %3330 = vmax.xlane.f32.xlu0 %v3329_v44 }
 0x7c9   : > { %3333 = vmax.xlane.f32.xlu0 %v3332_v45 }
 0x84a   : > { %v3325_v48 = vpop.xlane.xlu1 %3324 }
 0x84b   : > { %v3335_v49 = vsub.f32 %v3091_v6, %v3325_v48 }
 0x84d   : > { %v3339_v50 = vmul.f32 1.442695, %v3335_v49 }
 0x84e   : > { %v3328_v51 = vpop.xlane.xlu0 %3327 }
 0x84f   : > { %8769 = vpow2.f32 %v3339_v50  ;;  %v3336_v52 = vsub.f32 %v3167_v13, %v3328_v51 }
 0x851   : > { %v3341_v53 = vmul.f32 1.442695, %v3336_v52  ;;  %v3989_v52 = vld [vmem:[%s10275_s5] sm:$0xff] }
 0x852   : > { %v3331_v56 = vpop.xlane.xlu0 %3330 }
 0x853   : > { %8771 = vpow2.f32 %v3341_v53  ;;  %v3337_v57 = vsub.f32 %v3243_v19, %v3331_v56  ;;  %v3990_v53 = vld [vmem:[%s10275_s5 + $0x8] sm:$0xff]  ;;  %v3991_v56 = vld [vmem:[%s10275_s5 + $0x10] sm:$0xff] }
 0x855   : > { %v3343_v58 = vmul.f32 1.442695, %v3337_v57  ;;  %v8599_v57 = vpack.i.bf16 %v3990_v53, %v3989_v52 }
 0x856   : > { %v3334_v59 = vpop.xlane.xlu0 %3333 }
 0x857   : > { %8773 = vpow2.f32 %v3343_v58  ;;  %v3338_v47 = vsub.f32 %v3319_v40, %v3334_v59  ;;  %v3992_v58 = vld [vmem:[%s10275_s5 + $0x18] sm:$0xff] }
 0x858   : > { %v8604_v59 = vpack.i.bf16 %v3992_v58, %v3991_v56 }
 0x859   : > { %v8770_v60 = vpop.eup %8769  ;;  %v3345_v61 = vmul.f32 1.442695, %v3338_v47  ;;  %v7423_v47 = vld [vmem:[%s10274_s4] ss:$0 sm:$0xff] }
 0x85a   : > { %v3347_v62 = vsel %vm858_vm2, %v8770_v60, 0.0 }
 0x85b   : > { %8775 = vpow2.f32 %v3345_v61  ;;  %3348 = vadd.xlane.f32.xlu1 %v3347_v62 }
 0x85d   : > { %v8772_v63 = vpop.eup %8771 }
 0x85e   : > { %v3350_v3 = vsel %vm858_vm2, %v8772_v63, 0.0 }
 0x85f   : > { %3351 = vadd.xlane.f32.xlu0 %v3350_v3 }
 0x861   : > { %v8774_v7 = vpop.eup %8773 }
 0x862   : > { %v3353_v8 = vsel %vm858_vm2, %v8774_v7, 0.0 }
 0x863   : > { %3354 = vadd.xlane.f32.xlu1 %v3353_v8 }
 0x865   : > { %v8776_v12 = vpop.eup %8775 }
 0x866   : > { %v3356_v14 = vsel %vm858_vm2, %v8776_v12, 0.0 }
 0x867   : > { %3357 = vadd.xlane.f32.xlu0 %v3356_v14 }
 0x874   : > { %2931 = vrot.lane.b32.xlu1 %v9098_v42, %s8832_s28  ;;  %v3877_v42 = vld [vmem:[%s10273_s3 + $0x10] sm:$0xff] }
 0x875   : > { %v8589_v35 = vpack.i.bf16 %v3878_v30, %v3877_v42 }
 0x878   : > { %8585 = vrot.lane.b32.xlu1 %v8584_v29, %s8833_s20 }
 0x87c   : > { %8590 = vrot.lane.b32.xlu1 %v8589_v35, %s8833_s20 }
 0x87d   : > { %8580 = vrot.lane.b32.xlu0 %v8579_v31, %s8833_s20 }
 0x880   : > { %8595 = vrot.lane.b32.xlu1 %v8594_v37, %s8833_s20 }
 0x881   : > { %8600 = vrot.lane.b32.xlu0 %v8599_v57, %s8833_s20 }
 0x884   : > { %8605 = vrot.lane.b32.xlu1 %v8604_v59, %s8833_s20 }
 0x885   : > { %3901 = vrot.lane.b32.xlu0 %v7423_v47, %s8833_s20 }
 0x8e8   : > { %v3349_v15 = vpop.xlane.xlu1 %3348 }
 0x8e9   : > { %8777 = vrcp.f32 %v3349_v15 }
 0x8ec   : > { %v3352_v18 = vpop.xlane.xlu0 %3351 }
 0x8ed   : > { %8779 = vrcp.f32 %v3352_v18 }
 0x8f0   : > { %v3355_v28 = vpop.xlane.xlu1 %3354 }
 0x8f1   : > { %8781 = vrcp.f32 %v3355_v28 }
 0x8f3   : > { %v8778_v36 = vpop.eup %8777 }
 0x8f4   : > { %v2932_v24 = vpop.permute.xlu1 %2931  ;;  %v3358_v32 = vpop.xlane.xlu0 %3357  ;;  %v3363_v33 = vmul.f32 %v8778_v36, %v8770_v60  ;;  %v7418_v60 = vld [vmem:[%s10272_s2] ss:$0 sm:$0xff] }
 0x8f5   : > { %v3001_v1 = vadd.f32 %v9356_v4, %v2932_v24  ;;  %v3006_v0 = vadd.f32 %v9354_v23, %v2932_v24  ;;  %8783 = vrcp.f32 %v3358_v32  ;;  %v3011_v25 = vadd.f32 %v9360_v9, %v2932_v24  ;;  %3787 = vrot.lane.b32.xlu1 %v7418_v60, %s8833_s20 }
 0x8f6   : > { %v3016_v10 = vadd.f32 %v9358_v5, %v2932_v24 }
 0x8f7   : > { %v8780_v34 = vpop.eup %8779  ;;  %8280 = vmatpush3.msra.mxu1 %v3001_v1  ;;  %8285 = vmatpush3.msra.mxu0 %v3006_v0 }
 0x8f8   : > { %v3364_v6 = vmul.f32 %v8780_v34, %v8772_v63  ;;  %8282 = vmatmul.mubr.msk.f32.vlgmr.msra.gmra.mrb[40].mxu1 %vm858_vm2, %v3363_v33  ;;  %8289 = vmatprep.subr.mxu1 %v8829_v22  ;;  %v8586_v11 = vpop.permute.xlu1 %8585  ;;  %v8581_v38 = vpop.permute.xlu0 %8580 }
 0x8f9   : > { %8290 = vmatpush3.msra.mxu1 %v3011_v25  ;;  %8294 = vmatprep.subr.mxu0 %v8829_v22  ;;  %v8588_v13 = vunpack.i.h.bf16 %v8586_v11  ;;  %v8587_v19 = vunpack.i.l.bf16 %v8586_v11  ;;  %v8583_v39 = vunpack.i.h.bf16 %v8581_v38  ;;  %v8582_v40 = vunpack.i.l.bf16 %v8581_v38 }
 0x8fa   : > { %8287 = vmatmul.mubr.msk.f32.vlgmr.msra.gmra.mrb[40].mxu0 %vm858_vm2, %v3364_v6  ;;  %8291 = vmatprep.mubr.msk.f32.mxu1 %vm8830_vm1, %v8829_v22 }
 0x8fb   : > { %v8782_v23 = vpop.eup %8781  ;;  %8295 = vmatpush3.msra.mxu0 %v3016_v10  ;;  %8296 = vmatprep.mubr.msk.f32.mxu0 %vm8830_vm1, %v8829_v22  ;;  %v8469_v41 = vpack.c.bf16 %v8588_v13, %v8587_v19  ;;  %v8477_v45 = vpack.c.bf16 %v8583_v39, %v8582_v40 }
 0x8fc   : > { %v3365_v4 = vmul.f32 %v8782_v23, %v8774_v7  ;;  %8299 = vmatprep.subr.mxu0 %v3659_v20  ;;  %v8591_v44 = vpop.permute.xlu1 %8590  ;;  %v8601_v27 = vpop.permute.xlu0 %8600 }
 0x8fd   : > { %8470 = vmatprep.subr.bf16.mxu1 %v8469_v41  ;;  %v8593_v61 = vunpack.i.h.bf16 %v8591_v44  ;;  %v8592_v62 = vunpack.i.l.bf16 %v8591_v44  ;;  %v8603_v16 = vunpack.i.h.bf16 %v8601_v27  ;;  %v8602_v29 = vunpack.i.l.bf16 %v8601_v27 }
 0x8fe   : > { %8292 = vmatmul.mubr.msk.f32.vlgmr.msra.gmra.mrb[42].mxu1 %vm858_vm2, %v3365_v4 }
 0x8ff   : > { %8315 = vmatprep.mubr.msk.f32.mxu1 %vm568_vm0, %v9274_v43  ;;  %v8784_v5 = vpop.eup %8783  ;;  %8472 = vmatpush3.bf16.msra.mxu1 %v8469_v41  ;;  %v8481_v7 = vpack.c.bf16 %v8593_v61, %v8592_v62  ;;  %v8485_v2 = vpack.c.bf16 %v8603_v16, %v8602_v29 }
 0x900   : > { %v3366_v9 = vmul.f32 %v8784_v5, %v8776_v12  ;;  %v8596_v48 = vpop.permute.xlu1 %8595  ;;  %v3902_v36 = vpop.permute.xlu0 %3901 }
 0x901   : > { %v8598_v49 = vunpack.i.h.bf16 %v8596_v48  ;;  %v8597_v50 = vunpack.i.l.bf16 %v8596_v48 }
 0x902   : > { %8297 = vmatmul.mubr.msk.f32.vlgmr.msra.gmra.mrb[42].mxu0 %vm858_vm2, %v3366_v9 }
 0x903   : > { %8300 = vmatpush3.msra.mxu0 %v3659_v20  ;;  %v8473_v51 = vpack.c.bf16 %v8598_v49, %v8597_v50 }
 0x904   : > { %8478 = vmatprep.subr.bf16.mxu0 %v8477_v45  ;;  %v8606_v17 = vpop.permute.xlu1 %8605 }
 0x905   : > { %8474 = vmatprep.subr.bf16.mxu1 %v8473_v51  ;;  %v8608_v30 = vunpack.i.h.bf16 %v8606_v17  ;;  %v8607_v31 = vunpack.i.l.bf16 %v8606_v17 }
 0x906   : > { %8476 = vmatpush3.bf16.msra.mxu1 %v8473_v51 }
 0x907   : > { %v8489_v21 = vpack.c.bf16 %v8608_v30, %v8607_v31  ;;  %8486 = vmatprep.subr.bf16.mxu1 %v8485_v2  ;;  %v7428_v30 = vld [vmem:[%s10276_s6] ss:$0 sm:$0xff] }
 0x909   : > { %8316 = vmatmul.mubr.msk.f32.vlgmr.msra.gmra.mrb[44].mxu1 %vm568_vm0, %v9280_v46 }
 0x90a   : > { %8318 = vmatprep.mubr.msk.f32.mxu1 %vm568_vm0, %v9285_v54  ;;  %8488 = vmatpush3.bf16.msra.mxu1 %v8485_v2 }
 0x90b   : > { %8490 = vmatprep.subr.bf16.mxu1 %v8489_v21 }
 0x90d   : > { %8319 = vmatmul.mubr.msk.f32.gmra.mrb[46].mxu1 %vm568_vm0, %v9290_v55 }
 0x90e   : > { %8343 = vmatprep.mubr.msk.f32.mxu1 %vm568_vm0, %v9274_v43  ;;  %8492 = vmatpush3.bf16.msra.mxu1 %v8489_v21 }
 0x90f   : > { %8354 = vmatprep.subr.mxu1 %v8829_v22 }
 0x911   : > { %8344 = vmatmul.mubr.msk.f32.vlgmr.msra.gmra.mrb[48].mxu1 %vm568_vm0, %v9280_v46 }
 0x912   : > { %8346 = vmatprep.mubr.msk.f32.mxu1 %vm568_vm0, %v9285_v54 }
 0x915   : > { %8347 = vmatmul.mubr.msk.f32.gmra.mrb[50].mxu1 %vm568_vm0, %v9290_v55 }
 0x916   : > { %8356 = vmatprep.mubr.msk.f32.mxu1 %vm8830_vm1, %v8829_v22 }
 0x967   : > { %v3788_v24 = vpop.permute.xlu1 %3787 }
 0x9cb   : > { %v3436_v63 = vpop.f32.mrb[40].mxu1 }
 0x9cc   : > { %v8283_v3 = vpop.f32.mrb[41].mxu1  ;;  %8301 = vmatprep.mubr.msk.f32.mxu0 %vm858_vm2, %v3436_v63 }
 0x9cd   : > { %v3509_v8 = vpop.f32.mrb[40].mxu0 }
 0x9ce   : > { %v8288_v12 = vpop.f32.mrb[41].mxu0  ;;  %8302 = vmatmul.mubr.msk.f32.vlgmr.msra.gmra.mrb[28].mxu0 %vm858_vm2, %v3509_v8 }
 0x9cf   : > { %8480 = vmatpush3.bf16.msra.mxu0 %v8477_v45 }
 0x9d0   : > { %8482 = vmatprep.subr.bf16.mxu0 %v8481_v7 }
 0x9d1   : > { %v3582_v14 = vpop.f32.mrb[42].mxu1 }
 0x9d2   : > { %v8293_v26 = vpop.f32.mrb[43].mxu1  ;;  %8304 = vmatprep.mubr.msk.f32.mxu0 %vm858_vm2, %v3582_v14 }
 0x9d3   : > { %8484 = vmatpush3.bf16.msra.mxu0 %v8481_v7 }
 0x9d4   : > { %8349 = vmatprep.subr.mxu0 %v8829_v22 }
 0x9d5   : > { %v3655_v42 = vpop.f32.mrb[42].mxu0 }
 0x9d6   : > { %v8298_v35 = vpop.f32.mrb[43].mxu0  ;;  %8305 = vmatmul.mubr.msk.f32.gmra.mrb[30].mxu0 %vm858_vm2, %v3655_v42 }
 0x9d7   : > { %8329 = vmatprep.mubr.msk.f32.mxu0 %vm568_vm0, %v9274_v43 }
 0x9da   : > { %8330 = vmatmul.mubr.msk.f32.vlgmr.msra.gmra.mrb[44].mxu0 %vm568_vm0, %v9280_v46 }
 0x9db   : > { %8332 = vmatprep.mubr.msk.f32.mxu0 %vm568_vm0, %v9285_v54 }
 0x9dc   : > { %v8317_v37 = vpop.f32.mrb[44].mxu1 }
 0x9dd   : > { %v3856_v15 = vpop.f32.mrb[45].mxu1  ;;  %v3862_v34 = vadd.f32 %v8317_v37, %v3788_v24 }
 0x9de   : > { %8333 = vmatmul.mubr.msk.f32.gmra.mrb[46].mxu0 %vm568_vm0, %v9290_v55  ;;  %v3857_v25 = vadd.f32 %v3856_v15, %v3788_v24 }
 0x9df   : > { %8351 = vmatprep.mubr.msk.f32.mxu0 %vm8830_vm1, %v8829_v22 }
 0x9e0   : > { %v8320_v18 = vpop.f32.mrb[46].mxu1 }
 0x9e1   : > { %v3866_v28 = vpop.f32.mrb[47].mxu1  ;;  %v3872_v11 = vadd.f32 %v8320_v18, %v3788_v24 }
 0x9e2   : > { %v3867_v13 = vadd.f32 %v3866_v28, %v3788_v24 }
 0x9e4   : > { %v9478_v5 = vpop.f32.mrb[48].mxu1 }
 0x9e5   : > { %v9482_v9 = vpop.f32.mrb[49].mxu1 }
 0x9e8   : > { %v9491_v19 = vpop.f32.mrb[50].mxu1 }
 0x9e9   : > { %v9495_v20 = vpop.f32.mrb[51].mxu1 }
 0xaad   : > { %v8331_v32 = vpop.f32.mrb[44].mxu0 }
 0xaae   : > { %v3976_v1 = vadd.f32 %v8331_v32, %v3902_v36  ;;  %v3970_v0 = vpop.f32.mrb[45].mxu0 }
 0xaaf   : > { %v3971_v33 = vadd.f32 %v3970_v0, %v3902_v36 }
 0xab0   : > { %8355 = vmatpush3.xpose.msk.msra.mxu1 %vm858_vm2, %v3976_v1 }
 0xab1   : > { %v8334_v6 = vpop.f32.mrb[46].mxu0  ;;  %8350 = vmatpush3.xpose.msk.msra.mxu0 %vm858_vm2, %v3971_v33  ;;  %8364 = vmatprep.subr.mxu1 %v8829_v22 }
 0xab2   : > { %v3986_v10 = vadd.f32 %v8334_v6, %v3902_v36  ;;  %v3980_v23 = vpop.f32.mrb[47].mxu0  ;;  %8359 = vmatprep.subr.mxu0 %v8829_v22 }
 0xab3   : > { %v3981_v4 = vadd.f32 %v3980_v23, %v3902_v36  ;;  %8357 = vmatmul.mubr.msk.f32.vlgmr.msra.gmra.mrb[52].mxu1 %vm858_vm2, %v3862_v34 }
 0xab4   : > { %8352 = vmatmul.mubr.msk.f32.vlgmr.msra.gmra.mrb[48].mxu0 %vm858_vm2, %v3857_v25  ;;  %8365 = vmatpush3.xpose.msk.msra.mxu1 %vm858_vm2, %v3986_v10  ;;  %v4743_v10 = vld [vmem:[%s10277_s7 + $0x18] sm:$0xff] }
 0xab5   : > { %8360 = vmatpush3.xpose.msk.msra.mxu0 %vm858_vm2, %v3981_v4  ;;  %8366 = vmatprep.mubr.msk.f32.mxu1 %vm8830_vm1, %v8829_v22 }
 0xab6   : > { %8361 = vmatprep.mubr.msk.f32.mxu0 %vm8830_vm1, %v8829_v22  ;;  %8369 = vmatprep.subr.mxu0 %v8829_v22 }
 0xab7   : > { %8367 = vmatmul.mubr.msk.f32.vlgmr.msra.gmra.mrb[54].mxu1 %vm858_vm2, %v3872_v11  ;;  %8374 = vmatprep.subr.mxu1 %v8829_v22 }
 0xab8   : > { %8362 = vmatmul.mubr.msk.f32.vlgmr.msra.gmra.mrb[50].mxu0 %vm858_vm2, %v3867_v13  ;;  %8376 = vmatprep.mubr.msk.f32.mxu1 %vm8830_vm1, %v8829_v22 }
 0xab9   : > { %8371 = vmatprep.mubr.msk.f32.mxu0 %vm8830_vm1, %v8829_v22 }
 0xb86   : > { %v4251_v38 = vpop.f32.mrb[52].mxu1 }
 0xb87   : > { %v4175_v39 = vpop.f32.mrb[48].mxu0  ;;  %v4410_v40 = vsel %vm858_vm2, %v4251_v38, -inf  ;;  %v8358_v41 = vpop.f32.mrb[53].mxu1 }
 0xb88   : > { %4411 = vmax.xlane.f32.xlu1 %v4410_v40  ;;  %v4407_v44 = vsel %vm858_vm2, %v4175_v39, -inf  ;;  %v8353_v45 = vpop.f32.mrb[49].mxu0 }
 0xb89   : > { %4408 = vmax.xlane.f32.xlu0 %v4407_v44 }
 0xb8a   : > { %v4403_v48 = vpop.f32.mrb[54].mxu1 }
 0xb8b   : > { %v4327_v49 = vpop.f32.mrb[50].mxu0  ;;  %v8368_v50 = vpop.f32.mrb[55].mxu1  ;;  %v4416_v53 = vsel %vm858_vm2, %v4403_v48, -inf }
 0xb8c   : > { %v8363_v51 = vpop.f32.mrb[51].mxu0  ;;  %v4413_v52 = vsel %vm858_vm2, %v4327_v49, -inf }
 0xb8d   : > { %4414 = vmax.xlane.f32.xlu0 %v4413_v52 }
 0xb91   : > { %4417 = vmax.xlane.f32.xlu0 %v4416_v53 }
 0xc15   : > { %v4412_v56 = vpop.xlane.xlu1 %4411 }
 0xc16   : > { %v4420_v57 = vsub.f32 %v4251_v38, %v4412_v56  ;;  %v4409_v58 = vpop.xlane.xlu0 %4408 }
 0xc17   : > { %v4419_v59 = vsub.f32 %v4175_v39, %v4409_v58 }
 0xc18   : > { %v4425_v47 = vmul.f32 1.442695, %v4420_v57 }
 0xc19   : > { %v4423_v60 = vmul.f32 1.442695, %v4419_v59 }
 0xc1a   : > { %8785 = vpow2.f32 %v4425_v47  ;;  %v4415_v61 = vpop.xlane.xlu0 %4414 }
 0xc1b   : > { %8787 = vpow2.f32 %v4423_v60  ;;  %v4421_v62 = vsub.f32 %v4327_v49, %v4415_v61 }
 0xc1d   : > { %v4427_v63 = vmul.f32 1.442695, %v4421_v62 }
 0xc1e   : > { %v4418_v3 = vpop.xlane.xlu0 %4417 }
 0xc1f   : > { %8789 = vpow2.f32 %v4427_v63  ;;  %v4422_v7 = vsub.f32 %v4403_v48, %v4418_v3 }
 0xc21   : > { %v4429_v8 = vmul.f32 1.442695, %v4422_v7 }
 0xc23   : > { %8791 = vpow2.f32 %v4429_v8 }
 0xc24   : > { %v8786_v12 = vpop.eup %8785 }
 0xc25   : > { %v8788_v14 = vpop.eup %8787  ;;  %v4434_v26 = vsel %vm858_vm2, %v8786_v12, 0.0 }
 0xc26   : > { %4435 = vadd.xlane.f32.xlu1 %v4434_v26  ;;  %v4431_v27 = vsel %vm858_vm2, %v8788_v14, 0.0 }
 0xc27   : > { %4432 = vadd.xlane.f32.xlu0 %v4431_v27 }
 0xc29   : > { %v8790_v16 = vpop.eup %8789 }
 0xc2a   : > { %v4437_v29 = vsel %vm858_vm2, %v8790_v16, 0.0 }
 0xc2b   : > { %4438 = vadd.xlane.f32.xlu0 %v4437_v29 }
 0xc2d   : > { %v8792_v17 = vpop.eup %8791 }
 0xc2e   : > { %v4440_v42 = vsel %vm858_vm2, %v8792_v17, 0.0 }
 0xc2f   : > { %4441 = vadd.xlane.f32.xlu1 %v4440_v42 }
 0xc41   : > { %4015 = vrot.lane.b32.xlu0 %v7428_v30, %s8833_s20  ;;  %v4937_v30 = vld [vmem:[%s10281_s11] sm:$0xff]  ;;  %s550_s20 = scalar_lea.vmem %s10287_s17, %s10294_s30 }
 0xcb3   : > { %v4436_v31 = vpop.xlane.xlu1 %4435 }
 0xcb4   : > { %8793 = vrcp.f32 %v4436_v31  ;;  %v4433_v35 = vpop.xlane.xlu0 %4432  ;;  %v4939_v31 = vld [vmem:[%s10281_s11 + $0x40] sm:$0xff] }
 0xcb5   : > { %8795 = vrcp.f32 %v4433_v35  ;;  %v4938_v35 = vld [vmem:[%s10281_s11 + $0x8] sm:$0xff] }
 0xcb8   : > { %v4439_v2 = vpop.xlane.xlu0 %4438 }
 0xcb9   : > { %8797 = vrcp.f32 %v4439_v2  ;;  %v7453_v2 = vcombine.high %v4937_v30, %v4939_v31 }
 0xcbc   : > { %v4442_v21 = vpop.xlane.xlu1 %4441  ;;  %v4016_v37 = vpop.permute.xlu0 %4015 }
 0xcbd   : > { %8799 = vrcp.f32 %v4442_v21  ;;  %v4085_v15 = vadd.f32 %v9482_v9, %v4016_v37  ;;  %v4090_v18 = vadd.f32 %v9478_v5, %v4016_v37  ;;  %v4100_v1 = vadd.f32 %v9491_v19, %v4016_v37  ;;  %v4940_v21 = vld [vmem:[%s10281_s11 + $0x48] sm:$0xff] }
 0xcbe   : > { %v8794_v28 = vpop.eup %8793  ;;  %v4095_v0 = vadd.f32 %v9495_v20, %v4016_v37  ;;  %v7449_v20 = vld [vmem:[%s10278_s8] ss:$0 sm:$0xff]  ;;  %v7452_v37 = vcombine.low %v4937_v30, %v4939_v31 }
 0xcbf   : > { %v8796_v36 = vpop.eup %8795  ;;  %v4448_v24 = vmul.f32 %v8794_v28, %v8786_v12  ;;  %8370 = vmatpush3.msra.mxu0 %v4085_v15  ;;  %8375 = vmatpush3.msra.mxu1 %v4090_v18  ;;  %v7454_v15 = vcombine.low %v4938_v35, %v4940_v21  ;;  %v7455_v18 = vcombine.high %v4938_v35, %v4940_v21  ;;  %v4941_v28 = vld [vmem:[%s10281_s11 + $0x80] sm:$0xff] }
 0xcc0   : > { %v4447_v32 = vmul.f32 %v8796_v36, %v8788_v14  ;;  %8384 = vmatprep.subr.mxu1 %v8829_v22  ;;  %8379 = vmatprep.subr.mxu0 %v8829_v22  ;;  %v4943_v36 = vld [vmem:[%s10281_s11 + $0xc0] sm:$0xff] }
 0xcc1   : > { %8377 = vmatmul.mubr.msk.f32.vlgmr.msra.gmra.mrb[56].mxu1 %vm858_vm2, %v4448_v24  ;;  %v4942_v24 = vld [vmem:[%s10281_s11 + $0x88] sm:$0xff]  ;;  %v8610_v30 = vld [vmem:[%s10283_s13 + $0x1c0] sm:$0xff]  }
 0xcc2   : > { %8385 = vmatpush3.msra.mxu1 %v4100_v1  ;;  %8372 = vmatmul.mubr.msk.f32.vlgmr.msra.gmra.mrb[52].mxu0 %vm858_vm2, %v4447_v32  ;;  %v7457_v32 = vcombine.high %v4941_v28, %v4943_v36  ;;  %v4944_v1 = vld [vmem:[%s10281_s11 + $0xc8] sm:$0xff]  ;;  %v8612_v21 = vld [vmem:[%s10283_s13 + $0x180] sm:$0xff]  }
 0xcc3   : > { %v8798_v33 = vpop.eup %8797  ;;  %8380 = vmatpush3.msra.mxu0 %v4095_v0  ;;  %8381 = vmatprep.mubr.msk.f32.mxu0 %vm8830_vm1, %v8829_v22  ;;  %v7456_v0 = vcombine.low %v4941_v28, %v4943_v36  ;;  %v8616_v28 = vld [vmem:[%s10283_s13 + $0x188] sm:$0xff]   ;;  %v8617_v36 = vld [vmem:[%s10283_s13 + $0x150] sm:$0xff]  }
 0xcc4   : > { %v4449_v34 = vmul.f32 %v8798_v33, %v8790_v16  ;;  %8386 = vmatprep.mubr.msk.f32.mxu1 %vm8830_vm1, %v8829_v22  ;;  %8389 = vmatprep.subr.mxu0 %v4743_v10  ;;  %v7458_v33 = vcombine.low %v4942_v24, %v4944_v1 }
 0xcc5   : > { %5013 = vmatprep.subr.bf16.mxu1 %v7453_v2  ;;  %v8611_v2 = vld [vmem:[%s10283_s13 + $0x100] sm:$0xff]  }
 0xcc6   : > { %8382 = vmatmul.mubr.msk.f32.vlgmr.msra.gmra.mrb[54].mxu0 %vm858_vm2, %v4449_v34  ;;  %v7459_v34 = vcombine.high %v4942_v24, %v4944_v1  ;;  %v8618_v24 = vld [vmem:[%s10283_s13 + $0x1d0] sm:$0xff]  }
 0xcc7   : > { %v8800_v25 = vpop.eup %8799  ;;  %8390 = vmatpush3.msra.mxu0 %v4743_v10  ;;  %v5209_v10 = vld [vmem:[%s10281_s11 + $0x50] sm:$0xff] }
 0xcc8   : > { %v4450_v6 = vmul.f32 %v8800_v25, %v8792_v17  ;;  %5066 = vmatprep.subr.bf16.mxu0 %v7455_v18  ;;  %v8834_v25 = vmov 0   ;;  %v8615_v18 = vld [vmem:[%s10283_s13 + $0x108] sm:$0xff]   ;;  %v8620_v1 = vld [vmem:[%s10283_s13 + $0x190] sm:$0xff]  }
 0xcca   : > { %8387 = vmatmul.mubr.msk.f32.vlgmr.msra.gmra.mrb[58].mxu1 %vm858_vm2, %v4450_v6  ;;  %v5207_v6 = vld [vmem:[%s10281_s11 + $0x10] sm:$0xff] }
 0xccb   : > { %5014 = vmatpush1.bf16.msra.mxu1 %v7452_v37  ;;  %5045 = vmatprep.mubr.bf16.mxu1 %v8834_v25  ;;  %v8613_v37 = vld [vmem:[%s10283_s13 + $0x148] sm:$0xff]  }
 0xccc   : > { %5015 = vmatprep.subr.bf16.mxu1 %v7457_v32  ;;  %v8619_v32 = vld [vmem:[%s10283_s13 + $0x110] sm:$0xff]  }
 0xccf   : > { %5016 = vmatpush1.bf16.msra.mxu1 %v7456_v0  ;;  %v8621_v0 = vld [vmem:[%s10283_s13 + $0x158] sm:$0xff]  }
 0xd94   : > { %v4593_v23 = vpop.f32.mrb[56].mxu1 }
 0xd95   : > { %v4520_v4 = vpop.f32.mrb[52].mxu0  ;;  %v8378_v5 = vpop.f32.mrb[57].mxu1 }
 0xd96   : > { %v8373_v9 = vpop.f32.mrb[53].mxu0  ;;  %8391 = vmatprep.mubr.msk.f32.mxu0 %vm858_vm2, %v4520_v4  ;;  %v7464_v4 = vcombine.low %v5207_v6, %v5209_v10  ;;  %v7465_v5 = vcombine.high %v5207_v6, %v5209_v10  ;;  %v8624_v6 = vld [vmem:[%s10283_s13 + $0x198] sm:$0xff]   ;;  %v8625_v10 = vld [vmem:[%s10283_s13 + $0x160] sm:$0xff]  }
 0xd97   : > { %8392 = vmatmul.mubr.msk.f32.vlgmr.msra.gmra.mrb[28].mxu0 %vm858_vm2, %v4593_v23  ;;  %v5208_v23 = vld [vmem:[%s10281_s11 + $0x18] sm:$0xff] }
 0xd98   : > { %5067 = vmatpush1.bf16.msra.mxu0 %v7454_v15  ;;  %v5210_v9 = vld [vmem:[%s10281_s11 + $0x58] sm:$0xff]  ;;  %5277 = vmatprep.subr.bf16.mxu1 %v7465_v5  ;;  %v8614_v15 = vld [vmem:[%s10283_s13 + $0x1c8] sm:$0xff]   ;;  %v8628_v5 = vld [vmem:[%s10283_s13 + $0x1a0] sm:$0xff]  }
 0xd99   : > { %v4666_v22 = vpop.f32.mrb[54].mxu0  ;;  %5068 = vmatprep.subr.bf16.mxu0 %v7459_v34  ;;  %v8623_v34 = vld [vmem:[%s10283_s13 + $0x118] sm:$0xff]  }
 0xd9a   : > { %v8383_v11 = vpop.f32.mrb[55].mxu0  ;;  %8394 = vmatprep.mubr.msk.f32.mxu0 %vm858_vm2, %v4666_v22  ;;  %v7466_v22 = vcombine.low %v5208_v23, %v5210_v9 }
 0xd9b   : > { %v7467_v11 = vcombine.high %v5208_v23, %v5210_v9  ;;  %v8626_v23 = vld [vmem:[%s10283_s13 + $0x1e0] sm:$0xff]   ;;  %v8629_v9 = vld [vmem:[%s10283_s13 + $0x168] sm:$0xff]  }
 0xd9c   : > { %5069 = vmatpush1.bf16.msra.mxu0 %v7458_v33  ;;  %v8622_v33 = vld [vmem:[%s10283_s13 + $0x1d8] sm:$0xff]  }
 0xd9d   : > { %v4739_v13 = vpop.f32.mrb[58].mxu1  ;;  %5330 = vmatprep.subr.bf16.mxu0 %v7467_v11  ;;  %v8631_v11 = vld [vmem:[%s10283_s13 + $0x128] sm:$0xff]  }
 0xd9e   : > { %v8388_v19 = vpop.f32.mrb[59].mxu1  ;;  %8395 = vmatmul.mubr.msk.f32.gmra.mrb[30].mxu0 %vm858_vm2, %v4739_v13 }
 0xd9f   : > { %5098 = vmatprep.mubr.bf16.mxu0 %v8834_v25 }
 0xe6a   : > { %v8393_v38 = vpop.f32.mrb[28].mxu0 }
 0xe6b   : > { %v4853_v39 = vadd.f32 %v8393_v38, %v7449_v20  ;;  %v4822_v40 = vpop.f32.mrb[29].mxu0 }
 0xe6c   : > { %v4852_v41 = vadd.f32 %v7449_v20, %v4822_v40 }
 0xe6d   : > { %v4857_v44 = vadd.f32 %v9280_v46, %v4853_v39 }
 0xe6e   : > { %v4856_v48 = vadd.f32 %v9274_v43, %v4852_v41 }
 0xe6f   : > { %v4865_v45 = vsel %vm568_vm0, %v4857_v44, 0.0 }
 0xe70   : > { %4866 = vadd.xlane.f32.xlu1 %v4865_v45  ;;  %v4862_v53 = vsel %vm568_vm0, %v4856_v48, 0.0 }
 0xe71   : > { %v8396_v49 = vpop.f32.mrb[30].mxu0 }
 0xe72   : > { %v4832_v50 = vpop.f32.mrb[31].mxu0  ;;  %v4855_v51 = vadd.f32 %v8396_v49, %v7449_v20 }
 0xe73   : > { %v4854_v52 = vadd.f32 %v7449_v20, %v4832_v50 }
 0xe74   : > { %4863 = vadd.xlane.f32.xlu1 %v4862_v53  ;;  %v4859_v58 = vadd.f32 %v9290_v55, %v4855_v51  ;;  %v7450_v53 = vld [vmem:[%s10279_s9] ss:$0 sm:$0xff] }
 0xe75   : > { %v4858_v56 = vadd.f32 %v9285_v54, %v4854_v52 }
 0xe76   : > { %v4871_v46 = vsel %vm568_vm0, %v4859_v58, 0.0 }
 0xe77   : > { %v4868_v57 = vsel %vm568_vm0, %v4858_v56, 0.0 }
 0xe78   : > { %4869 = vadd.xlane.f32.xlu1 %v4868_v57 }
 0xe7c   : > { %4872 = vadd.xlane.f32.xlu1 %v4871_v46 }
 0xefd   : > { %v4867_v59 = vpop.xlane.xlu1 %4866 }
 0xefe   : > { %v4876_v43 = vmul.f32 0.03125, %v4867_v59  ;;  %v7451_v59 = vld [vmem:[%s10280_s10] ss:$0 sm:$0xff] }
 0xf00   : > { %v9545_v61 = vsub.f32 %v4857_v44, %v4876_v43 }
 0xf01   : > { %v4864_v47 = vpop.xlane.xlu1 %4863 }
 0xf02   : > { %v4875_v60 = vmul.f32 0.03125, %v4864_v47  ;;  %v4884_v8 = vmul.f32 %v9545_v61, %v9545_v61 }
 0xf04   : > { %v9547_v62 = vsub.f32 %v4856_v48, %v4875_v60  ;;  %v4890_v16 = vsel %vm568_vm0, %v4884_v8, 0.0  ;;  %v5214_v8 = vld [vmem:[%s10281_s11 + $0xd8] sm:$0xff] }
 0xf05   : > { %v4870_v63 = vpop.xlane.xlu1 %4869 }
 0xf06   : > { %v4877_v3 = vmul.f32 0.03125, %v4870_v63  ;;  %v4883_v54 = vmul.f32 %v9547_v62, %v9547_v62 }
 0xf08   : > { %v9551_v7 = vsub.f32 %v4858_v56, %v4877_v3  ;;  %v4887_v55 = vsel %vm568_vm0, %v4883_v54, 0.0 }
 0xf09   : > { %4888 = vadd.xlane.f32.xlu1 %v4887_v55  ;;  %v4873_v12 = vpop.xlane.xlu1 %4872  ;;  %v5212_v55 = vld [vmem:[%s10281_s11 + $0x98] sm:$0xff] }
 0xf0a   : > { %v4878_v14 = vmul.f32 0.03125, %v4873_v12  ;;  %v4885_v26 = vmul.f32 %v9551_v7, %v9551_v7 }
 0xf0c   : > { %v9558_v27 = vsub.f32 %v4859_v58, %v4878_v14  ;;  %v4893_v29 = vsel %vm568_vm0, %v4885_v26, 0.0  ;;  %v7471_v26 = vcombine.high %v5212_v55, %v5214_v8 }
 0xf0d   : > { %4891 = vadd.xlane.f32.xlu1 %v4890_v16  ;;  %4894 = vadd.xlane.f32.xlu0 %v4893_v29  ;;  %v7470_v29 = vcombine.low %v5212_v55, %v5214_v8 }
 0xf0e   : > { %v4886_v17 = vmul.f32 %v9558_v27, %v9558_v27 }
 0xf10   : > { %v4896_v42 = vsel %vm568_vm0, %v4886_v17, 0.0 }
 0xf11   : > { %4897 = vadd.xlane.f32.xlu1 %v4896_v42  ;;  %v8609_v42 = vld [vmem:[%s10283_s13 + $0x140] sm:$0xff]  }
 0xf96   : > { %v4889_v13 = vpop.xlane.xlu1 %4888 }
 0xf97   : > { %v4899_v19 = vmul.f32 0.03125, %v4889_v13  ;;  %v8632_v13 = vld [vmem:[%s10283_s13 + $0x1a8] sm:$0xff]  }
 0xf99   : > { %v4903_v20 = vadd.f32 1e-05, %v4899_v19  ;;  %v8633_v19 = vld [vmem:[%s10283_s13 + $0x170] sm:$0xff]  }
 0xf9a   : > { %v4895_v38 = vpop.xlane.xlu0 %4894  ;;  %v4892_v39 = vpop.xlane.xlu1 %4891 }
 0xf9b   : > { %8801 = vrsqrt.f32 %v4903_v20  ;;  %v4901_v40 = vmul.f32 0.03125, %v4895_v38  ;;  %v4900_v41 = vmul.f32 0.03125, %v4892_v39  ;;  %v8634_v20 = vld [vmem:[%s10283_s13 + $0x1f0] sm:$0xff]  }
 0xf9c   : > { %v8635_v38 = vld [vmem:[%s10283_s13 + $0x130] sm:$0xff]  }
 0xf9d   : > { %v4904_v44 = vadd.f32 1e-05, %v4900_v41  ;;  %v4905_v45 = vadd.f32 1e-05, %v4901_v40  ;;  %v8636_v39 = vld [vmem:[%s10283_s13 + $0x1b0] sm:$0xff]   ;;  %v8637_v40 = vld [vmem:[%s10283_s13 + $0x178] sm:$0xff]  }
 0xf9e   : > { %v4898_v48 = vpop.xlane.xlu1 %4897  ;;  %v8638_v41 = vld [vmem:[%s10283_s13 + $0x1f8] sm:$0xff]  }
 0xf9f   : > { %v4902_v49 = vmul.f32 0.03125, %v4898_v48  ;;  %8803 = vrsqrt.f32 %v4904_v44  ;;  %v8639_v44 = vld [vmem:[%s10283_s13 + $0x138] sm:$0xff]   ;;  %v8641_v48 = vld [vmem:[%s10283_s13 + $0x40] sm:$0xff]  }
 0xfa0   : > { %8805 = vrsqrt.f32 %v4905_v45  ;;  %v8640_v45 = vld [vmem:[%s10283_s13 + $0x1b8] sm:$0xff]  }
 0xfa1   : > { %v4906_v50 = vadd.f32 1e-05, %v4902_v49  ;;  %v8642_v49 = vld [vmem:[%s10283_s13 + $0xc0] sm:$0xff]  }
 0xfa3   : > { %8807 = vrsqrt.f32 %v4906_v50  ;;  %v4947_v50 = vlaneseq }
 0xfa5   : > { %v8802_v51 = vpop.eup %8801 }
 0xfa6   : > { %v4911_v52 = vmul.f32 %v8802_v51, %v9547_v62  ;;  %v5211_v62 = vld [vmem:[%s10281_s11 + $0x90] sm:$0xff]  ;;  %v4948_v51 = vshrl.u32 %v4947_v50, 7 }
 0xfa8   : > { %v4921_v57 = vmul.f32 %v7450_v53, %v4911_v52  ;;  %v9765_v52 = vsub.s32 0, %v4948_v51 }
 0xfa9   : > { %v8804_v56 = vpop.eup %8803 }
 0xfaa   : > { %v4912_v58 = vmul.f32 %v8804_v56, %v9545_v61  ;;  %v8806_v46 = vpop.eup %8805  ;;  %v9615_v63 = vadd.f32 %v7451_v59, %v4921_v57  ;;  %v5213_v61 = vld [vmem:[%s10281_s11 + $0xd0] sm:$0xff]  ;;  %v4945_v56 = vld [vmem:[%s10282_s12] sm:$0xf]  ;;  %v9772_v57 = vsub.s32 1, %v4948_v51 }
 0xfab   : > { %v4913_v3 = vmul.f32 %v8806_v46, %v9551_v7  ;;  %v7469_v7 = vcombine.high %v5211_v62, %v5213_v61  ;;  %v7468_v16 = vcombine.low %v5211_v62, %v5213_v61  ;;  %v4950_v46 = vrot.slane %v4945_v56, %v9765_v52 }
 0xfac   : > { %v4922_v47 = vmul.f32 %v7450_v53, %v4912_v58  ;;  %v9774_v58 = vsub.s32 3, %v4948_v51 }
 0xfad   : > { %v8808_v43 = vpop.eup %8807 }
 0xfae   : > { %v4914_v60 = vmul.f32 %v8808_v43, %v9558_v27  ;;  %v9618_v54 = vadd.f32 %v7451_v59, %v4922_v47  ;;  %v4923_v27 = vmul.f32 %v7450_v53, %v4913_v3  ;;  %v4954_v43 = vrot.slane %v4945_v56, %v9772_v57 }
 0xfaf   : > { %v4962_v47 = vrot.slane %v4945_v56, %v9774_v58 }
 0xfb0   : > { %v9631_v12 = vpack.c.bf16 %v9618_v54, %v9615_v63  ;;  %v4924_v14 = vmul.f32 %v7450_v53, %v4914_v60  ;;  %v9647_v31 = vadd.f32 %v7451_v59, %v4923_v27  ;;  %v9767_v53 = vsub.s32 2, %v4948_v51 }
 0xfb2   : > { %7460 = vmatmul.mubr.msk.bf16.vlgmr.msra.gmra.mrb[60].mxu1 %vm568_vm0, %v9631_v12  ;;  %7462 = vmatmul.mubr.msk.bf16.vlgmr.msra.gmra.mrb[56].mxu0 %vm568_vm0, %v9631_v12  ;;  %v9637_v17 = vadd.f32 %v7451_v59, %v4924_v14  ;;  %v4958_v59 = vrot.slane %v4945_v56, %v9767_v53 }
 0xfb3   : > { %5278 = vmatpush1.bf16.msra.mxu1 %v7464_v4  ;;  %5331 = vmatpush1.bf16.msra.mxu0 %v7466_v22  ;;  %v8627_v4 = vld [vmem:[%s10283_s13 + $0x120] sm:$0xff]   ;;  %v8630_v22 = vld [vmem:[%s10283_s13 + $0x1e8] sm:$0xff]  }
 0xfb4   : > { %5055 = vmatprep.mubr.bf16.mxu1 %v8834_v25  ;;  %5108 = vmatprep.mubr.bf16.mxu0 %v8834_v25  ;;  %v9651_v35 = vpack.c.bf16 %v9637_v17, %v9647_v31 }
 0xfb5   : > { %5279 = vmatprep.subr.bf16.mxu1 %v7469_v7  ;;  %5332 = vmatprep.subr.bf16.mxu0 %v7471_v26 }
 0xfb7   : > { %5280 = vmatpush1.bf16.msra.mxu1 %v7468_v16  ;;  %5333 = vmatpush1.bf16.msra.mxu0 %v7470_v29 }
 0xfb8   : > { %7813 = vmatprep.subr.bf16.mxu1 %v8609_v42  ;;  %7841 = vmatprep.subr.bf16.mxu0 %v8610_v30 }
 0xfba   : > { %7461 = vmatmul.mubr.msk.bf16.gmra.mrb[64].mxu1 %vm568_vm0, %v9651_v35  ;;  %7463 = vmatmul.mubr.msk.bf16.gmra.mrb[60].mxu0 %vm568_vm0, %v9651_v35 }
 0xfbb   : > { %5309 = vmatprep.mubr.bf16.mxu1 %v8834_v25  ;;  %5362 = vmatprep.mubr.bf16.mxu0 %v8834_v25 }
 0xfc2   : > { %7472 = vmatmul.mubr.msk.bf16.vlgmr.msra.gmra.mrb[68].mxu1 %vm568_vm0, %v9631_v12  ;;  %7474 = vmatmul.mubr.msk.bf16.vlgmr.msra.gmra.mrb[64].mxu0 %vm568_vm0, %v9631_v12 }
 0xfc3   : > { %5319 = vmatprep.mubr.bf16.mxu1 %v8834_v25  ;;  %5372 = vmatprep.mubr.bf16.mxu0 %v8834_v25 }
 0xfc4   : > { %7814 = vmatpush3.bf16.msra.mxu1 %v8611_v2  ;;  %7842 = vmatpush3.bf16.msra.mxu0 %v8612_v21 }
 0xfc5   : > { %7815 = vmatprep.subr.bf16.mxu1 %v8613_v37  ;;  %7843 = vmatprep.subr.bf16.mxu0 %v8614_v15 }
 0xfc8   : > { %7816 = vmatpush3.bf16.msra.mxu1 %v8615_v18  ;;  %7844 = vmatpush3.bf16.msra.mxu0 %v8616_v28 }
 0xfc9   : > { %7817 = vmatprep.subr.bf16.mxu1 %v8617_v36  ;;  %7845 = vmatprep.subr.bf16.mxu0 %v8618_v24 }
 0xfca   : > { %7473 = vmatmul.mubr.msk.bf16.gmra.mrb[72].mxu1 %vm568_vm0, %v9651_v35  ;;  %7475 = vmatmul.mubr.msk.bf16.gmra.mrb[68].mxu0 %vm568_vm0, %v9651_v35 }
 0xfcc   : > { %7818 = vmatpush3.bf16.msra.mxu1 %v8619_v32  ;;  %7846 = vmatpush3.bf16.msra.mxu0 %v8620_v1 }
 0xfcd   : > { %7819 = vmatprep.subr.bf16.mxu1 %v8621_v0  ;;  %7847 = vmatprep.subr.bf16.mxu0 %v8622_v33 }
 0xfd0   : > { %7820 = vmatpush3.bf16.msra.mxu1 %v8623_v34  ;;  %7848 = vmatpush3.bf16.msra.mxu0 %v8624_v6 }
 0xfd1   : > { %7821 = vmatprep.subr.bf16.mxu1 %v8625_v10  ;;  %7849 = vmatprep.subr.bf16.mxu0 %v8626_v23 }
 0xfd4   : > { %7822 = vmatpush3.bf16.msra.mxu1 %v8627_v4  ;;  %7850 = vmatpush3.bf16.msra.mxu0 %v8628_v5  ;;  %v5215_v4 = vld [vmem:[%s10282_s12 + $0x4] sm:$0xf] }
 0xfd5   : > { %7823 = vmatprep.subr.bf16.mxu1 %v8629_v9  ;;  %7851 = vmatprep.subr.bf16.mxu0 %v8630_v22  ;;  %v9794_v51 = vrot.slane %v5215_v4, %v9772_v57  ;;  %v9797_v56 = vrot.slane %v5215_v4, %v9774_v58 }
 0xfd8   : > { %7824 = vmatpush3.bf16.msra.mxu1 %v8631_v11  ;;  %7852 = vmatpush3.bf16.msra.mxu0 %v8632_v13 }
 0xfd9   : > { %7825 = vmatprep.subr.bf16.mxu1 %v8633_v19  ;;  %7853 = vmatprep.subr.bf16.mxu0 %v8634_v20 }
 0xfdc   : > { %7826 = vmatpush3.bf16.msra.mxu1 %v8635_v38  ;;  %7854 = vmatpush3.bf16.msra.mxu0 %v8636_v39 }
 0xfdd   : > { %7827 = vmatprep.subr.bf16.mxu1 %v8637_v40  ;;  %7855 = vmatprep.subr.bf16.mxu0 %v8638_v41 }
 0xfe0   : > { %7828 = vmatpush3.bf16.msra.mxu1 %v8639_v44  ;;  %7856 = vmatpush3.bf16.msra.mxu0 %v8640_v45  ;;  %v5220_v45 = vrot.slane %v5215_v4, %v9765_v52 }
 0xfe1   : > { %7869 = vmatprep.subr.bf16.mxu1 %v8641_v48  ;;  %7897 = vmatprep.subr.bf16.mxu0 %v8642_v49  ;;  %v5228_v48 = vrot.slane %v5215_v4, %v9767_v53 }
0x1085   : > { %v5047_v60 = vpop.f32.mrb[60].mxu1  ;;  %v5100_v62 = vpop.f32.mrb[56].mxu0 }
0x1086   : > { %v5048_v3 = vadd.f32 %v5047_v60, %v4950_v46  ;;  %v5101_v61 = vadd.f32 %v5100_v62, %v4958_v59  ;;  %v5049_v55 = vpop.f32.mrb[61].mxu1  ;;  %v5102_v8 = vpop.f32.mrb[57].mxu0 }
0x1087   : > { %v5050_v14 = vadd.f32 %v5049_v55, %v4954_v43  ;;  %v5103_v7 = vadd.f32 %v5102_v8, %v4962_v47  ;;  %v5051_v26 = vpop.f32.mrb[62].mxu1  ;;  %v5104_v27 = vpop.f32.mrb[58].mxu0 }
0x1088   : > { %v5052_v16 = vadd.f32 %v5051_v26, %v4950_v46  ;;  %v5105_v29 = vadd.f32 %v5104_v27, %v4958_v59  ;;  %v5053_v42 = vpop.f32.mrb[63].mxu1  ;;  %v5106_v30 = vpop.f32.mrb[59].mxu0  ;;  %v5119_v37 = vmax.f32 %v5048_v3, 0.0  ;;  %v5121_v15 = vmax.f32 %v5101_v61, 0.0 }
0x1089   : > { %v5054_v2 = vadd.f32 %v5053_v42, %v4954_v43  ;;  %v5107_v21 = vadd.f32 %v5106_v30, %v4962_v47  ;;  %v5120_v36 = vmax.f32 %v5050_v14, 0.0  ;;  %v5122_v24 = vmax.f32 %v5103_v7, 0.0 }
0x108a   : > { %v5123_v18 = vmax.f32 %v5052_v16, 0.0  ;;  %v5125_v28 = vmax.f32 %v5105_v29, 0.0 }
0x108b   : > { %v5124_v32 = vmax.f32 %v5054_v2, 0.0  ;;  %v5126_v1 = vmax.f32 %v5107_v21, 0.0 }
0x108c   : > { %v9780_v0 = vpack.c.bf16 %v5123_v18, %v5119_v37  ;;  %v9782_v33 = vpack.c.bf16 %v5125_v28, %v5121_v15 }
0x108d   : > { %v9784_v34 = vpack.c.bf16 %v5124_v32, %v5120_v36  ;;  %v9786_v6 = vpack.c.bf16 %v5126_v1, %v5122_v24  ;;  %v5057_v10 = vpop.f32.mrb[64].mxu1  ;;  %v5110_v23 = vpop.f32.mrb[60].mxu0 }
0x108e   : > { %v5058_v5 = vadd.f32 %v5057_v10, %v4950_v46  ;;  %v5111_v9 = vadd.f32 %v5110_v23, %v4958_v59  ;;  %v5059_v22 = vpop.f32.mrb[65].mxu1  ;;  %v5112_v11 = vpop.f32.mrb[61].mxu0 }
0x108f   : > { %v5060_v13 = vadd.f32 %v5059_v22, %v4954_v43  ;;  %v5113_v19 = vadd.f32 %v5112_v11, %v4962_v47  ;;  %v5061_v20 = vpop.f32.mrb[66].mxu1  ;;  %v5114_v38 = vpop.f32.mrb[62].mxu0 }
0x1090   : > { %v5062_v39 = vadd.f32 %v5061_v20, %v4950_v46  ;;  %v5115_v40 = vadd.f32 %v5114_v38, %v4958_v59  ;;  %v5063_v41 = vpop.f32.mrb[67].mxu1  ;;  %v5116_v44 = vpop.f32.mrb[63].mxu0  ;;  %v5127_v60 = vmax.f32 %v5058_v5, 0.0  ;;  %v5129_v62 = vmax.f32 %v5111_v9, 0.0 }
0x1091   : > { %v5064_v49 = vadd.f32 %v5063_v41, %v4954_v43  ;;  %v5117_v50 = vadd.f32 %v5116_v44, %v4962_v47  ;;  %v5128_v46 = vmax.f32 %v5060_v13, 0.0  ;;  %v5130_v59 = vmax.f32 %v5113_v19, 0.0  ;;  %v8643_v44 = vld [vmem:[%s10283_s13] sm:$0xff]  }
0x1092   : > { %v5131_v3 = vmax.f32 %v5062_v39, 0.0  ;;  %v5133_v61 = vmax.f32 %v5115_v40, 0.0 }
0x1093   : > { %v5132_v55 = vmax.f32 %v5064_v49, 0.0  ;;  %v5134_v8 = vmax.f32 %v5117_v50, 0.0  ;;  %v8644_v49 = vld [vmem:[%s10283_s13 + $0x80] sm:$0xff]  }
0x1094   : > { %v9799_v14 = vpack.c.bf16 %v5131_v3, %v5127_v60  ;;  %v9801_v7 = vpack.c.bf16 %v5133_v61, %v5129_v62  ;;  %v8645_v61 = vld [vmem:[%s10283_s13 + $0x48] sm:$0xff]  }
0x1095   : > { %v9803_v43 = vpack.c.bf16 %v5132_v55, %v5128_v46  ;;  %v9805_v47 = vpack.c.bf16 %v5134_v8, %v5130_v59  ;;  %v5311_v26 = vpop.f32.mrb[68].mxu1  ;;  %v5364_v27 = vpop.f32.mrb[64].mxu0  ;;  %v8646_v46 = vld [vmem:[%s10283_s13 + $0xc8] sm:$0xff]  }
0x1096   : > { %v5312_v16 = vadd.f32 %v5311_v26, %v5220_v45  ;;  %v5365_v29 = vadd.f32 %v5364_v27, %v5228_v48  ;;  %v5313_v42 = vpop.f32.mrb[69].mxu1  ;;  %v5366_v30 = vpop.f32.mrb[65].mxu0 }
0x1097   : > { %v5314_v2 = vadd.f32 %v5313_v42, %v9794_v51  ;;  %v5367_v21 = vadd.f32 %v5366_v30, %v9797_v56  ;;  %v5315_v37 = vpop.f32.mrb[70].mxu1  ;;  %v5368_v15 = vpop.f32.mrb[66].mxu0 }
0x1098   : > { %v5316_v18 = vadd.f32 %v5315_v37, %v5220_v45  ;;  %v5369_v28 = vadd.f32 %v5368_v15, %v5228_v48  ;;  %v5317_v36 = vpop.f32.mrb[71].mxu1  ;;  %v5370_v24 = vpop.f32.mrb[67].mxu0  ;;  %v5383_v10 = vmax.f32 %v5312_v16, 0.0  ;;  %v5385_v23 = vmax.f32 %v5365_v29, 0.0  ;;  %v8648_v37 = vld [vmem:[%s10283_s13 + $0x88] sm:$0xff]  }
0x1099   : > { %v5318_v32 = vadd.f32 %v5317_v36, %v9794_v51  ;;  %v5371_v1 = vadd.f32 %v5370_v24, %v9797_v56  ;;  %v5384_v9 = vmax.f32 %v5314_v2, 0.0  ;;  %v5386_v22 = vmax.f32 %v5367_v21, 0.0  ;;  %v8647_v21 = vld [vmem:[%s10283_s13 + $0x8] sm:$0xff]  }
0x109a   : > { %v5387_v4 = vmax.f32 %v5316_v18, 0.0  ;;  %v5389_v5 = vmax.f32 %v5369_v28, 0.0 }
0x109b   : > { %v5388_v11 = vmax.f32 %v5318_v32, 0.0  ;;  %v5390_v13 = vmax.f32 %v5371_v1, 0.0 }
0x109c   : > { %v5399_v19 = vpack.c.bf16 %v5387_v4, %v5383_v10  ;;  %v5401_v20 = vpack.c.bf16 %v5389_v5, %v5385_v23  ;;  %v8651_v5 = vld [vmem:[%s10283_s13 + $0x10] sm:$0xff]  }
0x109d   : > { %v5400_v38 = vpack.c.bf16 %v5388_v11, %v5384_v9  ;;  %v5402_v39 = vpack.c.bf16 %v5390_v13, %v5386_v22  ;;  %v5321_v40 = vpop.f32.mrb[72].mxu1  ;;  %v5374_v41 = vpop.f32.mrb[68].mxu0  ;;  %v8652_v9 = vld [vmem:[%s10283_s13 + $0x90] sm:$0xff]   ;;  %v8653_v22 = vld [vmem:[%s10283_s13 + $0x58] sm:$0xff]  }
0x109e   : > { %v5322_v50 = vadd.f32 %v5321_v40, %v5220_v45  ;;  %v5375_v60 = vadd.f32 %v5374_v41, %v5228_v48  ;;  %v5323_v62 = vpop.f32.mrb[73].mxu1  ;;  %v5376_v3 = vpop.f32.mrb[69].mxu0  ;;  %v8654_v11 = vld [vmem:[%s10283_s13 + $0xd8] sm:$0xff]   ;;  %v8662_v40 = vld [vmem:[%s10283_s13 + $0xe8] sm:$0xff]  }
0x109f   : > { %v5324_v59 = vadd.f32 %v5323_v62, %v9794_v51  ;;  %v5377_v55 = vadd.f32 %v5376_v3, %v9797_v56  ;;  %v5325_v8 = vpop.f32.mrb[74].mxu1  ;;  %v5378_v26 = vpop.f32.mrb[70].mxu0  ;;  %5695 = vmatprep.mubr.bf16.mxu1 %v5400_v38  ;;  %5744 = vmatprep.mubr.bf16.mxu0 %v5402_v39  ;;  %v8655_v13 = vld [vmem:[%s10283_s13 + $0x18] sm:$0xff]   ;;  %v8658_v38 = vld [vmem:[%s10283_s13 + $0xe0] sm:$0xff]   ;;  %v8663_v41 = vld [vmem:[%s10283_s13 + $0x28] sm:$0xff]  }
0x10a0   : > { %v5326_v27 = vadd.f32 %v5325_v8, %v5220_v45  ;;  %v5379_v16 = vadd.f32 %v5378_v26, %v5228_v48  ;;  %v5327_v29 = vpop.f32.mrb[75].mxu1  ;;  %v5380_v42 = vpop.f32.mrb[71].mxu0  ;;  %5696 = vmatmul.mubr.bf16.vlgmr.msra.gmra.mrb[76].mxu1 %v5399_v19  ;;  %5745 = vmatmul.mubr.bf16.vlgmr.msra.gmra.mrb[72].mxu0 %v5401_v20  ;;  %v5391_v45 = vmax.f32 %v5322_v50, 0.0  ;;  %v5393_v48 = vmax.f32 %v5375_v60, 0.0  ;;  %v8656_v19 = vld [vmem:[%s10283_s13 + $0x98] sm:$0xff]   ;;  %v8657_v20 = vld [vmem:[%s10283_s13 + $0x60] sm:$0xff]  }
0x10a1   : > { %v5328_v30 = vadd.f32 %v5327_v29, %v9794_v51  ;;  %v5381_v2 = vadd.f32 %v5380_v42, %v9797_v56  ;;  %7870 = vmatpush3.bf16.msra.mxu1 %v8643_v44  ;;  %7898 = vmatpush3.bf16.msra.mxu0 %v8644_v49  ;;  %v8649_v51 = vld [vmem:[%s10283_s13 + $0x50] sm:$0xff]   ;;  %v5392_v28 = vmax.f32 %v5324_v59, 0.0  ;;  %v5394_v36 = vmax.f32 %v5377_v55, 0.0  ;;  %v8659_v39 = vld [vmem:[%s10283_s13 + $0x20] sm:$0xff]   ;;  %v8664_v44 = vld [vmem:[%s10283_s13 + $0xa8] sm:$0xff]  }
0x10a2   : > { %v5395_v15 = vmax.f32 %v5326_v27, 0.0  ;;  %v5397_v18 = vmax.f32 %v5379_v16, 0.0  ;;  %7871 = vmatprep.subr.bf16.mxu1 %v8645_v61  ;;  %7899 = vmatprep.subr.bf16.mxu0 %v8646_v46  ;;  %v8650_v56 = vld [vmem:[%s10283_s13 + $0xd0] sm:$0xff]   ;;  %v8669_v3 = vld [vmem:[%s10283_s13 + $0x78] sm:$0xff]   ;;  %v6051_v46 = vld [vmem:[%s10281_s11 + $0x20] sm:$0xff] }
0x10a3   : > { %v5396_v24 = vmax.f32 %v5328_v30, 0.0  ;;  %v5398_v32 = vmax.f32 %v5381_v2, 0.0  ;;  %v8665_v49 = vld [vmem:[%s10283_s13 + $0x70] sm:$0xff]   ;;  %v8670_v61 = vld [vmem:[%s10283_s13 + $0xf8] sm:$0xff]   ;;  %v6053_v59 = vld [vmem:[%s10281_s11 + $0x60] sm:$0xff] }
0x10a4   : > { %v5403_v1 = vpack.c.bf16 %v5395_v15, %v5391_v45  ;;  %v5405_v10 = vpack.c.bf16 %v5397_v18, %v5393_v48  ;;  %v8666_v50 = vld [vmem:[%s10283_s13 + $0xf0] sm:$0xff]   ;;  %v6052_v55 = vld [vmem:[%s10281_s11 + $0x28] sm:$0xff]  ;;  %v8671_v26 = vld [vmem:[%s10283_s13 + $0x38] sm:$0xff]   ;;  %v7541_v16 = vcombine.high %v6051_v46, %v6053_v59 }
0x10a5   : > { %v5404_v23 = vpack.c.bf16 %v5396_v24, %v5392_v28  ;;  %v5406_v4 = vpack.c.bf16 %v5398_v32, %v5394_v36  ;;  %7872 = vmatpush3.bf16.msra.mxu1 %v8647_v21  ;;  %7900 = vmatpush3.bf16.msra.mxu0 %v8648_v37  ;;  %v8667_v60 = vld [vmem:[%s10283_s13 + $0x30] sm:$0xff]   ;;  %v6054_v8 = vld [vmem:[%s10281_s11 + $0x68] sm:$0xff]  ;;  %v8672_v27 = vld [vmem:[%s10283_s13 + $0xb8] sm:$0xff]   ;;  %v7540_v37 = vcombine.low %v6051_v46, %v6053_v59 }
0x10a6   : > { %7873 = vmatprep.subr.bf16.mxu1 %v8649_v51  ;;  %7901 = vmatprep.subr.bf16.mxu0 %v8650_v56  ;;  %v8668_v62 = vld [vmem:[%s10283_s13 + $0xb0] sm:$0xff]   ;;  %v7543_v29 = vcombine.high %v6052_v55, %v6054_v8  ;;  %v6055_v42 = vld [vmem:[%s10281_s11 + $0xa0] sm:$0xff]  ;;  %v6056_v2 = vld [vmem:[%s10281_s11 + $0xa8] sm:$0xff]  ;;  %v7542_v45 = vcombine.low %v6052_v55, %v6054_v8 }
0x10a7   : > { %5703 = vmatprep.mubr.bf16.mxu1 %v5404_v23  ;;  %5752 = vmatprep.mubr.bf16.mxu0 %v5406_v4  ;;  %v6057_v30 = vld [vmem:[%s10281_s11 + $0xe0] sm:$0xff]  ;;  %v6058_v21 = vld [vmem:[%s10281_s11 + $0xe8] sm:$0xff]  ;;  %v8681_v36 = vld [vmem:[%s10283_s13 + $0x250] sm:$0xff]  }
0x10a8   : > { %5704 = vmatmul.mubr.bf16.gmra.mrb[80].mxu1 %v5403_v1  ;;  %5753 = vmatmul.mubr.bf16.gmra.mrb[76].mxu0 %v5405_v10  ;;  %v7545_v48 = vcombine.high %v6055_v42, %v6057_v30  ;;  %v7547_v15 = vcombine.high %v6056_v2, %v6058_v21  ;;  %v7544_v18 = vcombine.low %v6055_v42, %v6057_v30  ;;  %v8679_v56 = vld [vmem:[%s10283_s13 + $0x208] sm:$0xff]   ;;  %v8682_v24 = vld [vmem:[%s10283_s13 + $0x2d0] sm:$0xff]   ;;  %v8685_v10 = vld [vmem:[%s10283_s13 + $0x258] sm:$0xff]  }
0x10a9   : > { %7874 = vmatpush3.bf16.msra.mxu1 %v8651_v5  ;;  %7902 = vmatpush3.bf16.msra.mxu0 %v8652_v9  ;;  %v7546_v51 = vcombine.low %v6056_v2, %v6058_v21  ;;  %v8680_v28 = vld [vmem:[%s10283_s13 + $0x288] sm:$0xff]   ;;  %v8683_v32 = vld [vmem:[%s10283_s13 + $0x210] sm:$0xff]   ;;  %v8686_v23 = vld [vmem:[%s10283_s13 + $0x2d8] sm:$0xff]  }
0x10aa   : > { %5985 = vmatprep.mubr.bf16.mxu1 %v9784_v34  ;;  %6034 = vmatprep.mubr.bf16.mxu0 %v9786_v6  ;;  %v8660_v34 = vld [vmem:[%s10283_s13 + $0xa0] sm:$0xff]   ;;  %v8661_v6 = vld [vmem:[%s10283_s13 + $0x68] sm:$0xff]   ;;  %v8684_v1 = vld [vmem:[%s10283_s13 + $0x290] sm:$0xff]  }
0x10ab   : > { %7875 = vmatprep.subr.bf16.mxu1 %v8653_v22  ;;  %7903 = vmatprep.subr.bf16.mxu0 %v8654_v11  ;;  %v8687_v4 = vld [vmem:[%s10283_s13 + $0x218] sm:$0xff]   ;;  %v8689_v9 = vld [vmem:[%s10283_s13 + $0x260] sm:$0xff]  }
0x10ac   : > { %v8688_v5 = vld [vmem:[%s10283_s13 + $0x298] sm:$0xff]   ;;  %v8690_v22 = vld [vmem:[%s10283_s13 + $0x2e0] sm:$0xff]  }
0x10ad   : > { %7876 = vmatpush3.bf16.msra.mxu1 %v8655_v13  ;;  %7904 = vmatpush3.bf16.msra.mxu0 %v8656_v19  ;;  %v8691_v11 = vld [vmem:[%s10283_s13 + $0x220] sm:$0xff]   ;;  %v8693_v19 = vld [vmem:[%s10283_s13 + $0x268] sm:$0xff]   ;;  %v10067_v55 = vld [vmem:[%s10281_s11 + $0x78] sm:$0xff] }
0x10ae   : > { %7877 = vmatprep.subr.bf16.mxu1 %v8657_v20  ;;  %7905 = vmatprep.subr.bf16.mxu0 %v8658_v38  ;;  %v8692_v13 = vld [vmem:[%s10283_s13 + $0x2a0] sm:$0xff]   ;;  %v8694_v20 = vld [vmem:[%s10283_s13 + $0x2e8] sm:$0xff]  }
0x10af   : > { %v8695_v38 = vld [vmem:[%s10283_s13 + $0x228] sm:$0xff]  }
0x10b1   : > { %7878 = vmatpush3.bf16.msra.mxu1 %v8659_v39  ;;  %7906 = vmatpush3.bf16.msra.mxu0 %v8660_v34  ;;  %v8696_v39 = vld [vmem:[%s10283_s13 + $0x2a8] sm:$0xff]   ;;  %v8697_v34 = vld [vmem:[%s10283_s13 + $0x270] sm:$0xff]  }
0x10b2   : > { %7879 = vmatprep.subr.bf16.mxu1 %v8661_v6  ;;  %7907 = vmatprep.subr.bf16.mxu0 %v8662_v40  ;;  %v8698_v6 = vld [vmem:[%s10283_s13 + $0x2f0] sm:$0xff]  }
0x10b3   : > { %v8699_v40 = vld [vmem:[%s10283_s13 + $0x230] sm:$0xff]  }
0x10b5   : > { %7880 = vmatpush3.bf16.msra.mxu1 %v8663_v41  ;;  %7908 = vmatpush3.bf16.msra.mxu0 %v8664_v44  ;;  %v8700_v41 = vld [vmem:[%s10283_s13 + $0x2b0] sm:$0xff]   ;;  %v8701_v44 = vld [vmem:[%s10283_s13 + $0x278] sm:$0xff]  }
0x10b6   : > { %7881 = vmatprep.subr.bf16.mxu1 %v8665_v49  ;;  %7909 = vmatprep.subr.bf16.mxu0 %v8666_v50  ;;  %v8702_v49 = vld [vmem:[%s10283_s13 + $0x2f8] sm:$0xff]  }
0x10b7   : > { %v8703_v50 = vld [vmem:[%s10283_s13 + $0x238] sm:$0xff]  }
0x10b9   : > { %7882 = vmatpush3.bf16.msra.mxu1 %v8667_v60  ;;  %7910 = vmatpush3.bf16.msra.mxu0 %v8668_v62  ;;  %v8704_v60 = vld [vmem:[%s10283_s13 + $0x2b8] sm:$0xff]   ;;  %v10048_v62 = vld [vmem:[%s10281_s11 + $0x30] sm:$0xff] }
0x10ba   : > { %7883 = vmatprep.subr.bf16.mxu1 %v8669_v3  ;;  %7911 = vmatprep.subr.bf16.mxu0 %v8670_v61  ;;  %v10053_v3 = vld [vmem:[%s10281_s11 + $0x70] sm:$0xff]  ;;  %v10058_v61 = vld [vmem:[%s10281_s11 + $0x38] sm:$0xff] }
0x10bb   : > { %v7584_v46 = vcombine.low %v10048_v62, %v10053_v3  ;;  %v7585_v59 = vcombine.high %v10048_v62, %v10053_v3  ;;  %v7586_v8 = vcombine.low %v10058_v61, %v10067_v55  ;;  %v8706_v62 = vld [vmem:[%s10283_s13 + $0x3c0] sm:$0xff]  }
0x10bd   : > { %7884 = vmatpush3.bf16.msra.mxu1 %v8671_v26  ;;  %7912 = vmatpush3.bf16.msra.mxu0 %v8672_v27  ;;  %v7587_v26 = vcombine.high %v10058_v61, %v10067_v55 }
0x10be   : > { %6121 = vmatprep.subr.bf16.mxu1 %v7541_v16  ;;  %6174 = vmatprep.subr.bf16.mxu0 %v7543_v29 }
0x10c0   : > { %5986 = vmatmul.mubr.bf16.vlgmr.msra.gmra.mrb[84].mxu1 %v9780_v0  ;;  %6035 = vmatmul.mubr.bf16.vlgmr.msra.gmra.mrb[80].mxu0 %v9782_v33  ;;  %v8673_v0 = vld [vmem:[%s10283_s13 + $0x240] sm:$0xff]  }
0x10c1   : > { %5993 = vmatprep.mubr.bf16.mxu1 %v9803_v43  ;;  %6042 = vmatprep.mubr.bf16.mxu0 %v9805_v47  ;;  %v8674_v33 = vld [vmem:[%s10283_s13 + $0x2c0] sm:$0xff]   ;;  %v8677_v43 = vld [vmem:[%s10283_s13 + $0x248] sm:$0xff]  }
0x10c2   : > { %6122 = vmatpush1.bf16.msra.mxu1 %v7540_v37  ;;  %6175 = vmatpush1.bf16.msra.mxu0 %v7542_v45  ;;  %v8678_v47 = vld [vmem:[%s10283_s13 + $0x2c8] sm:$0xff]  }
0x10c3   : > { %6123 = vmatprep.subr.bf16.mxu1 %v7545_v48  ;;  %6176 = vmatprep.subr.bf16.mxu0 %v7547_v15 }
0x10c6   : > { %6124 = vmatpush1.bf16.msra.mxu1 %v7544_v18  ;;  %6177 = vmatpush1.bf16.msra.mxu0 %v7546_v51 }
0x10c7   : > { %7925 = vmatprep.subr.bf16.mxu1 %v8673_v0  ;;  %7953 = vmatprep.subr.bf16.mxu0 %v8674_v33 }
0x10c8   : > { %5994 = vmatmul.mubr.bf16.gmra.mrb[88].mxu1 %v9799_v14  ;;  %6043 = vmatmul.mubr.bf16.gmra.mrb[84].mxu0 %v9801_v7  ;;  %v8675_v14 = vld [vmem:[%s10283_s13 + $0x200] sm:$0xff]  }
0x10c9   : > { %6153 = vmatprep.mubr.bf16.mxu1 %v8834_v25  ;;  %6206 = vmatprep.mubr.bf16.mxu0 %v8834_v25  ;;  %v8676_v7 = vld [vmem:[%s10283_s13 + $0x280] sm:$0xff]  }
0x10d0   : > { %7548 = vmatmul.mubr.msk.bf16.vlgmr.msra.gmra.mrb[92].mxu1 %vm568_vm0, %v9631_v12  ;;  %7550 = vmatmul.mubr.msk.bf16.vlgmr.msra.gmra.mrb[88].mxu0 %vm568_vm0, %v9631_v12 }
0x10d1   : > { %6163 = vmatprep.mubr.bf16.mxu1 %v8834_v25  ;;  %6216 = vmatprep.mubr.bf16.mxu0 %v8834_v25 }
0x10d2   : > { %7926 = vmatpush3.bf16.msra.mxu1 %v8675_v14  ;;  %7954 = vmatpush3.bf16.msra.mxu0 %v8676_v7 }
0x10d3   : > { %7927 = vmatprep.subr.bf16.mxu1 %v8677_v43  ;;  %7955 = vmatprep.subr.bf16.mxu0 %v8678_v47 }
0x10d6   : > { %7928 = vmatpush3.bf16.msra.mxu1 %v8679_v56  ;;  %7956 = vmatpush3.bf16.msra.mxu0 %v8680_v28 }
0x10d7   : > { %7929 = vmatprep.subr.bf16.mxu1 %v8681_v36  ;;  %7957 = vmatprep.subr.bf16.mxu0 %v8682_v24 }
0x10d8   : > { %7549 = vmatmul.mubr.msk.bf16.gmra.mrb[96].mxu1 %vm568_vm0, %v9651_v35  ;;  %7551 = vmatmul.mubr.msk.bf16.gmra.mrb[92].mxu0 %vm568_vm0, %v9651_v35 }
0x10da   : > { %7930 = vmatpush3.bf16.msra.mxu1 %v8683_v32  ;;  %7958 = vmatpush3.bf16.msra.mxu0 %v8684_v1 }
0x10db   : > { %7931 = vmatprep.subr.bf16.mxu1 %v8685_v10  ;;  %7959 = vmatprep.subr.bf16.mxu0 %v8686_v23 }
0x10de   : > { %7932 = vmatpush3.bf16.msra.mxu1 %v8687_v4  ;;  %7960 = vmatpush3.bf16.msra.mxu0 %v8688_v5 }
0x10df   : > { %7933 = vmatprep.subr.bf16.mxu1 %v8689_v9  ;;  %7961 = vmatprep.subr.bf16.mxu0 %v8690_v22 }
0x10e2   : > { %7934 = vmatpush3.bf16.msra.mxu1 %v8691_v11  ;;  %7962 = vmatpush3.bf16.msra.mxu0 %v8692_v13 }
0x10e3   : > { %7935 = vmatprep.subr.bf16.mxu1 %v8693_v19  ;;  %7963 = vmatprep.subr.bf16.mxu0 %v8694_v20 }
0x10e6   : > { %7936 = vmatpush3.bf16.msra.mxu1 %v8695_v38  ;;  %7964 = vmatpush3.bf16.msra.mxu0 %v8696_v39 }
0x10e7   : > { %7937 = vmatprep.subr.bf16.mxu1 %v8697_v34  ;;  %7965 = vmatprep.subr.bf16.mxu0 %v8698_v6 }
0x10ea   : > { %7938 = vmatpush3.bf16.msra.mxu1 %v8699_v40  ;;  %7966 = vmatpush3.bf16.msra.mxu0 %v8700_v41 }
0x10eb   : > { %7939 = vmatprep.subr.bf16.mxu1 %v8701_v44  ;;  %7967 = vmatprep.subr.bf16.mxu0 %v8702_v49 }
0x10ee   : > { %7940 = vmatpush3.bf16.msra.mxu1 %v8703_v50  ;;  %7968 = vmatpush3.bf16.msra.mxu0 %v8704_v60 }
0x10ef   : > { %6679 = vmatprep.subr.bf16.mxu1 %v7585_v59  ;;  %6732 = vmatprep.subr.bf16.mxu0 %v7587_v26 }
0x1173   : > { %v7829_v27 = vpop.f32.mrb[76].mxu1  ;;  %v7857_v16 = vpop.f32.mrb[72].mxu0 }
0x1174   : > { %v7830_v29 = vpop.f32.mrb[77].mxu1  ;;  %v7858_v42 = vpop.f32.mrb[73].mxu0 }
0x1175   : > { %v7831_v30 = vadd.f32 %v7830_v29, %v7829_v27  ;;  %v7859_v2 = vadd.f32 %v7858_v42, %v7857_v16  ;;  %v7832_v21 = vpop.f32.mrb[78].mxu1  ;;  %v7860_v37 = vpop.f32.mrb[74].mxu0 }
0x1176   : > { %v7833_v45 = vpop.f32.mrb[79].mxu1  ;;  %v7861_v48 = vpop.f32.mrb[75].mxu0 }
0x1177   : > { %v5747_v15 = vadd.f32 %v7859_v2, %v7831_v30  ;;  %v7834_v18 = vadd.f32 %v7833_v45, %v7832_v21  ;;  %v7862_v51 = vadd.f32 %v7861_v48, %v7860_v37  ;;  %v6059_v2 = vld [vmem:[%s10282_s12 + $0x8] sm:$0xf] }
0x1179   : > { %v5750_v0 = vadd.f32 %v7862_v51, %v7834_v18  ;;  %v6064_v18 = vrot.slane %v6059_v2, %v9765_v52  ;;  %v6072_v51 = vrot.slane %v6059_v2, %v9767_v53 }
0x117b   : > { %v7835_v33 = vpop.f32.mrb[80].mxu1  ;;  %v7863_v14 = vpop.f32.mrb[76].mxu0 }
0x117c   : > { %v7836_v7 = vpop.f32.mrb[81].mxu1  ;;  %v7864_v43 = vpop.f32.mrb[77].mxu0 }
0x117d   : > { %v7837_v47 = vadd.f32 %v7836_v7, %v7835_v33  ;;  %v7865_v56 = vadd.f32 %v7864_v43, %v7863_v14  ;;  %v7838_v28 = vpop.f32.mrb[82].mxu1  ;;  %v7866_v36 = vpop.f32.mrb[78].mxu0  ;;  %v6068_v14 = vrot.slane %v6059_v2, %v9772_v57  ;;  %v6076_v7 = vrot.slane %v6059_v2, %v9774_v58 }
0x117e   : > { %v7839_v24 = vpop.f32.mrb[83].mxu1  ;;  %v7867_v32 = vpop.f32.mrb[79].mxu0 }
0x117f   : > { %v5755_v1 = vadd.f32 %v7865_v56, %v7837_v47  ;;  %v7840_v10 = vadd.f32 %v7839_v24, %v7838_v28  ;;  %v7868_v23 = vadd.f32 %v7867_v32, %v7866_v36 }
0x1181   : > { %v5758_v4 = vadd.f32 %v7868_v23, %v7840_v10 }
0x1193   : > { %v7885_v5 = vpop.f32.mrb[84].mxu1  ;;  %v7913_v9 = vpop.f32.mrb[80].mxu0 }
0x1194   : > { %v7886_v22 = vpop.f32.mrb[85].mxu1  ;;  %v7914_v11 = vpop.f32.mrb[81].mxu0 }
0x1195   : > { %v7887_v13 = vadd.f32 %v7886_v22, %v7885_v5  ;;  %v7915_v19 = vadd.f32 %v7914_v11, %v7913_v9  ;;  %v7888_v20 = vpop.f32.mrb[86].mxu1  ;;  %v7916_v38 = vpop.f32.mrb[82].mxu0 }
0x1196   : > { %v7889_v39 = vpop.f32.mrb[87].mxu1  ;;  %v7917_v34 = vpop.f32.mrb[83].mxu0 }
0x1197   : > { %v5988_v6 = vadd.f32 %v7887_v13, %v5747_v15  ;;  %v7890_v40 = vadd.f32 %v7889_v39, %v7888_v20  ;;  %v7918_v41 = vadd.f32 %v7917_v34, %v7916_v38 }
0x1199   : > { %v10073_v44 = vadd.f32 %v7915_v19, %v5988_v6  ;;  %v5991_v49 = vadd.f32 %v7890_v40, %v5750_v0  ;;  %v6613_v6 = vld [vmem:[%s10281_s11 + $0xb0] sm:$0xff] }
0x119a   : > { %v6615_v40 = vld [vmem:[%s10281_s11 + $0xf0] sm:$0xff] }
0x119b   : > { %v10075_v50 = vadd.f32 %v7918_v41, %v5991_v49  ;;  %v7891_v60 = vpop.f32.mrb[88].mxu1  ;;  %v7919_v59 = vpop.f32.mrb[84].mxu0 }
0x119c   : > { %v7892_v26 = vpop.f32.mrb[89].mxu1  ;;  %v7920_v27 = vpop.f32.mrb[85].mxu0 }
0x119d   : > { %v7893_v16 = vadd.f32 %v7892_v26, %v7891_v60  ;;  %v7921_v29 = vadd.f32 %v7920_v27, %v7919_v59  ;;  %v7894_v42 = vpop.f32.mrb[90].mxu1  ;;  %v7922_v30 = vpop.f32.mrb[86].mxu0  ;;  %v6614_v26 = vld [vmem:[%s10281_s11 + $0xb8] sm:$0xff] }
0x119e   : > { %v7895_v21 = vpop.f32.mrb[91].mxu1  ;;  %v7923_v37 = vpop.f32.mrb[87].mxu0  ;;  %v6616_v27 = vld [vmem:[%s10281_s11 + $0xf8] sm:$0xff] }
0x119f   : > { %v5996_v45 = vadd.f32 %v7893_v16, %v5755_v1  ;;  %v7896_v48 = vadd.f32 %v7895_v21, %v7894_v42  ;;  %v7924_v15 = vadd.f32 %v7923_v37, %v7922_v30 }
0x11a1   : > { %v10082_v0 = vadd.f32 %v7921_v29, %v5996_v45  ;;  %v5999_v33 = vadd.f32 %v7896_v48, %v5758_v4 }
0x11a3   : > { %v10086_v43 = vadd.f32 %v7924_v15, %v5999_v33  ;;  %v6155_v47 = vpop.f32.mrb[92].mxu1  ;;  %v6208_v56 = vpop.f32.mrb[88].mxu0  ;;  %v7589_v33 = vcombine.high %v6613_v6, %v6615_v40 }
0x11a4   : > { %v6156_v28 = vadd.f32 %v6155_v47, %v6064_v18  ;;  %v6209_v36 = vadd.f32 %v6208_v56, %v6072_v51  ;;  %v6157_v24 = vpop.f32.mrb[93].mxu1  ;;  %v6210_v32 = vpop.f32.mrb[89].mxu0  ;;  %v7591_v47 = vcombine.high %v6614_v26, %v6616_v27 }
0x11a5   : > { %v6158_v1 = vadd.f32 %v6157_v24, %v6068_v14  ;;  %v6211_v10 = vadd.f32 %v6210_v32, %v6076_v7  ;;  %v6159_v23 = vpop.f32.mrb[94].mxu1  ;;  %v6212_v5 = vpop.f32.mrb[90].mxu0 }
0x11a6   : > { %v6160_v9 = vadd.f32 %v6159_v23, %v6064_v18  ;;  %v6213_v22 = vadd.f32 %v6212_v5, %v6072_v51  ;;  %v6161_v11 = vpop.f32.mrb[95].mxu1  ;;  %v6214_v4 = vpop.f32.mrb[91].mxu0  ;;  %v6227_v20 = vmax.f32 %v6156_v28, 0.0  ;;  %v6229_v38 = vmax.f32 %v6209_v36, 0.0 }
0x11a7   : > { %v6162_v13 = vadd.f32 %v6161_v11, %v6068_v14  ;;  %v6215_v19 = vadd.f32 %v6214_v4, %v6076_v7  ;;  %v6228_v41 = vmax.f32 %v6158_v1, 0.0  ;;  %v6230_v49 = vmax.f32 %v6211_v10, 0.0 }
0x11a8   : > { %v6231_v39 = vmax.f32 %v6160_v9, 0.0  ;;  %v6233_v34 = vmax.f32 %v6213_v22, 0.0  ;;  %v7588_v5 = vcombine.low %v6613_v6, %v6615_v40  ;;  %v7590_v11 = vcombine.low %v6614_v26, %v6616_v27  ;;  %v8710_v6 = vld [vmem:[%s10283_s13 + $0x3c8] sm:$0xff]   ;;  %v8719_v26 = vld [vmem:[%s10283_s13 + $0x318] sm:$0xff]  }
0x11a9   : > { %v6232_v60 = vmax.f32 %v6162_v13, 0.0  ;;  %v6234_v59 = vmax.f32 %v6215_v19, 0.0  ;;  %v8711_v40 = vld [vmem:[%s10283_s13 + $0x308] sm:$0xff]   ;;  %v8720_v27 = vld [vmem:[%s10283_s13 + $0x398] sm:$0xff]  }
0x11aa   : > { %v6243_v16 = vpack.c.bf16 %v6231_v39, %v6227_v20  ;;  %v6245_v29 = vpack.c.bf16 %v6233_v34, %v6229_v38  ;;  %v8707_v38 = vld [vmem:[%s10283_s13 + $0x300] sm:$0xff]   ;;  %v8709_v34 = vld [vmem:[%s10283_s13 + $0x348] sm:$0xff]  }
0x11ab   : > { %v6244_v42 = vpack.c.bf16 %v6232_v60, %v6228_v41  ;;  %v6246_v30 = vpack.c.bf16 %v6234_v59, %v6230_v49  ;;  %v6165_v2 = vpop.f32.mrb[96].mxu1  ;;  %v6218_v21 = vpop.f32.mrb[92].mxu0  ;;  %v8708_v39 = vld [vmem:[%s10283_s13 + $0x380] sm:$0xff]   ;;  %v8714_v41 = vld [vmem:[%s10283_s13 + $0x3d0] sm:$0xff]   ;;  %v8717_v60 = vld [vmem:[%s10283_s13 + $0x358] sm:$0xff]  }
0x11ac   : > { %v6166_v37 = vadd.f32 %v6165_v2, %v6064_v18  ;;  %v6219_v45 = vadd.f32 %v6218_v21, %v6072_v51  ;;  %v6167_v48 = vpop.f32.mrb[97].mxu1  ;;  %v6220_v15 = vpop.f32.mrb[93].mxu0  ;;  %v8716_v49 = vld [vmem:[%s10283_s13 + $0x390] sm:$0xff]   ;;  %v8718_v59 = vld [vmem:[%s10283_s13 + $0x3d8] sm:$0xff]   ;;  %v8725_v2 = vld [vmem:[%s10283_s13 + $0x368] sm:$0xff]  }
0x11ad   : > { %v6168_v56 = vadd.f32 %v6167_v48, %v6068_v14  ;;  %v6221_v28 = vadd.f32 %v6220_v15, %v6076_v7  ;;  %v6169_v36 = vpop.f32.mrb[98].mxu1  ;;  %v6222_v24 = vpop.f32.mrb[94].mxu0  ;;  %6539 = vmatprep.mubr.bf16.mxu1 %v6244_v42  ;;  %6588 = vmatprep.mubr.bf16.mxu0 %v6246_v30  ;;  %v8723_v42 = vld [vmem:[%s10283_s13 + $0x320] sm:$0xff]   ;;  %v8726_v21 = vld [vmem:[%s10283_s13 + $0x3e8] sm:$0xff]   ;;  %v8729_v48 = vld [vmem:[%s10283_s13 + $0x370] sm:$0xff]  }
0x11ae   : > { %v6170_v32 = vadd.f32 %v6169_v36, %v6064_v18  ;;  %v6223_v1 = vadd.f32 %v6222_v24, %v6072_v51  ;;  %v6171_v10 = vpop.f32.mrb[99].mxu1  ;;  %v6224_v23 = vpop.f32.mrb[95].mxu0  ;;  %6540 = vmatmul.mubr.bf16.vlgmr.msra.gmra.mrb[100].mxu1 %v6243_v16  ;;  %6589 = vmatmul.mubr.bf16.vlgmr.msra.gmra.mrb[96].mxu0 %v6245_v29  ;;  %v6235_v4 = vmax.f32 %v6166_v37, 0.0  ;;  %v6237_v13 = vmax.f32 %v6219_v45, 0.0  ;;  %v8721_v16 = vld [vmem:[%s10283_s13 + $0x360] sm:$0xff]   ;;  %v8727_v37 = vld [vmem:[%s10283_s13 + $0x328] sm:$0xff]  }
0x11af   : > { %v6172_v9 = vadd.f32 %v6171_v10, %v6068_v14  ;;  %v6225_v22 = vadd.f32 %v6224_v23, %v6076_v7  ;;  %6680 = vmatpush1.bf16.msra.mxu1 %v7584_v46  ;;  %6733 = vmatpush1.bf16.msra.mxu0 %v7586_v8  ;;  %v8705_v14 = vld [vmem:[%s10283_s13 + $0x340] sm:$0xff]   ;;  %v6236_v3 = vmax.f32 %v6168_v56, 0.0  ;;  %v6238_v46 = vmax.f32 %v6221_v28, 0.0  ;;  %v8728_v45 = vld [vmem:[%s10283_s13 + $0x3a8] sm:$0xff]   ;;  %v8730_v15 = vld [vmem:[%s10283_s13 + $0x3f0] sm:$0xff]  }
0x11b0   : > { %v6239_v18 = vmax.f32 %v6170_v32, 0.0  ;;  %v6241_v51 = vmax.f32 %v6223_v1, 0.0  ;;  %6681 = vmatprep.subr.bf16.mxu1 %v7589_v33  ;;  %6734 = vmatprep.subr.bf16.mxu0 %v7591_v47  ;;  %v8722_v29 = vld [vmem:[%s10283_s13 + $0x3e0] sm:$0xff]   ;;  %v8731_v33 = vld [vmem:[%s10283_s13 + $0x330] sm:$0xff]   ;;  %v8733_v56 = vld [vmem:[%s10283_s13 + $0x378] sm:$0xff]  }
0x11b1   : > { %v6240_v7 = vmax.f32 %v6172_v9, 0.0  ;;  %v6242_v61 = vmax.f32 %v6225_v22, 0.0  ;;  %v8724_v30 = vld [vmem:[%s10283_s13 + $0x3a0] sm:$0xff]   ;;  %v8732_v47 = vld [vmem:[%s10283_s13 + $0x3b0] sm:$0xff]   ;;  %v8734_v28 = vld [vmem:[%s10283_s13 + $0x3f8] sm:$0xff]  }
0x11b2   : > { %v6247_v55 = vpack.c.bf16 %v6239_v18, %v6235_v4  ;;  %v6249_v8 = vpack.c.bf16 %v6241_v51, %v6237_v13  ;;  %v8735_v36 = vld [vmem:[%s10283_s13 + $0x338] sm:$0xff]  }
0x11b3   : > { %v6248_v19 = vpack.c.bf16 %v6240_v7, %v6236_v3  ;;  %v6250_v20 = vpack.c.bf16 %v6242_v61, %v6238_v46  ;;  %6682 = vmatpush1.bf16.msra.mxu1 %v7588_v5  ;;  %6735 = vmatpush1.bf16.msra.mxu0 %v7590_v11  ;;  %v8736_v24 = vld [vmem:[%s10283_s13 + $0x3b8] sm:$0xff]  }
0x11b4   : > { %7981 = vmatprep.subr.bf16.mxu1 %v8705_v14  ;;  %8009 = vmatprep.subr.bf16.mxu0 %v8706_v62 }
0x11b5   : > { %6547 = vmatprep.mubr.bf16.mxu1 %v6248_v19  ;;  %6596 = vmatprep.mubr.bf16.mxu0 %v6250_v20 }
0x11b6   : > { %6548 = vmatmul.mubr.bf16.gmra.mrb[104].mxu1 %v6247_v55  ;;  %6597 = vmatmul.mubr.bf16.gmra.mrb[100].mxu0 %v6249_v8 }
0x11b7   : > { %6711 = vmatprep.mubr.bf16.mxu1 %v8834_v25  ;;  %6764 = vmatprep.mubr.bf16.mxu0 %v8834_v25 }
0x11be   : > { %7592 = vmatmul.mubr.msk.bf16.vlgmr.msra.gmra.mrb[108].mxu1 %vm568_vm0, %v9631_v12  ;;  %7594 = vmatmul.mubr.msk.bf16.vlgmr.msra.gmra.mrb[104].mxu0 %vm568_vm0, %v9631_v12  ;;  %v8712_v12 = vld [vmem:[%s10283_s13 + $0x388] sm:$0xff]  }
0x11bf   : > { %6721 = vmatprep.mubr.bf16.mxu1 %v8834_v25  ;;  %6774 = vmatprep.mubr.bf16.mxu0 %v8834_v25  ;;  %v8713_v25 = vld [vmem:[%s10283_s13 + $0x350] sm:$0xff]  }
0x11c0   : > { %7982 = vmatpush3.bf16.msra.mxu1 %v8707_v38  ;;  %8010 = vmatpush3.bf16.msra.mxu0 %v8708_v39 }
0x11c1   : > { %7983 = vmatprep.subr.bf16.mxu1 %v8709_v34  ;;  %8011 = vmatprep.subr.bf16.mxu0 %v8710_v6  ;;  %v6617_v34 = vld [vmem:[%s10282_s12 + $0xc] sm:$0xf] }
0x11c4   : > { %7984 = vmatpush3.bf16.msra.mxu1 %v8711_v40  ;;  %8012 = vmatpush3.bf16.msra.mxu0 %v8712_v12 }
0x11c5   : > { %7985 = vmatprep.subr.bf16.mxu1 %v8713_v25  ;;  %8013 = vmatprep.subr.bf16.mxu0 %v8714_v41  ;;  %v6630_v41 = vrot.slane %v6617_v34, %v9767_v53 }
0x11c6   : > { %7593 = vmatmul.mubr.msk.bf16.gmra.mrb[112].mxu1 %vm568_vm0, %v9651_v35  ;;  %7595 = vmatmul.mubr.msk.bf16.gmra.mrb[108].mxu0 %vm568_vm0, %v9651_v35  ;;  %v8715_v35 = vld [vmem:[%s10283_s13 + $0x310] sm:$0xff]  }
0x11c8   : > { %7986 = vmatpush3.bf16.msra.mxu1 %v8715_v35  ;;  %8014 = vmatpush3.bf16.msra.mxu0 %v8716_v49 }
0x11c9   : > { %7987 = vmatprep.subr.bf16.mxu1 %v8717_v60  ;;  %8015 = vmatprep.subr.bf16.mxu0 %v8718_v59  ;;  %v6626_v60 = vrot.slane %v6617_v34, %v9772_v57  ;;  %v6634_v59 = vrot.slane %v6617_v34, %v9774_v58 }
0x11cc   : > { %7988 = vmatpush3.bf16.msra.mxu1 %v8719_v26  ;;  %8016 = vmatpush3.bf16.msra.mxu0 %v8720_v27 }
0x11cd   : > { %7989 = vmatprep.subr.bf16.mxu1 %v8721_v16  ;;  %8017 = vmatprep.subr.bf16.mxu0 %v8722_v29 }
0x11d0   : > { %7990 = vmatpush3.bf16.msra.mxu1 %v8723_v42  ;;  %8018 = vmatpush3.bf16.msra.mxu0 %v8724_v30 }
0x11d1   : > { %7991 = vmatprep.subr.bf16.mxu1 %v8725_v2  ;;  %8019 = vmatprep.subr.bf16.mxu0 %v8726_v21 }
0x11d4   : > { %7992 = vmatpush3.bf16.msra.mxu1 %v8727_v37  ;;  %8020 = vmatpush3.bf16.msra.mxu0 %v8728_v45 }
0x11d5   : > { %7993 = vmatprep.subr.bf16.mxu1 %v8729_v48  ;;  %8021 = vmatprep.subr.bf16.mxu0 %v8730_v15 }
0x11d8   : > { %7994 = vmatpush3.bf16.msra.mxu1 %v8731_v33  ;;  %8022 = vmatpush3.bf16.msra.mxu0 %v8732_v47 }
0x11d9   : > { %7995 = vmatprep.subr.bf16.mxu1 %v8733_v56  ;;  %8023 = vmatprep.subr.bf16.mxu0 %v8734_v28 }
0x11dc   : > { %7996 = vmatpush3.bf16.msra.mxu1 %v8735_v36  ;;  %8024 = vmatpush3.bf16.msra.mxu0 %v8736_v24 }
0x1281   : > { %v7941_v32 = vpop.f32.mrb[100].mxu1  ;;  %v7969_v1 = vpop.f32.mrb[96].mxu0 }
0x1282   : > { %v7942_v10 = vpop.f32.mrb[101].mxu1  ;;  %v7970_v23 = vpop.f32.mrb[97].mxu0 }
0x1283   : > { %v7943_v5 = vadd.f32 %v7942_v10, %v7941_v32  ;;  %v7971_v9 = vadd.f32 %v7970_v23, %v7969_v1  ;;  %v7944_v22 = vpop.f32.mrb[102].mxu1  ;;  %v7972_v11 = vpop.f32.mrb[98].mxu0 }
0x1284   : > { %v7945_v4 = vpop.f32.mrb[103].mxu1  ;;  %v7973_v13 = vpop.f32.mrb[99].mxu0 }
0x1285   : > { %v6591_v18 = vadd.f32 %v7971_v9, %v7943_v5  ;;  %v7946_v51 = vadd.f32 %v7945_v4, %v7944_v22  ;;  %v7974_v14 = vadd.f32 %v7973_v13, %v7972_v11 }
0x1287   : > { %v10215_v62 = vadd.f32 %v6591_v18, %v10073_v44  ;;  %v6594_v3 = vadd.f32 %v7974_v14, %v7946_v51 }
0x1289   : > { %v10218_v46 = vadd.f32 %v6594_v3, %v10075_v50  ;;  %v7947_v7 = vpop.f32.mrb[104].mxu1  ;;  %v7975_v61 = vpop.f32.mrb[100].mxu0  ;;  %v6622_v50 = vrot.slane %v6617_v34, %v9765_v52 }
0x128a   : > { %v7948_v55 = vpop.f32.mrb[105].mxu1  ;;  %v7976_v8 = vpop.f32.mrb[101].mxu0 }
0x128b   : > { %v7949_v19 = vadd.f32 %v7948_v55, %v7947_v7  ;;  %v7977_v20 = vadd.f32 %v7976_v8, %v7975_v61  ;;  %v7950_v38 = vpop.f32.mrb[106].mxu1  ;;  %v7978_v39 = vpop.f32.mrb[102].mxu0 }
0x128c   : > { %v7951_v6 = vpop.f32.mrb[107].mxu1  ;;  %v7979_v40 = vpop.f32.mrb[103].mxu0 }
0x128d   : > { %v6599_v44 = vadd.f32 %v7977_v20, %v7949_v19  ;;  %v7952_v12 = vadd.f32 %v7951_v6, %v7950_v38  ;;  %v7980_v25 = vadd.f32 %v7979_v40, %v7978_v39 }
0x128f   : > { %v10226_v35 = vadd.f32 %v6599_v44, %v10082_v0  ;;  %v6602_v49 = vadd.f32 %v7980_v25, %v7952_v12 }
0x1291   : > { %v10231_v26 = vadd.f32 %v6602_v49, %v10086_v43  ;;  %v6713_v27 = vpop.f32.mrb[108].mxu1  ;;  %v6766_v16 = vpop.f32.mrb[104].mxu0 }
0x1292   : > { %v6714_v29 = vadd.f32 %v6713_v27, %v6622_v50  ;;  %v6767_v42 = vadd.f32 %v6766_v16, %v6630_v41  ;;  %v6715_v30 = vpop.f32.mrb[109].mxu1  ;;  %v6768_v2 = vpop.f32.mrb[105].mxu0 }
0x1293   : > { %v6716_v52 = vadd.f32 %v6715_v30, %v6626_v60  ;;  %v6769_v21 = vadd.f32 %v6768_v2, %v6634_v59  ;;  %v6717_v53 = vpop.f32.mrb[110].mxu1  ;;  %v6770_v37 = vpop.f32.mrb[106].mxu0 }
0x1294   : > { %v6718_v0 = vadd.f32 %v6717_v53, %v6622_v50  ;;  %v6771_v45 = vadd.f32 %v6770_v37, %v6630_v41  ;;  %v6719_v48 = vpop.f32.mrb[111].mxu1  ;;  %v6772_v15 = vpop.f32.mrb[107].mxu0  ;;  %v6785_v58 = vmax.f32 %v6714_v29, 0.0  ;;  %v6787_v47 = vmax.f32 %v6767_v42, 0.0 }
0x1295   : > { %v6720_v57 = vadd.f32 %v6719_v48, %v6626_v60  ;;  %v6773_v33 = vadd.f32 %v6772_v15, %v6634_v59  ;;  %v6786_v28 = vmax.f32 %v6716_v52, 0.0  ;;  %v6788_v36 = vmax.f32 %v6769_v21, 0.0  ;;  %v7628_v15 = vld [vmem:[%s10284_s14] ss:$0 sm:$0xff] }
0x1296   : > { %v6789_v43 = vmax.f32 %v6718_v0, 0.0  ;;  %v6791_v56 = vmax.f32 %v6771_v45, 0.0 }
0x1297   : > { %v6790_v24 = vmax.f32 %v6720_v57, 0.0  ;;  %v6792_v32 = vmax.f32 %v6773_v33, 0.0 }
0x1298   : > { %v6801_v1 = vpack.c.bf16 %v6789_v43, %v6785_v58  ;;  %v6803_v10 = vpack.c.bf16 %v6791_v56, %v6787_v47 }
0x1299   : > { %v6802_v23 = vpack.c.bf16 %v6790_v24, %v6786_v28  ;;  %v6804_v5 = vpack.c.bf16 %v6792_v32, %v6788_v36  ;;  %v6723_v9 = vpop.f32.mrb[112].mxu1  ;;  %v6776_v22 = vpop.f32.mrb[108].mxu0 }
0x129a   : > { %v6724_v11 = vadd.f32 %v6723_v9, %v6622_v50  ;;  %v6777_v4 = vadd.f32 %v6776_v22, %v6630_v41  ;;  %v6725_v13 = vpop.f32.mrb[113].mxu1  ;;  %v6778_v18 = vpop.f32.mrb[109].mxu0 }
0x129b   : > { %v6726_v51 = vadd.f32 %v6725_v13, %v6626_v60  ;;  %v6779_v14 = vadd.f32 %v6778_v18, %v6634_v59  ;;  %v6727_v3 = vpop.f32.mrb[114].mxu1  ;;  %v6780_v7 = vpop.f32.mrb[110].mxu0  ;;  %7097 = vmatprep.mubr.bf16.mxu1 %v6802_v23  ;;  %7146 = vmatprep.mubr.bf16.mxu0 %v6804_v5 }
0x129c   : > { %v6728_v61 = vadd.f32 %v6727_v3, %v6622_v50  ;;  %v6781_v55 = vadd.f32 %v6780_v7, %v6630_v41  ;;  %v6729_v8 = vpop.f32.mrb[115].mxu1  ;;  %v6782_v19 = vpop.f32.mrb[111].mxu0  ;;  %7098 = vmatmul.mubr.bf16.vlgmr.msra.gmra.mrb[116].mxu1 %v6801_v1  ;;  %7147 = vmatmul.mubr.bf16.vlgmr.msra.gmra.mrb[112].mxu0 %v6803_v10  ;;  %v6793_v39 = vmax.f32 %v6724_v11, 0.0  ;;  %v6795_v34 = vmax.f32 %v6777_v4, 0.0 }
0x129d   : > { %v6730_v20 = vadd.f32 %v6729_v8, %v6626_v60  ;;  %v6783_v38 = vadd.f32 %v6782_v19, %v6634_v59  ;;  %v6794_v44 = vmax.f32 %v6726_v51, 0.0  ;;  %v6796_v12 = vmax.f32 %v6779_v14, 0.0 }
0x129e   : > { %v6797_v6 = vmax.f32 %v6728_v61, 0.0  ;;  %v6799_v40 = vmax.f32 %v6781_v55, 0.0 }
0x129f   : > { %v6798_v25 = vmax.f32 %v6730_v20, 0.0  ;;  %v6800_v49 = vmax.f32 %v6783_v38, 0.0 }
0x12a0   : > { %v6805_v27 = vpack.c.bf16 %v6797_v6, %v6793_v39  ;;  %v6807_v16 = vpack.c.bf16 %v6799_v40, %v6795_v34 }
0x12a1   : > { %v6806_v29 = vpack.c.bf16 %v6798_v25, %v6794_v44  ;;  %v6808_v42 = vpack.c.bf16 %v6800_v49, %v6796_v12 }
0x12a3   : > { %7105 = vmatprep.mubr.bf16.mxu1 %v6806_v29  ;;  %7154 = vmatprep.mubr.bf16.mxu0 %v6808_v42 }
0x12a4   : > { %7106 = vmatmul.mubr.bf16.gmra.mrb[120].mxu1 %v6805_v27  ;;  %7155 = vmatmul.mubr.bf16.gmra.mrb[116].mxu0 %v6807_v16 }
0x136f   : > { %v7997_v50 = vpop.f32.mrb[116].mxu1  ;;  %v8025_v41 = vpop.f32.mrb[112].mxu0 }
0x1370   : > { %v7998_v60 = vpop.f32.mrb[117].mxu1  ;;  %v8026_v59 = vpop.f32.mrb[113].mxu0 }
0x1371   : > { %v7999_v30 = vadd.f32 %v7998_v60, %v7997_v50  ;;  %v8027_v2 = vadd.f32 %v8026_v59, %v8025_v41  ;;  %v8000_v52 = vpop.f32.mrb[118].mxu1  ;;  %v8028_v21 = vpop.f32.mrb[114].mxu0 }
0x1372   : > { %v8001_v53 = vpop.f32.mrb[119].mxu1  ;;  %v8029_v37 = vpop.f32.mrb[115].mxu0 }
0x1373   : > { %v7149_v0 = vadd.f32 %v8027_v2, %v7999_v30  ;;  %v8002_v45 = vadd.f32 %v8001_v53, %v8000_v52  ;;  %v8030_v48 = vadd.f32 %v8029_v37, %v8028_v21 }
0x1375   : > { %v7163_v57 = vadd.f32 %v7149_v0, %v10215_v62  ;;  %v7152_v33 = vadd.f32 %v8030_v48, %v8002_v45 }
0x1377   : > { %v7164_v58 = vadd.f32 %v7152_v33, %v10218_v46  ;;  %v8003_v47 = vpop.f32.mrb[120].mxu1  ;;  %v8031_v43 = vpop.f32.mrb[116].mxu0  ;;  %v7174_v56 = vadd.f32 %v7628_v15, %v7163_v57 }
0x1378   : > { %v8004_v28 = vpop.f32.mrb[121].mxu1  ;;  %v8032_v36 = vpop.f32.mrb[117].mxu0 }
0x1379   : > { %v8005_v24 = vadd.f32 %v8004_v28, %v8003_v47  ;;  %v8033_v32 = vadd.f32 %v8032_v36, %v8031_v43  ;;  %v8006_v1 = vpop.f32.mrb[122].mxu1  ;;  %v8034_v10 = vpop.f32.mrb[118].mxu0  ;;  %v7178_v23 = vadd.f32 %v7174_v56, %v9615_v63  ;;  %v7175_v5 = vadd.f32 %v7628_v15, %v7164_v58  ;;  %v7630_v58 = vld [vmem:[%s10286_s16] ss:$0 sm:$0xff] }
0x137a   : > { %v8007_v9 = vpop.f32.mrb[123].mxu1  ;;  %v8035_v22 = vpop.f32.mrb[119].mxu0 }
0x137b   : > { %v7157_v11 = vadd.f32 %v8033_v32, %v8005_v24  ;;  %v8008_v4 = vadd.f32 %v8007_v9, %v8006_v1  ;;  %v8036_v62 = vadd.f32 %v8035_v22, %v8034_v10  ;;  %v7184_v13 = vsel %vm568_vm0, %v7178_v23, 0.0 }
0x137c   : > { %7185 = vadd.xlane.f32.xlu1 %v7184_v13  ;;  %v7179_v46 = vadd.f32 %v7175_v5, %v9618_v54 }
0x137d   : > { %v7165_v18 = vadd.f32 %v7157_v11, %v10226_v35  ;;  %v7160_v51 = vadd.f32 %v8036_v62, %v8008_v4 }
0x137e   : > { %v7187_v3 = vsel %vm568_vm0, %v7179_v46, 0.0 }
0x137f   : > { %v7166_v14 = vadd.f32 %v7160_v51, %v10231_v26  ;;  %v7176_v7 = vadd.f32 %v7628_v15, %v7165_v18 }
0x1380   : > { %7188 = vadd.xlane.f32.xlu1 %v7187_v3 }
0x1381   : > { %v7180_v63 = vadd.f32 %v7176_v7, %v9647_v31  ;;  %v7177_v61 = vadd.f32 %v7628_v15, %v7166_v14  ;;  %v7629_v15 = vld [vmem:[%s10285_s15] ss:$0 sm:$0xff] }
0x1383   : > { %v7190_v55 = vsel %vm568_vm0, %v7180_v63, 0.0  ;;  %v7181_v8 = vadd.f32 %v7177_v61, %v9637_v17 }
0x1384   : > { %7191 = vadd.xlane.f32.xlu1 %v7190_v55 }
0x1385   : > { %v7193_v19 = vsel %vm568_vm0, %v7181_v8, 0.0 }
0x1388   : > { %7194 = vadd.xlane.f32.xlu1 %v7193_v19 }
0x1409   : > { %v7186_v54 = vpop.xlane.xlu1 %7185 }
0x140a   : > { %v7196_v35 = vmul.f32 0.03125, %v7186_v54 }
0x140c   : > { %v7200_v20 = vsub.f32 %v7178_v23, %v7196_v35 }
0x140d   : > { %v7189_v38 = vpop.xlane.xlu1 %7188 }
0x140e   : > { %v7197_v26 = vmul.f32 0.03125, %v7189_v38  ;;  %v7204_v39 = vmul.f32 %v7200_v20, %v7200_v20 }
0x1410   : > { %v7201_v34 = vsub.f32 %v7179_v46, %v7197_v26  ;;  %v7208_v6 = vsel %vm568_vm0, %v7204_v39, 0.0 }
0x1411   : > { %7209 = vadd.xlane.f32.xlu1 %v7208_v6  ;;  %v7192_v31 = vpop.xlane.xlu1 %7191 }
0x1412   : > { %v7198_v40 = vmul.f32 0.03125, %v7192_v31  ;;  %v7205_v44 = vmul.f32 %v7201_v34, %v7201_v34 }
0x1414   : > { %v7202_v12 = vsub.f32 %v7180_v63, %v7198_v40  ;;  %v7211_v17 = vsel %vm568_vm0, %v7205_v44, 0.0 }
0x1415   : > { %7212 = vadd.xlane.f32.xlu1 %v7211_v17  ;;  %v7195_v25 = vpop.xlane.xlu1 %7194 }
0x1416   : > { %v7199_v49 = vmul.f32 0.03125, %v7195_v25  ;;  %v7206_v27 = vmul.f32 %v7202_v12, %v7202_v12 }
0x1418   : > { %v7203_v16 = vsub.f32 %v7181_v8, %v7199_v49  ;;  %v7214_v29 = vsel %vm568_vm0, %v7206_v27, 0.0 }
0x1419   : > { %7215 = vadd.xlane.f32.xlu1 %v7214_v29 }
0x141a   : > { %v7207_v42 = vmul.f32 %v7203_v16, %v7203_v16 }
0x141c   : > { %v7217_v50 = vsel %vm568_vm0, %v7207_v42, 0.0 }
0x141d   : > { %7218 = vadd.xlane.f32.xlu0 %v7217_v50 }
0x149e   : > { %v7210_v41 = vpop.xlane.xlu1 %7209 }
0x149f   : > { %v7220_v60 = vmul.f32 0.03125, %v7210_v41 }
0x14a1   : > { %v7224_v59 = vadd.f32 1e-05, %v7220_v60 }
0x14a2   : > { %v7213_v30 = vpop.xlane.xlu1 %7212 }
0x14a3   : > { %8809 = vrsqrt.f32 %v7224_v59  ;;  %v7221_v2 = vmul.f32 0.03125, %v7213_v30 }
0x14a5   : > { %v7225_v52 = vadd.f32 1e-05, %v7221_v2 }
0x14a6   : > { %v7216_v21 = vpop.xlane.xlu1 %7215 }
0x14a7   : > { %8811 = vrsqrt.f32 %v7225_v52  ;;  %v7222_v53 = vmul.f32 0.03125, %v7216_v21 }
0x14a9   : > { %v7226_v37 = vadd.f32 1e-05, %v7222_v53 }
0x14aa   : > { %v7219_v0 = vpop.xlane.xlu0 %7218 }
0x14ab   : > { %8813 = vrsqrt.f32 %v7226_v37  ;;  %v7223_v45 = vmul.f32 0.03125, %v7219_v0 }
0x14ad   : > { %v8810_v48 = vpop.eup %8809  ;;  %v7227_v57 = vadd.f32 1e-05, %v7223_v45 }
0x14ae   : > { %v7232_v33 = vmul.f32 %v8810_v48, %v7200_v20 }
0x14af   : > { %8815 = vrsqrt.f32 %v7227_v57 }
0x14b0   : > { %v7242_v47 = vmul.f32 %v7629_v15, %v7232_v33 }
0x14b1   : > { %v8812_v43 = vpop.eup %8811 }
0x14b2   : > { %v7252_v56 = vadd.f32 %v7630_v58, %v7242_v47  ;;  %v7233_v28 = vmul.f32 %v8812_v43, %v7201_v34 }
0x14b4   : > { %7256 = vst.msk [vmem:[%s550_s20] sm:$0xff] %vm568_vm0, %v7252_v56  ;;  %v7243_v36 = vmul.f32 %v7629_v15, %v7233_v28 }
0x14b5   : > { %v8814_v24 = vpop.eup %8813 }
0x14b6   : > { %v7253_v32 = vadd.f32 %v7630_v58, %v7243_v36  ;;  %v7234_v1 = vmul.f32 %v8814_v24, %v7202_v12 }
0x14b8   : > { %7257 = vst.msk [vmem:[%s550_s20 + $0x8] sm:$0xff] %vm568_vm0, %v7253_v32  ;;  %v7244_v10 = vmul.f32 %v7629_v15, %v7234_v1 }
0x14b9   : > { %v8816_v23 = vpop.eup %8815 }
0x14ba   : > { %v7254_v5 = vadd.f32 %v7630_v58, %v7244_v10  ;;  %v7235_v9 = vmul.f32 %v8816_v23, %v7203_v16 }
0x14bc   : > { %7258 = vst.msk [vmem:[%s550_s20 + $0x10] sm:$0xff] %vm568_vm0, %v7254_v5  ;;  %v7245_v22 = vmul.f32 %v7629_v15, %v7235_v9 }
0x14be   : > { %v7255_v11 = vadd.f32 %v7630_v58, %v7245_v22 }
0x14c0   : > { %7259 = vst.msk [vmem:[%s550_s20 + $0x18] sm:$0xff] %vm568_vm0, %v7255_v11 }
0x14c1 PF: > { %s27_s24 = sadd.s32 1, %s8827_s24  }
0x14c2   : > { %p24_p4 = scmp.ge.s32.totalorder %s27_s24, 4  }
0x14c4   :  { %26 = sbr.rel (!%p24_p4) target bundleno = 3 (0x3), region = 118 }

// kernel: _lambda_.5
= control target key start
LH: loop header
LB: loop body
LE: loop exit
PB: predicated region body
PF: predicated region fallthrough
CT: control target
= control target key end

     0   :  { %s10487_s0 = inlined_call_operand.vmem [shape: f32[64,32], index: 0, kind: input, shape index: {}]   ;;  %s10488_s1 = inlined_call_operand.vmem [shape: f32[64,32], index: 1, kind: input, shape index: {}]   ;;  %s10489_s2 = inlined_call_operand.vmem [shape: f32[8,8], index: 2, kind: input, shape index: {}]   ;;  %s10490_s3 = inlined_call_operand.vmem [shape: f32[32,32], index: 3, kind: input, shape index: {}]   ;;  %s10491_s4 = inlined_call_operand.vmem [shape: f32[1,32], index: 4, kind: input, shape index: {}]   ;;  %s10492_s5 = inlined_call_operand.vmem [shape: f32[32,32], index: 5, kind: input, shape index: {}]   ;;  %s10493_s6 = inlined_call_operand.vmem [shape: f32[1,32], index: 6, kind: input, shape index: {}]   ;;  %s10494_s7 = inlined_call_operand.vmem [shape: f32[32,32], index: 7, kind: input, shape index: {}]   ;;  %s10495_s8 = inlined_call_operand.vmem [shape: f32[1,32], index: 8, kind: input, shape index: {}]   ;;  %s10496_s9 = inlined_call_operand.vmem [shape: f32[32,32], index: 9, kind: input, shape index: {}]   ;;  %s10497_s10 = inlined_call_operand.vmem [shape: f32[1,32], index: 10, kind: input, shape index: {}]   ;;  %s10498_s11 = inlined_call_operand.vmem [shape: f32[1,32], index: 11, kind: input, shape index: {}]   ;;  %s10499_s12 = inlined_call_operand.vmem [shape: f32[1,32], index: 12, kind: input, shape index: {}]   ;;  %s10500_s13 = inlined_call_operand.vmem [shape: bf16[32,2048], index: 13, kind: input, shape index: {}]   ;;  %s10501_s14 = inlined_call_operand.vmem [shape: f32[1,2048], index: 14, kind: input, shape index: {}]   ;;  %s10502_s15 = inlined_call_operand.vmem [shape: bf16[2048,32], index: 15, kind: input, shape index: {}]   ;;  %s10503_s16 = inlined_call_operand.vmem [shape: f32[1,32], index: 16, kind: input, shape index: {}]   ;;  %s10504_s17 = inlined_call_operand.vmem [shape: f32[1,32], index: 17, kind: input, shape index: {}]   ;;  %s10505_s18 = inlined_call_operand.vmem [shape: f32[1,32], index: 18, kind: input, shape index: {}]   ;;  %s10506_s19 = inlined_call_operand.vmem [shape: f32[1,32], index: 19, kind: input, shape index: {}]   ;;  %s10507_s20 = inlined_call_operand.vmem [shape: f32[64,1], index: 20, kind: output, shape index: {}]  }
   0x1   :  { %10512 = sst [smem:[#allocation3_spill]] %s10487_s0 }
   0x2   :  { %10513 = sst [smem:[#allocation4_spill]] %s10488_s1  ;;  %s9104_s1 = smov 0  }
   0x3   :  { %10514 = sst [smem:[#allocation5_spill]] %s10489_s2 }
   0x4   :  { %10515 = sst [smem:[#allocation6_spill]] %s10490_s3 }
   0x5   :  { %10516 = sst [smem:[#allocation7_spill]] %s10491_s4 }
   0x6   :  { %10517 = sst [smem:[#allocation8_spill]] %s10507_s20 }
   0x7 LB: > { %10518 = sst [smem:[#allocation2_spill]] %s8991_s1  ;;  %s7472_s22 = sadd.s32 4294967295, %s8991_s1   ;;  %s8991_s1 = sphi %s9104_s1, %s30_s1  }
   0x8   : > { %p7476_p0 = scmp.ge.s32.totalorder %s8991_s1, 1  ;;  %p574_p1 = scmp.lt.s32.totalorder %s8991_s1, 3 }
   0xa   : > { %p575_p2 = pnand %p7476_p0, %p574_p1 }
   0xb   : > { %v9115_v0 = vld [vmem:[%s10492_s5] sm:$0xff] (!%p575_p2)  ;;  %v9120_v1 = vld [vmem:[%s10492_s5 + $0x8] sm:$0xff] (!%p575_p2)  ;;  %s10519_s27 = sld [smem:[#allocation6_spill]] (!%p575_p2)  ;;  %s7477_s28 = sshll.u32 (!%p575_p2), %s7472_s22, 2  ;;  %v9137_v5 = vld [vmem:[%s10492_s5 + $0x10] sm:$0xff] (!%p575_p2)  ;;  %vm676_vm0 = vcmask (!%p575_p2), 261120  }
   0xc   : > { %578 = sbr.rel (%p575_p2) target bundleno = 5470 (0x155e), region = 100  ;;  %v8564_v3 = vpack.c.bf16 (!%p575_p2), %v9120_v1, %v9115_v0  ;;  %v9142_v6 = vld [vmem:[%s10492_s5 + $0x18] sm:$0xff] (!%p575_p2)  ;;  %p638_p3 = scmp.lt.s32.totalorder (!%p575_p2), %s7477_s28, 7  ;;  %v9161_v11 = vld [vmem:[%s10494_s7] sm:$0xff] (!%p575_p2)  ;;  %v9168_v13 = vld [vmem:[%s10494_s7 + $0x8] sm:$0xff] (!%p575_p2)  ;;  %v8993_v22 = vmov (!%p575_p2), 0.0  }
   0xd   : > { %v8568_v8 = vpack.c.bf16 (!%p575_p2), %v9142_v6, %v9137_v5  ;;  %s10520_s23 = sld [smem:[#allocation3_spill]] (!%p575_p2)  ;;  %v8572_v14 = vpack.c.bf16 (!%p575_p2), %v9168_v13, %v9161_v11  ;;  %v9211_v19 = vld [vmem:[%s10494_s7 + $0x10] sm:$0xff] (!%p575_p2)  ;;  %v9216_v20 = vld [vmem:[%s10494_s7 + $0x18] sm:$0xff] (!%p575_p2)  ;;  %s10521_s4 = sld [smem:[#allocation4_spill]] (!%p575_p2)  ;;  %vm8994_vm1 = vmmov (!%p575_p2), 0   ;;  %vm978_vm2 = vcmask (!%p575_p2), 64512  }
   0xe   : > { %8565 = vmatprep.subr.bf16.mxu1 (!%p575_p2), %v8564_v3  ;;  %v8576_v21 = vpack.c.bf16 (!%p575_p2), %v9216_v20, %v9211_v19  ;;  %v9255_v27 = vld [vmem:[%s10493_s6] ss:$0 sm:$0xff] (!%p575_p2)  ;;  %s10522_s24 = sld [smem:[#allocation7_spill]] (!%p575_p2)  ;;  %s8995_s0 = smov (!%p575_p2), 120   ;;  %vm7399_vm3 = vcmask (!%p575_p2), 7168  }
   0xf   : > { %8567 = vmatpush3.bf16.msra.mxu1 (!%p575_p2), %v8564_v3  ;;  %v9293_v46 = vld [vmem:[%s10495_s8] ss:$0 sm:$0xff] (!%p575_p2)  ;;  %s8996_s21 = smov (!%p575_p2), 112   ;;  %s8997_s3 = smov (!%p575_p2), 104  }
  0x10   : > { %8569 = vmatprep.subr.bf16.mxu1 (!%p575_p2), %v8568_v8  ;;  %s10524_s25 = sld [smem:[#allocation8_spill]] (!%p575_p2) }
  0x11   : > { %v9125_v2 = vld [vmem:[%s10519_s27] sm:$0xff] (!%p575_p2)  ;;  %v9132_v4 = vld [vmem:[%s10519_s27 + $0x8] sm:$0xff] (!%p575_p2)  ;;  %v9151_v9 = vld [vmem:[%s10519_s27 + $0x10] sm:$0xff] (!%p575_p2) }
  0x12   : > { %v8556_v7 = vpack.c.bf16 (!%p575_p2), %v9132_v4, %v9125_v2  ;;  %v9156_v10 = vld [vmem:[%s10519_s27 + $0x18] sm:$0xff] (!%p575_p2) }
  0x13   : > { %v8560_v12 = vpack.c.bf16 %v9156_v10, %v9151_v9  ;;  %s10527_s28 = smov (!%p638_p3, %s7477_s28), 7  ;;  %8571 = vmatpush3.bf16.msra.mxu1 %v8568_v8 }
  0x14   : > { %8557 = vmatprep.subr.bf16.mxu0 %v8556_v7  ;;  %s9170_s30 = sshll.u32 %s10527_s28, 3  ;;  %8238 = vmatprep.subr.mxu1 %v8993_v22  ;;  %v9260_v29 = vld [vmem:[%s10522_s24] ss:$0 sm:$0xff] }
  0x15   : > { %8559 = vmatpush3.bf16.msra.mxu0 %v8556_v7  ;;  %s9176_s22 = scalar_lea.vmem %s10520_s23, %s9170_s30  ;;  %s9225_s29 = scalar_lea.vmem %s10521_s4, %s9170_s30 }
  0x16   : > { %8561 = vmatprep.subr.bf16.mxu0 %v8560_v12  ;;  %v9181_v15 = vld [vmem:[%s9176_s22] sm:$0xff]  ;;  %v9184_v16 = vld [vmem:[%s9176_s22 + $0x8] sm:$0xff]  ;;  %v9189_v17 = vld [vmem:[%s9176_s22 + $0x10] sm:$0xff]  ;;  %s10523_s4 = sld [smem:[#allocation5_spill]]  ;;  %s653_s26 = scalar_lea.vmem %s10524_s25, %s9170_s30 }
  0x17   : > { %8218 = vmatprep.mubr.msk.f32.mxu1 %vm676_vm0, %v9181_v15  ;;  %8204 = vmatprep.mubr.msk.f32.mxu0 %vm676_vm0, %v9181_v15  ;;  %v9194_v18 = vld [vmem:[%s9176_s22 + $0x18] sm:$0xff]  ;;  %v9229_v23 = vld [vmem:[%s9225_s29] sm:$0xff]  ;;  %v9232_v24 = vld [vmem:[%s9225_s29 + $0x8] sm:$0xff] }
  0x18   : > { %8219 = vmatmul.mubr.msk.f32.vlgmr.msra.gmra.mrb[0].mxu1 %vm676_vm0, %v9184_v16  ;;  %v9241_v25 = vld [vmem:[%s9225_s29 + $0x10] sm:$0xff]  ;;  %v9244_v26 = vld [vmem:[%s9225_s29 + $0x18] sm:$0xff] }
  0x19   : > { %8563 = vmatpush3.bf16.msra.mxu0 %v8560_v12  ;;  %8221 = vmatprep.mubr.msk.f32.mxu1 %vm676_vm0, %v9189_v17 }
  0x1a   : > { %8573 = vmatprep.subr.bf16.mxu0 %v8572_v14 }
  0x1c   : > { %8205 = vmatmul.mubr.msk.f32.vlgmr.msra.gmra.mrb[0].mxu0 %vm676_vm0, %v9184_v16  ;;  %8222 = vmatmul.mubr.msk.f32.gmra.mrb[2].mxu1 %vm676_vm0, %v9194_v18  ;;  %v9306_v54 = vld [vmem:[%s10523_s4] sm:$0xff] }
  0x1d   : > { %8207 = vmatprep.mubr.msk.f32.mxu0 %vm676_vm0, %v9189_v17  ;;  %8575 = vmatpush3.bf16.msra.mxu0 %v8572_v14 }
  0x1e   : > { %8577 = vmatprep.subr.bf16.mxu0 %v8576_v21  ;;  %8240 = vmatprep.mubr.msk.f32.mxu1 %vm8994_vm1, %v8993_v22 }
  0x20   : > { %8208 = vmatmul.mubr.msk.f32.gmra.mrb[2].mxu0 %vm676_vm0, %v9194_v18 }
  0x21   : > { %8579 = vmatpush3.bf16.msra.mxu0 %v8576_v21  ;;  %8232 = vmatprep.mubr.msk.f32.mxu0 %vm676_vm0, %v9229_v23 }
  0x22   : > { %8248 = vmatprep.subr.mxu0 %v8993_v22 }
  0x24   : > { %8233 = vmatmul.mubr.msk.f32.vlgmr.msra.gmra.mrb[4].mxu0 %vm676_vm0, %v9232_v24 }
  0x25   : > { %8235 = vmatprep.mubr.msk.f32.mxu0 %vm676_vm0, %v9241_v25 }
  0x28   : > { %8236 = vmatmul.mubr.msk.f32.gmra.mrb[6].mxu0 %vm676_vm0, %v9244_v26 }
  0x29   : > { %8250 = vmatprep.mubr.msk.f32.mxu0 %vm8994_vm1, %v8993_v22 }
  0xeb   : > { %v8220_v28 = vpop.f32.mrb[0].mxu1 }
  0xec   : > { %v851_v30 = vpop.f32.mrb[1].mxu1  ;;  %v857_v38 = vadd.f32 %v8220_v28, %v9255_v27 }
  0xed   : > { %v852_v32 = vadd.f32 %v9255_v27, %v851_v30 }
  0xef   : > { %v8206_v31 = vpop.f32.mrb[0].mxu0  ;;  %8239 = vmatpush3.xpose.msk.msra.mxu1 %vm978_vm2, %v852_v32  ;;  %v8223_v35 = vpop.f32.mrb[2].mxu1 }
  0xf0   : > { %v755_v33 = vpop.f32.mrb[1].mxu0  ;;  %8243 = vmatprep.subr.mxu1 %v8993_v22  ;;  %v861_v36 = vpop.f32.mrb[3].mxu1  ;;  %v867_v41 = vadd.f32 %v8223_v35, %v9255_v27  ;;  %v761_v43 = vadd.f32 %v8206_v31, %v9260_v29 }
  0xf1   : > { %v756_v34 = vadd.f32 %v9260_v29, %v755_v33  ;;  %v862_v39 = vadd.f32 %v9255_v27, %v861_v36 }
  0xf3   : > { %v8209_v37 = vpop.f32.mrb[2].mxu0  ;;  %8241 = vmatmul.mubr.msk.f32.vlgmr.msra.gmra.mrb[4].mxu1 %vm978_vm2, %v756_v34  ;;  %8249 = vmatpush3.xpose.msk.msra.mxu0 %vm978_vm2, %v862_v39 }
  0xf4   : > { %v765_v40 = vpop.f32.mrb[3].mxu0  ;;  %8244 = vmatpush3.xpose.msk.msra.mxu1 %vm978_vm2, %v857_v38  ;;  %8245 = vmatprep.mubr.msk.f32.mxu1 %vm8994_vm1, %v8993_v22  ;;  %v771_v44 = vadd.f32 %v8209_v37, %v9260_v29 }
  0xf5   : > { %v766_v42 = vadd.f32 %v9260_v29, %v765_v40  ;;  %8253 = vmatprep.subr.mxu1 %v8993_v22  ;;  %8258 = vmatprep.subr.mxu0 %v8993_v22 }
  0xf7   : > { %8246 = vmatmul.mubr.msk.f32.vlgmr.msra.gmra.mrb[6].mxu1 %vm978_vm2, %v761_v43  ;;  %8251 = vmatmul.mubr.msk.f32.vlgmr.msra.gmra.mrb[8].mxu0 %vm978_vm2, %v766_v42  ;;  %v8234_v45 = vpop.f32.mrb[4].mxu0 }
  0xf8   : > { %8254 = vmatpush3.xpose.msk.msra.mxu1 %vm978_vm2, %v867_v41  ;;  %8255 = vmatprep.mubr.msk.f32.mxu1 %vm8994_vm1, %v8993_v22  ;;  %v965_v47 = vadd.f32 %v8234_v45, %v9293_v46  ;;  %v959_v48 = vpop.f32.mrb[5].mxu0 }
  0xf9   : > { %8263 = vmatprep.subr.mxu1 %v8993_v22  ;;  %8260 = vmatprep.mubr.msk.f32.mxu0 %vm8994_vm1, %v8993_v22  ;;  %v960_v49 = vadd.f32 %v9293_v46, %v959_v48 }
  0xfb   : > { %8256 = vmatmul.mubr.msk.f32.vlgmr.msra.gmra.mrb[8].mxu1 %vm978_vm2, %v771_v44  ;;  %v9297_v50 = vpop.f32.mrb[6].mxu0  ;;  %8259 = vmatpush3.msra.mxu0 %v960_v49  ;;  %v9322_v49 = vpack.i.bf16 %v9132_v4, %v9125_v2  ;;  %v9340_v2 = vpack.i.bf16 %v9156_v10, %v9151_v9 }
  0xfc   : > { %8265 = vmatprep.mubr.msk.f32.mxu1 %vm8994_vm1, %v8993_v22  ;;  %8264 = vmatpush3.msra.mxu1 %v965_v47  ;;  %v9300_v51 = vpop.f32.mrb[7].mxu0 }
  0xfd   : > { %8273 = vmatprep.subr.mxu1 %v8993_v22  ;;  %8268 = vmatprep.subr.mxu0 %v8993_v22 }
 0x1c6   : > { %v1051_v52 = vpop.f32.mrb[4].mxu1 }
 0x1c7   : > { %v8242_v53 = vpop.f32.mrb[5].mxu1  ;;  %v1052_v60 = vadd.f32 %v1051_v52, %v9306_v54  ;;  %v9326_v52 = vpack.i.bf16 %v9120_v1, %v9115_v0  ;;  %v9346_v0 = vpack.i.bf16 %v9168_v13, %v9161_v11  ;;  %v9350_v1 = vpack.i.bf16 %v9216_v20, %v9211_v19 }
 0x1c8   : > { %v9332_v53 = vpack.i.bf16 %v9142_v6, %v9137_v5 }
 0x1c9   : > { %v1283_v8 = vsel %vm978_vm2, %v1052_v60, -inf }
 0x1ca   : > { %v1127_v55 = vpop.f32.mrb[6].mxu1  ;;  %v1203_v58 = vpop.f32.mrb[8].mxu0 }
 0x1cb   : > { %v1128_v56 = vadd.f32 %v1127_v55, %v9306_v54  ;;  %v8247_v57 = vpop.f32.mrb[7].mxu1  ;;  %v8252_v59 = vpop.f32.mrb[9].mxu0  ;;  %v1204_v7 = vadd.f32 %v1203_v58, %v9306_v54 }
 0x1cc   : > { %v975_v57 = vadd.f32 %v9297_v50, %v9293_v46 }
 0x1cd   : > { %v1286_v61 = vsel %vm978_vm2, %v1128_v56, -inf  ;;  %v1289_v14 = vsel %vm978_vm2, %v1204_v7, -inf }
 0x1ce   : > { %1287 = vmax.xlane.f32.xlu0 %v1286_v61  ;;  %v1279_v62 = vpop.f32.mrb[8].mxu1 }
 0x1cf   : > { %v1280_v63 = vadd.f32 %v1279_v62, %v9306_v54  ;;  %v8257_v3 = vpop.f32.mrb[9].mxu1 }
 0x1d0   : > { %v970_v3 = vadd.f32 %v9293_v46, %v9300_v51 }
 0x1d1   : > { %v1292_v12 = vsel %vm978_vm2, %v1280_v63, -inf }
 0x1d2   : > { %1284 = vmax.xlane.f32.xlu0 %v1283_v8  ;;  %1293 = vmax.xlane.f32.xlu1 %v1292_v12 }
 0x1d6   : > { %1290 = vmax.xlane.f32.xlu1 %v1289_v14 }
 0x25b   : > { %v1288_v21 = vpop.xlane.xlu0 %1287 }
 0x25c   : > { %v1296_v28 = vsub.f32 %v1128_v56, %v1288_v21 }
 0x25e   : > { %v1301_v30 = vmul.f32 1.442695, %v1296_v28 }
 0x25f   : > { %v1285_v31 = vpop.xlane.xlu0 %1284  ;;  %v1294_v32 = vpop.xlane.xlu1 %1293 }
 0x260   : > { %8896 = vpow2.f32 %v1301_v30  ;;  %v1295_v33 = vsub.f32 %v1052_v60, %v1285_v31  ;;  %v1298_v34 = vsub.f32 %v1280_v63, %v1294_v32 }
 0x262   : > { %v1299_v35 = vmul.f32 1.442695, %v1295_v33  ;;  %v1305_v36 = vmul.f32 1.442695, %v1298_v34 }
 0x263   : > { %v1291_v37 = vpop.xlane.xlu1 %1290 }
 0x264   : > { %8898 = vpow2.f32 %v1299_v35  ;;  %v1297_v38 = vsub.f32 %v1204_v7, %v1291_v37 }
 0x265   : > { %8900 = vpow2.f32 %v1305_v36 }
 0x266   : > { %v1303_v39 = vmul.f32 1.442695, %v1297_v38 }
 0x268   : > { %8902 = vpow2.f32 %v1303_v39 }
 0x26a   : > { %v8897_v40 = vpop.eup %8896 }
 0x26b   : > { %v1310_v41 = vsel %vm978_vm2, %v8897_v40, 0.0 }
 0x26c   : > { %1311 = vadd.xlane.f32.xlu0 %v1310_v41 }
 0x26e   : > { %v8899_v42 = vpop.eup %8898 }
 0x26f   : > { %v8901_v43 = vpop.eup %8900  ;;  %v1307_v44 = vsel %vm978_vm2, %v8899_v42, 0.0 }
 0x270   : > { %1308 = vadd.xlane.f32.xlu1 %v1307_v44  ;;  %v1316_v45 = vsel %vm978_vm2, %v8901_v43, 0.0 }
 0x271   : > { %1317 = vadd.xlane.f32.xlu0 %v1316_v45 }
 0x272   : > { %v8903_v47 = vpop.eup %8902 }
 0x273   : > { %v1313_v48 = vsel %vm978_vm2, %v8903_v47, 0.0 }
 0x274   : > { %1314 = vadd.xlane.f32.xlu1 %v1313_v48 }
 0x285   : > { %8684 = vrot.lane.b32.xlu1 %v9322_v49, %s8995_s0 }
 0x287   : > { %8679 = vrot.lane.b32.xlu0 %v9326_v52, %s8995_s0 }
 0x289   : > { %8689 = vrot.lane.b32.xlu1 %v9332_v53, %s8995_s0 }
 0x28b   : > { %8699 = vrot.lane.b32.xlu0 %v9346_v0, %s8995_s0 }
 0x28d   : > { %8694 = vrot.lane.b32.xlu1 %v9340_v2, %s8995_s0 }
 0x28f   : > { %1760 = vrot.lane.b32.xlu0 %v9255_v27, %s8995_s0 }
 0x291   : > { %8704 = vrot.lane.b32.xlu1 %v9350_v1, %s8995_s0 }
 0x295   : > { %1646 = vrot.lane.b32.xlu1 %v9260_v29, %s8995_s0 }
 0x2f9   : > { %v1312_v4 = vpop.xlane.xlu0 %1311 }
 0x2fa   : > { %8904 = vrcp.f32 %v1312_v4 }
 0x2fd   : > { %v1309_v5 = vpop.xlane.xlu1 %1308 }
 0x2fe   : > { %v1318_v6 = vpop.xlane.xlu0 %1317  ;;  %8906 = vrcp.f32 %v1309_v5 }
 0x2ff   : > { %8908 = vrcp.f32 %v1318_v6 }
 0x301   : > { %v1315_v9 = vpop.xlane.xlu1 %1314 }
 0x302   : > { %8910 = vrcp.f32 %v1315_v9  ;;  %v8680_v10 = vpop.permute.xlu0 %8679 }
 0x303   : > { %v8682_v11 = vunpack.i.h.bf16 %v8680_v10  ;;  %v8681_v13 = vunpack.i.l.bf16 %v8680_v10 }
 0x304   : > { %v8905_v19 = vpop.eup %8904 }
 0x305   : > { %v1324_v20 = vmul.f32 %v8905_v19, %v8897_v40  ;;  %v8588_v55 = vpack.c.bf16 %v8682_v11, %v8681_v13  ;;  %v8685_v56 = vpop.permute.xlu1 %8684 }
 0x306   : > { %v8687_v58 = vunpack.i.h.bf16 %v8685_v56  ;;  %v8686_v59 = vunpack.i.l.bf16 %v8685_v56  ;;  %v8700_v51 = vpop.permute.xlu0 %8699 }
 0x307   : > { %8266 = vmatmul.mubr.msk.f32.vlgmr.msra.gmra.mrb[10].mxu1 %vm978_vm2, %v1324_v20  ;;  %v8702_v34 = vunpack.i.h.bf16 %v8700_v51  ;;  %v8701_v35 = vunpack.i.l.bf16 %v8700_v51 }
 0x308   : > { %v8907_v60 = vpop.eup %8906  ;;  %8274 = vmatpush3.msra.mxu1 %v975_v57  ;;  %8275 = vmatprep.mubr.msk.f32.mxu1 %vm8994_vm1, %v8993_v22  ;;  %v8580_v50 = vpack.c.bf16 %v8687_v58, %v8686_v59 }
 0x309   : > { %v8909_v61 = vpop.eup %8908  ;;  %v1323_v62 = vmul.f32 %v8907_v60, %v8899_v42  ;;  %v8690_v63 = vpop.permute.xlu1 %8689  ;;  %8589 = vmatprep.subr.bf16.mxu1 %v8588_v55  ;;  %v8596_v36 = vpack.c.bf16 %v8702_v34, %v8701_v35 }
 0x30a   : > { %v1326_v7 = vmul.f32 %v8909_v61, %v8901_v43  ;;  %v8692_v8 = vunpack.i.h.bf16 %v8690_v63  ;;  %v8691_v12 = vunpack.i.l.bf16 %v8690_v63  ;;  %v1761_v45 = vpop.permute.xlu0 %1760 }
 0x30b   : > { %8261 = vmatmul.mubr.msk.f32.vlgmr.msra.gmra.mrb[10].mxu0 %vm978_vm2, %v1323_v62 }
 0x30c   : > { %v8911_v14 = vpop.eup %8910  ;;  %v8592_v21 = vpack.c.bf16 %v8692_v8, %v8691_v12  ;;  %8269 = vmatpush3.msra.mxu0 %v970_v3  ;;  %8276 = vmatmul.mubr.msk.f32.vlgmr.msra.gmra.mrb[12].mxu1 %vm978_vm2, %v1326_v7 }
 0x30d   : > { %v1325_v28 = vmul.f32 %v8911_v14, %v8903_v47  ;;  %8591 = vmatpush3.bf16.msra.mxu1 %v8588_v55  ;;  %8581 = vmatprep.subr.bf16.mxu0 %v8580_v50  ;;  %v8695_v30 = vpop.permute.xlu1 %8694 }
 0x30e   : > { %v8697_v31 = vunpack.i.h.bf16 %v8695_v30  ;;  %v8696_v32 = vunpack.i.l.bf16 %v8695_v30  ;;  %8270 = vmatprep.mubr.msk.f32.mxu0 %vm8994_vm1, %v8993_v22  ;;  %8593 = vmatprep.subr.bf16.mxu1 %v8592_v21 }
 0x30f   : > { %8271 = vmatmul.mubr.msk.f32.vlgmr.msra.gmra.mrb[12].mxu0 %vm978_vm2, %v1325_v28  ;;  %8300 = vmatprep.mubr.msk.f32.mxu1 %vm676_vm0, %v9181_v15 }
 0x310   : > { %v8584_v33 = vpack.c.bf16 %v8697_v31, %v8696_v32  ;;  %8583 = vmatpush3.bf16.msra.mxu0 %v8580_v50  ;;  %8286 = vmatprep.mubr.msk.f32.mxu0 %vm676_vm0, %v9181_v15 }
 0x311   : > { %8595 = vmatpush3.bf16.msra.mxu1 %v8592_v21  ;;  %v8705_v15 = vpop.permute.xlu1 %8704 }
 0x312   : > { %8585 = vmatprep.subr.bf16.mxu0 %v8584_v33  ;;  %8320 = vmatprep.subr.mxu1 %v8993_v22  ;;  %v8707_v37 = vunpack.i.h.bf16 %v8705_v15  ;;  %v8706_v38 = vunpack.i.l.bf16 %v8705_v15 }
 0x314   : > { %8301 = vmatmul.mubr.msk.f32.vlgmr.msra.gmra.mrb[14].mxu1 %vm676_vm0, %v9184_v16  ;;  %8587 = vmatpush3.bf16.msra.mxu0 %v8584_v33 }
 0x315   : > { %8303 = vmatprep.mubr.msk.f32.mxu1 %vm676_vm0, %v9189_v17  ;;  %8597 = vmatprep.subr.bf16.mxu0 %v8596_v36  ;;  %v1647_v5 = vpop.permute.xlu1 %1646 }
 0x317   : > { %8287 = vmatmul.mubr.msk.f32.vlgmr.msra.gmra.mrb[14].mxu0 %vm676_vm0, %v9184_v16  ;;  %v8600_v16 = vpack.c.bf16 %v8707_v37, %v8706_v38 }
 0x318   : > { %8304 = vmatmul.mubr.msk.f32.gmra.mrb[16].mxu1 %vm676_vm0, %v9194_v18  ;;  %8289 = vmatprep.mubr.msk.f32.mxu0 %vm676_vm0, %v9189_v17 }
 0x319   : > { %8599 = vmatpush3.bf16.msra.mxu0 %v8596_v36  ;;  %8322 = vmatprep.mubr.msk.f32.mxu1 %vm8994_vm1, %v8993_v22 }
 0x31a   : > { %8601 = vmatprep.subr.bf16.mxu0 %v8600_v16 }
 0x31b   : > { %8290 = vmatmul.mubr.msk.f32.gmra.mrb[16].mxu0 %vm676_vm0, %v9194_v18 }
 0x31c   : > { %8314 = vmatprep.mubr.msk.f32.mxu0 %vm676_vm0, %v9229_v23 }
 0x31d   : > { %8603 = vmatpush3.bf16.msra.mxu0 %v8600_v16 }
 0x31e   : > { %8330 = vmatprep.subr.mxu0 %v8993_v22 }
 0x320   : > { %8315 = vmatmul.mubr.msk.f32.vlgmr.msra.gmra.mrb[18].mxu0 %vm676_vm0, %v9232_v24 }
 0x321   : > { %8317 = vmatprep.mubr.msk.f32.mxu0 %vm676_vm0, %v9241_v25 }
 0x324   : > { %8318 = vmatmul.mubr.msk.f32.gmra.mrb[20].mxu0 %vm676_vm0, %v9244_v26 }
 0x325   : > { %8332 = vmatprep.mubr.msk.f32.mxu0 %vm8994_vm1, %v8993_v22 }
 0x3da   : > { %v9402_v17 = vpop.f32.mrb[10].mxu1 }
 0x3db   : > { %v8267_v18 = vpop.f32.mrb[11].mxu1 }
 0x3de   : > { %v9404_v39 = vpop.f32.mrb[10].mxu0 }
 0x3df   : > { %v9406_v40 = vpop.f32.mrb[12].mxu1  ;;  %v8262_v41 = vpop.f32.mrb[11].mxu0 }
 0x3e0   : > { %v8277_v42 = vpop.f32.mrb[13].mxu1 }
 0x3e2   : > { %v9408_v43 = vpop.f32.mrb[12].mxu0 }
 0x3e3   : > { %v8272_v44 = vpop.f32.mrb[13].mxu0 }
 0x3e7   : > { %v8302_v47 = vpop.f32.mrb[14].mxu1 }
 0x3e8   : > { %v1829_v48 = vpop.f32.mrb[15].mxu1  ;;  %v1835_v19 = vadd.f32 %v8302_v47, %v1761_v45 }
 0x3e9   : > { %v1830_v4 = vadd.f32 %v1829_v48, %v1761_v45 }
 0x3ea   : > { %v8288_v6 = vpop.f32.mrb[14].mxu0 }
 0x3eb   : > { %v8305_v9 = vpop.f32.mrb[16].mxu1  ;;  %8321 = vmatpush3.xpose.msk.msra.mxu1 %vm978_vm2, %v1830_v4  ;;  %v1715_v10 = vpop.f32.mrb[15].mxu0  ;;  %v1721_v57 = vadd.f32 %v8288_v6, %v1647_v5 }
 0x3ec   : > { %v1716_v11 = vadd.f32 %v1715_v10, %v1647_v5  ;;  %v1839_v13 = vpop.f32.mrb[17].mxu1  ;;  %8325 = vmatprep.subr.mxu1 %v8993_v22  ;;  %v1845_v59 = vadd.f32 %v8305_v9, %v1761_v45 }
 0x3ed   : > { %v1840_v20 = vadd.f32 %v1839_v13, %v1761_v45 }
 0x3ee   : > { %v8291_v55 = vpop.f32.mrb[16].mxu0  ;;  %8323 = vmatmul.mubr.msk.f32.vlgmr.msra.gmra.mrb[18].mxu1 %vm978_vm2, %v1716_v11 }
 0x3ef   : > { %8326 = vmatpush3.xpose.msk.msra.mxu1 %vm978_vm2, %v1835_v19  ;;  %8331 = vmatpush3.xpose.msk.msra.mxu0 %vm978_vm2, %v1840_v20  ;;  %v1725_v56 = vpop.f32.mrb[17].mxu0  ;;  %v1731_v60 = vadd.f32 %v8291_v55, %v1647_v5 }
 0x3f0   : > { %v1726_v58 = vadd.f32 %v1725_v56, %v1647_v5  ;;  %8327 = vmatprep.mubr.msk.f32.mxu1 %vm8994_vm1, %v8993_v22  ;;  %8335 = vmatprep.subr.mxu1 %v8993_v22 }
 0x3f1   : > { %8340 = vmatprep.subr.mxu0 %v8993_v22 }
 0x3f2   : > { %8328 = vmatmul.mubr.msk.f32.vlgmr.msra.gmra.mrb[20].mxu1 %vm978_vm2, %v1721_v57  ;;  %8333 = vmatmul.mubr.msk.f32.vlgmr.msra.gmra.mrb[22].mxu0 %vm978_vm2, %v1726_v58 }
 0x3f3   : > { %8336 = vmatpush3.xpose.msk.msra.mxu1 %vm978_vm2, %v1845_v59  ;;  %8337 = vmatprep.mubr.msk.f32.mxu1 %vm8994_vm1, %v8993_v22  ;;  %v9430_v61 = vpop.f32.mrb[18].mxu0 }
 0x3f4   : > { %8345 = vmatprep.subr.mxu1 %v8993_v22  ;;  %8342 = vmatprep.mubr.msk.f32.mxu0 %vm8994_vm1, %v8993_v22  ;;  %v9432_v62 = vpop.f32.mrb[19].mxu0 }
 0x3f6   : > { %8338 = vmatmul.mubr.msk.f32.vlgmr.msra.gmra.mrb[22].mxu1 %vm978_vm2, %v1731_v60 }
 0x3f7   : > { %8347 = vmatprep.mubr.msk.f32.mxu1 %vm8994_vm1, %v8993_v22  ;;  %v9434_v63 = vpop.f32.mrb[20].mxu0 }
 0x3f8   : > { %v9436_v3 = vpop.f32.mrb[21].mxu0 }
 0x4c1   : > { %v2034_v7 = vpop.f32.mrb[18].mxu1 }
 0x4c2   : > { %v2035_v8 = vadd.f32 %v2034_v7, %v9306_v54  ;;  %v8324_v12 = vpop.f32.mrb[19].mxu1 }
 0x4c4   : > { %v2266_v50 = vsel %vm978_vm2, %v2035_v8, -inf }
 0x4c5   : > { %v2186_v14 = vpop.f32.mrb[22].mxu0  ;;  %2267 = vmax.xlane.f32.xlu1 %v2266_v50  ;;  %v2110_v21 = vpop.f32.mrb[20].mxu1 }
 0x4c6   : > { %v2111_v28 = vadd.f32 %v2110_v21, %v9306_v54  ;;  %v8329_v30 = vpop.f32.mrb[21].mxu1  ;;  %v8334_v31 = vpop.f32.mrb[23].mxu0  ;;  %v2187_v35 = vadd.f32 %v2186_v14, %v9306_v54 }
 0x4c7   : > { %v9482_v31 = vld [vmem:[%s9176_s22] sm:$0xff] }
 0x4c8   : > { %v2269_v32 = vsel %vm978_vm2, %v2111_v28, -inf  ;;  %v2272_v15 = vsel %vm978_vm2, %v2187_v35, -inf }
 0x4c9   : > { %2270 = vmax.xlane.f32.xlu0 %v2269_v32  ;;  %v2262_v51 = vpop.f32.mrb[22].mxu1 }
 0x4ca   : > { %v2263_v33 = vadd.f32 %v2262_v51, %v9306_v54  ;;  %v8339_v34 = vpop.f32.mrb[23].mxu1 }
 0x4cc   : > { %v2275_v36 = vsel %vm978_vm2, %v2263_v33, -inf }
 0x4cd   : > { %2276 = vmax.xlane.f32.xlu0 %v2275_v36 }
 0x4d1   : > { %2273 = vmax.xlane.f32.xlu0 %v2272_v15 }
 0x552   : > { %v2268_v37 = vpop.xlane.xlu1 %2267 }
 0x553   : > { %v2278_v38 = vsub.f32 %v2035_v8, %v2268_v37 }
 0x555   : > { %v2282_v16 = vmul.f32 1.442695, %v2278_v38  ;;  %v9488_v38 = vld [vmem:[%s9176_s22 + $0x8] sm:$0xff] }
 0x556   : > { %v2271_v18 = vpop.xlane.xlu0 %2270 }
 0x557   : > { %8912 = vpow2.f32 %v2282_v16  ;;  %v2279_v41 = vsub.f32 %v2111_v28, %v2271_v18  ;;  %v9493_v16 = vld [vmem:[%s9176_s22 + $0x10] sm:$0xff]  ;;  %v9498_v18 = vld [vmem:[%s9176_s22 + $0x18] sm:$0xff] }
 0x559   : > { %v2284_v42 = vmul.f32 1.442695, %v2279_v41  ;;  %v2602_v41 = vld [vmem:[%s10496_s9 + $0x8] sm:$0xff] }
 0x55a   : > { %v2277_v44 = vpop.xlane.xlu0 %2276 }
 0x55b   : > { %8914 = vpow2.f32 %v2284_v42  ;;  %v2281_v45 = vsub.f32 %v2263_v33, %v2277_v44  ;;  %v1619_v42 = vld [vmem:[%s10496_s9] sm:$0xff] }
 0x55d   : > { %v2288_v47 = vmul.f32 1.442695, %v2281_v45 }
 0x55e   : > { %v2274_v48 = vpop.xlane.xlu0 %2273 }
 0x55f   : > { %8916 = vpow2.f32 %v2288_v47  ;;  %v2280_v4 = vsub.f32 %v2187_v35, %v2274_v48 }
 0x561   : > { %v8913_v5 = vpop.eup %8912  ;;  %v2286_v6 = vmul.f32 1.442695, %v2280_v4 }
 0x562   : > { %v2290_v9 = vsel %vm978_vm2, %v8913_v5, 0.0 }
 0x563   : > { %8918 = vpow2.f32 %v2286_v6  ;;  %2291 = vadd.xlane.f32.xlu1 %v2290_v9 }
 0x565   : > { %v8915_v10 = vpop.eup %8914 }
 0x566   : > { %v2293_v11 = vsel %vm978_vm2, %v8915_v10, 0.0 }
 0x567   : > { %2294 = vadd.xlane.f32.xlu0 %v2293_v11 }
 0x569   : > { %v8917_v13 = vpop.eup %8916 }
 0x56a   : > { %v2299_v19 = vsel %vm978_vm2, %v8917_v13, 0.0 }
 0x56b   : > { %2300 = vadd.xlane.f32.xlu0 %v2299_v19 }
 0x56d   : > { %v8919_v20 = vpop.eup %8918 }
 0x56e   : > { %v2296_v55 = vsel %vm978_vm2, %v8919_v20, 0.0 }
 0x56f   : > { %2297 = vadd.xlane.f32.xlu1 %v2296_v55 }
 0x580   : > { %8709 = vrot.lane.b32.xlu1 %v9322_v49, %s8996_s21 }
 0x581   : > { %1874 = vrot.lane.b32.xlu0 %v9293_v46, %s8995_s0 }
 0x584   : > { %8714 = vrot.lane.b32.xlu1 %v9340_v2, %s8996_s21 }
 0x585   : > { %8724 = vrot.lane.b32.xlu0 %v9332_v53, %s8996_s21 }
 0x588   : > { %8719 = vrot.lane.b32.xlu1 %v9326_v52, %s8996_s21 }
 0x589   : > { %8734 = vrot.lane.b32.xlu0 %v9350_v1, %s8996_s21 }
 0x58c   : > { %8729 = vrot.lane.b32.xlu1 %v9346_v0, %s8996_s21 }
 0x58d   : > { %2823 = vrot.lane.b32.xlu0 %v9260_v29, %s8996_s21 }
 0x590   : > { %2937 = vrot.lane.b32.xlu1 %v9255_v27, %s8996_s21 }
 0x5f0   : > { %v2292_v49 = vpop.xlane.xlu1 %2291 }
 0x5f1   : > { %8920 = vrcp.f32 %v2292_v49 }
 0x5f4   : > { %v2295_v2 = vpop.xlane.xlu0 %2294 }
 0x5f5   : > { %8922 = vrcp.f32 %v2295_v2 }
 0x5f8   : > { %v2301_v53 = vpop.xlane.xlu0 %2300 }
 0x5f9   : > { %8924 = vrcp.f32 %v2301_v53 }
 0x5fb   : > { %v8921_v56 = vpop.eup %8920 }
 0x5fc   : > { %v2298_v52 = vpop.xlane.xlu1 %2297  ;;  %v1875_v57 = vpop.permute.xlu0 %1874  ;;  %v2306_v58 = vmul.f32 %v8921_v56, %v8913_v5 }
 0x5fd   : > { %8926 = vrcp.f32 %v2298_v52  ;;  %v1944_v1 = vadd.f32 %v9432_v62, %v1875_v57  ;;  %v1949_v0 = vadd.f32 %v9430_v61, %v1875_v57  ;;  %v1954_v29 = vadd.f32 %v9436_v3, %v1875_v57 }
 0x5fe   : > { %v1959_v7 = vadd.f32 %v9434_v63, %v1875_v57 }
 0x5ff   : > { %v8923_v59 = vpop.eup %8922  ;;  %8341 = vmatpush3.msra.mxu0 %v1944_v1  ;;  %8346 = vmatpush3.msra.mxu1 %v1949_v0 }
 0x600   : > { %v2307_v27 = vmul.f32 %v8923_v59, %v8915_v10  ;;  %v8710_v60 = vpop.permute.xlu1 %8709  ;;  %8343 = vmatmul.mubr.msk.f32.vlgmr.msra.gmra.mrb[24].mxu0 %vm978_vm2, %v2306_v58  ;;  %8350 = vmatprep.subr.mxu0 %v8993_v22  ;;  %v8725_v21 = vpop.permute.xlu0 %8724 }
 0x601   : > { %v8712_v8 = vunpack.i.h.bf16 %v8710_v60  ;;  %v8711_v12 = vunpack.i.l.bf16 %v8710_v60  ;;  %8351 = vmatpush3.msra.mxu0 %v1954_v29  ;;  %8355 = vmatprep.subr.mxu1 %v8993_v22  ;;  %v8727_v33 = vunpack.i.h.bf16 %v8725_v21  ;;  %v8726_v34 = vunpack.i.l.bf16 %v8725_v21 }
 0x602   : > { %8348 = vmatmul.mubr.msk.f32.vlgmr.msra.gmra.mrb[24].mxu1 %vm978_vm2, %v2307_v27  ;;  %8352 = vmatprep.mubr.msk.f32.mxu0 %vm8994_vm1, %v8993_v22 }
 0x603   : > { %v8925_v61 = vpop.eup %8924  ;;  %v8604_v62 = vpack.c.bf16 %v8712_v8, %v8711_v12  ;;  %8356 = vmatpush3.msra.mxu1 %v1959_v7  ;;  %8357 = vmatprep.mubr.msk.f32.mxu1 %vm8994_vm1, %v8993_v22  ;;  %v8616_v37 = vpack.c.bf16 %v8727_v33, %v8726_v34 }
 0x604   : > { %v2309_v3 = vmul.f32 %v8925_v61, %v8917_v13  ;;  %v8715_v50 = vpop.permute.xlu1 %8714  ;;  %8360 = vmatprep.subr.mxu0 %v2602_v41  ;;  %v8735_v13 = vpop.permute.xlu0 %8734 }
 0x605   : > { %v8717_v63 = vunpack.i.h.bf16 %v8715_v50  ;;  %v8716_v14 = vunpack.i.l.bf16 %v8715_v50  ;;  %8605 = vmatprep.subr.bf16.mxu1 %v8604_v62  ;;  %v8736_v55 = vunpack.i.l.bf16 %v8735_v13 }
 0x606   : > { %8358 = vmatmul.mubr.msk.f32.vlgmr.msra.gmra.mrb[26].mxu1 %vm978_vm2, %v2309_v3 }
 0x607   : > { %v8927_v28 = vpop.eup %8926  ;;  %v8608_v30 = vpack.c.bf16 %v8717_v63, %v8716_v14  ;;  %8607 = vmatpush3.bf16.msra.mxu1 %v8604_v62  ;;  %8384 = vmatprep.mubr.msk.f32.mxu1 %vm676_vm0, %v9482_v31 }
 0x608   : > { %v2308_v32 = vmul.f32 %v8927_v28, %v8919_v20  ;;  %v8720_v51 = vpop.permute.xlu1 %8719  ;;  %v8737_v20 = vunpack.i.h.bf16 %v8735_v13 }
 0x609   : > { %v8722_v35 = vunpack.i.h.bf16 %v8720_v51  ;;  %v8721_v36 = vunpack.i.l.bf16 %v8720_v51  ;;  %8609 = vmatprep.subr.bf16.mxu1 %v8608_v30 }
 0x60a   : > { %8353 = vmatmul.mubr.msk.f32.vlgmr.msra.gmra.mrb[26].mxu0 %vm978_vm2, %v2308_v32  ;;  %v8624_v2 = vpack.c.bf16 %v8737_v20, %v8736_v55 }
 0x60b   : > { %v8612_v15 = vpack.c.bf16 %v8722_v35, %v8721_v36  ;;  %8611 = vmatpush3.bf16.msra.mxu1 %v8608_v30  ;;  %8361 = vmatpush3.msra.mxu0 %v2602_v41 }
 0x60c   : > { %8368 = vmatprep.subr.mxu0 %v1619_v42  ;;  %v8730_v44 = vpop.permute.xlu1 %8729 }
 0x60d   : > { %8613 = vmatprep.subr.bf16.mxu1 %v8612_v15  ;;  %v8732_v45 = vunpack.i.h.bf16 %v8730_v44  ;;  %v8731_v47 = vunpack.i.l.bf16 %v8730_v44 }
 0x60e   : > { %8385 = vmatmul.mubr.msk.f32.vlgmr.msra.gmra.mrb[28].mxu1 %vm676_vm0, %v9488_v38 }
 0x60f   : > { %8615 = vmatpush3.bf16.msra.mxu1 %v8612_v15  ;;  %8387 = vmatprep.mubr.msk.f32.mxu1 %vm676_vm0, %v9493_v16  ;;  %v8620_v5 = vpack.c.bf16 %v8732_v45, %v8731_v47 }
 0x610   : > { %8617 = vmatprep.subr.bf16.mxu1 %v8616_v37  ;;  %v2938_v1 = vpop.permute.xlu1 %2937 }
 0x612   : > { %8388 = vmatmul.mubr.msk.f32.gmra.mrb[30].mxu1 %vm676_vm0, %v9498_v18 }
 0x613   : > { %8619 = vmatpush3.bf16.msra.mxu1 %v8616_v37  ;;  %8398 = vmatprep.mubr.msk.f32.mxu1 %vm676_vm0, %v9482_v31 }
 0x614   : > { %8418 = vmatprep.subr.mxu1 %v8993_v22 }
 0x616   : > { %8399 = vmatmul.mubr.msk.f32.vlgmr.msra.gmra.mrb[32].mxu1 %vm676_vm0, %v9488_v38 }
 0x617   : > { %8401 = vmatprep.mubr.msk.f32.mxu1 %vm676_vm0, %v9493_v16 }
 0x61a   : > { %8402 = vmatmul.mubr.msk.f32.gmra.mrb[34].mxu1 %vm676_vm0, %v9498_v18 }
 0x61b   : > { %8420 = vmatprep.mubr.msk.f32.mxu1 %vm8994_vm1, %v8993_v22 }
 0x6d3   : > { %v2379_v48 = vpop.f32.mrb[24].mxu0 }
 0x6d4   : > { %v8344_v4 = vpop.f32.mrb[25].mxu0  ;;  %8362 = vmatprep.mubr.msk.f32.mxu0 %vm978_vm2, %v2379_v48 }
 0x6d5   : > { %v2452_v6 = vpop.f32.mrb[24].mxu1 }
 0x6d6   : > { %v8349_v9 = vpop.f32.mrb[25].mxu1  ;;  %8363 = vmatmul.mubr.msk.f32.vlgmr.msra.gmra.mrb[28].mxu0 %vm978_vm2, %v2452_v6 }
 0x6d7   : > { %8369 = vmatpush3.msra.mxu0 %v1619_v42 }
 0x6d8   : > { %8621 = vmatprep.subr.bf16.mxu0 %v8620_v5 }
 0x6d9   : > { %v2598_v10 = vpop.f32.mrb[26].mxu1 }
 0x6da   : > { %v8359_v11 = vpop.f32.mrb[27].mxu1 }
 0x6dd   : > { %v2525_v19 = vpop.f32.mrb[26].mxu0 }
 0x6de   : > { %v8354_v49 = vpop.f32.mrb[27].mxu0  ;;  %8365 = vmatprep.mubr.msk.f32.mxu0 %vm978_vm2, %v2525_v19 }
 0x6df   : > { %8366 = vmatmul.mubr.msk.f32.gmra.mrb[30].mxu0 %vm978_vm2, %v2598_v10 }
 0x6e0   : > { %8370 = vmatprep.mubr.msk.f32.mxu0 %vm978_vm2, %v9404_v39 }
 0x6e1   : > { %v8386_v53 = vpop.f32.mrb[28].mxu1 }
 0x6e2   : > { %v2892_v56 = vpop.f32.mrb[29].mxu1 }
 0x6e3   : > { %8371 = vmatmul.mubr.msk.f32.vlgmr.msra.gmra.mrb[28].mxu0 %vm978_vm2, %v9402_v17  ;;  %v2824_v17 = vpop.permute.xlu0 %2823 }
 0x6e4   : > { %8623 = vmatpush3.bf16.msra.mxu0 %v8620_v5  ;;  %8373 = vmatprep.mubr.msk.f32.mxu0 %vm978_vm2, %v9408_v43 }
 0x6e5   : > { %v8389_v52 = vpop.f32.mrb[30].mxu1  ;;  %8625 = vmatprep.subr.bf16.mxu0 %v8624_v2 }
 0x6e6   : > { %v2902_v57 = vpop.f32.mrb[31].mxu1 }
 0x6e7   : > { %8374 = vmatmul.mubr.msk.f32.gmra.mrb[30].mxu0 %vm978_vm2, %v9406_v40  ;;  %v2893_v40 = vadd.f32 %v2892_v56, %v2824_v17  ;;  %v3882_v56 = vld [vmem:[%s10519_s27 + $0x8] sm:$0xff] }
 0x6e8   : > { %8627 = vmatpush3.bf16.msra.mxu0 %v8624_v2  ;;  %8412 = vmatprep.mubr.msk.f32.mxu0 %vm676_vm0, %v9229_v23 }
 0x6e9   : > { %v8400_v39 = vpop.f32.mrb[32].mxu1  ;;  %8423 = vmatprep.subr.mxu0 %v8993_v22 }
 0x6ea   : > { %v3006_v0 = vpop.f32.mrb[33].mxu1  ;;  %v3012_v43 = vadd.f32 %v8400_v39, %v2938_v1  ;;  %v3998_v39 = vld [vmem:[%s10492_s5 + $0x18] sm:$0xff] }
 0x6eb   : > { %v3007_v58 = vadd.f32 %v3006_v0, %v2938_v1  ;;  %8413 = vmatmul.mubr.msk.f32.vlgmr.msra.gmra.mrb[32].mxu0 %vm676_vm0, %v9232_v24  ;;  %v2898_v24 = vadd.f32 %v8386_v53, %v2824_v17  ;;  %v3881_v53 = vld [vmem:[%s10519_s27] sm:$0xff] }
 0x6ec   : > { %8415 = vmatprep.mubr.msk.f32.mxu0 %vm676_vm0, %v9241_v25  ;;  %v2903_v25 = vadd.f32 %v2902_v57, %v2824_v17  ;;  %v8743_v57 = vpack.i.bf16 %v3882_v56, %v3881_v53 }
 0x6ed   : > { %v8403_v59 = vpop.f32.mrb[34].mxu1  ;;  %8419 = vmatpush3.xpose.msk.msra.mxu1 %vm978_vm2, %v3007_v58  ;;  %v3883_v58 = vld [vmem:[%s10519_s27 + $0x10] sm:$0xff] }
 0x6ee   : > { %v3016_v29 = vpop.f32.mrb[35].mxu1  ;;  %8428 = vmatprep.subr.mxu1 %v8993_v22  ;;  %v3022_v27 = vadd.f32 %v8403_v59, %v2938_v1 }
 0x6ef   : > { %v3017_v23 = vadd.f32 %v3016_v29, %v2938_v1  ;;  %8416 = vmatmul.mubr.msk.f32.gmra.mrb[34].mxu0 %vm676_vm0, %v9244_v26  ;;  %v2908_v26 = vadd.f32 %v8389_v52, %v2824_v17  ;;  %v3995_v52 = vld [vmem:[%s10492_s5] sm:$0xff]  ;;  %v3996_v1 = vld [vmem:[%s10492_s5 + $0x8] sm:$0xff] }
 0x6f0   : > { %8421 = vmatmul.mubr.msk.f32.vlgmr.msra.gmra.mrb[36].mxu1 %vm978_vm2, %v2893_v40  ;;  %8425 = vmatprep.mubr.msk.f32.mxu0 %vm8994_vm1, %v8993_v22  ;;  %v8738_v0 = vpack.i.bf16 %v3996_v1, %v3995_v52 }
 0x6f1   : > { %8424 = vmatpush3.xpose.msk.msra.mxu0 %vm978_vm2, %v3012_v43  ;;  %8429 = vmatpush3.xpose.msk.msra.mxu1 %vm978_vm2, %v3017_v23  ;;  %v3884_v43 = vld [vmem:[%s10519_s27 + $0x18] sm:$0xff] }
 0x6f2   : > { %8430 = vmatprep.mubr.msk.f32.mxu1 %vm8994_vm1, %v8993_v22  ;;  %8433 = vmatprep.subr.mxu0 %v8993_v22  ;;  %v8753_v59 = vpack.i.bf16 %v3884_v43, %v3883_v58 }
 0x6f3   : > { %8438 = vmatprep.subr.mxu1 %v8993_v22 }
 0x6f4   : > { %8426 = vmatmul.mubr.msk.f32.vlgmr.msra.gmra.mrb[36].mxu0 %vm978_vm2, %v2898_v24  ;;  %8431 = vmatmul.mubr.msk.f32.vlgmr.msra.gmra.mrb[38].mxu1 %vm978_vm2, %v2903_v25 }
 0x6f5   : > { %8434 = vmatpush3.xpose.msk.msra.mxu0 %vm978_vm2, %v3022_v27  ;;  %8435 = vmatprep.mubr.msk.f32.mxu0 %vm8994_vm1, %v8993_v22 }
 0x6f6   : > { %8443 = vmatprep.subr.mxu0 %v8993_v22  ;;  %8440 = vmatprep.mubr.msk.f32.mxu1 %vm8994_vm1, %v8993_v22 }
 0x6f8   : > { %8436 = vmatmul.mubr.msk.f32.vlgmr.msra.gmra.mrb[38].mxu0 %vm978_vm2, %v2908_v26 }
 0x6f9   : > { %8445 = vmatprep.mubr.msk.f32.mxu0 %vm8994_vm1, %v8993_v22 }
 0x7be   : > { %v9562_v60 = vpop.f32.mrb[32].mxu0 }
 0x7bf   : > { %v9564_v7 = vpop.f32.mrb[33].mxu0 }
 0x7c2   : > { %v9566_v8 = vpop.f32.mrb[34].mxu0 }
 0x7c3   : > { %v3211_v12 = vpop.f32.mrb[36].mxu1  ;;  %v9568_v61 = vpop.f32.mrb[35].mxu0 }
 0x7c4   : > { %v3212_v62 = vadd.f32 %v3211_v12, %v9306_v54  ;;  %v8422_v3 = vpop.f32.mrb[37].mxu1 }
 0x7c6   : > { %v3443_v50 = vsel %vm978_vm2, %v3212_v62, -inf }
 0x7c7   : > { %v3287_v63 = vpop.f32.mrb[36].mxu0  ;;  %3444 = vmax.xlane.f32.xlu1 %v3443_v50  ;;  %v3363_v14 = vpop.f32.mrb[38].mxu1 }
 0x7c8   : > { %v3288_v21 = vadd.f32 %v3287_v63, %v9306_v54  ;;  %v8427_v28 = vpop.f32.mrb[37].mxu0  ;;  %v8432_v30 = vpop.f32.mrb[39].mxu1  ;;  %v3364_v32 = vadd.f32 %v3363_v14, %v9306_v54 }
 0x7ca   : > { %v3446_v51 = vsel %vm978_vm2, %v3288_v21, -inf  ;;  %v3449_v36 = vsel %vm978_vm2, %v3364_v32, -inf }
 0x7cb   : > { %3447 = vmax.xlane.f32.xlu0 %v3446_v51  ;;  %v3439_v33 = vpop.f32.mrb[38].mxu0 }
 0x7cc   : > { %v8437_v34 = vpop.f32.mrb[39].mxu0  ;;  %v3440_v35 = vadd.f32 %v3439_v33, %v9306_v54 }
 0x7ce   : > { %v3452_v15 = vsel %vm978_vm2, %v3440_v35, -inf }
 0x7cf   : > { %3450 = vmax.xlane.f32.xlu0 %v3449_v36 }
 0x7d3   : > { %3453 = vmax.xlane.f32.xlu0 %v3452_v15 }
 0x854   : > { %v3445_v37 = vpop.xlane.xlu1 %3444 }
 0x855   : > { %v3455_v41 = vsub.f32 %v3212_v62, %v3445_v37 }
 0x857   : > { %v3459_v42 = vmul.f32 1.442695, %v3455_v41 }
 0x858   : > { %v3448_v44 = vpop.xlane.xlu0 %3447 }
 0x859   : > { %8928 = vpow2.f32 %v3459_v42  ;;  %v3456_v45 = vsub.f32 %v3288_v21, %v3448_v44 }
 0x85b   : > { %v3461_v47 = vmul.f32 1.442695, %v3456_v45  ;;  %v4109_v45 = vld [vmem:[%s10494_s7] sm:$0xff] }
 0x85c   : > { %v3451_v48 = vpop.xlane.xlu0 %3450 }
 0x85d   : > { %8930 = vpow2.f32 %v3461_v47  ;;  %v3457_v4 = vsub.f32 %v3364_v32, %v3451_v48  ;;  %v3779_v32 = vld [vmem:[%s10496_s9 + $0x10] sm:$0xff]  ;;  %v4110_v47 = vld [vmem:[%s10494_s7 + $0x8] sm:$0xff] }
 0x85e   : > { %v4111_v48 = vld [vmem:[%s10494_s7 + $0x10] sm:$0xff] }
 0x85f   : > { %v3463_v5 = vmul.f32 1.442695, %v3457_v4  ;;  %v8980_v4 = vld [vmem:[%s9225_s29] sm:$0xff] }
 0x860   : > { %v3454_v6 = vpop.xlane.xlu0 %3453 }
 0x861   : > { %8932 = vpow2.f32 %v3463_v5  ;;  %v3458_v54 = vsub.f32 %v3440_v35, %v3454_v6  ;;  %v8758_v5 = vpack.i.bf16 %v4110_v47, %v4109_v45  ;;  %v4112_v6 = vld [vmem:[%s10494_s7 + $0x18] sm:$0xff] }
 0x863   : > { %v8929_v9 = vpop.eup %8928  ;;  %v3465_v10 = vmul.f32 1.442695, %v3458_v54  ;;  %v8763_v54 = vpack.i.bf16 %v4112_v6, %v4111_v48 }
 0x864   : > { %v3467_v11 = vsel %vm978_vm2, %v8929_v9, 0.0 }
 0x865   : > { %8934 = vpow2.f32 %v3465_v10  ;;  %3468 = vadd.xlane.f32.xlu1 %v3467_v11  ;;  %v7576_v10 = vld [vmem:[%s10522_s24] ss:$0 sm:$0xff] }
 0x867   : > { %v8931_v13 = vpop.eup %8930 }
 0x868   : > { %v3470_v19 = vsel %vm978_vm2, %v8931_v13, 0.0 }
 0x869   : > { %3471 = vadd.xlane.f32.xlu0 %v3470_v19 }
 0x86b   : > { %v8933_v20 = vpop.eup %8932 }
 0x86c   : > { %v3473_v55 = vsel %vm978_vm2, %v8933_v20, 0.0 }
 0x86d   : > { %3474 = vadd.xlane.f32.xlu1 %v3473_v55 }
 0x86f   : > { %v8935_v49 = vpop.eup %8934 }
 0x870   : > { %v3476_v2 = vsel %vm978_vm2, %v8935_v49, 0.0 }
 0x871   : > { %3477 = vadd.xlane.f32.xlu0 %v3476_v2 }
 0x87e   : > { %3051 = vrot.lane.b32.xlu1 %v9293_v46, %s8996_s21  ;;  %v3997_v46 = vld [vmem:[%s10492_s5 + $0x10] sm:$0xff] }
 0x87f   : > { %v8748_v17 = vpack.i.bf16 %v3998_v39, %v3997_v46 }
 0x882   : > { %8744 = vrot.lane.b32.xlu1 %v8743_v57, %s8997_s3 }
 0x886   : > { %8749 = vrot.lane.b32.xlu1 %v8748_v17, %s8997_s3 }
 0x887   : > { %8739 = vrot.lane.b32.xlu0 %v8738_v0, %s8997_s3 }
 0x88a   : > { %8754 = vrot.lane.b32.xlu1 %v8753_v59, %s8997_s3 }
 0x88b   : > { %8759 = vrot.lane.b32.xlu0 %v8758_v5, %s8997_s3 }
 0x88e   : > { %8764 = vrot.lane.b32.xlu1 %v8763_v54, %s8997_s3 }
 0x892   : > { %3907 = vrot.lane.b32.xlu1 %v7576_v10, %s8997_s3 }
 0x8f2   : > { %v3469_v40 = vpop.xlane.xlu1 %3468 }
 0x8f3   : > { %8936 = vrcp.f32 %v3469_v40  ;;  %v8981_v40 = vld [vmem:[%s9225_s29 + $0x8] sm:$0xff] }
 0x8f6   : > { %v3472_v29 = vpop.xlane.xlu0 %3471 }
 0x8f7   : > { %8938 = vrcp.f32 %v3472_v29  ;;  %v8982_v29 = vld [vmem:[%s9225_s29 + $0x10] sm:$0xff] }
 0x8fa   : > { %v3475_v23 = vpop.xlane.xlu1 %3474 }
 0x8fb   : > { %8940 = vrcp.f32 %v3475_v23  ;;  %v8983_v23 = vld [vmem:[%s9225_s29 + $0x18] sm:$0xff] }
 0x8fd   : > { %v8937_v24 = vpop.eup %8936 }
 0x8fe   : > { %v3052_v25 = vpop.permute.xlu1 %3051  ;;  %v3478_v27 = vpop.xlane.xlu0 %3477  ;;  %v3483_v62 = vmul.f32 %v8937_v24, %v8929_v9  ;;  %v7581_v9 = vld [vmem:[%s10493_s6] ss:$0 sm:$0xff] }
 0x8ff   : > { %v3121_v26 = vadd.f32 %v9564_v7, %v3052_v25  ;;  %v3126_v12 = vadd.f32 %v9562_v60, %v3052_v25  ;;  %8942 = vrcp.f32 %v3478_v27  ;;  %v3131_v50 = vadd.f32 %v9568_v61, %v3052_v25  ;;  %4021 = vrot.lane.b32.xlu0 %v7581_v9, %s8997_s3 }
 0x900   : > { %v3136_v14 = vadd.f32 %v9566_v8, %v3052_v25 }
 0x901   : > { %v8939_v3 = vpop.eup %8938  ;;  %8439 = vmatpush3.msra.mxu1 %v3121_v26  ;;  %8444 = vmatpush3.msra.mxu0 %v3126_v12 }
 0x902   : > { %v3484_v63 = vmul.f32 %v8939_v3, %v8931_v13  ;;  %8441 = vmatmul.mubr.msk.f32.vlgmr.msra.gmra.mrb[40].mxu1 %vm978_vm2, %v3483_v62  ;;  %8448 = vmatprep.subr.mxu1 %v8993_v22  ;;  %v8745_v21 = vpop.permute.xlu1 %8744  ;;  %v8740_v51 = vpop.permute.xlu0 %8739 }
 0x903   : > { %8449 = vmatpush3.msra.mxu1 %v3131_v50  ;;  %8453 = vmatprep.subr.mxu0 %v8993_v22  ;;  %v8747_v28 = vunpack.i.h.bf16 %v8745_v21  ;;  %v8746_v30 = vunpack.i.l.bf16 %v8745_v21  ;;  %v8742_v33 = vunpack.i.h.bf16 %v8740_v51  ;;  %v8741_v34 = vunpack.i.l.bf16 %v8740_v51 }
 0x904   : > { %8446 = vmatmul.mubr.msk.f32.vlgmr.msra.gmra.mrb[40].mxu0 %vm978_vm2, %v3484_v63  ;;  %8450 = vmatprep.mubr.msk.f32.mxu1 %vm8994_vm1, %v8993_v22 }
 0x905   : > { %v8941_v60 = vpop.eup %8940  ;;  %8454 = vmatpush3.msra.mxu0 %v3136_v14  ;;  %8455 = vmatprep.mubr.msk.f32.mxu0 %vm8994_vm1, %v8993_v22  ;;  %v8628_v35 = vpack.c.bf16 %v8747_v28, %v8746_v30  ;;  %v8636_v15 = vpack.c.bf16 %v8742_v33, %v8741_v34 }
 0x906   : > { %v3485_v7 = vmul.f32 %v8941_v60, %v8933_v20  ;;  %8458 = vmatprep.subr.mxu0 %v3779_v32  ;;  %v8750_v36 = vpop.permute.xlu1 %8749  ;;  %v8760_v52 = vpop.permute.xlu0 %8759 }
 0x907   : > { %8629 = vmatprep.subr.bf16.mxu1 %v8628_v35  ;;  %v8752_v11 = vunpack.i.h.bf16 %v8750_v36  ;;  %v8751_v13 = vunpack.i.l.bf16 %v8750_v36  ;;  %v8762_v57 = vunpack.i.h.bf16 %v8760_v52  ;;  %v8761_v1 = vunpack.i.l.bf16 %v8760_v52 }
 0x908   : > { %8451 = vmatmul.mubr.msk.f32.vlgmr.msra.gmra.mrb[42].mxu1 %vm978_vm2, %v3485_v7 }
 0x909   : > { %8474 = vmatprep.mubr.msk.f32.mxu1 %vm676_vm0, %v9482_v31  ;;  %v8943_v8 = vpop.eup %8942  ;;  %8631 = vmatpush3.bf16.msra.mxu1 %v8628_v35  ;;  %v8640_v55 = vpack.c.bf16 %v8752_v11, %v8751_v13  ;;  %v8644_v43 = vpack.c.bf16 %v8762_v57, %v8761_v1 }
 0x90a   : > { %v3486_v61 = vmul.f32 %v8943_v8, %v8935_v49  ;;  %v8755_v37 = vpop.permute.xlu1 %8754 }
 0x90b   : > { %v8757_v41 = vunpack.i.h.bf16 %v8755_v37  ;;  %v8756_v42 = vunpack.i.l.bf16 %v8755_v37 }
 0x90c   : > { %8456 = vmatmul.mubr.msk.f32.vlgmr.msra.gmra.mrb[42].mxu0 %vm978_vm2, %v3486_v61 }
 0x90d   : > { %8459 = vmatpush3.msra.mxu0 %v3779_v32  ;;  %v8632_v44 = vpack.c.bf16 %v8757_v41, %v8756_v42 }
 0x90e   : > { %8637 = vmatprep.subr.bf16.mxu0 %v8636_v15  ;;  %v8765_v46 = vpop.permute.xlu1 %8764 }
 0x90f   : > { %8633 = vmatprep.subr.bf16.mxu1 %v8632_v44  ;;  %v8767_v0 = vunpack.i.h.bf16 %v8765_v46  ;;  %v8766_v17 = vunpack.i.l.bf16 %v8765_v46 }
 0x910   : > { %8635 = vmatpush3.bf16.msra.mxu1 %v8632_v44 }
 0x911   : > { %v8648_v59 = vpack.c.bf16 %v8767_v0, %v8766_v17  ;;  %8645 = vmatprep.subr.bf16.mxu1 %v8644_v43 }
 0x912   : > { %v3908_v62 = vpop.permute.xlu1 %3907 }
 0x913   : > { %8475 = vmatmul.mubr.msk.f32.vlgmr.msra.gmra.mrb[44].mxu1 %vm676_vm0, %v9488_v38 }
 0x914   : > { %8477 = vmatprep.mubr.msk.f32.mxu1 %vm676_vm0, %v9493_v16  ;;  %8647 = vmatpush3.bf16.msra.mxu1 %v8644_v43 }
 0x915   : > { %8649 = vmatprep.subr.bf16.mxu1 %v8648_v59 }
 0x917   : > { %8478 = vmatmul.mubr.msk.f32.gmra.mrb[46].mxu1 %vm676_vm0, %v9498_v18 }
 0x918   : > { %8502 = vmatprep.mubr.msk.f32.mxu1 %vm676_vm0, %v8980_v4  ;;  %8651 = vmatpush3.bf16.msra.mxu1 %v8648_v59 }
 0x919   : > { %8513 = vmatprep.subr.mxu1 %v8993_v22 }
 0x91b   : > { %8503 = vmatmul.mubr.msk.f32.vlgmr.msra.gmra.mrb[48].mxu1 %vm676_vm0, %v8981_v40 }
 0x91c   : > { %8505 = vmatprep.mubr.msk.f32.mxu1 %vm676_vm0, %v8982_v29 }
 0x91f   : > { %8506 = vmatmul.mubr.msk.f32.gmra.mrb[50].mxu1 %vm676_vm0, %v8983_v23 }
 0x920   : > { %8515 = vmatprep.mubr.msk.f32.mxu1 %vm8994_vm1, %v8993_v22 }
 0x971   : > { %v4022_v12 = vpop.permute.xlu0 %4021 }
 0x9d5   : > { %v3556_v19 = vpop.f32.mrb[40].mxu1 }
 0x9d6   : > { %v8442_v20 = vpop.f32.mrb[41].mxu1  ;;  %8460 = vmatprep.mubr.msk.f32.mxu0 %vm978_vm2, %v3556_v19 }
 0x9d7   : > { %v3629_v49 = vpop.f32.mrb[40].mxu0 }
 0x9d8   : > { %v8447_v2 = vpop.f32.mrb[41].mxu0  ;;  %8461 = vmatmul.mubr.msk.f32.vlgmr.msra.gmra.mrb[28].mxu0 %vm978_vm2, %v3629_v49 }
 0x9d9   : > { %8639 = vmatpush3.bf16.msra.mxu0 %v8636_v15  ;;  %v8984_v15 = vld [vmem:[%s10523_s4] sm:$0xff] }
 0x9da   : > { %8641 = vmatprep.subr.bf16.mxu0 %v8640_v55 }
 0x9db   : > { %v3702_v53 = vpop.f32.mrb[42].mxu1 }
 0x9dc   : > { %v8452_v56 = vpop.f32.mrb[43].mxu1  ;;  %8463 = vmatprep.mubr.msk.f32.mxu0 %vm978_vm2, %v3702_v53 }
 0x9dd   : > { %8643 = vmatpush3.bf16.msra.mxu0 %v8640_v55 }
 0x9de   : > { %8508 = vmatprep.subr.mxu0 %v8993_v22 }
 0x9df   : > { %v3775_v39 = vpop.f32.mrb[42].mxu0 }
 0x9e0   : > { %v8457_v58 = vpop.f32.mrb[43].mxu0  ;;  %8464 = vmatmul.mubr.msk.f32.gmra.mrb[30].mxu0 %vm978_vm2, %v3775_v39 }
 0x9e1   : > { %8488 = vmatprep.mubr.msk.f32.mxu0 %vm676_vm0, %v9482_v31 }
 0x9e4   : > { %8489 = vmatmul.mubr.msk.f32.vlgmr.msra.gmra.mrb[44].mxu0 %vm676_vm0, %v9488_v38 }
 0x9e5   : > { %8491 = vmatprep.mubr.msk.f32.mxu0 %vm676_vm0, %v9493_v16 }
 0x9e6   : > { %v8476_v24 = vpop.f32.mrb[44].mxu1 }
 0x9e7   : > { %v3976_v25 = vpop.f32.mrb[45].mxu1  ;;  %v3982_v60 = vadd.f32 %v8476_v24, %v3908_v62  ;;  %v7586_v24 = vld [vmem:[%s10495_s8] ss:$0 sm:$0xff] }
 0x9e8   : > { %8492 = vmatmul.mubr.msk.f32.gmra.mrb[46].mxu0 %vm676_vm0, %v9498_v18  ;;  %v3977_v7 = vadd.f32 %v3976_v25, %v3908_v62 }
 0x9e9   : > { %8510 = vmatprep.mubr.msk.f32.mxu0 %vm8994_vm1, %v8993_v22 }
 0x9ea   : > { %v8479_v27 = vpop.f32.mrb[46].mxu1 }
 0x9eb   : > { %v3986_v26 = vpop.f32.mrb[47].mxu1  ;;  %v3992_v51 = vadd.f32 %v8479_v27, %v3908_v62 }
 0x9ec   : > { %v3987_v33 = vadd.f32 %v3986_v26, %v3908_v62 }
 0x9ee   : > { %v9690_v30 = vpop.f32.mrb[48].mxu1 }
 0x9ef   : > { %v9694_v32 = vpop.f32.mrb[49].mxu1 }
 0x9f2   : > { %v9703_v34 = vpop.f32.mrb[50].mxu1 }
 0x9f3   : > { %v9707_v35 = vpop.f32.mrb[51].mxu1 }
 0xab7   : > { %v8490_v3 = vpop.f32.mrb[44].mxu0 }
 0xab8   : > { %v4096_v50 = vadd.f32 %v8490_v3, %v4022_v12  ;;  %v4090_v63 = vpop.f32.mrb[45].mxu0 }
 0xab9   : > { %v4091_v14 = vadd.f32 %v4090_v63, %v4022_v12 }
 0xaba   : > { %8514 = vmatpush3.xpose.msk.msra.mxu1 %vm978_vm2, %v4096_v50 }
 0xabb   : > { %v8493_v8 = vpop.f32.mrb[46].mxu0  ;;  %8509 = vmatpush3.xpose.msk.msra.mxu0 %vm978_vm2, %v4091_v14  ;;  %8523 = vmatprep.subr.mxu1 %v8993_v22 }
 0xabc   : > { %v4106_v61 = vadd.f32 %v8493_v8, %v4022_v12  ;;  %v4100_v21 = vpop.f32.mrb[47].mxu0  ;;  %8518 = vmatprep.subr.mxu0 %v8993_v22 }
 0xabd   : > { %v4101_v28 = vadd.f32 %v4100_v21, %v4022_v12  ;;  %8516 = vmatmul.mubr.msk.f32.vlgmr.msra.gmra.mrb[52].mxu1 %vm978_vm2, %v3982_v60 }
 0xabe   : > { %8511 = vmatmul.mubr.msk.f32.vlgmr.msra.gmra.mrb[48].mxu0 %vm978_vm2, %v3977_v7  ;;  %8524 = vmatpush3.xpose.msk.msra.mxu1 %vm978_vm2, %v4106_v61 }
 0xabf   : > { %8519 = vmatpush3.xpose.msk.msra.mxu0 %vm978_vm2, %v4101_v28  ;;  %8525 = vmatprep.mubr.msk.f32.mxu1 %vm8994_vm1, %v8993_v22 }
 0xac0   : > { %8520 = vmatprep.mubr.msk.f32.mxu0 %vm8994_vm1, %v8993_v22  ;;  %8528 = vmatprep.subr.mxu0 %v8993_v22 }
 0xac1   : > { %8526 = vmatmul.mubr.msk.f32.vlgmr.msra.gmra.mrb[54].mxu1 %vm978_vm2, %v3992_v51  ;;  %8533 = vmatprep.subr.mxu1 %v8993_v22  ;;  %v4863_v51 = vld [vmem:[%s10496_s9 + $0x18] sm:$0xff] }
 0xac2   : > { %8521 = vmatmul.mubr.msk.f32.vlgmr.msra.gmra.mrb[50].mxu0 %vm978_vm2, %v3987_v33  ;;  %8535 = vmatprep.mubr.msk.f32.mxu1 %vm8994_vm1, %v8993_v22 }
 0xac3   : > { %8530 = vmatprep.mubr.msk.f32.mxu0 %vm8994_vm1, %v8993_v22 }
 0xb90   : > { %v4371_v36 = vpop.f32.mrb[52].mxu1 }
 0xb91   : > { %v4372_v37 = vadd.f32 %v8984_v15, %v4371_v36  ;;  %v4295_v41 = vpop.f32.mrb[48].mxu0  ;;  %v8517_v42 = vpop.f32.mrb[53].mxu1 }
 0xb92   : > { %v4296_v44 = vadd.f32 %v8984_v15, %v4295_v41  ;;  %v8512_v45 = vpop.f32.mrb[49].mxu0  ;;  %v7607_v42 = vld [vmem:[%s10497_s10] ss:$0 sm:$0xff] }
 0xb93   : > { %v4530_v47 = vsel %vm978_vm2, %v4372_v37, -inf }
 0xb94   : > { %4531 = vmax.xlane.f32.xlu1 %v4530_v47  ;;  %v4523_v48 = vpop.f32.mrb[54].mxu1  ;;  %v4527_v4 = vsel %vm978_vm2, %v4296_v44, -inf }
 0xb95   : > { %v8527_v5 = vpop.f32.mrb[55].mxu1  ;;  %4528 = vmax.xlane.f32.xlu0 %v4527_v4  ;;  %v4447_v6 = vpop.f32.mrb[50].mxu0  ;;  %v4524_v10 = vadd.f32 %v8984_v15, %v4523_v48 }
 0xb96   : > { %v4448_v54 = vadd.f32 %v8984_v15, %v4447_v6  ;;  %v8522_v9 = vpop.f32.mrb[51].mxu0 }
 0xb97   : > { %v4536_v13 = vsel %vm978_vm2, %v4524_v10, -inf }
 0xb98   : > { %v4533_v11 = vsel %vm978_vm2, %v4448_v54, -inf }
 0xb99   : > { %4534 = vmax.xlane.f32.xlu0 %v4533_v11 }
 0xb9d   : > { %4537 = vmax.xlane.f32.xlu0 %v4536_v13 }
 0xc21   : > { %v4532_v19 = vpop.xlane.xlu1 %4531 }
 0xc22   : > { %v4540_v20 = vsub.f32 %v4372_v37, %v4532_v19  ;;  %v4529_v55 = vpop.xlane.xlu0 %4528 }
 0xc23   : > { %v4539_v49 = vsub.f32 %v4296_v44, %v4529_v55 }
 0xc24   : > { %v4545_v2 = vmul.f32 1.442695, %v4540_v20 }
 0xc25   : > { %v4543_v53 = vmul.f32 1.442695, %v4539_v49 }
 0xc26   : > { %8944 = vpow2.f32 %v4545_v2  ;;  %v4535_v56 = vpop.xlane.xlu0 %4534 }
 0xc27   : > { %8946 = vpow2.f32 %v4543_v53  ;;  %v4541_v52 = vsub.f32 %v4448_v54, %v4535_v56 }
 0xc29   : > { %v4547_v57 = vmul.f32 1.442695, %v4541_v52 }
 0xc2a   : > { %v4538_v1 = vpop.xlane.xlu0 %4537 }
 0xc2b   : > { %8948 = vpow2.f32 %v4547_v57  ;;  %v4542_v46 = vsub.f32 %v4524_v10, %v4538_v1 }
 0xc2d   : > { %v4549_v39 = vmul.f32 1.442695, %v4542_v46 }
 0xc2f   : > { %8950 = vpow2.f32 %v4549_v39 }
 0xc30   : > { %v8945_v0 = vpop.eup %8944 }
 0xc31   : > { %v8947_v17 = vpop.eup %8946  ;;  %v4554_v58 = vsel %vm978_vm2, %v8945_v0, 0.0 }
 0xc32   : > { %4555 = vadd.xlane.f32.xlu1 %v4554_v58  ;;  %v4551_v43 = vsel %vm978_vm2, %v8947_v17, 0.0 }
 0xc33   : > { %4552 = vadd.xlane.f32.xlu0 %v4551_v43 }
 0xc35   : > { %v8949_v59 = vpop.eup %8948 }
 0xc36   : > { %v4557_v40 = vsel %vm978_vm2, %v8949_v59, 0.0 }
 0xc37   : > { %4558 = vadd.xlane.f32.xlu0 %v4557_v40 }
 0xc39   : > { %v8951_v29 = vpop.eup %8950 }
 0xc3a   : > { %v4560_v23 = vsel %vm978_vm2, %v8951_v29, 0.0 }
 0xc3b   : > { %4561 = vadd.xlane.f32.xlu1 %v4560_v23 }
 0xc4d   : > { %4135 = vrot.lane.b32.xlu0 %v7586_v24, %s8997_s3  ;;  %v5057_v24 = vld [vmem:[%s10500_s13] sm:$0xff] }
 0xcbf   : > { %v4556_v25 = vpop.xlane.xlu1 %4555 }
 0xcc0   : > { %8952 = vrcp.f32 %v4556_v25  ;;  %v4553_v27 = vpop.xlane.xlu0 %4552  ;;  %v5059_v25 = vld [vmem:[%s10500_s13 + $0x40] sm:$0xff] }
 0xcc1   : > { %8954 = vrcp.f32 %v4553_v27  ;;  %v5058_v27 = vld [vmem:[%s10500_s13 + $0x8] sm:$0xff] }
 0xcc4   : > { %v4559_v26 = vpop.xlane.xlu0 %4558 }
 0xcc5   : > { %8956 = vrcp.f32 %v4559_v26  ;;  %v7611_v26 = vcombine.high %v5057_v24, %v5059_v25 }
 0xcc8   : > { %v4562_v12 = vpop.xlane.xlu1 %4561  ;;  %v4136_v62 = vpop.permute.xlu0 %4135 }
 0xcc9   : > { %8958 = vrcp.f32 %v4562_v12  ;;  %v4205_v3 = vadd.f32 %v9694_v32, %v4136_v62  ;;  %v4210_v50 = vadd.f32 %v9690_v30, %v4136_v62  ;;  %v4220_v8 = vadd.f32 %v9703_v34, %v4136_v62  ;;  %v5060_v12 = vld [vmem:[%s10500_s13 + $0x48] sm:$0xff] }
 0xcca   : > { %v8953_v63 = vpop.eup %8952  ;;  %v4215_v61 = vadd.f32 %v9707_v35, %v4136_v62  ;;  %v7610_v62 = vcombine.low %v5057_v24, %v5059_v25  ;;  %v8769_v24 = vld [vmem:[%s10502_s15 + $0x1c0] sm:$0xff]  }
 0xccb   : > { %v8955_v14 = vpop.eup %8954  ;;  %v4568_v60 = vmul.f32 %v8953_v63, %v8945_v0  ;;  %8529 = vmatpush3.msra.mxu0 %v4205_v3  ;;  %8534 = vmatpush3.msra.mxu1 %v4210_v50  ;;  %v7612_v3 = vcombine.low %v5058_v27, %v5060_v12  ;;  %v7613_v50 = vcombine.high %v5058_v27, %v5060_v12  ;;  %v5061_v63 = vld [vmem:[%s10500_s13 + $0x80] sm:$0xff] }
 0xccc   : > { %v4567_v7 = vmul.f32 %v8955_v14, %v8947_v17  ;;  %8543 = vmatprep.subr.mxu1 %v8993_v22  ;;  %8538 = vmatprep.subr.mxu0 %v8993_v22  ;;  %v5063_v14 = vld [vmem:[%s10500_s13 + $0xc0] sm:$0xff] }
 0xccd   : > { %8536 = vmatmul.mubr.msk.f32.vlgmr.msra.gmra.mrb[56].mxu1 %vm978_vm2, %v4568_v60  ;;  %v5062_v60 = vld [vmem:[%s10500_s13 + $0x88] sm:$0xff]  ;;  %v8771_v12 = vld [vmem:[%s10502_s15 + $0x180] sm:$0xff]  }
 0xcce   : > { %8544 = vmatpush3.msra.mxu1 %v4220_v8  ;;  %8531 = vmatmul.mubr.msk.f32.vlgmr.msra.gmra.mrb[52].mxu0 %vm978_vm2, %v4567_v7  ;;  %v7615_v7 = vcombine.high %v5061_v63, %v5063_v14  ;;  %v5064_v8 = vld [vmem:[%s10500_s13 + $0xc8] sm:$0xff] }
 0xccf   : > { %v8957_v21 = vpop.eup %8956  ;;  %8539 = vmatpush3.msra.mxu0 %v4215_v61  ;;  %8540 = vmatprep.mubr.msk.f32.mxu0 %vm8994_vm1, %v8993_v22  ;;  %v7614_v61 = vcombine.low %v5061_v63, %v5063_v14  ;;  %v8775_v63 = vld [vmem:[%s10502_s15 + $0x188] sm:$0xff]   ;;  %v8776_v14 = vld [vmem:[%s10502_s15 + $0x150] sm:$0xff]  }
 0xcd0   : > { %v4569_v28 = vmul.f32 %v8957_v21, %v8949_v59  ;;  %8545 = vmatprep.mubr.msk.f32.mxu1 %vm8994_vm1, %v8993_v22  ;;  %8548 = vmatprep.subr.mxu0 %v4863_v51  ;;  %v7616_v21 = vcombine.low %v5062_v60, %v5064_v8 }
 0xcd1   : > { %5133 = vmatprep.subr.bf16.mxu1 %v7611_v26  ;;  %v8770_v26 = vld [vmem:[%s10502_s15 + $0x100] sm:$0xff]  }
 0xcd2   : > { %8541 = vmatmul.mubr.msk.f32.vlgmr.msra.gmra.mrb[54].mxu0 %vm978_vm2, %v4569_v28  ;;  %v7617_v28 = vcombine.high %v5062_v60, %v5064_v8  ;;  %v8777_v60 = vld [vmem:[%s10502_s15 + $0x1d0] sm:$0xff]  }
 0xcd3   : > { %v8959_v30 = vpop.eup %8958  ;;  %8549 = vmatpush3.msra.mxu0 %v4863_v51  ;;  %v5329_v51 = vld [vmem:[%s10500_s13 + $0x50] sm:$0xff] }
 0xcd4   : > { %v4570_v32 = vmul.f32 %v8959_v30, %v8951_v29  ;;  %5186 = vmatprep.subr.bf16.mxu0 %v7613_v50  ;;  %v8998_v30 = vmov 0   ;;  %v8774_v50 = vld [vmem:[%s10502_s15 + $0x108] sm:$0xff]   ;;  %v8779_v8 = vld [vmem:[%s10502_s15 + $0x190] sm:$0xff]  }
 0xcd6   : > { %8546 = vmatmul.mubr.msk.f32.vlgmr.msra.gmra.mrb[58].mxu1 %vm978_vm2, %v4570_v32  ;;  %v5327_v32 = vld [vmem:[%s10500_s13 + $0x10] sm:$0xff] }
 0xcd7   : > { %5134 = vmatpush1.bf16.msra.mxu1 %v7610_v62  ;;  %5165 = vmatprep.mubr.bf16.mxu1 %v8998_v30  ;;  %v8772_v62 = vld [vmem:[%s10502_s15 + $0x148] sm:$0xff]  }
 0xcd8   : > { %5135 = vmatprep.subr.bf16.mxu1 %v7615_v7  ;;  %v8778_v7 = vld [vmem:[%s10502_s15 + $0x110] sm:$0xff]  }
 0xcdb   : > { %5136 = vmatpush1.bf16.msra.mxu1 %v7614_v61  ;;  %v8780_v61 = vld [vmem:[%s10502_s15 + $0x158] sm:$0xff]  }
 0xda0   : > { %v4713_v33 = vpop.f32.mrb[56].mxu1 }
 0xda1   : > { %v4640_v34 = vpop.f32.mrb[52].mxu0  ;;  %v8537_v35 = vpop.f32.mrb[57].mxu1 }
 0xda2   : > { %v8532_v36 = vpop.f32.mrb[53].mxu0  ;;  %8550 = vmatprep.mubr.msk.f32.mxu0 %vm978_vm2, %v4640_v34  ;;  %v7622_v34 = vcombine.low %v5327_v32, %v5329_v51  ;;  %v7623_v35 = vcombine.high %v5327_v32, %v5329_v51  ;;  %v8783_v32 = vld [vmem:[%s10502_s15 + $0x198] sm:$0xff]   ;;  %v8784_v51 = vld [vmem:[%s10502_s15 + $0x160] sm:$0xff]  }
 0xda3   : > { %8551 = vmatmul.mubr.msk.f32.vlgmr.msra.gmra.mrb[28].mxu0 %vm978_vm2, %v4713_v33  ;;  %v5328_v33 = vld [vmem:[%s10500_s13 + $0x18] sm:$0xff] }
 0xda4   : > { %5187 = vmatpush1.bf16.msra.mxu0 %v7612_v3  ;;  %v5330_v36 = vld [vmem:[%s10500_s13 + $0x58] sm:$0xff]  ;;  %5397 = vmatprep.subr.bf16.mxu1 %v7623_v35  ;;  %v8773_v3 = vld [vmem:[%s10502_s15 + $0x1c8] sm:$0xff]   ;;  %v8787_v35 = vld [vmem:[%s10502_s15 + $0x1a0] sm:$0xff]  }
 0xda5   : > { %v4786_v22 = vpop.f32.mrb[54].mxu0  ;;  %5188 = vmatprep.subr.bf16.mxu0 %v7617_v28  ;;  %v8782_v28 = vld [vmem:[%s10502_s15 + $0x118] sm:$0xff]  }
 0xda6   : > { %v8542_v15 = vpop.f32.mrb[55].mxu0  ;;  %8553 = vmatprep.mubr.msk.f32.mxu0 %vm978_vm2, %v4786_v22  ;;  %v7624_v22 = vcombine.low %v5328_v33, %v5330_v36 }
 0xda7   : > { %v7625_v15 = vcombine.high %v5328_v33, %v5330_v36  ;;  %v8785_v33 = vld [vmem:[%s10502_s15 + $0x1e0] sm:$0xff]   ;;  %v8788_v36 = vld [vmem:[%s10502_s15 + $0x168] sm:$0xff]  }
 0xda8   : > { %5189 = vmatpush1.bf16.msra.mxu0 %v7616_v21  ;;  %v8781_v21 = vld [vmem:[%s10502_s15 + $0x1d8] sm:$0xff]  }
 0xda9   : > { %v4859_v37 = vpop.f32.mrb[58].mxu1  ;;  %5450 = vmatprep.subr.bf16.mxu0 %v7625_v15  ;;  %v8790_v15 = vld [vmem:[%s10502_s15 + $0x128] sm:$0xff]  }
 0xdaa   : > { %v8547_v41 = vpop.f32.mrb[59].mxu1  ;;  %8554 = vmatmul.mubr.msk.f32.gmra.mrb[30].mxu0 %vm978_vm2, %v4859_v37 }
 0xdab   : > { %5218 = vmatprep.mubr.bf16.mxu0 %v8998_v30 }
 0xe76   : > { %v8552_v44 = vpop.f32.mrb[28].mxu0 }
 0xe77   : > { %v4973_v45 = vadd.f32 %v8552_v44, %v7607_v42  ;;  %v4942_v47 = vpop.f32.mrb[29].mxu0 }
 0xe78   : > { %v4972_v48 = vadd.f32 %v7607_v42, %v4942_v47 }
 0xe79   : > { %v4977_v4 = vadd.f32 %v9488_v38, %v4973_v45 }
 0xe7a   : > { %v4976_v6 = vadd.f32 %v9482_v31, %v4972_v48 }
 0xe7b   : > { %v4985_v5 = vsel %vm676_vm0, %v4977_v4, 0.0 }
 0xe7c   : > { %4986 = vadd.xlane.f32.xlu1 %v4985_v5  ;;  %v4982_v13 = vsel %vm676_vm0, %v4976_v6, 0.0 }
 0xe7d   : > { %v8555_v54 = vpop.f32.mrb[30].mxu0 }
 0xe7e   : > { %v4952_v9 = vpop.f32.mrb[31].mxu0  ;;  %v4975_v10 = vadd.f32 %v8555_v54, %v7607_v42 }
 0xe7f   : > { %v4974_v11 = vadd.f32 %v7607_v42, %v4952_v9 }
 0xe80   : > { %4983 = vadd.xlane.f32.xlu1 %v4982_v13  ;;  %v4979_v55 = vadd.f32 %v9498_v18, %v4975_v10  ;;  %v7608_v13 = vld [vmem:[%s10498_s11] ss:$0 sm:$0xff] }
 0xe81   : > { %v4978_v19 = vadd.f32 %v9493_v16, %v4974_v11 }
 0xe82   : > { %v4991_v38 = vsel %vm676_vm0, %v4979_v55, 0.0 }
 0xe83   : > { %v4988_v20 = vsel %vm676_vm0, %v4978_v19, 0.0 }
 0xe84   : > { %4989 = vadd.xlane.f32.xlu1 %v4988_v20 }
 0xe88   : > { %4992 = vadd.xlane.f32.xlu1 %v4991_v38 }
 0xf09   : > { %v4987_v49 = vpop.xlane.xlu1 %4986 }
 0xf0a   : > { %v4996_v31 = vmul.f32 0.03125, %v4987_v49  ;;  %v7609_v49 = vld [vmem:[%s10499_s12] ss:$0 sm:$0xff] }
 0xf0c   : > { %v9760_v56 = vsub.f32 %v4977_v4, %v4996_v31 }
 0xf0d   : > { %v4984_v2 = vpop.xlane.xlu1 %4983 }
 0xf0e   : > { %v4995_v53 = vmul.f32 0.03125, %v4984_v2  ;;  %v5004_v39 = vmul.f32 %v9760_v56, %v9760_v56 }
 0xf10   : > { %v9762_v52 = vsub.f32 %v4976_v6, %v4995_v53  ;;  %v5010_v59 = vsel %vm676_vm0, %v5004_v39, 0.0  ;;  %v5334_v39 = vld [vmem:[%s10500_s13 + $0xd8] sm:$0xff] }
 0xf11   : > { %v4990_v57 = vpop.xlane.xlu1 %4989 }
 0xf12   : > { %v4997_v1 = vmul.f32 0.03125, %v4990_v57  ;;  %v5003_v16 = vmul.f32 %v9762_v52, %v9762_v52 }
 0xf14   : > { %v9766_v46 = vsub.f32 %v4978_v19, %v4997_v1  ;;  %v5007_v18 = vsel %vm676_vm0, %v5003_v16, 0.0 }
 0xf15   : > { %5008 = vadd.xlane.f32.xlu1 %v5007_v18  ;;  %v4993_v0 = vpop.xlane.xlu1 %4992  ;;  %v5332_v18 = vld [vmem:[%s10500_s13 + $0x98] sm:$0xff] }
 0xf16   : > { %v4998_v17 = vmul.f32 0.03125, %v4993_v0  ;;  %v5005_v58 = vmul.f32 %v9766_v46, %v9766_v46 }
 0xf18   : > { %v9773_v43 = vsub.f32 %v4979_v55, %v4998_v17  ;;  %v5013_v40 = vsel %vm676_vm0, %v5005_v58, 0.0  ;;  %v7629_v58 = vcombine.high %v5332_v18, %v5334_v39 }
 0xf19   : > { %5011 = vadd.xlane.f32.xlu1 %v5010_v59  ;;  %5014 = vadd.xlane.f32.xlu0 %v5013_v40  ;;  %v7628_v40 = vcombine.low %v5332_v18, %v5334_v39 }
 0xf1a   : > { %v5006_v29 = vmul.f32 %v9773_v43, %v9773_v43 }
 0xf1c   : > { %v5016_v23 = vsel %vm676_vm0, %v5006_v29, 0.0 }
 0xf1d   : > { %5017 = vadd.xlane.f32.xlu1 %v5016_v23  ;;  %v8768_v23 = vld [vmem:[%s10502_s15 + $0x140] sm:$0xff]  }
 0xfa2   : > { %v5009_v37 = vpop.xlane.xlu1 %5008 }
 0xfa3   : > { %v5019_v41 = vmul.f32 0.03125, %v5009_v37  ;;  %v8791_v37 = vld [vmem:[%s10502_s15 + $0x1a8] sm:$0xff]  }
 0xfa5   : > { %v5023_v42 = vadd.f32 1e-05, %v5019_v41  ;;  %v8792_v41 = vld [vmem:[%s10502_s15 + $0x170] sm:$0xff]  }
 0xfa6   : > { %v5015_v44 = vpop.xlane.xlu0 %5014  ;;  %v5012_v45 = vpop.xlane.xlu1 %5011 }
 0xfa7   : > { %8960 = vrsqrt.f32 %v5023_v42  ;;  %v5021_v47 = vmul.f32 0.03125, %v5015_v44  ;;  %v5020_v48 = vmul.f32 0.03125, %v5012_v45  ;;  %v8793_v42 = vld [vmem:[%s10502_s15 + $0x1f0] sm:$0xff]  }
 0xfa8   : > { %v8794_v44 = vld [vmem:[%s10502_s15 + $0x130] sm:$0xff]  }
 0xfa9   : > { %v5024_v4 = vadd.f32 1e-05, %v5020_v48  ;;  %v5025_v5 = vadd.f32 1e-05, %v5021_v47  ;;  %v8795_v45 = vld [vmem:[%s10502_s15 + $0x1b0] sm:$0xff]   ;;  %v8796_v47 = vld [vmem:[%s10502_s15 + $0x178] sm:$0xff]  }
 0xfaa   : > { %v5018_v6 = vpop.xlane.xlu1 %5017  ;;  %v8797_v48 = vld [vmem:[%s10502_s15 + $0x1f8] sm:$0xff]  }
 0xfab   : > { %v5022_v54 = vmul.f32 0.03125, %v5018_v6  ;;  %8962 = vrsqrt.f32 %v5024_v4  ;;  %v8798_v4 = vld [vmem:[%s10502_s15 + $0x138] sm:$0xff]   ;;  %v8800_v6 = vld [vmem:[%s10502_s15 + $0x40] sm:$0xff]  }
 0xfac   : > { %8964 = vrsqrt.f32 %v5025_v5  ;;  %v8799_v5 = vld [vmem:[%s10502_s15 + $0x1b8] sm:$0xff]  }
 0xfad   : > { %v5026_v9 = vadd.f32 1e-05, %v5022_v54  ;;  %v8801_v54 = vld [vmem:[%s10502_s15 + $0xc0] sm:$0xff]  }
 0xfaf   : > { %8966 = vrsqrt.f32 %v5026_v9  ;;  %v5067_v9 = vlaneseq }
 0xfb1   : > { %v8961_v10 = vpop.eup %8960 }
 0xfb2   : > { %v5031_v11 = vmul.f32 %v8961_v10, %v9762_v52  ;;  %v5331_v52 = vld [vmem:[%s10500_s13 + $0x90] sm:$0xff]  ;;  %v5068_v10 = vshrl.u32 %v5067_v9, 7 }
 0xfb4   : > { %v5041_v20 = vmul.f32 %v7608_v13, %v5031_v11  ;;  %v9980_v11 = vsub.s32 0, %v5068_v10 }
 0xfb5   : > { %v8963_v19 = vpop.eup %8962 }
 0xfb6   : > { %v5032_v55 = vmul.f32 %v8963_v19, %v9760_v56  ;;  %v8965_v38 = vpop.eup %8964  ;;  %v9830_v57 = vadd.f32 %v7609_v49, %v5041_v20  ;;  %v5333_v56 = vld [vmem:[%s10500_s13 + $0xd0] sm:$0xff]  ;;  %v5065_v19 = vld [vmem:[%s10501_s14] sm:$0xf]  ;;  %v9987_v20 = vsub.s32 1, %v5068_v10 }
 0xfb7   : > { %v5033_v1 = vmul.f32 %v8965_v38, %v9766_v46  ;;  %v7627_v46 = vcombine.high %v5331_v52, %v5333_v56  ;;  %v7626_v59 = vcombine.low %v5331_v52, %v5333_v56  ;;  %v5070_v38 = vrot.slane %v5065_v19, %v9980_v11 }
 0xfb8   : > { %v5042_v2 = vmul.f32 %v7608_v13, %v5032_v55  ;;  %v9989_v55 = vsub.s32 3, %v5068_v10 }
 0xfb9   : > { %v8967_v31 = vpop.eup %8966 }
 0xfba   : > { %v5034_v53 = vmul.f32 %v8967_v31, %v9773_v43  ;;  %v9833_v16 = vadd.f32 %v7609_v49, %v5042_v2  ;;  %v5043_v43 = vmul.f32 %v7608_v13, %v5033_v1  ;;  %v5074_v31 = vrot.slane %v5065_v19, %v9987_v20 }
 0xfbb   : > { %v5082_v2 = vrot.slane %v5065_v19, %v9989_v55 }
 0xfbc   : > { %v9846_v0 = vpack.c.bf16 %v9833_v16, %v9830_v57  ;;  %v5044_v17 = vmul.f32 %v7608_v13, %v5034_v53  ;;  %v9862_v25 = vadd.f32 %v7609_v49, %v5043_v43  ;;  %v9982_v13 = vsub.s32 2, %v5068_v10 }
 0xfbe   : > { %7618 = vmatmul.mubr.msk.bf16.vlgmr.msra.gmra.mrb[60].mxu1 %vm676_vm0, %v9846_v0  ;;  %7620 = vmatmul.mubr.msk.bf16.vlgmr.msra.gmra.mrb[56].mxu0 %vm676_vm0, %v9846_v0  ;;  %v9852_v29 = vadd.f32 %v7609_v49, %v5044_v17  ;;  %v5078_v49 = vrot.slane %v5065_v19, %v9982_v13 }
 0xfbf   : > { %5398 = vmatpush1.bf16.msra.mxu1 %v7622_v34  ;;  %5451 = vmatpush1.bf16.msra.mxu0 %v7624_v22  ;;  %v8786_v34 = vld [vmem:[%s10502_s15 + $0x120] sm:$0xff]   ;;  %v8789_v22 = vld [vmem:[%s10502_s15 + $0x1e8] sm:$0xff]  }
 0xfc0   : > { %5175 = vmatprep.mubr.bf16.mxu1 %v8998_v30  ;;  %5228 = vmatprep.mubr.bf16.mxu0 %v8998_v30  ;;  %v9866_v27 = vpack.c.bf16 %v9852_v29, %v9862_v25 }
 0xfc1   : > { %5399 = vmatprep.subr.bf16.mxu1 %v7627_v46  ;;  %5452 = vmatprep.subr.bf16.mxu0 %v7629_v58 }
 0xfc3   : > { %5400 = vmatpush1.bf16.msra.mxu1 %v7626_v59  ;;  %5453 = vmatpush1.bf16.msra.mxu0 %v7628_v40 }
 0xfc4   : > { %7972 = vmatprep.subr.bf16.mxu1 %v8768_v23  ;;  %8000 = vmatprep.subr.bf16.mxu0 %v8769_v24 }
 0xfc6   : > { %7619 = vmatmul.mubr.msk.bf16.gmra.mrb[64].mxu1 %vm676_vm0, %v9866_v27  ;;  %7621 = vmatmul.mubr.msk.bf16.gmra.mrb[60].mxu0 %vm676_vm0, %v9866_v27 }
 0xfc7   : > { %5429 = vmatprep.mubr.bf16.mxu1 %v8998_v30  ;;  %5482 = vmatprep.mubr.bf16.mxu0 %v8998_v30 }
 0xfce   : > { %7630 = vmatmul.mubr.msk.bf16.vlgmr.msra.gmra.mrb[68].mxu1 %vm676_vm0, %v9846_v0  ;;  %7632 = vmatmul.mubr.msk.bf16.vlgmr.msra.gmra.mrb[64].mxu0 %vm676_vm0, %v9846_v0 }
 0xfcf   : > { %5439 = vmatprep.mubr.bf16.mxu1 %v8998_v30  ;;  %5492 = vmatprep.mubr.bf16.mxu0 %v8998_v30 }
 0xfd0   : > { %7973 = vmatpush3.bf16.msra.mxu1 %v8770_v26  ;;  %8001 = vmatpush3.bf16.msra.mxu0 %v8771_v12 }
 0xfd1   : > { %7974 = vmatprep.subr.bf16.mxu1 %v8772_v62  ;;  %8002 = vmatprep.subr.bf16.mxu0 %v8773_v3 }
 0xfd4   : > { %7975 = vmatpush3.bf16.msra.mxu1 %v8774_v50  ;;  %8003 = vmatpush3.bf16.msra.mxu0 %v8775_v63 }
 0xfd5   : > { %7976 = vmatprep.subr.bf16.mxu1 %v8776_v14  ;;  %8004 = vmatprep.subr.bf16.mxu0 %v8777_v60 }
 0xfd6   : > { %7631 = vmatmul.mubr.msk.bf16.gmra.mrb[72].mxu1 %vm676_vm0, %v9866_v27  ;;  %7633 = vmatmul.mubr.msk.bf16.gmra.mrb[68].mxu0 %vm676_vm0, %v9866_v27 }
 0xfd8   : > { %7977 = vmatpush3.bf16.msra.mxu1 %v8778_v7  ;;  %8005 = vmatpush3.bf16.msra.mxu0 %v8779_v8 }
 0xfd9   : > { %7978 = vmatprep.subr.bf16.mxu1 %v8780_v61  ;;  %8006 = vmatprep.subr.bf16.mxu0 %v8781_v21 }
 0xfdc   : > { %7979 = vmatpush3.bf16.msra.mxu1 %v8782_v28  ;;  %8007 = vmatpush3.bf16.msra.mxu0 %v8783_v32 }
 0xfdd   : > { %7980 = vmatprep.subr.bf16.mxu1 %v8784_v51  ;;  %8008 = vmatprep.subr.bf16.mxu0 %v8785_v33 }
 0xfe0   : > { %7981 = vmatpush3.bf16.msra.mxu1 %v8786_v34  ;;  %8009 = vmatpush3.bf16.msra.mxu0 %v8787_v35  ;;  %v5335_v34 = vld [vmem:[%s10501_s14 + $0x4] sm:$0xf] }
 0xfe1   : > { %7982 = vmatprep.subr.bf16.mxu1 %v8788_v36  ;;  %8010 = vmatprep.subr.bf16.mxu0 %v8789_v22  ;;  %v10009_v10 = vrot.slane %v5335_v34, %v9987_v20  ;;  %v10012_v19 = vrot.slane %v5335_v34, %v9989_v55 }
 0xfe4   : > { %7983 = vmatpush3.bf16.msra.mxu1 %v8790_v15  ;;  %8011 = vmatpush3.bf16.msra.mxu0 %v8791_v37 }
 0xfe5   : > { %7984 = vmatprep.subr.bf16.mxu1 %v8792_v41  ;;  %8012 = vmatprep.subr.bf16.mxu0 %v8793_v42 }
 0xfe8   : > { %7985 = vmatpush3.bf16.msra.mxu1 %v8794_v44  ;;  %8013 = vmatpush3.bf16.msra.mxu0 %v8795_v45 }
 0xfe9   : > { %7986 = vmatprep.subr.bf16.mxu1 %v8796_v47  ;;  %8014 = vmatprep.subr.bf16.mxu0 %v8797_v48 }
 0xfec   : > { %7987 = vmatpush3.bf16.msra.mxu1 %v8798_v4  ;;  %8015 = vmatpush3.bf16.msra.mxu0 %v8799_v5  ;;  %v5340_v5 = vrot.slane %v5335_v34, %v9980_v11 }
 0xfed   : > { %8028 = vmatprep.subr.bf16.mxu1 %v8800_v6  ;;  %8056 = vmatprep.subr.bf16.mxu0 %v8801_v54  ;;  %v5348_v6 = vrot.slane %v5335_v34, %v9982_v13 }
0x1091   : > { %v5167_v53 = vpop.f32.mrb[60].mxu1  ;;  %v5220_v52 = vpop.f32.mrb[56].mxu0 }
0x1092   : > { %v5168_v1 = vadd.f32 %v5167_v53, %v5070_v38  ;;  %v5221_v56 = vadd.f32 %v5220_v52, %v5078_v49  ;;  %v5169_v18 = vpop.f32.mrb[61].mxu1  ;;  %v5222_v39 = vpop.f32.mrb[57].mxu0 }
0x1093   : > { %v5170_v17 = vadd.f32 %v5169_v18, %v5074_v31  ;;  %v5223_v46 = vadd.f32 %v5222_v39, %v5082_v2  ;;  %v5171_v58 = vpop.f32.mrb[62].mxu1  ;;  %v5224_v43 = vpop.f32.mrb[58].mxu0 }
0x1094   : > { %v5172_v59 = vadd.f32 %v5171_v58, %v5070_v38  ;;  %v5225_v40 = vadd.f32 %v5224_v43, %v5078_v49  ;;  %v5173_v23 = vpop.f32.mrb[63].mxu1  ;;  %v5226_v24 = vpop.f32.mrb[59].mxu0  ;;  %v5239_v62 = vmax.f32 %v5168_v1, 0.0  ;;  %v5241_v3 = vmax.f32 %v5221_v56, 0.0 }
0x1095   : > { %v5174_v26 = vadd.f32 %v5173_v23, %v5074_v31  ;;  %v5227_v12 = vadd.f32 %v5226_v24, %v5082_v2  ;;  %v5240_v14 = vmax.f32 %v5170_v17, 0.0  ;;  %v5242_v60 = vmax.f32 %v5223_v46, 0.0 }
0x1096   : > { %v5243_v50 = vmax.f32 %v5172_v59, 0.0  ;;  %v5245_v63 = vmax.f32 %v5225_v40, 0.0 }
0x1097   : > { %v5244_v7 = vmax.f32 %v5174_v26, 0.0  ;;  %v5246_v8 = vmax.f32 %v5227_v12, 0.0 }
0x1098   : > { %v9995_v61 = vpack.c.bf16 %v5243_v50, %v5239_v62  ;;  %v9997_v21 = vpack.c.bf16 %v5245_v63, %v5241_v3 }
0x1099   : > { %v9999_v28 = vpack.c.bf16 %v5244_v7, %v5240_v14  ;;  %v10001_v32 = vpack.c.bf16 %v5246_v8, %v5242_v60  ;;  %v5177_v51 = vpop.f32.mrb[64].mxu1  ;;  %v5230_v33 = vpop.f32.mrb[60].mxu0 }
0x109a   : > { %v5178_v35 = vadd.f32 %v5177_v51, %v5070_v38  ;;  %v5231_v36 = vadd.f32 %v5230_v33, %v5078_v49  ;;  %v5179_v22 = vpop.f32.mrb[65].mxu1  ;;  %v5232_v15 = vpop.f32.mrb[61].mxu0 }
0x109b   : > { %v5180_v37 = vadd.f32 %v5179_v22, %v5074_v31  ;;  %v5233_v41 = vadd.f32 %v5232_v15, %v5082_v2  ;;  %v5181_v42 = vpop.f32.mrb[66].mxu1  ;;  %v5234_v44 = vpop.f32.mrb[62].mxu0 }
0x109c   : > { %v5182_v45 = vadd.f32 %v5181_v42, %v5070_v38  ;;  %v5235_v47 = vadd.f32 %v5234_v44, %v5078_v49  ;;  %v5183_v48 = vpop.f32.mrb[67].mxu1  ;;  %v5236_v4 = vpop.f32.mrb[63].mxu0  ;;  %v5247_v53 = vmax.f32 %v5178_v35, 0.0  ;;  %v5249_v52 = vmax.f32 %v5231_v36, 0.0 }
0x109d   : > { %v5184_v54 = vadd.f32 %v5183_v48, %v5074_v31  ;;  %v5237_v9 = vadd.f32 %v5236_v4, %v5082_v2  ;;  %v5248_v38 = vmax.f32 %v5180_v37, 0.0  ;;  %v5250_v49 = vmax.f32 %v5233_v41, 0.0  ;;  %v8802_v4 = vld [vmem:[%s10502_s15] sm:$0xff]  }
0x109e   : > { %v5251_v1 = vmax.f32 %v5182_v45, 0.0  ;;  %v5253_v56 = vmax.f32 %v5235_v47, 0.0 }
0x109f   : > { %v5252_v18 = vmax.f32 %v5184_v54, 0.0  ;;  %v5254_v39 = vmax.f32 %v5237_v9, 0.0  ;;  %v8803_v54 = vld [vmem:[%s10502_s15 + $0x80] sm:$0xff]  }
0x10a0   : > { %v10014_v17 = vpack.c.bf16 %v5251_v1, %v5247_v53  ;;  %v10016_v46 = vpack.c.bf16 %v5253_v56, %v5249_v52  ;;  %v8804_v56 = vld [vmem:[%s10502_s15 + $0x48] sm:$0xff]  }
0x10a1   : > { %v10018_v31 = vpack.c.bf16 %v5252_v18, %v5248_v38  ;;  %v10020_v2 = vpack.c.bf16 %v5254_v39, %v5250_v49  ;;  %v5431_v58 = vpop.f32.mrb[68].mxu1  ;;  %v5484_v43 = vpop.f32.mrb[64].mxu0  ;;  %v8805_v38 = vld [vmem:[%s10502_s15 + $0xc8] sm:$0xff]  }
0x10a2   : > { %v5432_v59 = vadd.f32 %v5431_v58, %v5340_v5  ;;  %v5485_v40 = vadd.f32 %v5484_v43, %v5348_v6  ;;  %v5433_v23 = vpop.f32.mrb[69].mxu1  ;;  %v5486_v24 = vpop.f32.mrb[65].mxu0 }
0x10a3   : > { %v5434_v26 = vadd.f32 %v5433_v23, %v10009_v10  ;;  %v5487_v12 = vadd.f32 %v5486_v24, %v10012_v19  ;;  %v5435_v62 = vpop.f32.mrb[70].mxu1  ;;  %v5488_v3 = vpop.f32.mrb[66].mxu0 }
0x10a4   : > { %v5436_v50 = vadd.f32 %v5435_v62, %v5340_v5  ;;  %v5489_v63 = vadd.f32 %v5488_v3, %v5348_v6  ;;  %v5437_v14 = vpop.f32.mrb[71].mxu1  ;;  %v5490_v60 = vpop.f32.mrb[67].mxu0  ;;  %v5503_v51 = vmax.f32 %v5432_v59, 0.0  ;;  %v5505_v33 = vmax.f32 %v5485_v40, 0.0  ;;  %v8807_v62 = vld [vmem:[%s10502_s15 + $0x88] sm:$0xff]  }
0x10a5   : > { %v5438_v7 = vadd.f32 %v5437_v14, %v10009_v10  ;;  %v5491_v8 = vadd.f32 %v5490_v60, %v10012_v19  ;;  %v5504_v36 = vmax.f32 %v5434_v26, 0.0  ;;  %v5506_v22 = vmax.f32 %v5487_v12, 0.0  ;;  %v8806_v12 = vld [vmem:[%s10502_s15 + $0x8] sm:$0xff]  }
0x10a6   : > { %v5507_v34 = vmax.f32 %v5436_v50, 0.0  ;;  %v5509_v35 = vmax.f32 %v5489_v63, 0.0 }
0x10a7   : > { %v5508_v15 = vmax.f32 %v5438_v7, 0.0  ;;  %v5510_v37 = vmax.f32 %v5491_v8, 0.0 }
0x10a8   : > { %v5519_v41 = vpack.c.bf16 %v5507_v34, %v5503_v51  ;;  %v5521_v42 = vpack.c.bf16 %v5509_v35, %v5505_v33  ;;  %v8810_v35 = vld [vmem:[%s10502_s15 + $0x10] sm:$0xff]  }
0x10a9   : > { %v5520_v44 = vpack.c.bf16 %v5508_v15, %v5504_v36  ;;  %v5522_v45 = vpack.c.bf16 %v5510_v37, %v5506_v22  ;;  %v5441_v47 = vpop.f32.mrb[72].mxu1  ;;  %v5494_v48 = vpop.f32.mrb[68].mxu0  ;;  %v8811_v36 = vld [vmem:[%s10502_s15 + $0x90] sm:$0xff]   ;;  %v8812_v22 = vld [vmem:[%s10502_s15 + $0x58] sm:$0xff]  }
0x10aa   : > { %v5442_v9 = vadd.f32 %v5441_v47, %v5340_v5  ;;  %v5495_v53 = vadd.f32 %v5494_v48, %v5348_v6  ;;  %v5443_v52 = vpop.f32.mrb[73].mxu1  ;;  %v5496_v1 = vpop.f32.mrb[69].mxu0  ;;  %v8813_v15 = vld [vmem:[%s10502_s15 + $0xd8] sm:$0xff]   ;;  %v8821_v47 = vld [vmem:[%s10502_s15 + $0xe8] sm:$0xff]  }
0x10ab   : > { %v5444_v49 = vadd.f32 %v5443_v52, %v10009_v10  ;;  %v5497_v18 = vadd.f32 %v5496_v1, %v10012_v19  ;;  %v5445_v39 = vpop.f32.mrb[74].mxu1  ;;  %v5498_v58 = vpop.f32.mrb[70].mxu0  ;;  %5815 = vmatprep.mubr.bf16.mxu1 %v5520_v44  ;;  %5864 = vmatprep.mubr.bf16.mxu0 %v5522_v45  ;;  %v8814_v37 = vld [vmem:[%s10502_s15 + $0x18] sm:$0xff]   ;;  %v8817_v44 = vld [vmem:[%s10502_s15 + $0xe0] sm:$0xff]   ;;  %v8822_v48 = vld [vmem:[%s10502_s15 + $0x28] sm:$0xff]  }
0x10ac   : > { %v5446_v43 = vadd.f32 %v5445_v39, %v5340_v5  ;;  %v5499_v59 = vadd.f32 %v5498_v58, %v5348_v6  ;;  %v5447_v40 = vpop.f32.mrb[75].mxu1  ;;  %v5500_v23 = vpop.f32.mrb[71].mxu0  ;;  %5816 = vmatmul.mubr.bf16.vlgmr.msra.gmra.mrb[76].mxu1 %v5519_v41  ;;  %5865 = vmatmul.mubr.bf16.vlgmr.msra.gmra.mrb[72].mxu0 %v5521_v42  ;;  %v5511_v5 = vmax.f32 %v5442_v9, 0.0  ;;  %v5513_v6 = vmax.f32 %v5495_v53, 0.0  ;;  %v8815_v41 = vld [vmem:[%s10502_s15 + $0x98] sm:$0xff]   ;;  %v8816_v42 = vld [vmem:[%s10502_s15 + $0x60] sm:$0xff]  }
0x10ad   : > { %v5448_v24 = vadd.f32 %v5447_v40, %v10009_v10  ;;  %v5501_v26 = vadd.f32 %v5500_v23, %v10012_v19  ;;  %8029 = vmatpush3.bf16.msra.mxu1 %v8802_v4  ;;  %8057 = vmatpush3.bf16.msra.mxu0 %v8803_v54  ;;  %v8808_v10 = vld [vmem:[%s10502_s15 + $0x50] sm:$0xff]   ;;  %v5512_v63 = vmax.f32 %v5444_v49, 0.0  ;;  %v5514_v14 = vmax.f32 %v5497_v18, 0.0  ;;  %v8818_v45 = vld [vmem:[%s10502_s15 + $0x20] sm:$0xff]   ;;  %v8823_v4 = vld [vmem:[%s10502_s15 + $0xa8] sm:$0xff]  }
0x10ae   : > { %v5515_v3 = vmax.f32 %v5446_v43, 0.0  ;;  %v5517_v50 = vmax.f32 %v5499_v59, 0.0  ;;  %8030 = vmatprep.subr.bf16.mxu1 %v8804_v56  ;;  %8058 = vmatprep.subr.bf16.mxu0 %v8805_v38  ;;  %v8809_v19 = vld [vmem:[%s10502_s15 + $0xd0] sm:$0xff]   ;;  %v8828_v1 = vld [vmem:[%s10502_s15 + $0x78] sm:$0xff]   ;;  %v6171_v38 = vld [vmem:[%s10500_s13 + $0x20] sm:$0xff] }
0x10af   : > { %v5516_v60 = vmax.f32 %v5448_v24, 0.0  ;;  %v5518_v7 = vmax.f32 %v5501_v26, 0.0  ;;  %v8824_v54 = vld [vmem:[%s10502_s15 + $0x70] sm:$0xff]   ;;  %v8829_v56 = vld [vmem:[%s10502_s15 + $0xf8] sm:$0xff]   ;;  %v6173_v49 = vld [vmem:[%s10500_s13 + $0x60] sm:$0xff] }
0x10b0   : > { %v5523_v8 = vpack.c.bf16 %v5515_v3, %v5511_v5  ;;  %v5525_v51 = vpack.c.bf16 %v5517_v50, %v5513_v6  ;;  %v8825_v9 = vld [vmem:[%s10502_s15 + $0xf0] sm:$0xff]   ;;  %v6172_v18 = vld [vmem:[%s10500_s13 + $0x28] sm:$0xff]  ;;  %v8830_v58 = vld [vmem:[%s10502_s15 + $0x38] sm:$0xff]   ;;  %v7699_v59 = vcombine.high %v6171_v38, %v6173_v49 }
0x10b1   : > { %v5524_v33 = vpack.c.bf16 %v5516_v60, %v5512_v63  ;;  %v5526_v34 = vpack.c.bf16 %v5518_v7, %v5514_v14  ;;  %8031 = vmatpush3.bf16.msra.mxu1 %v8806_v12  ;;  %8059 = vmatpush3.bf16.msra.mxu0 %v8807_v62  ;;  %v8826_v53 = vld [vmem:[%s10502_s15 + $0x30] sm:$0xff]   ;;  %v6174_v39 = vld [vmem:[%s10500_s13 + $0x68] sm:$0xff]  ;;  %v8831_v43 = vld [vmem:[%s10502_s15 + $0xb8] sm:$0xff]   ;;  %v7698_v62 = vcombine.low %v6171_v38, %v6173_v49 }
0x10b2   : > { %8032 = vmatprep.subr.bf16.mxu1 %v8808_v10  ;;  %8060 = vmatprep.subr.bf16.mxu0 %v8809_v19  ;;  %v8827_v52 = vld [vmem:[%s10502_s15 + $0xb0] sm:$0xff]   ;;  %v7701_v40 = vcombine.high %v6172_v18, %v6174_v39  ;;  %v6175_v23 = vld [vmem:[%s10500_s13 + $0xa0] sm:$0xff]  ;;  %v6176_v26 = vld [vmem:[%s10500_s13 + $0xa8] sm:$0xff]  ;;  %v7700_v5 = vcombine.low %v6172_v18, %v6174_v39 }
0x10b3   : > { %5823 = vmatprep.mubr.bf16.mxu1 %v5524_v33  ;;  %5872 = vmatprep.mubr.bf16.mxu0 %v5526_v34  ;;  %v6177_v24 = vld [vmem:[%s10500_s13 + $0xe0] sm:$0xff]  ;;  %v6178_v12 = vld [vmem:[%s10500_s13 + $0xe8] sm:$0xff]  ;;  %v8840_v14 = vld [vmem:[%s10502_s15 + $0x250] sm:$0xff]  }
0x10b4   : > { %5824 = vmatmul.mubr.bf16.gmra.mrb[80].mxu1 %v5523_v8  ;;  %5873 = vmatmul.mubr.bf16.gmra.mrb[76].mxu0 %v5525_v51  ;;  %v7703_v6 = vcombine.high %v6175_v23, %v6177_v24  ;;  %v7705_v3 = vcombine.high %v6176_v26, %v6178_v12  ;;  %v7702_v50 = vcombine.low %v6175_v23, %v6177_v24  ;;  %v8838_v19 = vld [vmem:[%s10502_s15 + $0x208] sm:$0xff]   ;;  %v8841_v60 = vld [vmem:[%s10502_s15 + $0x2d0] sm:$0xff]   ;;  %v8844_v51 = vld [vmem:[%s10502_s15 + $0x258] sm:$0xff]  }
0x10b5   : > { %8033 = vmatpush3.bf16.msra.mxu1 %v8810_v35  ;;  %8061 = vmatpush3.bf16.msra.mxu0 %v8811_v36  ;;  %v7704_v10 = vcombine.low %v6176_v26, %v6178_v12  ;;  %v8839_v63 = vld [vmem:[%s10502_s15 + $0x288] sm:$0xff]   ;;  %v8842_v7 = vld [vmem:[%s10502_s15 + $0x210] sm:$0xff]   ;;  %v8845_v33 = vld [vmem:[%s10502_s15 + $0x2d8] sm:$0xff]  }
0x10b6   : > { %6105 = vmatprep.mubr.bf16.mxu1 %v9999_v28  ;;  %6154 = vmatprep.mubr.bf16.mxu0 %v10001_v32  ;;  %v8819_v28 = vld [vmem:[%s10502_s15 + $0xa0] sm:$0xff]   ;;  %v8820_v32 = vld [vmem:[%s10502_s15 + $0x68] sm:$0xff]   ;;  %v8843_v8 = vld [vmem:[%s10502_s15 + $0x290] sm:$0xff]  }
0x10b7   : > { %8034 = vmatprep.subr.bf16.mxu1 %v8812_v22  ;;  %8062 = vmatprep.subr.bf16.mxu0 %v8813_v15  ;;  %v8846_v34 = vld [vmem:[%s10502_s15 + $0x218] sm:$0xff]   ;;  %v8848_v36 = vld [vmem:[%s10502_s15 + $0x260] sm:$0xff]  }
0x10b8   : > { %v8847_v35 = vld [vmem:[%s10502_s15 + $0x298] sm:$0xff]   ;;  %v8849_v22 = vld [vmem:[%s10502_s15 + $0x2e0] sm:$0xff]  }
0x10b9   : > { %8035 = vmatpush3.bf16.msra.mxu1 %v8814_v37  ;;  %8063 = vmatpush3.bf16.msra.mxu0 %v8815_v41  ;;  %v8850_v15 = vld [vmem:[%s10502_s15 + $0x220] sm:$0xff]   ;;  %v8852_v41 = vld [vmem:[%s10502_s15 + $0x268] sm:$0xff]   ;;  %v10282_v18 = vld [vmem:[%s10500_s13 + $0x78] sm:$0xff] }
0x10ba   : > { %8036 = vmatprep.subr.bf16.mxu1 %v8816_v42  ;;  %8064 = vmatprep.subr.bf16.mxu0 %v8817_v44  ;;  %v8851_v37 = vld [vmem:[%s10502_s15 + $0x2a0] sm:$0xff]   ;;  %v8853_v42 = vld [vmem:[%s10502_s15 + $0x2e8] sm:$0xff]  }
0x10bb   : > { %v8854_v44 = vld [vmem:[%s10502_s15 + $0x228] sm:$0xff]  }
0x10bd   : > { %8037 = vmatpush3.bf16.msra.mxu1 %v8818_v45  ;;  %8065 = vmatpush3.bf16.msra.mxu0 %v8819_v28  ;;  %v8855_v45 = vld [vmem:[%s10502_s15 + $0x2a8] sm:$0xff]   ;;  %v8856_v28 = vld [vmem:[%s10502_s15 + $0x270] sm:$0xff]  }
0x10be   : > { %8038 = vmatprep.subr.bf16.mxu1 %v8820_v32  ;;  %8066 = vmatprep.subr.bf16.mxu0 %v8821_v47  ;;  %v8857_v32 = vld [vmem:[%s10502_s15 + $0x2f0] sm:$0xff]  }
0x10bf   : > { %v8858_v47 = vld [vmem:[%s10502_s15 + $0x230] sm:$0xff]  }
0x10c1   : > { %8039 = vmatpush3.bf16.msra.mxu1 %v8822_v48  ;;  %8067 = vmatpush3.bf16.msra.mxu0 %v8823_v4  ;;  %v8859_v48 = vld [vmem:[%s10502_s15 + $0x2b0] sm:$0xff]   ;;  %v8860_v4 = vld [vmem:[%s10502_s15 + $0x278] sm:$0xff]  }
0x10c2   : > { %8040 = vmatprep.subr.bf16.mxu1 %v8824_v54  ;;  %8068 = vmatprep.subr.bf16.mxu0 %v8825_v9  ;;  %v8861_v54 = vld [vmem:[%s10502_s15 + $0x2f8] sm:$0xff]  }
0x10c3   : > { %v8862_v9 = vld [vmem:[%s10502_s15 + $0x238] sm:$0xff]  }
0x10c5   : > { %8041 = vmatpush3.bf16.msra.mxu1 %v8826_v53  ;;  %8069 = vmatpush3.bf16.msra.mxu0 %v8827_v52  ;;  %v8863_v53 = vld [vmem:[%s10502_s15 + $0x2b8] sm:$0xff]   ;;  %v10263_v52 = vld [vmem:[%s10500_s13 + $0x30] sm:$0xff] }
0x10c6   : > { %8042 = vmatprep.subr.bf16.mxu1 %v8828_v1  ;;  %8070 = vmatprep.subr.bf16.mxu0 %v8829_v56  ;;  %v10268_v1 = vld [vmem:[%s10500_s13 + $0x70] sm:$0xff]  ;;  %v10273_v56 = vld [vmem:[%s10500_s13 + $0x38] sm:$0xff] }
0x10c7   : > { %v7742_v38 = vcombine.low %v10263_v52, %v10268_v1  ;;  %v7743_v49 = vcombine.high %v10263_v52, %v10268_v1  ;;  %v7744_v39 = vcombine.low %v10273_v56, %v10282_v18  ;;  %v8865_v52 = vld [vmem:[%s10502_s15 + $0x3c0] sm:$0xff]  }
0x10c9   : > { %8043 = vmatpush3.bf16.msra.mxu1 %v8830_v58  ;;  %8071 = vmatpush3.bf16.msra.mxu0 %v8831_v43  ;;  %v7745_v58 = vcombine.high %v10273_v56, %v10282_v18 }
0x10ca   : > { %6241 = vmatprep.subr.bf16.mxu1 %v7699_v59  ;;  %6294 = vmatprep.subr.bf16.mxu0 %v7701_v40 }
0x10cc   : > { %6106 = vmatmul.mubr.bf16.vlgmr.msra.gmra.mrb[84].mxu1 %v9995_v61  ;;  %6155 = vmatmul.mubr.bf16.vlgmr.msra.gmra.mrb[80].mxu0 %v9997_v21  ;;  %v8832_v61 = vld [vmem:[%s10502_s15 + $0x240] sm:$0xff]  }
0x10cd   : > { %6113 = vmatprep.mubr.bf16.mxu1 %v10018_v31  ;;  %6162 = vmatprep.mubr.bf16.mxu0 %v10020_v2  ;;  %v8833_v21 = vld [vmem:[%s10502_s15 + $0x2c0] sm:$0xff]   ;;  %v8836_v31 = vld [vmem:[%s10502_s15 + $0x248] sm:$0xff]  }
0x10ce   : > { %6242 = vmatpush1.bf16.msra.mxu1 %v7698_v62  ;;  %6295 = vmatpush1.bf16.msra.mxu0 %v7700_v5  ;;  %v8837_v2 = vld [vmem:[%s10502_s15 + $0x2c8] sm:$0xff]  }
0x10cf   : > { %6243 = vmatprep.subr.bf16.mxu1 %v7703_v6  ;;  %6296 = vmatprep.subr.bf16.mxu0 %v7705_v3 }
0x10d2   : > { %6244 = vmatpush1.bf16.msra.mxu1 %v7702_v50  ;;  %6297 = vmatpush1.bf16.msra.mxu0 %v7704_v10 }
0x10d3   : > { %8084 = vmatprep.subr.bf16.mxu1 %v8832_v61  ;;  %8112 = vmatprep.subr.bf16.mxu0 %v8833_v21 }
0x10d4   : > { %6114 = vmatmul.mubr.bf16.gmra.mrb[88].mxu1 %v10014_v17  ;;  %6163 = vmatmul.mubr.bf16.gmra.mrb[84].mxu0 %v10016_v46  ;;  %v8834_v17 = vld [vmem:[%s10502_s15 + $0x200] sm:$0xff]  }
0x10d5   : > { %6273 = vmatprep.mubr.bf16.mxu1 %v8998_v30  ;;  %6326 = vmatprep.mubr.bf16.mxu0 %v8998_v30  ;;  %v8835_v46 = vld [vmem:[%s10502_s15 + $0x280] sm:$0xff]  }
0x10dc   : > { %7706 = vmatmul.mubr.msk.bf16.vlgmr.msra.gmra.mrb[92].mxu1 %vm676_vm0, %v9846_v0  ;;  %7708 = vmatmul.mubr.msk.bf16.vlgmr.msra.gmra.mrb[88].mxu0 %vm676_vm0, %v9846_v0 }
0x10dd   : > { %6283 = vmatprep.mubr.bf16.mxu1 %v8998_v30  ;;  %6336 = vmatprep.mubr.bf16.mxu0 %v8998_v30 }
0x10de   : > { %8085 = vmatpush3.bf16.msra.mxu1 %v8834_v17  ;;  %8113 = vmatpush3.bf16.msra.mxu0 %v8835_v46 }
0x10df   : > { %8086 = vmatprep.subr.bf16.mxu1 %v8836_v31  ;;  %8114 = vmatprep.subr.bf16.mxu0 %v8837_v2 }
0x10e2   : > { %8087 = vmatpush3.bf16.msra.mxu1 %v8838_v19  ;;  %8115 = vmatpush3.bf16.msra.mxu0 %v8839_v63 }
0x10e3   : > { %8088 = vmatprep.subr.bf16.mxu1 %v8840_v14  ;;  %8116 = vmatprep.subr.bf16.mxu0 %v8841_v60 }
0x10e4   : > { %7707 = vmatmul.mubr.msk.bf16.gmra.mrb[96].mxu1 %vm676_vm0, %v9866_v27  ;;  %7709 = vmatmul.mubr.msk.bf16.gmra.mrb[92].mxu0 %vm676_vm0, %v9866_v27 }
0x10e6   : > { %8089 = vmatpush3.bf16.msra.mxu1 %v8842_v7  ;;  %8117 = vmatpush3.bf16.msra.mxu0 %v8843_v8 }
0x10e7   : > { %8090 = vmatprep.subr.bf16.mxu1 %v8844_v51  ;;  %8118 = vmatprep.subr.bf16.mxu0 %v8845_v33 }
0x10ea   : > { %8091 = vmatpush3.bf16.msra.mxu1 %v8846_v34  ;;  %8119 = vmatpush3.bf16.msra.mxu0 %v8847_v35 }
0x10eb   : > { %8092 = vmatprep.subr.bf16.mxu1 %v8848_v36  ;;  %8120 = vmatprep.subr.bf16.mxu0 %v8849_v22 }
0x10ee   : > { %8093 = vmatpush3.bf16.msra.mxu1 %v8850_v15  ;;  %8121 = vmatpush3.bf16.msra.mxu0 %v8851_v37 }
0x10ef   : > { %8094 = vmatprep.subr.bf16.mxu1 %v8852_v41  ;;  %8122 = vmatprep.subr.bf16.mxu0 %v8853_v42 }
0x10f2   : > { %8095 = vmatpush3.bf16.msra.mxu1 %v8854_v44  ;;  %8123 = vmatpush3.bf16.msra.mxu0 %v8855_v45 }
0x10f3   : > { %8096 = vmatprep.subr.bf16.mxu1 %v8856_v28  ;;  %8124 = vmatprep.subr.bf16.mxu0 %v8857_v32 }
0x10f6   : > { %8097 = vmatpush3.bf16.msra.mxu1 %v8858_v47  ;;  %8125 = vmatpush3.bf16.msra.mxu0 %v8859_v48 }
0x10f7   : > { %8098 = vmatprep.subr.bf16.mxu1 %v8860_v4  ;;  %8126 = vmatprep.subr.bf16.mxu0 %v8861_v54 }
0x10fa   : > { %8099 = vmatpush3.bf16.msra.mxu1 %v8862_v9  ;;  %8127 = vmatpush3.bf16.msra.mxu0 %v8863_v53 }
0x10fb   : > { %6799 = vmatprep.subr.bf16.mxu1 %v7743_v49  ;;  %6852 = vmatprep.subr.bf16.mxu0 %v7745_v58 }
0x117f   : > { %v7988_v43 = vpop.f32.mrb[76].mxu1  ;;  %v8016_v59 = vpop.f32.mrb[72].mxu0 }
0x1180   : > { %v7989_v40 = vpop.f32.mrb[77].mxu1  ;;  %v8017_v23 = vpop.f32.mrb[73].mxu0 }
0x1181   : > { %v7990_v24 = vadd.f32 %v7989_v40, %v7988_v43  ;;  %v8018_v26 = vadd.f32 %v8017_v23, %v8016_v59  ;;  %v7991_v12 = vpop.f32.mrb[78].mxu1  ;;  %v8019_v62 = vpop.f32.mrb[74].mxu0 }
0x1182   : > { %v7992_v5 = vpop.f32.mrb[79].mxu1  ;;  %v8020_v6 = vpop.f32.mrb[75].mxu0 }
0x1183   : > { %v5867_v3 = vadd.f32 %v8018_v26, %v7990_v24  ;;  %v7993_v50 = vadd.f32 %v7992_v5, %v7991_v12  ;;  %v8021_v10 = vadd.f32 %v8020_v6, %v8019_v62  ;;  %v6179_v26 = vld [vmem:[%s10501_s14 + $0x8] sm:$0xf] }
0x1185   : > { %v5870_v61 = vadd.f32 %v8021_v10, %v7993_v50  ;;  %v6184_v50 = vrot.slane %v6179_v26, %v9980_v11  ;;  %v6192_v10 = vrot.slane %v6179_v26, %v9982_v13 }
0x1187   : > { %v7994_v21 = vpop.f32.mrb[80].mxu1  ;;  %v8022_v17 = vpop.f32.mrb[76].mxu0 }
0x1188   : > { %v7995_v46 = vpop.f32.mrb[81].mxu1  ;;  %v8023_v31 = vpop.f32.mrb[77].mxu0 }
0x1189   : > { %v7996_v2 = vadd.f32 %v7995_v46, %v7994_v21  ;;  %v8024_v19 = vadd.f32 %v8023_v31, %v8022_v17  ;;  %v7997_v63 = vpop.f32.mrb[82].mxu1  ;;  %v8025_v14 = vpop.f32.mrb[78].mxu0  ;;  %v6188_v17 = vrot.slane %v6179_v26, %v9987_v20  ;;  %v6196_v46 = vrot.slane %v6179_v26, %v9989_v55 }
0x118a   : > { %v7998_v60 = vpop.f32.mrb[83].mxu1  ;;  %v8026_v7 = vpop.f32.mrb[79].mxu0 }
0x118b   : > { %v5875_v8 = vadd.f32 %v8024_v19, %v7996_v2  ;;  %v7999_v51 = vadd.f32 %v7998_v60, %v7997_v63  ;;  %v8027_v33 = vadd.f32 %v8026_v7, %v8025_v14 }
0x118d   : > { %v5878_v34 = vadd.f32 %v8027_v33, %v7999_v51 }
0x119f   : > { %v8044_v35 = vpop.f32.mrb[84].mxu1  ;;  %v8072_v36 = vpop.f32.mrb[80].mxu0 }
0x11a0   : > { %v8045_v22 = vpop.f32.mrb[85].mxu1  ;;  %v8073_v15 = vpop.f32.mrb[81].mxu0 }
0x11a1   : > { %v8046_v37 = vadd.f32 %v8045_v22, %v8044_v35  ;;  %v8074_v41 = vadd.f32 %v8073_v15, %v8072_v36  ;;  %v8047_v42 = vpop.f32.mrb[86].mxu1  ;;  %v8075_v44 = vpop.f32.mrb[82].mxu0 }
0x11a2   : > { %v8048_v45 = vpop.f32.mrb[87].mxu1  ;;  %v8076_v28 = vpop.f32.mrb[83].mxu0 }
0x11a3   : > { %v6108_v32 = vadd.f32 %v8046_v37, %v5867_v3  ;;  %v8049_v47 = vadd.f32 %v8048_v45, %v8047_v42  ;;  %v8077_v48 = vadd.f32 %v8076_v28, %v8075_v44 }
0x11a5   : > { %v10288_v4 = vadd.f32 %v8074_v41, %v6108_v32  ;;  %v6111_v54 = vadd.f32 %v8049_v47, %v5870_v61  ;;  %v6733_v32 = vld [vmem:[%s10500_s13 + $0xb0] sm:$0xff] }
0x11a6   : > { %v6735_v47 = vld [vmem:[%s10500_s13 + $0xf0] sm:$0xff] }
0x11a7   : > { %v10290_v9 = vadd.f32 %v8077_v48, %v6111_v54  ;;  %v8050_v53 = vpop.f32.mrb[88].mxu1  ;;  %v8078_v49 = vpop.f32.mrb[84].mxu0 }
0x11a8   : > { %v8051_v58 = vpop.f32.mrb[89].mxu1  ;;  %v8079_v43 = vpop.f32.mrb[85].mxu0 }
0x11a9   : > { %v8052_v59 = vadd.f32 %v8051_v58, %v8050_v53  ;;  %v8080_v40 = vadd.f32 %v8079_v43, %v8078_v49  ;;  %v8053_v23 = vpop.f32.mrb[90].mxu1  ;;  %v8081_v24 = vpop.f32.mrb[86].mxu0  ;;  %v6734_v58 = vld [vmem:[%s10500_s13 + $0xb8] sm:$0xff] }
0x11aa   : > { %v8054_v12 = vpop.f32.mrb[91].mxu1  ;;  %v8082_v62 = vpop.f32.mrb[87].mxu0  ;;  %v6736_v43 = vld [vmem:[%s10500_s13 + $0xf8] sm:$0xff] }
0x11ab   : > { %v6116_v5 = vadd.f32 %v8052_v59, %v5875_v8  ;;  %v8055_v6 = vadd.f32 %v8054_v12, %v8053_v23  ;;  %v8083_v3 = vadd.f32 %v8082_v62, %v8081_v24 }
0x11ad   : > { %v10297_v61 = vadd.f32 %v8080_v40, %v6116_v5  ;;  %v6119_v21 = vadd.f32 %v8055_v6, %v5878_v34 }
0x11af   : > { %v10301_v31 = vadd.f32 %v8083_v3, %v6119_v21  ;;  %v6275_v2 = vpop.f32.mrb[92].mxu1  ;;  %v6328_v19 = vpop.f32.mrb[88].mxu0  ;;  %v7747_v21 = vcombine.high %v6733_v32, %v6735_v47 }
0x11b0   : > { %v6276_v63 = vadd.f32 %v6275_v2, %v6184_v50  ;;  %v6329_v14 = vadd.f32 %v6328_v19, %v6192_v10  ;;  %v6277_v60 = vpop.f32.mrb[93].mxu1  ;;  %v6330_v7 = vpop.f32.mrb[89].mxu0  ;;  %v7749_v2 = vcombine.high %v6734_v58, %v6736_v43 }
0x11b1   : > { %v6278_v8 = vadd.f32 %v6277_v60, %v6188_v17  ;;  %v6331_v51 = vadd.f32 %v6330_v7, %v6196_v46  ;;  %v6279_v33 = vpop.f32.mrb[94].mxu1  ;;  %v6332_v35 = vpop.f32.mrb[90].mxu0 }
0x11b2   : > { %v6280_v36 = vadd.f32 %v6279_v33, %v6184_v50  ;;  %v6333_v22 = vadd.f32 %v6332_v35, %v6192_v10  ;;  %v6281_v15 = vpop.f32.mrb[95].mxu1  ;;  %v6334_v34 = vpop.f32.mrb[91].mxu0  ;;  %v6347_v42 = vmax.f32 %v6276_v63, 0.0  ;;  %v6349_v44 = vmax.f32 %v6329_v14, 0.0 }
0x11b3   : > { %v6282_v37 = vadd.f32 %v6281_v15, %v6188_v17  ;;  %v6335_v41 = vadd.f32 %v6334_v34, %v6196_v46  ;;  %v6348_v48 = vmax.f32 %v6278_v8, 0.0  ;;  %v6350_v54 = vmax.f32 %v6331_v51, 0.0 }
0x11b4   : > { %v6351_v45 = vmax.f32 %v6280_v36, 0.0  ;;  %v6353_v28 = vmax.f32 %v6333_v22, 0.0  ;;  %v7746_v35 = vcombine.low %v6733_v32, %v6735_v47  ;;  %v7748_v15 = vcombine.low %v6734_v58, %v6736_v43  ;;  %v8869_v32 = vld [vmem:[%s10502_s15 + $0x3c8] sm:$0xff]   ;;  %v8878_v58 = vld [vmem:[%s10502_s15 + $0x318] sm:$0xff]  }
0x11b5   : > { %v6352_v53 = vmax.f32 %v6282_v37, 0.0  ;;  %v6354_v49 = vmax.f32 %v6335_v41, 0.0  ;;  %v8870_v47 = vld [vmem:[%s10502_s15 + $0x308] sm:$0xff]   ;;  %v8879_v43 = vld [vmem:[%s10502_s15 + $0x398] sm:$0xff]  }
0x11b6   : > { %v6363_v59 = vpack.c.bf16 %v6351_v45, %v6347_v42  ;;  %v6365_v40 = vpack.c.bf16 %v6353_v28, %v6349_v44  ;;  %v8866_v44 = vld [vmem:[%s10502_s15 + $0x300] sm:$0xff]   ;;  %v8868_v28 = vld [vmem:[%s10502_s15 + $0x348] sm:$0xff]  }
0x11b7   : > { %v6364_v23 = vpack.c.bf16 %v6352_v53, %v6348_v48  ;;  %v6366_v24 = vpack.c.bf16 %v6354_v49, %v6350_v54  ;;  %v6285_v26 = vpop.f32.mrb[96].mxu1  ;;  %v6338_v12 = vpop.f32.mrb[92].mxu0  ;;  %v8867_v45 = vld [vmem:[%s10502_s15 + $0x380] sm:$0xff]   ;;  %v8873_v48 = vld [vmem:[%s10502_s15 + $0x3d0] sm:$0xff]   ;;  %v8876_v53 = vld [vmem:[%s10502_s15 + $0x358] sm:$0xff]  }
0x11b8   : > { %v6286_v62 = vadd.f32 %v6285_v26, %v6184_v50  ;;  %v6339_v5 = vadd.f32 %v6338_v12, %v6192_v10  ;;  %v6287_v6 = vpop.f32.mrb[97].mxu1  ;;  %v6340_v3 = vpop.f32.mrb[93].mxu0  ;;  %v8875_v54 = vld [vmem:[%s10502_s15 + $0x390] sm:$0xff]   ;;  %v8877_v49 = vld [vmem:[%s10502_s15 + $0x3d8] sm:$0xff]   ;;  %v8884_v26 = vld [vmem:[%s10502_s15 + $0x368] sm:$0xff]  }
0x11b9   : > { %v6288_v19 = vadd.f32 %v6287_v6, %v6188_v17  ;;  %v6341_v63 = vadd.f32 %v6340_v3, %v6196_v46  ;;  %v6289_v14 = vpop.f32.mrb[98].mxu1  ;;  %v6342_v60 = vpop.f32.mrb[94].mxu0  ;;  %6659 = vmatprep.mubr.bf16.mxu1 %v6364_v23  ;;  %6708 = vmatprep.mubr.bf16.mxu0 %v6366_v24  ;;  %v8882_v23 = vld [vmem:[%s10502_s15 + $0x320] sm:$0xff]   ;;  %v8885_v12 = vld [vmem:[%s10502_s15 + $0x3e8] sm:$0xff]   ;;  %v8888_v6 = vld [vmem:[%s10502_s15 + $0x370] sm:$0xff]  }
0x11ba   : > { %v6290_v7 = vadd.f32 %v6289_v14, %v6184_v50  ;;  %v6343_v8 = vadd.f32 %v6342_v60, %v6192_v10  ;;  %v6291_v51 = vpop.f32.mrb[99].mxu1  ;;  %v6344_v33 = vpop.f32.mrb[95].mxu0  ;;  %6660 = vmatmul.mubr.bf16.vlgmr.msra.gmra.mrb[100].mxu1 %v6363_v59  ;;  %6709 = vmatmul.mubr.bf16.vlgmr.msra.gmra.mrb[96].mxu0 %v6365_v40  ;;  %v6355_v34 = vmax.f32 %v6286_v62, 0.0  ;;  %v6357_v37 = vmax.f32 %v6339_v5, 0.0  ;;  %v8880_v59 = vld [vmem:[%s10502_s15 + $0x360] sm:$0xff]   ;;  %v8886_v62 = vld [vmem:[%s10502_s15 + $0x328] sm:$0xff]  }
0x11bb   : > { %v6292_v36 = vadd.f32 %v6291_v51, %v6188_v17  ;;  %v6345_v22 = vadd.f32 %v6344_v33, %v6196_v46  ;;  %6800 = vmatpush1.bf16.msra.mxu1 %v7742_v38  ;;  %6853 = vmatpush1.bf16.msra.mxu0 %v7744_v39  ;;  %v8864_v17 = vld [vmem:[%s10502_s15 + $0x340] sm:$0xff]   ;;  %v6356_v1 = vmax.f32 %v6288_v19, 0.0  ;;  %v6358_v38 = vmax.f32 %v6341_v63, 0.0  ;;  %v8887_v5 = vld [vmem:[%s10502_s15 + $0x3a8] sm:$0xff]   ;;  %v8889_v3 = vld [vmem:[%s10502_s15 + $0x3f0] sm:$0xff]  }
0x11bc   : > { %v6359_v50 = vmax.f32 %v6290_v7, 0.0  ;;  %v6361_v10 = vmax.f32 %v6343_v8, 0.0  ;;  %6801 = vmatprep.subr.bf16.mxu1 %v7747_v21  ;;  %6854 = vmatprep.subr.bf16.mxu0 %v7749_v2  ;;  %v8881_v40 = vld [vmem:[%s10502_s15 + $0x3e0] sm:$0xff]   ;;  %v8890_v21 = vld [vmem:[%s10502_s15 + $0x330] sm:$0xff]   ;;  %v8892_v19 = vld [vmem:[%s10502_s15 + $0x378] sm:$0xff]  }
0x11bd   : > { %v6360_v46 = vmax.f32 %v6292_v36, 0.0  ;;  %v6362_v56 = vmax.f32 %v6345_v22, 0.0  ;;  %v8883_v24 = vld [vmem:[%s10502_s15 + $0x3a0] sm:$0xff]   ;;  %v8891_v2 = vld [vmem:[%s10502_s15 + $0x3b0] sm:$0xff]   ;;  %v8893_v63 = vld [vmem:[%s10502_s15 + $0x3f8] sm:$0xff]  }
0x11be   : > { %v6367_v18 = vpack.c.bf16 %v6359_v50, %v6355_v34  ;;  %v6369_v39 = vpack.c.bf16 %v6361_v10, %v6357_v37  ;;  %v8894_v14 = vld [vmem:[%s10502_s15 + $0x338] sm:$0xff]  }
0x11bf   : > { %v6368_v41 = vpack.c.bf16 %v6360_v46, %v6356_v1  ;;  %v6370_v42 = vpack.c.bf16 %v6362_v56, %v6358_v38  ;;  %6802 = vmatpush1.bf16.msra.mxu1 %v7746_v35  ;;  %6855 = vmatpush1.bf16.msra.mxu0 %v7748_v15  ;;  %v8895_v60 = vld [vmem:[%s10502_s15 + $0x3b8] sm:$0xff]  }
0x11c0   : > { %8140 = vmatprep.subr.bf16.mxu1 %v8864_v17  ;;  %8168 = vmatprep.subr.bf16.mxu0 %v8865_v52 }
0x11c1   : > { %6667 = vmatprep.mubr.bf16.mxu1 %v6368_v41  ;;  %6716 = vmatprep.mubr.bf16.mxu0 %v6370_v42 }
0x11c2   : > { %6668 = vmatmul.mubr.bf16.gmra.mrb[104].mxu1 %v6367_v18  ;;  %6717 = vmatmul.mubr.bf16.gmra.mrb[100].mxu0 %v6369_v39 }
0x11c3   : > { %6831 = vmatprep.mubr.bf16.mxu1 %v8998_v30  ;;  %6884 = vmatprep.mubr.bf16.mxu0 %v8998_v30 }
0x11ca   : > { %7750 = vmatmul.mubr.msk.bf16.vlgmr.msra.gmra.mrb[108].mxu1 %vm676_vm0, %v9846_v0  ;;  %7752 = vmatmul.mubr.msk.bf16.vlgmr.msra.gmra.mrb[104].mxu0 %vm676_vm0, %v9846_v0  ;;  %v8871_v0 = vld [vmem:[%s10502_s15 + $0x388] sm:$0xff]  }
0x11cb   : > { %6841 = vmatprep.mubr.bf16.mxu1 %v8998_v30  ;;  %6894 = vmatprep.mubr.bf16.mxu0 %v8998_v30  ;;  %v8872_v30 = vld [vmem:[%s10502_s15 + $0x350] sm:$0xff]  }
0x11cc   : > { %8141 = vmatpush3.bf16.msra.mxu1 %v8866_v44  ;;  %8169 = vmatpush3.bf16.msra.mxu0 %v8867_v45 }
0x11cd   : > { %8142 = vmatprep.subr.bf16.mxu1 %v8868_v28  ;;  %8170 = vmatprep.subr.bf16.mxu0 %v8869_v32  ;;  %v6737_v28 = vld [vmem:[%s10501_s14 + $0xc] sm:$0xf] }
0x11d0   : > { %8143 = vmatpush3.bf16.msra.mxu1 %v8870_v47  ;;  %8171 = vmatpush3.bf16.msra.mxu0 %v8871_v0 }
0x11d1   : > { %8144 = vmatprep.subr.bf16.mxu1 %v8872_v30  ;;  %8172 = vmatprep.subr.bf16.mxu0 %v8873_v48  ;;  %v6750_v48 = vrot.slane %v6737_v28, %v9982_v13 }
0x11d2   : > { %7751 = vmatmul.mubr.msk.bf16.gmra.mrb[112].mxu1 %vm676_vm0, %v9866_v27  ;;  %7753 = vmatmul.mubr.msk.bf16.gmra.mrb[108].mxu0 %vm676_vm0, %v9866_v27  ;;  %v8874_v27 = vld [vmem:[%s10502_s15 + $0x310] sm:$0xff]  }
0x11d4   : > { %8145 = vmatpush3.bf16.msra.mxu1 %v8874_v27  ;;  %8173 = vmatpush3.bf16.msra.mxu0 %v8875_v54 }
0x11d5   : > { %8146 = vmatprep.subr.bf16.mxu1 %v8876_v53  ;;  %8174 = vmatprep.subr.bf16.mxu0 %v8877_v49  ;;  %v6746_v53 = vrot.slane %v6737_v28, %v9987_v20  ;;  %v6754_v49 = vrot.slane %v6737_v28, %v9989_v55 }
0x11d8   : > { %8147 = vmatpush3.bf16.msra.mxu1 %v8878_v58  ;;  %8175 = vmatpush3.bf16.msra.mxu0 %v8879_v43 }
0x11d9   : > { %8148 = vmatprep.subr.bf16.mxu1 %v8880_v59  ;;  %8176 = vmatprep.subr.bf16.mxu0 %v8881_v40 }
0x11dc   : > { %8149 = vmatpush3.bf16.msra.mxu1 %v8882_v23  ;;  %8177 = vmatpush3.bf16.msra.mxu0 %v8883_v24 }
0x11dd   : > { %8150 = vmatprep.subr.bf16.mxu1 %v8884_v26  ;;  %8178 = vmatprep.subr.bf16.mxu0 %v8885_v12 }
0x11e0   : > { %8151 = vmatpush3.bf16.msra.mxu1 %v8886_v62  ;;  %8179 = vmatpush3.bf16.msra.mxu0 %v8887_v5 }
0x11e1   : > { %8152 = vmatprep.subr.bf16.mxu1 %v8888_v6  ;;  %8180 = vmatprep.subr.bf16.mxu0 %v8889_v3 }
0x11e4   : > { %8153 = vmatpush3.bf16.msra.mxu1 %v8890_v21  ;;  %8181 = vmatpush3.bf16.msra.mxu0 %v8891_v2 }
0x11e5   : > { %8154 = vmatprep.subr.bf16.mxu1 %v8892_v19  ;;  %8182 = vmatprep.subr.bf16.mxu0 %v8893_v63 }
0x11e8   : > { %8155 = vmatpush3.bf16.msra.mxu1 %v8894_v14  ;;  %8183 = vmatpush3.bf16.msra.mxu0 %v8895_v60 }
0x128d   : > { %v8100_v7 = vpop.f32.mrb[100].mxu1  ;;  %v8128_v8 = vpop.f32.mrb[96].mxu0 }
0x128e   : > { %v8101_v51 = vpop.f32.mrb[101].mxu1  ;;  %v8129_v33 = vpop.f32.mrb[97].mxu0 }
0x128f   : > { %v8102_v35 = vadd.f32 %v8101_v51, %v8100_v7  ;;  %v8130_v36 = vadd.f32 %v8129_v33, %v8128_v8  ;;  %v8103_v22 = vpop.f32.mrb[102].mxu1  ;;  %v8131_v15 = vpop.f32.mrb[98].mxu0 }
0x1290   : > { %v8104_v34 = vpop.f32.mrb[103].mxu1  ;;  %v8132_v37 = vpop.f32.mrb[99].mxu0 }
0x1291   : > { %v6711_v50 = vadd.f32 %v8130_v36, %v8102_v35  ;;  %v8105_v10 = vadd.f32 %v8104_v34, %v8103_v22  ;;  %v8133_v17 = vadd.f32 %v8132_v37, %v8131_v15 }
0x1293   : > { %v10430_v52 = vadd.f32 %v6711_v50, %v10288_v4  ;;  %v6714_v1 = vadd.f32 %v8133_v17, %v8105_v10 }
0x1295   : > { %v10433_v38 = vadd.f32 %v6714_v1, %v10290_v9  ;;  %v8106_v46 = vpop.f32.mrb[104].mxu1  ;;  %v8134_v56 = vpop.f32.mrb[100].mxu0  ;;  %v6742_v9 = vrot.slane %v6737_v28, %v9980_v11 }
0x1296   : > { %v8107_v18 = vpop.f32.mrb[105].mxu1  ;;  %v8135_v39 = vpop.f32.mrb[101].mxu0 }
0x1297   : > { %v8108_v41 = vadd.f32 %v8107_v18, %v8106_v46  ;;  %v8136_v42 = vadd.f32 %v8135_v39, %v8134_v56  ;;  %v8109_v44 = vpop.f32.mrb[106].mxu1  ;;  %v8137_v45 = vpop.f32.mrb[102].mxu0 }
0x1298   : > { %v8110_v32 = vpop.f32.mrb[107].mxu1  ;;  %v8138_v47 = vpop.f32.mrb[103].mxu0 }
0x1299   : > { %v6719_v4 = vadd.f32 %v8136_v42, %v8108_v41  ;;  %v8111_v0 = vadd.f32 %v8110_v32, %v8109_v44  ;;  %v8139_v30 = vadd.f32 %v8138_v47, %v8137_v45 }
0x129b   : > { %v10441_v27 = vadd.f32 %v6719_v4, %v10297_v61  ;;  %v6722_v54 = vadd.f32 %v8139_v30, %v8111_v0 }
0x129d   : > { %v10446_v58 = vadd.f32 %v6722_v54, %v10301_v31  ;;  %v6833_v43 = vpop.f32.mrb[108].mxu1  ;;  %v6886_v59 = vpop.f32.mrb[104].mxu0 }
0x129e   : > { %v6834_v40 = vadd.f32 %v6833_v43, %v6742_v9  ;;  %v6887_v23 = vadd.f32 %v6886_v59, %v6750_v48  ;;  %v6835_v24 = vpop.f32.mrb[109].mxu1  ;;  %v6888_v26 = vpop.f32.mrb[105].mxu0 }
0x129f   : > { %v6836_v11 = vadd.f32 %v6835_v24, %v6746_v53  ;;  %v6889_v12 = vadd.f32 %v6888_v26, %v6754_v49  ;;  %v6837_v13 = vpop.f32.mrb[110].mxu1  ;;  %v6890_v62 = vpop.f32.mrb[106].mxu0 }
0x12a0   : > { %v6838_v61 = vadd.f32 %v6837_v13, %v6742_v9  ;;  %v6891_v5 = vadd.f32 %v6890_v62, %v6750_v48  ;;  %v6839_v6 = vpop.f32.mrb[111].mxu1  ;;  %v6892_v3 = vpop.f32.mrb[107].mxu0  ;;  %v6905_v55 = vmax.f32 %v6834_v40, 0.0  ;;  %v6907_v2 = vmax.f32 %v6887_v23, 0.0 }
0x12a1   : > { %v6840_v20 = vadd.f32 %v6839_v6, %v6746_v53  ;;  %v6893_v21 = vadd.f32 %v6892_v3, %v6754_v49  ;;  %v6906_v63 = vmax.f32 %v6836_v11, 0.0  ;;  %v6908_v14 = vmax.f32 %v6889_v12, 0.0  ;;  %v7786_v3 = vld [vmem:[%s10503_s16] ss:$0 sm:$0xff] }
0x12a2   : > { %v6909_v31 = vmax.f32 %v6838_v61, 0.0  ;;  %v6911_v19 = vmax.f32 %v6891_v5, 0.0 }
0x12a3   : > { %v6910_v60 = vmax.f32 %v6840_v20, 0.0  ;;  %v6912_v7 = vmax.f32 %v6893_v21, 0.0 }
0x12a4   : > { %v6921_v8 = vpack.c.bf16 %v6909_v31, %v6905_v55  ;;  %v6923_v51 = vpack.c.bf16 %v6911_v19, %v6907_v2 }
0x12a5   : > { %v6922_v33 = vpack.c.bf16 %v6910_v60, %v6906_v63  ;;  %v6924_v35 = vpack.c.bf16 %v6912_v7, %v6908_v14  ;;  %v6843_v36 = vpop.f32.mrb[112].mxu1  ;;  %v6896_v22 = vpop.f32.mrb[108].mxu0 }
0x12a6   : > { %v6844_v15 = vadd.f32 %v6843_v36, %v6742_v9  ;;  %v6897_v34 = vadd.f32 %v6896_v22, %v6750_v48  ;;  %v6845_v37 = vpop.f32.mrb[113].mxu1  ;;  %v6898_v50 = vpop.f32.mrb[109].mxu0 }
0x12a7   : > { %v6846_v10 = vadd.f32 %v6845_v37, %v6746_v53  ;;  %v6899_v17 = vadd.f32 %v6898_v50, %v6754_v49  ;;  %v6847_v1 = vpop.f32.mrb[114].mxu1  ;;  %v6900_v46 = vpop.f32.mrb[110].mxu0  ;;  %7217 = vmatprep.mubr.bf16.mxu1 %v6922_v33  ;;  %7266 = vmatprep.mubr.bf16.mxu0 %v6924_v35 }
0x12a8   : > { %v6848_v56 = vadd.f32 %v6847_v1, %v6742_v9  ;;  %v6901_v18 = vadd.f32 %v6900_v46, %v6750_v48  ;;  %v6849_v39 = vpop.f32.mrb[115].mxu1  ;;  %v6902_v41 = vpop.f32.mrb[111].mxu0  ;;  %7218 = vmatmul.mubr.bf16.vlgmr.msra.gmra.mrb[116].mxu1 %v6921_v8  ;;  %7267 = vmatmul.mubr.bf16.vlgmr.msra.gmra.mrb[112].mxu0 %v6923_v51  ;;  %v6913_v45 = vmax.f32 %v6844_v15, 0.0  ;;  %v6915_v28 = vmax.f32 %v6897_v34, 0.0 }
0x12a9   : > { %v6850_v42 = vadd.f32 %v6849_v39, %v6746_v53  ;;  %v6903_v44 = vadd.f32 %v6902_v41, %v6754_v49  ;;  %v6914_v4 = vmax.f32 %v6846_v10, 0.0  ;;  %v6916_v0 = vmax.f32 %v6899_v17, 0.0 }
0x12aa   : > { %v6917_v32 = vmax.f32 %v6848_v56, 0.0  ;;  %v6919_v47 = vmax.f32 %v6901_v18, 0.0 }
0x12ab   : > { %v6918_v30 = vmax.f32 %v6850_v42, 0.0  ;;  %v6920_v54 = vmax.f32 %v6903_v44, 0.0 }
0x12ac   : > { %v6925_v43 = vpack.c.bf16 %v6917_v32, %v6913_v45  ;;  %v6927_v59 = vpack.c.bf16 %v6919_v47, %v6915_v28 }
0x12ad   : > { %v6926_v40 = vpack.c.bf16 %v6918_v30, %v6914_v4  ;;  %v6928_v23 = vpack.c.bf16 %v6920_v54, %v6916_v0 }
0x12af   : > { %7225 = vmatprep.mubr.bf16.mxu1 %v6926_v40  ;;  %7274 = vmatprep.mubr.bf16.mxu0 %v6928_v23 }
0x12b0   : > { %7226 = vmatmul.mubr.bf16.gmra.mrb[120].mxu1 %v6925_v43  ;;  %7275 = vmatmul.mubr.bf16.gmra.mrb[116].mxu0 %v6927_v59 }
0x137b   : > { %v8156_v9 = vpop.f32.mrb[116].mxu1  ;;  %v8184_v48 = vpop.f32.mrb[112].mxu0 }
0x137c   : > { %v8157_v53 = vpop.f32.mrb[117].mxu1  ;;  %v8185_v49 = vpop.f32.mrb[113].mxu0 }
0x137d   : > { %v8158_v24 = vadd.f32 %v8157_v53, %v8156_v9  ;;  %v8186_v26 = vadd.f32 %v8185_v49, %v8184_v48  ;;  %v8159_v11 = vpop.f32.mrb[118].mxu1  ;;  %v8187_v12 = vpop.f32.mrb[114].mxu0 }
0x137e   : > { %v8160_v13 = vpop.f32.mrb[119].mxu1  ;;  %v8188_v62 = vpop.f32.mrb[115].mxu0 }
0x137f   : > { %v7269_v61 = vadd.f32 %v8186_v26, %v8158_v24  ;;  %v8161_v5 = vadd.f32 %v8160_v13, %v8159_v11  ;;  %v8189_v6 = vadd.f32 %v8188_v62, %v8187_v12 }
0x1381   : > { %v7283_v20 = vadd.f32 %v7269_v61, %v10430_v52  ;;  %v7272_v21 = vadd.f32 %v8189_v6, %v8161_v5 }
0x1383   : > { %v7284_v55 = vadd.f32 %v7272_v21, %v10433_v38  ;;  %v8162_v2 = vpop.f32.mrb[120].mxu1  ;;  %v8190_v31 = vpop.f32.mrb[116].mxu0  ;;  %v7294_v19 = vadd.f32 %v7786_v3, %v7283_v20  ;;  %v7787_v20 = vld [vmem:[%s10504_s17] ss:$0 sm:$0xff] }
0x1384   : > { %v8163_v63 = vpop.f32.mrb[121].mxu1  ;;  %v8191_v14 = vpop.f32.mrb[117].mxu0 }
0x1385   : > { %v8164_v60 = vadd.f32 %v8163_v63, %v8162_v2  ;;  %v8192_v7 = vadd.f32 %v8191_v14, %v8190_v31  ;;  %v8165_v8 = vpop.f32.mrb[122].mxu1  ;;  %v8193_v51 = vpop.f32.mrb[118].mxu0  ;;  %v7298_v33 = vadd.f32 %v7294_v19, %v9830_v57  ;;  %v7295_v35 = vadd.f32 %v7786_v3, %v7284_v55  ;;  %v7788_v55 = vld [vmem:[%s10505_s18] ss:$0 sm:$0xff] }
0x1386   : > { %v8166_v36 = vpop.f32.mrb[123].mxu1  ;;  %v8194_v22 = vpop.f32.mrb[119].mxu0  ;;  %v7789_v19 = vld [vmem:[%s10506_s19] ss:$0 sm:$0xff] }
0x1387   : > { %v7277_v15 = vadd.f32 %v8192_v7, %v8164_v60  ;;  %v8167_v34 = vadd.f32 %v8166_v36, %v8165_v8  ;;  %v8195_v52 = vadd.f32 %v8194_v22, %v8193_v51  ;;  %v7304_v37 = vsel %vm676_vm0, %v7298_v33, 0.0 }
0x1388   : > { %7305 = vadd.xlane.f32.xlu1 %v7304_v37  ;;  %v7299_v38 = vadd.f32 %v7295_v35, %v9833_v16 }
0x1389   : > { %v7285_v50 = vadd.f32 %v7277_v15, %v10441_v27  ;;  %v7280_v10 = vadd.f32 %v8195_v52, %v8167_v34 }
0x138a   : > { %v7307_v1 = vsel %vm676_vm0, %v7299_v38, 0.0 }
0x138b   : > { %v7286_v17 = vadd.f32 %v7280_v10, %v10446_v58  ;;  %v7296_v46 = vadd.f32 %v7786_v3, %v7285_v50 }
0x138c   : > { %7308 = vadd.xlane.f32.xlu1 %v7307_v1 }
0x138d   : > { %v7300_v57 = vadd.f32 %v7296_v46, %v9862_v25  ;;  %v7297_v56 = vadd.f32 %v7786_v3, %v7286_v17 }
0x138f   : > { %v7310_v18 = vsel %vm676_vm0, %v7300_v57, 0.0  ;;  %v7301_v39 = vadd.f32 %v7297_v56, %v9852_v29 }
0x1390   : > { %7311 = vadd.xlane.f32.xlu1 %v7310_v18 }
0x1391   : > { %v7313_v41 = vsel %vm676_vm0, %v7301_v39, 0.0 }
0x1394   : > { %7314 = vadd.xlane.f32.xlu1 %v7313_v41 }
0x1415   : > { %v7306_v16 = vpop.xlane.xlu1 %7305 }
0x1416   : > { %v7316_v27 = vmul.f32 0.03125, %v7306_v16 }
0x1418   : > { %v7320_v42 = vsub.f32 %v7298_v33, %v7316_v27 }
0x1419   : > { %v7309_v44 = vpop.xlane.xlu1 %7308 }
0x141a   : > { %v7317_v58 = vmul.f32 0.03125, %v7309_v44  ;;  %v7324_v45 = vmul.f32 %v7320_v42, %v7320_v42 }
0x141c   : > { %v7321_v28 = vsub.f32 %v7299_v38, %v7317_v58  ;;  %v7328_v32 = vsel %vm676_vm0, %v7324_v45, 0.0 }
0x141d   : > { %7329 = vadd.xlane.f32.xlu1 %v7328_v32  ;;  %v7312_v25 = vpop.xlane.xlu1 %7311 }
0x141e   : > { %v7318_v47 = vmul.f32 0.03125, %v7312_v25  ;;  %v7325_v4 = vmul.f32 %v7321_v28, %v7321_v28 }
0x1420   : > { %v7322_v0 = vsub.f32 %v7300_v57, %v7318_v47  ;;  %v7331_v29 = vsel %vm676_vm0, %v7325_v4, 0.0 }
0x1421   : > { %7332 = vadd.xlane.f32.xlu1 %v7331_v29  ;;  %v7315_v30 = vpop.xlane.xlu1 %7314 }
0x1422   : > { %v7319_v54 = vmul.f32 0.03125, %v7315_v30  ;;  %v7326_v43 = vmul.f32 %v7322_v0, %v7322_v0 }
0x1424   : > { %v7323_v59 = vsub.f32 %v7301_v39, %v7319_v54  ;;  %v7334_v40 = vsel %vm676_vm0, %v7326_v43, 0.0 }
0x1425   : > { %7335 = vadd.xlane.f32.xlu1 %v7334_v40 }
0x1426   : > { %v7327_v23 = vmul.f32 %v7323_v59, %v7323_v59 }
0x1428   : > { %v7337_v9 = vsel %vm676_vm0, %v7327_v23, 0.0 }
0x1429   : > { %7338 = vadd.xlane.f32.xlu0 %v7337_v9 }
0x14aa   : > { %v7330_v48 = vpop.xlane.xlu1 %7329 }
0x14ab   : > { %v7340_v53 = vmul.f32 0.03125, %v7330_v48 }
0x14ad   : > { %v7344_v49 = vadd.f32 1e-05, %v7340_v53 }
0x14ae   : > { %v7333_v24 = vpop.xlane.xlu1 %7332 }
0x14af   : > { %8968 = vrsqrt.f32 %v7344_v49  ;;  %v7341_v26 = vmul.f32 0.03125, %v7333_v24 }
0x14b1   : > { %v7345_v11 = vadd.f32 1e-05, %v7341_v26 }
0x14b2   : > { %v7336_v12 = vpop.xlane.xlu1 %7335 }
0x14b3   : > { %8970 = vrsqrt.f32 %v7345_v11  ;;  %v7342_v13 = vmul.f32 0.03125, %v7336_v12 }
0x14b5   : > { %v7346_v62 = vadd.f32 1e-05, %v7342_v13 }
0x14b6   : > { %v7339_v61 = vpop.xlane.xlu0 %7338 }
0x14b7   : > { %8972 = vrsqrt.f32 %v7346_v62  ;;  %v7343_v5 = vmul.f32 0.03125, %v7339_v61 }
0x14b9   : > { %v8969_v6 = vpop.eup %8968  ;;  %v7347_v3 = vadd.f32 1e-05, %v7343_v5 }
0x14ba   : > { %v7352_v21 = vmul.f32 %v8969_v6, %v7320_v42 }
0x14bb   : > { %8974 = vrsqrt.f32 %v7347_v3 }
0x14bc   : > { %v7362_v2 = vmul.f32 %v7787_v20, %v7352_v21 }
0x14bd   : > { %v8971_v31 = vpop.eup %8970 }
0x14be   : > { %v7372_v63 = vadd.f32 %v7788_v55, %v7362_v2  ;;  %v7353_v14 = vmul.f32 %v8971_v31, %v7321_v28 }
0x14c0   : > { %v7383_v60 = vmul.f32 %v7789_v19, %v7372_v63  ;;  %v7363_v7 = vmul.f32 %v7787_v20, %v7353_v14 }
0x14c1   : > { %v8973_v8 = vpop.eup %8972 }
0x14c2   : > { %v7387_v51 = vsel %vm676_vm0, %v7383_v60, 0.0  ;;  %v7373_v33 = vadd.f32 %v7788_v55, %v7363_v7  ;;  %v7354_v35 = vmul.f32 %v8973_v8, %v7322_v0 }
0x14c3   : > { %7388 = vadd.xlane.f32.xlu1 %v7387_v51 }
0x14c4   : > { %v7384_v36 = vmul.f32 %v7789_v19, %v7373_v33  ;;  %v7364_v22 = vmul.f32 %v7787_v20, %v7354_v35 }
0x14c5   : > { %v8975_v15 = vpop.eup %8974 }
0x14c6   : > { %v7390_v34 = vsel %vm676_vm0, %v7384_v36, 0.0  ;;  %v7374_v52 = vadd.f32 %v7788_v55, %v7364_v22  ;;  %v7355_v37 = vmul.f32 %v8975_v15, %v7323_v59 }
0x14c7   : > { %7391 = vadd.xlane.f32.xlu0 %v7390_v34 }
0x14c8   : > { %v7385_v38 = vmul.f32 %v7789_v19, %v7374_v52  ;;  %v7365_v50 = vmul.f32 %v7787_v20, %v7355_v37 }
0x14ca   : > { %v7393_v10 = vsel %vm676_vm0, %v7385_v38, 0.0  ;;  %v7375_v17 = vadd.f32 %v7788_v55, %v7365_v50 }
0x14cb   : > { %7394 = vadd.xlane.f32.xlu1 %v7393_v10 }
0x14cc   : > { %v7386_v1 = vmul.f32 %v7789_v19, %v7375_v17 }
0x14ce   : > { %v7396_v46 = vsel %vm676_vm0, %v7386_v1, 0.0 }
0x14cf   : > { %7397 = vadd.xlane.f32.xlu0 %v7396_v46 }
0x1550   : > { %v7389_v57 = vpop.xlane.xlu1 %7388 }
0x1551   : > { %7400 = vst.msk [vmem:[%s653_s26] sm:$0xff] %vm7399_vm3, %v7389_v57 }
0x1554   : > { %v7392_v56 = vpop.xlane.xlu0 %7391 }
0x1555   : > { %7401 = vst.msk [vmem:[%s653_s26 + $0x8] sm:$0xff] %vm7399_vm3, %v7392_v56 }
0x1558   : > { %v7395_v18 = vpop.xlane.xlu1 %7394 }
0x1559   : > { %7402 = vst.msk [vmem:[%s653_s26 + $0x10] sm:$0xff] %vm7399_vm3, %v7395_v18 }
0x155c   : > { %v7398_v39 = vpop.xlane.xlu0 %7397 }
0x155d   : > { %7403 = vst.msk [vmem:[%s653_s26 + $0x18] sm:$0xff] %vm7399_vm3, %v7398_v39 }
0x155e PF: > { %s10525_s3 = sld [smem:[#allocation2_spill]] }
0x1564   : > { %s30_s1 = sadd.s32 1, %s10525_s3  }
0x1565   : > { %p27_p4 = scmp.ge.s32.totalorder %s30_s1, 4  }
0x1567   :  { %29 = sbr.rel (!%p27_p4) target bundleno = 7 (0x7), region = 133 }

// kernel: _lambda_.4
= control target key start
LH: loop header
LB: loop body
LE: loop exit
PB: predicated region body
PF: predicated region fallthrough
CT: control target
= control target key end

     0   :  { %s10427_s0 = inlined_call_operand.vmem [shape: f32[64,32], index: 0, kind: input, shape index: {}]   ;;  %s10428_s1 = inlined_call_operand.vmem [shape: f32[64,32], index: 1, kind: input, shape index: {}]   ;;  %s10429_s2 = inlined_call_operand.vmem [shape: f32[8,8], index: 2, kind: input, shape index: {}]   ;;  %s10430_s3 = inlined_call_operand.vmem [shape: f32[32,32], index: 3, kind: input, shape index: {}]   ;;  %s10431_s4 = inlined_call_operand.vmem [shape: f32[1,32], index: 4, kind: input, shape index: {}]   ;;  %s10432_s5 = inlined_call_operand.vmem [shape: f32[32,32], index: 5, kind: input, shape index: {}]   ;;  %s10433_s6 = inlined_call_operand.vmem [shape: f32[1,32], index: 6, kind: input, shape index: {}]   ;;  %s10434_s7 = inlined_call_operand.vmem [shape: f32[32,32], index: 7, kind: input, shape index: {}]   ;;  %s10435_s8 = inlined_call_operand.vmem [shape: f32[1,32], index: 8, kind: input, shape index: {}]   ;;  %s10436_s9 = inlined_call_operand.vmem [shape: f32[32,32], index: 9, kind: input, shape index: {}]   ;;  %s10437_s10 = inlined_call_operand.vmem [shape: f32[1,32], index: 10, kind: input, shape index: {}]   ;;  %s10438_s11 = inlined_call_operand.vmem [shape: f32[1,32], index: 11, kind: input, shape index: {}]   ;;  %s10439_s12 = inlined_call_operand.vmem [shape: f32[1,32], index: 12, kind: input, shape index: {}]   ;;  %s10440_s13 = inlined_call_operand.vmem [shape: bf16[32,2048], index: 13, kind: input, shape index: {}]   ;;  %s10441_s14 = inlined_call_operand.vmem [shape: f32[1,2048], index: 14, kind: input, shape index: {}]   ;;  %s10442_s15 = inlined_call_operand.vmem [shape: bf16[2048,32], index: 15, kind: input, shape index: {}]   ;;  %s10443_s16 = inlined_call_operand.vmem [shape: f32[1,32], index: 16, kind: input, shape index: {}]   ;;  %s10444_s17 = inlined_call_operand.vmem [shape: f32[1,32], index: 17, kind: input, shape index: {}]   ;;  %s10445_s18 = inlined_call_operand.vmem [shape: f32[1,32], index: 18, kind: input, shape index: {}]   ;;  %s10446_s19 = inlined_call_operand.vmem [shape: f32[64,32], index: 19, kind: output, shape index: {}]  }
   0x1   :  { %10450 = sst [smem:[#allocation3_spill]] %s10427_s0  ;;  %s9047_s0 = smov 0  }
   0x2   :  { %10451 = sst [smem:[#allocation4_spill]] %s10428_s1 }
   0x3   :  { %10452 = sst [smem:[#allocation5_spill]] %s10429_s2 }
   0x4   :  { %10453 = sst [smem:[#allocation6_spill]] %s10430_s3 }
   0x5 LB: > { %10454 = sst [smem:[#allocation2_spill]] %s8939_s0  ;;  %s7421_s30 = sadd.s32 4294967295, %s8939_s0   ;;  %s8939_s0 = sphi %s9047_s0, %s29_s0  }
   0x6   : > { %p7425_p0 = scmp.ge.s32.totalorder %s8939_s0, 1  ;;  %p549_p1 = scmp.lt.s32.totalorder %s8939_s0, 3 }
   0x8   : > { %p550_p2 = pnand %p7425_p0, %p549_p1 }
   0x9   : > { %v9058_v0 = vld [vmem:[%s10432_s5] sm:$0xff] (!%p550_p2)  ;;  %v9063_v1 = vld [vmem:[%s10432_s5 + $0x8] sm:$0xff] (!%p550_p2)  ;;  %s10455_s24 = sld [smem:[#allocation6_spill]] (!%p550_p2)  ;;  %s7426_s25 = sshll.u32 (!%p550_p2), %s7421_s30, 2  ;;  %v9080_v5 = vld [vmem:[%s10432_s5 + $0x10] sm:$0xff] (!%p550_p2)  ;;  %vm649_vm0 = vcmask (!%p550_p2), 261120  }
   0xa   : > { %553 = sbr.rel (%p550_p2) target bundleno = 5323 (0x14cb), region = 96  ;;  %v8512_v3 = vpack.c.bf16 (!%p550_p2), %v9063_v1, %v9058_v0  ;;  %v9085_v6 = vld [vmem:[%s10432_s5 + $0x18] sm:$0xff] (!%p550_p2)  ;;  %p611_p3 = scmp.lt.s32.totalorder (!%p550_p2), %s7426_s25, 7  ;;  %v9104_v11 = vld [vmem:[%s10434_s7] sm:$0xff] (!%p550_p2)  ;;  %v9111_v13 = vld [vmem:[%s10434_s7 + $0x8] sm:$0xff] (!%p550_p2)  ;;  %v8941_v22 = vmov (!%p550_p2), 0.0  }
   0xb   : > { %v8516_v8 = vpack.c.bf16 (!%p550_p2), %v9085_v6, %v9080_v5  ;;  %s10456_s20 = sld [smem:[#allocation3_spill]] (!%p550_p2)  ;;  %v8520_v14 = vpack.c.bf16 (!%p550_p2), %v9111_v13, %v9104_v11  ;;  %v9154_v19 = vld [vmem:[%s10434_s7 + $0x10] sm:$0xff] (!%p550_p2)  ;;  %v9159_v20 = vld [vmem:[%s10434_s7 + $0x18] sm:$0xff] (!%p550_p2)  ;;  %s10457_s3 = sld [smem:[#allocation4_spill]] (!%p550_p2)  ;;  %vm8942_vm1 = vmmov (!%p550_p2), 0   ;;  %vm951_vm2 = vcmask (!%p550_p2), 64512  }
   0xc   : > { %8513 = vmatprep.subr.bf16.mxu1 (!%p550_p2), %v8512_v3  ;;  %v8524_v21 = vpack.c.bf16 (!%p550_p2), %v9159_v20, %v9154_v19  ;;  %v9198_v27 = vld [vmem:[%s10433_s6] ss:$0 sm:$0xff] (!%p550_p2)  ;;  %s10458_s23 = sld [smem:[#allocation5_spill]] (!%p550_p2)  ;;  %s8944_s28 = smov (!%p550_p2), 112  }
   0xd   : > { %8515 = vmatpush3.bf16.msra.mxu1 (!%p550_p2), %v8512_v3  ;;  %v9203_v29 = vld [vmem:[%s10431_s4] ss:$0 sm:$0xff] (!%p550_p2)  ;;  %s8945_s1 = smov (!%p550_p2), 104  }
   0xe   : > { %8517 = vmatprep.subr.bf16.mxu1 (!%p550_p2), %v8516_v8  ;;  %v9236_v46 = vld [vmem:[%s10435_s8] ss:$0 sm:$0xff] (!%p550_p2) }
   0xf   : > { %v9068_v2 = vld [vmem:[%s10455_s24] sm:$0xff] (!%p550_p2)  ;;  %v9075_v4 = vld [vmem:[%s10455_s24 + $0x8] sm:$0xff] (!%p550_p2)  ;;  %v9094_v9 = vld [vmem:[%s10455_s24 + $0x10] sm:$0xff] (!%p550_p2) }
  0x10   : > { %v8504_v7 = vpack.c.bf16 (!%p550_p2), %v9075_v4, %v9068_v2  ;;  %v9099_v10 = vld [vmem:[%s10455_s24 + $0x18] sm:$0xff] (!%p550_p2) }
  0x11   : > { %v8508_v12 = vpack.c.bf16 %v9099_v10, %v9094_v9  ;;  %s10461_s25 = smov (!%p611_p3, %s7426_s25), 7  ;;  %8519 = vmatpush3.bf16.msra.mxu1 %v8516_v8 }
  0x12   : > { %8505 = vmatprep.subr.bf16.mxu0 %v8504_v7  ;;  %s9113_s27 = sshll.u32 %s10461_s25, 3  ;;  %8186 = vmatprep.subr.mxu1 %v8941_v22  ;;  %v9249_v54 = vld [vmem:[%s10458_s23] sm:$0xff] }
  0x13   : > { %8507 = vmatpush3.bf16.msra.mxu0 %v8504_v7  ;;  %s9119_s30 = scalar_lea.vmem %s10456_s20, %s9113_s27  ;;  %s9168_s26 = scalar_lea.vmem %s10457_s3, %s9113_s27 }
  0x14   : > { %8509 = vmatprep.subr.bf16.mxu0 %v8508_v12  ;;  %v9124_v15 = vld [vmem:[%s9119_s30] sm:$0xff]  ;;  %v9127_v16 = vld [vmem:[%s9119_s30 + $0x8] sm:$0xff]  ;;  %v9132_v17 = vld [vmem:[%s9119_s30 + $0x10] sm:$0xff]  ;;  %s8943_s3 = smov 120  }
  0x15   : > { %8166 = vmatprep.mubr.msk.f32.mxu1 %vm649_vm0, %v9124_v15  ;;  %8152 = vmatprep.mubr.msk.f32.mxu0 %vm649_vm0, %v9124_v15  ;;  %v9137_v18 = vld [vmem:[%s9119_s30 + $0x18] sm:$0xff]  ;;  %v9172_v23 = vld [vmem:[%s9168_s26] sm:$0xff]  ;;  %v9175_v24 = vld [vmem:[%s9168_s26 + $0x8] sm:$0xff] }
  0x16   : > { %8167 = vmatmul.mubr.msk.f32.vlgmr.msra.gmra.mrb[0].mxu1 %vm649_vm0, %v9127_v16  ;;  %v9184_v25 = vld [vmem:[%s9168_s26 + $0x10] sm:$0xff]  ;;  %v9187_v26 = vld [vmem:[%s9168_s26 + $0x18] sm:$0xff] }
  0x17   : > { %8511 = vmatpush3.bf16.msra.mxu0 %v8508_v12  ;;  %8169 = vmatprep.mubr.msk.f32.mxu1 %vm649_vm0, %v9132_v17 }
  0x18   : > { %8521 = vmatprep.subr.bf16.mxu0 %v8520_v14 }
  0x1a   : > { %8153 = vmatmul.mubr.msk.f32.vlgmr.msra.gmra.mrb[0].mxu0 %vm649_vm0, %v9127_v16  ;;  %8170 = vmatmul.mubr.msk.f32.gmra.mrb[2].mxu1 %vm649_vm0, %v9137_v18 }
  0x1b   : > { %8155 = vmatprep.mubr.msk.f32.mxu0 %vm649_vm0, %v9132_v17  ;;  %8523 = vmatpush3.bf16.msra.mxu0 %v8520_v14 }
  0x1c   : > { %8525 = vmatprep.subr.bf16.mxu0 %v8524_v21  ;;  %8188 = vmatprep.mubr.msk.f32.mxu1 %vm8942_vm1, %v8941_v22 }
  0x1e   : > { %8156 = vmatmul.mubr.msk.f32.gmra.mrb[2].mxu0 %vm649_vm0, %v9137_v18 }
  0x1f   : > { %8527 = vmatpush3.bf16.msra.mxu0 %v8524_v21  ;;  %8180 = vmatprep.mubr.msk.f32.mxu0 %vm649_vm0, %v9172_v23 }
  0x20   : > { %8196 = vmatprep.subr.mxu0 %v8941_v22 }
  0x22   : > { %8181 = vmatmul.mubr.msk.f32.vlgmr.msra.gmra.mrb[4].mxu0 %vm649_vm0, %v9175_v24 }
  0x23   : > { %8183 = vmatprep.mubr.msk.f32.mxu0 %vm649_vm0, %v9184_v25 }
  0x26   : > { %8184 = vmatmul.mubr.msk.f32.gmra.mrb[6].mxu0 %vm649_vm0, %v9187_v26 }
  0x27   : > { %8198 = vmatprep.mubr.msk.f32.mxu0 %vm8942_vm1, %v8941_v22 }
  0xe9   : > { %v8168_v28 = vpop.f32.mrb[0].mxu1 }
  0xea   : > { %v824_v30 = vpop.f32.mrb[1].mxu1  ;;  %v830_v38 = vadd.f32 %v8168_v28, %v9198_v27 }
  0xeb   : > { %v825_v32 = vadd.f32 %v9198_v27, %v824_v30 }
  0xed   : > { %v8154_v31 = vpop.f32.mrb[0].mxu0  ;;  %8187 = vmatpush3.xpose.msk.msra.mxu1 %vm951_vm2, %v825_v32  ;;  %v8171_v35 = vpop.f32.mrb[2].mxu1 }
  0xee   : > { %v728_v33 = vpop.f32.mrb[1].mxu0  ;;  %8191 = vmatprep.subr.mxu1 %v8941_v22  ;;  %v834_v36 = vpop.f32.mrb[3].mxu1  ;;  %v840_v41 = vadd.f32 %v8171_v35, %v9198_v27  ;;  %v734_v43 = vadd.f32 %v8154_v31, %v9203_v29 }
  0xef   : > { %v729_v34 = vadd.f32 %v9203_v29, %v728_v33  ;;  %v835_v39 = vadd.f32 %v9198_v27, %v834_v36 }
  0xf1   : > { %v8157_v37 = vpop.f32.mrb[2].mxu0  ;;  %8189 = vmatmul.mubr.msk.f32.vlgmr.msra.gmra.mrb[4].mxu1 %vm951_vm2, %v729_v34  ;;  %8197 = vmatpush3.xpose.msk.msra.mxu0 %vm951_vm2, %v835_v39 }
  0xf2   : > { %v738_v40 = vpop.f32.mrb[3].mxu0  ;;  %8192 = vmatpush3.xpose.msk.msra.mxu1 %vm951_vm2, %v830_v38  ;;  %8193 = vmatprep.mubr.msk.f32.mxu1 %vm8942_vm1, %v8941_v22  ;;  %v744_v44 = vadd.f32 %v8157_v37, %v9203_v29 }
  0xf3   : > { %v739_v42 = vadd.f32 %v9203_v29, %v738_v40  ;;  %8201 = vmatprep.subr.mxu1 %v8941_v22  ;;  %8206 = vmatprep.subr.mxu0 %v8941_v22 }
  0xf5   : > { %8194 = vmatmul.mubr.msk.f32.vlgmr.msra.gmra.mrb[6].mxu1 %vm951_vm2, %v734_v43  ;;  %8199 = vmatmul.mubr.msk.f32.vlgmr.msra.gmra.mrb[8].mxu0 %vm951_vm2, %v739_v42  ;;  %v8182_v45 = vpop.f32.mrb[4].mxu0 }
  0xf6   : > { %8202 = vmatpush3.xpose.msk.msra.mxu1 %vm951_vm2, %v840_v41  ;;  %8203 = vmatprep.mubr.msk.f32.mxu1 %vm8942_vm1, %v8941_v22  ;;  %v938_v47 = vadd.f32 %v8182_v45, %v9236_v46  ;;  %v932_v48 = vpop.f32.mrb[5].mxu0 }
  0xf7   : > { %8211 = vmatprep.subr.mxu1 %v8941_v22  ;;  %8208 = vmatprep.mubr.msk.f32.mxu0 %vm8942_vm1, %v8941_v22  ;;  %v933_v49 = vadd.f32 %v9236_v46, %v932_v48 }
  0xf9   : > { %8204 = vmatmul.mubr.msk.f32.vlgmr.msra.gmra.mrb[8].mxu1 %vm951_vm2, %v744_v44  ;;  %v9240_v50 = vpop.f32.mrb[6].mxu0  ;;  %8207 = vmatpush3.msra.mxu0 %v933_v49  ;;  %v9265_v49 = vpack.i.bf16 %v9075_v4, %v9068_v2  ;;  %v9283_v2 = vpack.i.bf16 %v9099_v10, %v9094_v9 }
  0xfa   : > { %8213 = vmatprep.mubr.msk.f32.mxu1 %vm8942_vm1, %v8941_v22  ;;  %8212 = vmatpush3.msra.mxu1 %v938_v47  ;;  %v9243_v51 = vpop.f32.mrb[7].mxu0 }
  0xfb   : > { %8221 = vmatprep.subr.mxu1 %v8941_v22  ;;  %8216 = vmatprep.subr.mxu0 %v8941_v22 }
 0x1c4   : > { %v1024_v52 = vpop.f32.mrb[4].mxu1 }
 0x1c5   : > { %v8190_v53 = vpop.f32.mrb[5].mxu1  ;;  %v1025_v60 = vadd.f32 %v1024_v52, %v9249_v54  ;;  %v9269_v52 = vpack.i.bf16 %v9063_v1, %v9058_v0  ;;  %v9289_v0 = vpack.i.bf16 %v9111_v13, %v9104_v11  ;;  %v9293_v1 = vpack.i.bf16 %v9159_v20, %v9154_v19 }
 0x1c6   : > { %v9275_v53 = vpack.i.bf16 %v9085_v6, %v9080_v5 }
 0x1c7   : > { %v1256_v8 = vsel %vm951_vm2, %v1025_v60, -inf }
 0x1c8   : > { %v1100_v55 = vpop.f32.mrb[6].mxu1  ;;  %v1176_v58 = vpop.f32.mrb[8].mxu0 }
 0x1c9   : > { %v1101_v56 = vadd.f32 %v1100_v55, %v9249_v54  ;;  %v8195_v57 = vpop.f32.mrb[7].mxu1  ;;  %v8200_v59 = vpop.f32.mrb[9].mxu0  ;;  %v1177_v7 = vadd.f32 %v1176_v58, %v9249_v54 }
 0x1ca   : > { %v948_v57 = vadd.f32 %v9240_v50, %v9236_v46 }
 0x1cb   : > { %v1259_v61 = vsel %vm951_vm2, %v1101_v56, -inf  ;;  %v1262_v14 = vsel %vm951_vm2, %v1177_v7, -inf }
 0x1cc   : > { %1260 = vmax.xlane.f32.xlu0 %v1259_v61  ;;  %v1252_v62 = vpop.f32.mrb[8].mxu1 }
 0x1cd   : > { %v1253_v63 = vadd.f32 %v1252_v62, %v9249_v54  ;;  %v8205_v3 = vpop.f32.mrb[9].mxu1 }
 0x1ce   : > { %v943_v3 = vadd.f32 %v9236_v46, %v9243_v51 }
 0x1cf   : > { %v1265_v12 = vsel %vm951_vm2, %v1253_v63, -inf }
 0x1d0   : > { %1257 = vmax.xlane.f32.xlu0 %v1256_v8  ;;  %1266 = vmax.xlane.f32.xlu1 %v1265_v12 }
 0x1d4   : > { %1263 = vmax.xlane.f32.xlu1 %v1262_v14 }
 0x259   : > { %v1261_v21 = vpop.xlane.xlu0 %1260 }
 0x25a   : > { %v1269_v28 = vsub.f32 %v1101_v56, %v1261_v21 }
 0x25c   : > { %v1274_v30 = vmul.f32 1.442695, %v1269_v28 }
 0x25d   : > { %v1258_v31 = vpop.xlane.xlu0 %1257  ;;  %v1267_v32 = vpop.xlane.xlu1 %1266 }
 0x25e   : > { %8844 = vpow2.f32 %v1274_v30  ;;  %v1268_v33 = vsub.f32 %v1025_v60, %v1258_v31  ;;  %v1271_v34 = vsub.f32 %v1253_v63, %v1267_v32 }
 0x260   : > { %v1272_v35 = vmul.f32 1.442695, %v1268_v33  ;;  %v1278_v36 = vmul.f32 1.442695, %v1271_v34 }
 0x261   : > { %v1264_v37 = vpop.xlane.xlu1 %1263 }
 0x262   : > { %8846 = vpow2.f32 %v1272_v35  ;;  %v1270_v38 = vsub.f32 %v1177_v7, %v1264_v37 }
 0x263   : > { %8848 = vpow2.f32 %v1278_v36 }
 0x264   : > { %v1276_v39 = vmul.f32 1.442695, %v1270_v38 }
 0x266   : > { %8850 = vpow2.f32 %v1276_v39 }
 0x268   : > { %v8845_v40 = vpop.eup %8844 }
 0x269   : > { %v1283_v41 = vsel %vm951_vm2, %v8845_v40, 0.0 }
 0x26a   : > { %1284 = vadd.xlane.f32.xlu0 %v1283_v41 }
 0x26c   : > { %v8847_v42 = vpop.eup %8846 }
 0x26d   : > { %v8849_v43 = vpop.eup %8848  ;;  %v1280_v44 = vsel %vm951_vm2, %v8847_v42, 0.0 }
 0x26e   : > { %1281 = vadd.xlane.f32.xlu1 %v1280_v44  ;;  %v1289_v45 = vsel %vm951_vm2, %v8849_v43, 0.0 }
 0x26f   : > { %1290 = vadd.xlane.f32.xlu0 %v1289_v45 }
 0x270   : > { %v8851_v47 = vpop.eup %8850 }
 0x271   : > { %v1286_v48 = vsel %vm951_vm2, %v8851_v47, 0.0 }
 0x272   : > { %1287 = vadd.xlane.f32.xlu1 %v1286_v48 }
 0x283   : > { %8632 = vrot.lane.b32.xlu1 %v9265_v49, %s8943_s3 }
 0x285   : > { %8627 = vrot.lane.b32.xlu0 %v9269_v52, %s8943_s3 }
 0x287   : > { %8637 = vrot.lane.b32.xlu1 %v9275_v53, %s8943_s3 }
 0x289   : > { %8647 = vrot.lane.b32.xlu0 %v9289_v0, %s8943_s3 }
 0x28b   : > { %8642 = vrot.lane.b32.xlu1 %v9283_v2, %s8943_s3 }
 0x28d   : > { %1733 = vrot.lane.b32.xlu0 %v9198_v27, %s8943_s3 }
 0x28f   : > { %8652 = vrot.lane.b32.xlu1 %v9293_v1, %s8943_s3 }
 0x293   : > { %1619 = vrot.lane.b32.xlu1 %v9203_v29, %s8943_s3 }
 0x2f7   : > { %v1285_v4 = vpop.xlane.xlu0 %1284 }
 0x2f8   : > { %8852 = vrcp.f32 %v1285_v4 }
 0x2fb   : > { %v1282_v5 = vpop.xlane.xlu1 %1281 }
 0x2fc   : > { %v1291_v6 = vpop.xlane.xlu0 %1290  ;;  %8854 = vrcp.f32 %v1282_v5 }
 0x2fd   : > { %8856 = vrcp.f32 %v1291_v6 }
 0x2ff   : > { %v1288_v9 = vpop.xlane.xlu1 %1287 }
 0x300   : > { %8858 = vrcp.f32 %v1288_v9  ;;  %v8628_v10 = vpop.permute.xlu0 %8627 }
 0x301   : > { %v8630_v11 = vunpack.i.h.bf16 %v8628_v10  ;;  %v8629_v13 = vunpack.i.l.bf16 %v8628_v10 }
 0x302   : > { %v8853_v19 = vpop.eup %8852 }
 0x303   : > { %v1297_v20 = vmul.f32 %v8853_v19, %v8845_v40  ;;  %v8536_v55 = vpack.c.bf16 %v8630_v11, %v8629_v13  ;;  %v8633_v56 = vpop.permute.xlu1 %8632 }
 0x304   : > { %v8635_v58 = vunpack.i.h.bf16 %v8633_v56  ;;  %v8634_v59 = vunpack.i.l.bf16 %v8633_v56  ;;  %v8648_v51 = vpop.permute.xlu0 %8647 }
 0x305   : > { %8214 = vmatmul.mubr.msk.f32.vlgmr.msra.gmra.mrb[10].mxu1 %vm951_vm2, %v1297_v20  ;;  %v8650_v34 = vunpack.i.h.bf16 %v8648_v51  ;;  %v8649_v35 = vunpack.i.l.bf16 %v8648_v51 }
 0x306   : > { %v8855_v60 = vpop.eup %8854  ;;  %8222 = vmatpush3.msra.mxu1 %v948_v57  ;;  %8223 = vmatprep.mubr.msk.f32.mxu1 %vm8942_vm1, %v8941_v22  ;;  %v8528_v50 = vpack.c.bf16 %v8635_v58, %v8634_v59 }
 0x307   : > { %v8857_v61 = vpop.eup %8856  ;;  %v1296_v62 = vmul.f32 %v8855_v60, %v8847_v42  ;;  %v8638_v63 = vpop.permute.xlu1 %8637  ;;  %8537 = vmatprep.subr.bf16.mxu1 %v8536_v55  ;;  %v8544_v36 = vpack.c.bf16 %v8650_v34, %v8649_v35 }
 0x308   : > { %v1299_v7 = vmul.f32 %v8857_v61, %v8849_v43  ;;  %v8640_v8 = vunpack.i.h.bf16 %v8638_v63  ;;  %v8639_v12 = vunpack.i.l.bf16 %v8638_v63  ;;  %v1734_v45 = vpop.permute.xlu0 %1733 }
 0x309   : > { %8209 = vmatmul.mubr.msk.f32.vlgmr.msra.gmra.mrb[10].mxu0 %vm951_vm2, %v1296_v62 }
 0x30a   : > { %v8859_v14 = vpop.eup %8858  ;;  %v8540_v21 = vpack.c.bf16 %v8640_v8, %v8639_v12  ;;  %8217 = vmatpush3.msra.mxu0 %v943_v3  ;;  %8224 = vmatmul.mubr.msk.f32.vlgmr.msra.gmra.mrb[12].mxu1 %vm951_vm2, %v1299_v7 }
 0x30b   : > { %v1298_v28 = vmul.f32 %v8859_v14, %v8851_v47  ;;  %8539 = vmatpush3.bf16.msra.mxu1 %v8536_v55  ;;  %8529 = vmatprep.subr.bf16.mxu0 %v8528_v50  ;;  %v8643_v30 = vpop.permute.xlu1 %8642 }
 0x30c   : > { %v8645_v31 = vunpack.i.h.bf16 %v8643_v30  ;;  %v8644_v32 = vunpack.i.l.bf16 %v8643_v30  ;;  %8218 = vmatprep.mubr.msk.f32.mxu0 %vm8942_vm1, %v8941_v22  ;;  %8541 = vmatprep.subr.bf16.mxu1 %v8540_v21 }
 0x30d   : > { %8219 = vmatmul.mubr.msk.f32.vlgmr.msra.gmra.mrb[12].mxu0 %vm951_vm2, %v1298_v28  ;;  %8248 = vmatprep.mubr.msk.f32.mxu1 %vm649_vm0, %v9124_v15 }
 0x30e   : > { %v8532_v33 = vpack.c.bf16 %v8645_v31, %v8644_v32  ;;  %8531 = vmatpush3.bf16.msra.mxu0 %v8528_v50  ;;  %8234 = vmatprep.mubr.msk.f32.mxu0 %vm649_vm0, %v9124_v15 }
 0x30f   : > { %8543 = vmatpush3.bf16.msra.mxu1 %v8540_v21  ;;  %v8653_v15 = vpop.permute.xlu1 %8652 }
 0x310   : > { %8533 = vmatprep.subr.bf16.mxu0 %v8532_v33  ;;  %8268 = vmatprep.subr.mxu1 %v8941_v22  ;;  %v8655_v37 = vunpack.i.h.bf16 %v8653_v15  ;;  %v8654_v38 = vunpack.i.l.bf16 %v8653_v15 }
 0x312   : > { %8249 = vmatmul.mubr.msk.f32.vlgmr.msra.gmra.mrb[14].mxu1 %vm649_vm0, %v9127_v16  ;;  %8535 = vmatpush3.bf16.msra.mxu0 %v8532_v33 }
 0x313   : > { %8251 = vmatprep.mubr.msk.f32.mxu1 %vm649_vm0, %v9132_v17  ;;  %8545 = vmatprep.subr.bf16.mxu0 %v8544_v36  ;;  %v1620_v5 = vpop.permute.xlu1 %1619 }
 0x315   : > { %8235 = vmatmul.mubr.msk.f32.vlgmr.msra.gmra.mrb[14].mxu0 %vm649_vm0, %v9127_v16  ;;  %v8548_v16 = vpack.c.bf16 %v8655_v37, %v8654_v38 }
 0x316   : > { %8252 = vmatmul.mubr.msk.f32.gmra.mrb[16].mxu1 %vm649_vm0, %v9137_v18  ;;  %8237 = vmatprep.mubr.msk.f32.mxu0 %vm649_vm0, %v9132_v17 }
 0x317   : > { %8547 = vmatpush3.bf16.msra.mxu0 %v8544_v36  ;;  %8270 = vmatprep.mubr.msk.f32.mxu1 %vm8942_vm1, %v8941_v22 }
 0x318   : > { %8549 = vmatprep.subr.bf16.mxu0 %v8548_v16 }
 0x319   : > { %8238 = vmatmul.mubr.msk.f32.gmra.mrb[16].mxu0 %vm649_vm0, %v9137_v18 }
 0x31a   : > { %8262 = vmatprep.mubr.msk.f32.mxu0 %vm649_vm0, %v9172_v23 }
 0x31b   : > { %8551 = vmatpush3.bf16.msra.mxu0 %v8548_v16 }
 0x31c   : > { %8278 = vmatprep.subr.mxu0 %v8941_v22 }
 0x31e   : > { %8263 = vmatmul.mubr.msk.f32.vlgmr.msra.gmra.mrb[18].mxu0 %vm649_vm0, %v9175_v24 }
 0x31f   : > { %8265 = vmatprep.mubr.msk.f32.mxu0 %vm649_vm0, %v9184_v25 }
 0x322   : > { %8266 = vmatmul.mubr.msk.f32.gmra.mrb[20].mxu0 %vm649_vm0, %v9187_v26 }
 0x323   : > { %8280 = vmatprep.mubr.msk.f32.mxu0 %vm8942_vm1, %v8941_v22 }
 0x3d8   : > { %v9345_v17 = vpop.f32.mrb[10].mxu1 }
 0x3d9   : > { %v8215_v18 = vpop.f32.mrb[11].mxu1 }
 0x3dc   : > { %v9347_v39 = vpop.f32.mrb[10].mxu0 }
 0x3dd   : > { %v9349_v40 = vpop.f32.mrb[12].mxu1  ;;  %v8210_v41 = vpop.f32.mrb[11].mxu0 }
 0x3de   : > { %v8225_v42 = vpop.f32.mrb[13].mxu1 }
 0x3e0   : > { %v9351_v43 = vpop.f32.mrb[12].mxu0 }
 0x3e1   : > { %v8220_v44 = vpop.f32.mrb[13].mxu0 }
 0x3e5   : > { %v8250_v47 = vpop.f32.mrb[14].mxu1 }
 0x3e6   : > { %v1802_v48 = vpop.f32.mrb[15].mxu1  ;;  %v1808_v19 = vadd.f32 %v8250_v47, %v1734_v45 }
 0x3e7   : > { %v1803_v4 = vadd.f32 %v1802_v48, %v1734_v45 }
 0x3e8   : > { %v8236_v6 = vpop.f32.mrb[14].mxu0 }
 0x3e9   : > { %v8253_v9 = vpop.f32.mrb[16].mxu1  ;;  %8269 = vmatpush3.xpose.msk.msra.mxu1 %vm951_vm2, %v1803_v4  ;;  %v1688_v10 = vpop.f32.mrb[15].mxu0  ;;  %v1694_v57 = vadd.f32 %v8236_v6, %v1620_v5 }
 0x3ea   : > { %v1689_v11 = vadd.f32 %v1688_v10, %v1620_v5  ;;  %v1812_v13 = vpop.f32.mrb[17].mxu1  ;;  %8273 = vmatprep.subr.mxu1 %v8941_v22  ;;  %v1818_v59 = vadd.f32 %v8253_v9, %v1734_v45 }
 0x3eb   : > { %v1813_v20 = vadd.f32 %v1812_v13, %v1734_v45 }
 0x3ec   : > { %v8239_v55 = vpop.f32.mrb[16].mxu0  ;;  %8271 = vmatmul.mubr.msk.f32.vlgmr.msra.gmra.mrb[18].mxu1 %vm951_vm2, %v1689_v11 }
 0x3ed   : > { %8274 = vmatpush3.xpose.msk.msra.mxu1 %vm951_vm2, %v1808_v19  ;;  %8279 = vmatpush3.xpose.msk.msra.mxu0 %vm951_vm2, %v1813_v20  ;;  %v1698_v56 = vpop.f32.mrb[17].mxu0  ;;  %v1704_v60 = vadd.f32 %v8239_v55, %v1620_v5 }
 0x3ee   : > { %v1699_v58 = vadd.f32 %v1698_v56, %v1620_v5  ;;  %8275 = vmatprep.mubr.msk.f32.mxu1 %vm8942_vm1, %v8941_v22  ;;  %8283 = vmatprep.subr.mxu1 %v8941_v22 }
 0x3ef   : > { %8288 = vmatprep.subr.mxu0 %v8941_v22 }
 0x3f0   : > { %8276 = vmatmul.mubr.msk.f32.vlgmr.msra.gmra.mrb[20].mxu1 %vm951_vm2, %v1694_v57  ;;  %8281 = vmatmul.mubr.msk.f32.vlgmr.msra.gmra.mrb[22].mxu0 %vm951_vm2, %v1699_v58 }
 0x3f1   : > { %8284 = vmatpush3.xpose.msk.msra.mxu1 %vm951_vm2, %v1818_v59  ;;  %8285 = vmatprep.mubr.msk.f32.mxu1 %vm8942_vm1, %v8941_v22  ;;  %v9373_v61 = vpop.f32.mrb[18].mxu0 }
 0x3f2   : > { %8293 = vmatprep.subr.mxu1 %v8941_v22  ;;  %8290 = vmatprep.mubr.msk.f32.mxu0 %vm8942_vm1, %v8941_v22  ;;  %v9375_v62 = vpop.f32.mrb[19].mxu0 }
 0x3f4   : > { %8286 = vmatmul.mubr.msk.f32.vlgmr.msra.gmra.mrb[22].mxu1 %vm951_vm2, %v1704_v60 }
 0x3f5   : > { %8295 = vmatprep.mubr.msk.f32.mxu1 %vm8942_vm1, %v8941_v22  ;;  %v9377_v63 = vpop.f32.mrb[20].mxu0 }
 0x3f6   : > { %v9379_v3 = vpop.f32.mrb[21].mxu0 }
 0x4bf   : > { %v2007_v7 = vpop.f32.mrb[18].mxu1 }
 0x4c0   : > { %v2008_v8 = vadd.f32 %v2007_v7, %v9249_v54  ;;  %v8272_v12 = vpop.f32.mrb[19].mxu1 }
 0x4c2   : > { %v2239_v50 = vsel %vm951_vm2, %v2008_v8, -inf }
 0x4c3   : > { %v2159_v14 = vpop.f32.mrb[22].mxu0  ;;  %2240 = vmax.xlane.f32.xlu1 %v2239_v50  ;;  %v2083_v21 = vpop.f32.mrb[20].mxu1 }
 0x4c4   : > { %v2084_v28 = vadd.f32 %v2083_v21, %v9249_v54  ;;  %v8277_v30 = vpop.f32.mrb[21].mxu1  ;;  %v8282_v31 = vpop.f32.mrb[23].mxu0  ;;  %v2160_v35 = vadd.f32 %v2159_v14, %v9249_v54 }
 0x4c5   : > { %v9425_v31 = vld [vmem:[%s9119_s30] sm:$0xff] }
 0x4c6   : > { %v2242_v32 = vsel %vm951_vm2, %v2084_v28, -inf  ;;  %v2245_v15 = vsel %vm951_vm2, %v2160_v35, -inf }
 0x4c7   : > { %2243 = vmax.xlane.f32.xlu0 %v2242_v32  ;;  %v2235_v51 = vpop.f32.mrb[22].mxu1 }
 0x4c8   : > { %v2236_v33 = vadd.f32 %v2235_v51, %v9249_v54  ;;  %v8287_v34 = vpop.f32.mrb[23].mxu1 }
 0x4ca   : > { %v2248_v36 = vsel %vm951_vm2, %v2236_v33, -inf }
 0x4cb   : > { %2249 = vmax.xlane.f32.xlu0 %v2248_v36 }
 0x4cf   : > { %2246 = vmax.xlane.f32.xlu0 %v2245_v15 }
 0x550   : > { %v2241_v37 = vpop.xlane.xlu1 %2240 }
 0x551   : > { %v2251_v38 = vsub.f32 %v2008_v8, %v2241_v37 }
 0x553   : > { %v2255_v16 = vmul.f32 1.442695, %v2251_v38  ;;  %v9431_v38 = vld [vmem:[%s9119_s30 + $0x8] sm:$0xff] }
 0x554   : > { %v2244_v18 = vpop.xlane.xlu0 %2243 }
 0x555   : > { %8860 = vpow2.f32 %v2255_v16  ;;  %v2252_v41 = vsub.f32 %v2084_v28, %v2244_v18  ;;  %v9436_v16 = vld [vmem:[%s9119_s30 + $0x10] sm:$0xff]  ;;  %v9441_v18 = vld [vmem:[%s9119_s30 + $0x18] sm:$0xff] }
 0x557   : > { %v2257_v42 = vmul.f32 1.442695, %v2252_v41  ;;  %v2575_v41 = vld [vmem:[%s10436_s9 + $0x8] sm:$0xff] }
 0x558   : > { %v2250_v44 = vpop.xlane.xlu0 %2249 }
 0x559   : > { %8862 = vpow2.f32 %v2257_v42  ;;  %v2254_v45 = vsub.f32 %v2236_v33, %v2250_v44  ;;  %v1592_v42 = vld [vmem:[%s10436_s9] sm:$0xff] }
 0x55b   : > { %v2261_v47 = vmul.f32 1.442695, %v2254_v45 }
 0x55c   : > { %v2247_v48 = vpop.xlane.xlu0 %2246 }
 0x55d   : > { %8864 = vpow2.f32 %v2261_v47  ;;  %v2253_v4 = vsub.f32 %v2160_v35, %v2247_v48 }
 0x55f   : > { %v8861_v5 = vpop.eup %8860  ;;  %v2259_v6 = vmul.f32 1.442695, %v2253_v4 }
 0x560   : > { %v2263_v9 = vsel %vm951_vm2, %v8861_v5, 0.0 }
 0x561   : > { %8866 = vpow2.f32 %v2259_v6  ;;  %2264 = vadd.xlane.f32.xlu1 %v2263_v9 }
 0x563   : > { %v8863_v10 = vpop.eup %8862 }
 0x564   : > { %v2266_v11 = vsel %vm951_vm2, %v8863_v10, 0.0 }
 0x565   : > { %2267 = vadd.xlane.f32.xlu0 %v2266_v11 }
 0x567   : > { %v8865_v13 = vpop.eup %8864 }
 0x568   : > { %v2272_v19 = vsel %vm951_vm2, %v8865_v13, 0.0 }
 0x569   : > { %2273 = vadd.xlane.f32.xlu0 %v2272_v19 }
 0x56b   : > { %v8867_v20 = vpop.eup %8866 }
 0x56c   : > { %v2269_v55 = vsel %vm951_vm2, %v8867_v20, 0.0 }
 0x56d   : > { %2270 = vadd.xlane.f32.xlu1 %v2269_v55 }
 0x57e   : > { %8657 = vrot.lane.b32.xlu1 %v9265_v49, %s8944_s28 }
 0x57f   : > { %1847 = vrot.lane.b32.xlu0 %v9236_v46, %s8943_s3 }
 0x582   : > { %8662 = vrot.lane.b32.xlu1 %v9283_v2, %s8944_s28 }
 0x583   : > { %8672 = vrot.lane.b32.xlu0 %v9275_v53, %s8944_s28 }
 0x586   : > { %8667 = vrot.lane.b32.xlu1 %v9269_v52, %s8944_s28 }
 0x587   : > { %8682 = vrot.lane.b32.xlu0 %v9293_v1, %s8944_s28 }
 0x58a   : > { %8677 = vrot.lane.b32.xlu1 %v9289_v0, %s8944_s28 }
 0x58b   : > { %2796 = vrot.lane.b32.xlu0 %v9203_v29, %s8944_s28 }
 0x58e   : > { %2910 = vrot.lane.b32.xlu1 %v9198_v27, %s8944_s28 }
 0x5ee   : > { %v2265_v49 = vpop.xlane.xlu1 %2264 }
 0x5ef   : > { %8868 = vrcp.f32 %v2265_v49 }
 0x5f2   : > { %v2268_v2 = vpop.xlane.xlu0 %2267 }
 0x5f3   : > { %8870 = vrcp.f32 %v2268_v2 }
 0x5f6   : > { %v2274_v53 = vpop.xlane.xlu0 %2273 }
 0x5f7   : > { %8872 = vrcp.f32 %v2274_v53 }
 0x5f9   : > { %v8869_v56 = vpop.eup %8868 }
 0x5fa   : > { %v2271_v52 = vpop.xlane.xlu1 %2270  ;;  %v1848_v57 = vpop.permute.xlu0 %1847  ;;  %v2279_v58 = vmul.f32 %v8869_v56, %v8861_v5 }
 0x5fb   : > { %8874 = vrcp.f32 %v2271_v52  ;;  %v1917_v1 = vadd.f32 %v9375_v62, %v1848_v57  ;;  %v1922_v0 = vadd.f32 %v9373_v61, %v1848_v57  ;;  %v1927_v29 = vadd.f32 %v9379_v3, %v1848_v57 }
 0x5fc   : > { %v1932_v7 = vadd.f32 %v9377_v63, %v1848_v57 }
 0x5fd   : > { %v8871_v59 = vpop.eup %8870  ;;  %8289 = vmatpush3.msra.mxu0 %v1917_v1  ;;  %8294 = vmatpush3.msra.mxu1 %v1922_v0 }
 0x5fe   : > { %v2280_v27 = vmul.f32 %v8871_v59, %v8863_v10  ;;  %v8658_v60 = vpop.permute.xlu1 %8657  ;;  %8291 = vmatmul.mubr.msk.f32.vlgmr.msra.gmra.mrb[24].mxu0 %vm951_vm2, %v2279_v58  ;;  %8298 = vmatprep.subr.mxu0 %v8941_v22  ;;  %v8673_v21 = vpop.permute.xlu0 %8672 }
 0x5ff   : > { %v8660_v8 = vunpack.i.h.bf16 %v8658_v60  ;;  %v8659_v12 = vunpack.i.l.bf16 %v8658_v60  ;;  %8299 = vmatpush3.msra.mxu0 %v1927_v29  ;;  %8303 = vmatprep.subr.mxu1 %v8941_v22  ;;  %v8675_v33 = vunpack.i.h.bf16 %v8673_v21  ;;  %v8674_v34 = vunpack.i.l.bf16 %v8673_v21 }
 0x600   : > { %8296 = vmatmul.mubr.msk.f32.vlgmr.msra.gmra.mrb[24].mxu1 %vm951_vm2, %v2280_v27  ;;  %8300 = vmatprep.mubr.msk.f32.mxu0 %vm8942_vm1, %v8941_v22 }
 0x601   : > { %v8873_v61 = vpop.eup %8872  ;;  %v8552_v62 = vpack.c.bf16 %v8660_v8, %v8659_v12  ;;  %8304 = vmatpush3.msra.mxu1 %v1932_v7  ;;  %8305 = vmatprep.mubr.msk.f32.mxu1 %vm8942_vm1, %v8941_v22  ;;  %v8564_v37 = vpack.c.bf16 %v8675_v33, %v8674_v34 }
 0x602   : > { %v2282_v3 = vmul.f32 %v8873_v61, %v8865_v13  ;;  %v8663_v50 = vpop.permute.xlu1 %8662  ;;  %8308 = vmatprep.subr.mxu0 %v2575_v41  ;;  %v8683_v13 = vpop.permute.xlu0 %8682 }
 0x603   : > { %v8665_v63 = vunpack.i.h.bf16 %v8663_v50  ;;  %v8664_v14 = vunpack.i.l.bf16 %v8663_v50  ;;  %8553 = vmatprep.subr.bf16.mxu1 %v8552_v62  ;;  %v8684_v55 = vunpack.i.l.bf16 %v8683_v13 }
 0x604   : > { %8306 = vmatmul.mubr.msk.f32.vlgmr.msra.gmra.mrb[26].mxu1 %vm951_vm2, %v2282_v3 }
 0x605   : > { %v8875_v28 = vpop.eup %8874  ;;  %v8556_v30 = vpack.c.bf16 %v8665_v63, %v8664_v14  ;;  %8555 = vmatpush3.bf16.msra.mxu1 %v8552_v62  ;;  %8332 = vmatprep.mubr.msk.f32.mxu1 %vm649_vm0, %v9425_v31 }
 0x606   : > { %v2281_v32 = vmul.f32 %v8875_v28, %v8867_v20  ;;  %v8668_v51 = vpop.permute.xlu1 %8667  ;;  %v8685_v20 = vunpack.i.h.bf16 %v8683_v13 }
 0x607   : > { %v8670_v35 = vunpack.i.h.bf16 %v8668_v51  ;;  %v8669_v36 = vunpack.i.l.bf16 %v8668_v51  ;;  %8557 = vmatprep.subr.bf16.mxu1 %v8556_v30 }
 0x608   : > { %8301 = vmatmul.mubr.msk.f32.vlgmr.msra.gmra.mrb[26].mxu0 %vm951_vm2, %v2281_v32  ;;  %v8572_v2 = vpack.c.bf16 %v8685_v20, %v8684_v55 }
 0x609   : > { %v8560_v15 = vpack.c.bf16 %v8670_v35, %v8669_v36  ;;  %8559 = vmatpush3.bf16.msra.mxu1 %v8556_v30  ;;  %8309 = vmatpush3.msra.mxu0 %v2575_v41 }
 0x60a   : > { %8316 = vmatprep.subr.mxu0 %v1592_v42  ;;  %v8678_v44 = vpop.permute.xlu1 %8677 }
 0x60b   : > { %8561 = vmatprep.subr.bf16.mxu1 %v8560_v15  ;;  %v8680_v45 = vunpack.i.h.bf16 %v8678_v44  ;;  %v8679_v47 = vunpack.i.l.bf16 %v8678_v44 }
 0x60c   : > { %8333 = vmatmul.mubr.msk.f32.vlgmr.msra.gmra.mrb[28].mxu1 %vm649_vm0, %v9431_v38 }
 0x60d   : > { %8563 = vmatpush3.bf16.msra.mxu1 %v8560_v15  ;;  %8335 = vmatprep.mubr.msk.f32.mxu1 %vm649_vm0, %v9436_v16  ;;  %v8568_v5 = vpack.c.bf16 %v8680_v45, %v8679_v47 }
 0x60e   : > { %8565 = vmatprep.subr.bf16.mxu1 %v8564_v37  ;;  %v2911_v1 = vpop.permute.xlu1 %2910 }
 0x610   : > { %8336 = vmatmul.mubr.msk.f32.gmra.mrb[30].mxu1 %vm649_vm0, %v9441_v18 }
 0x611   : > { %8567 = vmatpush3.bf16.msra.mxu1 %v8564_v37  ;;  %8346 = vmatprep.mubr.msk.f32.mxu1 %vm649_vm0, %v9425_v31 }
 0x612   : > { %8366 = vmatprep.subr.mxu1 %v8941_v22 }
 0x614   : > { %8347 = vmatmul.mubr.msk.f32.vlgmr.msra.gmra.mrb[32].mxu1 %vm649_vm0, %v9431_v38 }
 0x615   : > { %8349 = vmatprep.mubr.msk.f32.mxu1 %vm649_vm0, %v9436_v16 }
 0x618   : > { %8350 = vmatmul.mubr.msk.f32.gmra.mrb[34].mxu1 %vm649_vm0, %v9441_v18 }
 0x619   : > { %8368 = vmatprep.mubr.msk.f32.mxu1 %vm8942_vm1, %v8941_v22 }
 0x6d1   : > { %v2352_v48 = vpop.f32.mrb[24].mxu0 }
 0x6d2   : > { %v8292_v4 = vpop.f32.mrb[25].mxu0  ;;  %8310 = vmatprep.mubr.msk.f32.mxu0 %vm951_vm2, %v2352_v48 }
 0x6d3   : > { %v2425_v6 = vpop.f32.mrb[24].mxu1 }
 0x6d4   : > { %v8297_v9 = vpop.f32.mrb[25].mxu1  ;;  %8311 = vmatmul.mubr.msk.f32.vlgmr.msra.gmra.mrb[28].mxu0 %vm951_vm2, %v2425_v6 }
 0x6d5   : > { %8317 = vmatpush3.msra.mxu0 %v1592_v42 }
 0x6d6   : > { %8569 = vmatprep.subr.bf16.mxu0 %v8568_v5 }
 0x6d7   : > { %v2571_v10 = vpop.f32.mrb[26].mxu1 }
 0x6d8   : > { %v8307_v11 = vpop.f32.mrb[27].mxu1 }
 0x6db   : > { %v2498_v19 = vpop.f32.mrb[26].mxu0 }
 0x6dc   : > { %v8302_v49 = vpop.f32.mrb[27].mxu0  ;;  %8313 = vmatprep.mubr.msk.f32.mxu0 %vm951_vm2, %v2498_v19 }
 0x6dd   : > { %8314 = vmatmul.mubr.msk.f32.gmra.mrb[30].mxu0 %vm951_vm2, %v2571_v10 }
 0x6de   : > { %8318 = vmatprep.mubr.msk.f32.mxu0 %vm951_vm2, %v9347_v39 }
 0x6df   : > { %v8334_v53 = vpop.f32.mrb[28].mxu1 }
 0x6e0   : > { %v2865_v56 = vpop.f32.mrb[29].mxu1 }
 0x6e1   : > { %8319 = vmatmul.mubr.msk.f32.vlgmr.msra.gmra.mrb[28].mxu0 %vm951_vm2, %v9345_v17  ;;  %v2797_v17 = vpop.permute.xlu0 %2796 }
 0x6e2   : > { %8571 = vmatpush3.bf16.msra.mxu0 %v8568_v5  ;;  %8321 = vmatprep.mubr.msk.f32.mxu0 %vm951_vm2, %v9351_v43 }
 0x6e3   : > { %v8337_v52 = vpop.f32.mrb[30].mxu1  ;;  %8573 = vmatprep.subr.bf16.mxu0 %v8572_v2 }
 0x6e4   : > { %v2875_v57 = vpop.f32.mrb[31].mxu1 }
 0x6e5   : > { %8322 = vmatmul.mubr.msk.f32.gmra.mrb[30].mxu0 %vm951_vm2, %v9349_v40  ;;  %v2866_v40 = vadd.f32 %v2865_v56, %v2797_v17  ;;  %v3855_v56 = vld [vmem:[%s10455_s24 + $0x8] sm:$0xff] }
 0x6e6   : > { %8575 = vmatpush3.bf16.msra.mxu0 %v8572_v2  ;;  %8360 = vmatprep.mubr.msk.f32.mxu0 %vm649_vm0, %v9172_v23 }
 0x6e7   : > { %v8348_v39 = vpop.f32.mrb[32].mxu1  ;;  %8371 = vmatprep.subr.mxu0 %v8941_v22 }
 0x6e8   : > { %v2979_v0 = vpop.f32.mrb[33].mxu1  ;;  %v2985_v43 = vadd.f32 %v8348_v39, %v2911_v1  ;;  %v3971_v39 = vld [vmem:[%s10432_s5 + $0x18] sm:$0xff] }
 0x6e9   : > { %v2980_v58 = vadd.f32 %v2979_v0, %v2911_v1  ;;  %8361 = vmatmul.mubr.msk.f32.vlgmr.msra.gmra.mrb[32].mxu0 %vm649_vm0, %v9175_v24  ;;  %v2871_v24 = vadd.f32 %v8334_v53, %v2797_v17  ;;  %v3854_v53 = vld [vmem:[%s10455_s24] sm:$0xff] }
 0x6ea   : > { %8363 = vmatprep.mubr.msk.f32.mxu0 %vm649_vm0, %v9184_v25  ;;  %v2876_v25 = vadd.f32 %v2875_v57, %v2797_v17  ;;  %v8691_v57 = vpack.i.bf16 %v3855_v56, %v3854_v53 }
 0x6eb   : > { %v8351_v59 = vpop.f32.mrb[34].mxu1  ;;  %8367 = vmatpush3.xpose.msk.msra.mxu1 %vm951_vm2, %v2980_v58  ;;  %v3856_v58 = vld [vmem:[%s10455_s24 + $0x10] sm:$0xff] }
 0x6ec   : > { %v2989_v29 = vpop.f32.mrb[35].mxu1  ;;  %8376 = vmatprep.subr.mxu1 %v8941_v22  ;;  %v2995_v27 = vadd.f32 %v8351_v59, %v2911_v1 }
 0x6ed   : > { %v2990_v23 = vadd.f32 %v2989_v29, %v2911_v1  ;;  %8364 = vmatmul.mubr.msk.f32.gmra.mrb[34].mxu0 %vm649_vm0, %v9187_v26  ;;  %v2881_v26 = vadd.f32 %v8337_v52, %v2797_v17  ;;  %v3968_v52 = vld [vmem:[%s10432_s5] sm:$0xff]  ;;  %v3969_v1 = vld [vmem:[%s10432_s5 + $0x8] sm:$0xff] }
 0x6ee   : > { %8369 = vmatmul.mubr.msk.f32.vlgmr.msra.gmra.mrb[36].mxu1 %vm951_vm2, %v2866_v40  ;;  %8373 = vmatprep.mubr.msk.f32.mxu0 %vm8942_vm1, %v8941_v22  ;;  %v8686_v0 = vpack.i.bf16 %v3969_v1, %v3968_v52 }
 0x6ef   : > { %8372 = vmatpush3.xpose.msk.msra.mxu0 %vm951_vm2, %v2985_v43  ;;  %8377 = vmatpush3.xpose.msk.msra.mxu1 %vm951_vm2, %v2990_v23  ;;  %v3857_v43 = vld [vmem:[%s10455_s24 + $0x18] sm:$0xff] }
 0x6f0   : > { %8378 = vmatprep.mubr.msk.f32.mxu1 %vm8942_vm1, %v8941_v22  ;;  %8381 = vmatprep.subr.mxu0 %v8941_v22  ;;  %v8701_v59 = vpack.i.bf16 %v3857_v43, %v3856_v58 }
 0x6f1   : > { %8386 = vmatprep.subr.mxu1 %v8941_v22 }
 0x6f2   : > { %8374 = vmatmul.mubr.msk.f32.vlgmr.msra.gmra.mrb[36].mxu0 %vm951_vm2, %v2871_v24  ;;  %8379 = vmatmul.mubr.msk.f32.vlgmr.msra.gmra.mrb[38].mxu1 %vm951_vm2, %v2876_v25 }
 0x6f3   : > { %8382 = vmatpush3.xpose.msk.msra.mxu0 %vm951_vm2, %v2995_v27  ;;  %8383 = vmatprep.mubr.msk.f32.mxu0 %vm8942_vm1, %v8941_v22 }
 0x6f4   : > { %8391 = vmatprep.subr.mxu0 %v8941_v22  ;;  %8388 = vmatprep.mubr.msk.f32.mxu1 %vm8942_vm1, %v8941_v22 }
 0x6f6   : > { %8384 = vmatmul.mubr.msk.f32.vlgmr.msra.gmra.mrb[38].mxu0 %vm951_vm2, %v2881_v26 }
 0x6f7   : > { %8393 = vmatprep.mubr.msk.f32.mxu0 %vm8942_vm1, %v8941_v22 }
 0x7bc   : > { %v9505_v60 = vpop.f32.mrb[32].mxu0 }
 0x7bd   : > { %v9507_v7 = vpop.f32.mrb[33].mxu0 }
 0x7c0   : > { %v9509_v8 = vpop.f32.mrb[34].mxu0 }
 0x7c1   : > { %v3184_v12 = vpop.f32.mrb[36].mxu1  ;;  %v9511_v61 = vpop.f32.mrb[35].mxu0 }
 0x7c2   : > { %v3185_v62 = vadd.f32 %v3184_v12, %v9249_v54  ;;  %v8370_v3 = vpop.f32.mrb[37].mxu1 }
 0x7c4   : > { %v3416_v50 = vsel %vm951_vm2, %v3185_v62, -inf }
 0x7c5   : > { %v3260_v63 = vpop.f32.mrb[36].mxu0  ;;  %3417 = vmax.xlane.f32.xlu1 %v3416_v50  ;;  %v3336_v14 = vpop.f32.mrb[38].mxu1 }
 0x7c6   : > { %v3261_v21 = vadd.f32 %v3260_v63, %v9249_v54  ;;  %v8375_v28 = vpop.f32.mrb[37].mxu0  ;;  %v8380_v30 = vpop.f32.mrb[39].mxu1  ;;  %v3337_v32 = vadd.f32 %v3336_v14, %v9249_v54 }
 0x7c8   : > { %v3419_v51 = vsel %vm951_vm2, %v3261_v21, -inf  ;;  %v3422_v36 = vsel %vm951_vm2, %v3337_v32, -inf }
 0x7c9   : > { %3420 = vmax.xlane.f32.xlu0 %v3419_v51  ;;  %v3412_v33 = vpop.f32.mrb[38].mxu0 }
 0x7ca   : > { %v8385_v34 = vpop.f32.mrb[39].mxu0  ;;  %v3413_v35 = vadd.f32 %v3412_v33, %v9249_v54 }
 0x7cc   : > { %v3425_v15 = vsel %vm951_vm2, %v3413_v35, -inf }
 0x7cd   : > { %3423 = vmax.xlane.f32.xlu0 %v3422_v36 }
 0x7d1   : > { %3426 = vmax.xlane.f32.xlu0 %v3425_v15 }
 0x852   : > { %v3418_v37 = vpop.xlane.xlu1 %3417 }
 0x853   : > { %v3428_v41 = vsub.f32 %v3185_v62, %v3418_v37 }
 0x855   : > { %v3432_v42 = vmul.f32 1.442695, %v3428_v41 }
 0x856   : > { %v3421_v44 = vpop.xlane.xlu0 %3420 }
 0x857   : > { %8876 = vpow2.f32 %v3432_v42  ;;  %v3429_v45 = vsub.f32 %v3261_v21, %v3421_v44 }
 0x859   : > { %v3434_v47 = vmul.f32 1.442695, %v3429_v45  ;;  %v4082_v45 = vld [vmem:[%s10434_s7] sm:$0xff] }
 0x85a   : > { %v3424_v48 = vpop.xlane.xlu0 %3423 }
 0x85b   : > { %8878 = vpow2.f32 %v3434_v47  ;;  %v3430_v4 = vsub.f32 %v3337_v32, %v3424_v48  ;;  %v3752_v32 = vld [vmem:[%s10436_s9 + $0x10] sm:$0xff]  ;;  %v4083_v47 = vld [vmem:[%s10434_s7 + $0x8] sm:$0xff] }
 0x85c   : > { %v4084_v48 = vld [vmem:[%s10434_s7 + $0x10] sm:$0xff] }
 0x85d   : > { %v3436_v5 = vmul.f32 1.442695, %v3430_v4  ;;  %v8928_v4 = vld [vmem:[%s9168_s26] sm:$0xff] }
 0x85e   : > { %v3427_v6 = vpop.xlane.xlu0 %3426 }
 0x85f   : > { %8880 = vpow2.f32 %v3436_v5  ;;  %v3431_v54 = vsub.f32 %v3413_v35, %v3427_v6  ;;  %v8706_v5 = vpack.i.bf16 %v4083_v47, %v4082_v45  ;;  %v4085_v6 = vld [vmem:[%s10434_s7 + $0x18] sm:$0xff] }
 0x861   : > { %v8877_v9 = vpop.eup %8876  ;;  %v3438_v10 = vmul.f32 1.442695, %v3431_v54  ;;  %v8711_v54 = vpack.i.bf16 %v4085_v6, %v4084_v48 }
 0x862   : > { %v3440_v11 = vsel %vm951_vm2, %v8877_v9, 0.0 }
 0x863   : > { %8882 = vpow2.f32 %v3438_v10  ;;  %3441 = vadd.xlane.f32.xlu1 %v3440_v11  ;;  %v7525_v10 = vld [vmem:[%s10431_s4] ss:$0 sm:$0xff] }
 0x865   : > { %v8879_v13 = vpop.eup %8878 }
 0x866   : > { %v3443_v19 = vsel %vm951_vm2, %v8879_v13, 0.0 }
 0x867   : > { %3444 = vadd.xlane.f32.xlu0 %v3443_v19 }
 0x869   : > { %v8881_v20 = vpop.eup %8880 }
 0x86a   : > { %v3446_v55 = vsel %vm951_vm2, %v8881_v20, 0.0 }
 0x86b   : > { %3447 = vadd.xlane.f32.xlu1 %v3446_v55 }
 0x86d   : > { %v8883_v49 = vpop.eup %8882 }
 0x86e   : > { %v3449_v2 = vsel %vm951_vm2, %v8883_v49, 0.0 }
 0x86f   : > { %3450 = vadd.xlane.f32.xlu0 %v3449_v2 }
 0x87c   : > { %3024 = vrot.lane.b32.xlu1 %v9236_v46, %s8944_s28  ;;  %v3970_v46 = vld [vmem:[%s10432_s5 + $0x10] sm:$0xff] }
 0x87d   : > { %v8696_v17 = vpack.i.bf16 %v3971_v39, %v3970_v46 }
 0x880   : > { %8692 = vrot.lane.b32.xlu1 %v8691_v57, %s8945_s1 }
 0x884   : > { %8697 = vrot.lane.b32.xlu1 %v8696_v17, %s8945_s1 }
 0x885   : > { %8687 = vrot.lane.b32.xlu0 %v8686_v0, %s8945_s1 }
 0x888   : > { %8702 = vrot.lane.b32.xlu1 %v8701_v59, %s8945_s1 }
 0x889   : > { %8707 = vrot.lane.b32.xlu0 %v8706_v5, %s8945_s1 }
 0x88c   : > { %8712 = vrot.lane.b32.xlu1 %v8711_v54, %s8945_s1 }
 0x890   : > { %3880 = vrot.lane.b32.xlu1 %v7525_v10, %s8945_s1 }
 0x8f0   : > { %v3442_v40 = vpop.xlane.xlu1 %3441 }
 0x8f1   : > { %8884 = vrcp.f32 %v3442_v40  ;;  %v8929_v40 = vld [vmem:[%s9168_s26 + $0x8] sm:$0xff] }
 0x8f4   : > { %v3445_v29 = vpop.xlane.xlu0 %3444 }
 0x8f5   : > { %8886 = vrcp.f32 %v3445_v29  ;;  %v8930_v29 = vld [vmem:[%s9168_s26 + $0x10] sm:$0xff] }
 0x8f8   : > { %v3448_v23 = vpop.xlane.xlu1 %3447 }
 0x8f9   : > { %8888 = vrcp.f32 %v3448_v23  ;;  %v8931_v23 = vld [vmem:[%s9168_s26 + $0x18] sm:$0xff]  ;;  %s626_s26 = scalar_lea.vmem %s10446_s19, %s9113_s27 }
 0x8fb   : > { %v8885_v24 = vpop.eup %8884 }
 0x8fc   : > { %v3025_v25 = vpop.permute.xlu1 %3024  ;;  %v3451_v27 = vpop.xlane.xlu0 %3450  ;;  %v3456_v62 = vmul.f32 %v8885_v24, %v8877_v9  ;;  %v7530_v9 = vld [vmem:[%s10433_s6] ss:$0 sm:$0xff] }
 0x8fd   : > { %v3094_v26 = vadd.f32 %v9507_v7, %v3025_v25  ;;  %v3099_v12 = vadd.f32 %v9505_v60, %v3025_v25  ;;  %8890 = vrcp.f32 %v3451_v27  ;;  %v3104_v50 = vadd.f32 %v9511_v61, %v3025_v25  ;;  %3994 = vrot.lane.b32.xlu0 %v7530_v9, %s8945_s1 }
 0x8fe   : > { %v3109_v14 = vadd.f32 %v9509_v8, %v3025_v25 }
 0x8ff   : > { %v8887_v3 = vpop.eup %8886  ;;  %8387 = vmatpush3.msra.mxu1 %v3094_v26  ;;  %8392 = vmatpush3.msra.mxu0 %v3099_v12 }
 0x900   : > { %v3457_v63 = vmul.f32 %v8887_v3, %v8879_v13  ;;  %8389 = vmatmul.mubr.msk.f32.vlgmr.msra.gmra.mrb[40].mxu1 %vm951_vm2, %v3456_v62  ;;  %8396 = vmatprep.subr.mxu1 %v8941_v22  ;;  %v8693_v21 = vpop.permute.xlu1 %8692  ;;  %v8688_v51 = vpop.permute.xlu0 %8687 }
 0x901   : > { %8397 = vmatpush3.msra.mxu1 %v3104_v50  ;;  %8401 = vmatprep.subr.mxu0 %v8941_v22  ;;  %v8695_v28 = vunpack.i.h.bf16 %v8693_v21  ;;  %v8694_v30 = vunpack.i.l.bf16 %v8693_v21  ;;  %v8690_v33 = vunpack.i.h.bf16 %v8688_v51  ;;  %v8689_v34 = vunpack.i.l.bf16 %v8688_v51 }
 0x902   : > { %8394 = vmatmul.mubr.msk.f32.vlgmr.msra.gmra.mrb[40].mxu0 %vm951_vm2, %v3457_v63  ;;  %8398 = vmatprep.mubr.msk.f32.mxu1 %vm8942_vm1, %v8941_v22 }
 0x903   : > { %v8889_v60 = vpop.eup %8888  ;;  %8402 = vmatpush3.msra.mxu0 %v3109_v14  ;;  %8403 = vmatprep.mubr.msk.f32.mxu0 %vm8942_vm1, %v8941_v22  ;;  %v8576_v35 = vpack.c.bf16 %v8695_v28, %v8694_v30  ;;  %v8584_v15 = vpack.c.bf16 %v8690_v33, %v8689_v34 }
 0x904   : > { %v3458_v7 = vmul.f32 %v8889_v60, %v8881_v20  ;;  %8406 = vmatprep.subr.mxu0 %v3752_v32  ;;  %v8698_v36 = vpop.permute.xlu1 %8697  ;;  %v8708_v52 = vpop.permute.xlu0 %8707 }
 0x905   : > { %8577 = vmatprep.subr.bf16.mxu1 %v8576_v35  ;;  %v8700_v11 = vunpack.i.h.bf16 %v8698_v36  ;;  %v8699_v13 = vunpack.i.l.bf16 %v8698_v36  ;;  %v8710_v57 = vunpack.i.h.bf16 %v8708_v52  ;;  %v8709_v1 = vunpack.i.l.bf16 %v8708_v52 }
 0x906   : > { %8399 = vmatmul.mubr.msk.f32.vlgmr.msra.gmra.mrb[42].mxu1 %vm951_vm2, %v3458_v7 }
 0x907   : > { %8422 = vmatprep.mubr.msk.f32.mxu1 %vm649_vm0, %v9425_v31  ;;  %v8891_v8 = vpop.eup %8890  ;;  %8579 = vmatpush3.bf16.msra.mxu1 %v8576_v35  ;;  %v8588_v55 = vpack.c.bf16 %v8700_v11, %v8699_v13  ;;  %v8592_v43 = vpack.c.bf16 %v8710_v57, %v8709_v1 }
 0x908   : > { %v3459_v61 = vmul.f32 %v8891_v8, %v8883_v49  ;;  %v8703_v37 = vpop.permute.xlu1 %8702 }
 0x909   : > { %v8705_v41 = vunpack.i.h.bf16 %v8703_v37  ;;  %v8704_v42 = vunpack.i.l.bf16 %v8703_v37 }
 0x90a   : > { %8404 = vmatmul.mubr.msk.f32.vlgmr.msra.gmra.mrb[42].mxu0 %vm951_vm2, %v3459_v61 }
 0x90b   : > { %8407 = vmatpush3.msra.mxu0 %v3752_v32  ;;  %v8580_v44 = vpack.c.bf16 %v8705_v41, %v8704_v42 }
 0x90c   : > { %8585 = vmatprep.subr.bf16.mxu0 %v8584_v15  ;;  %v8713_v46 = vpop.permute.xlu1 %8712 }
 0x90d   : > { %8581 = vmatprep.subr.bf16.mxu1 %v8580_v44  ;;  %v8715_v0 = vunpack.i.h.bf16 %v8713_v46  ;;  %v8714_v17 = vunpack.i.l.bf16 %v8713_v46 }
 0x90e   : > { %8583 = vmatpush3.bf16.msra.mxu1 %v8580_v44 }
 0x90f   : > { %v8596_v59 = vpack.c.bf16 %v8715_v0, %v8714_v17  ;;  %8593 = vmatprep.subr.bf16.mxu1 %v8592_v43 }
 0x910   : > { %v3881_v62 = vpop.permute.xlu1 %3880 }
 0x911   : > { %8423 = vmatmul.mubr.msk.f32.vlgmr.msra.gmra.mrb[44].mxu1 %vm649_vm0, %v9431_v38 }
 0x912   : > { %8425 = vmatprep.mubr.msk.f32.mxu1 %vm649_vm0, %v9436_v16  ;;  %8595 = vmatpush3.bf16.msra.mxu1 %v8592_v43 }
 0x913   : > { %8597 = vmatprep.subr.bf16.mxu1 %v8596_v59 }
 0x915   : > { %8426 = vmatmul.mubr.msk.f32.gmra.mrb[46].mxu1 %vm649_vm0, %v9441_v18 }
 0x916   : > { %8450 = vmatprep.mubr.msk.f32.mxu1 %vm649_vm0, %v8928_v4  ;;  %8599 = vmatpush3.bf16.msra.mxu1 %v8596_v59 }
 0x917   : > { %8461 = vmatprep.subr.mxu1 %v8941_v22 }
 0x919   : > { %8451 = vmatmul.mubr.msk.f32.vlgmr.msra.gmra.mrb[48].mxu1 %vm649_vm0, %v8929_v40 }
 0x91a   : > { %8453 = vmatprep.mubr.msk.f32.mxu1 %vm649_vm0, %v8930_v29 }
 0x91d   : > { %8454 = vmatmul.mubr.msk.f32.gmra.mrb[50].mxu1 %vm649_vm0, %v8931_v23 }
 0x91e   : > { %8463 = vmatprep.mubr.msk.f32.mxu1 %vm8942_vm1, %v8941_v22 }
 0x96f   : > { %v3995_v12 = vpop.permute.xlu0 %3994 }
 0x9d3   : > { %v3529_v19 = vpop.f32.mrb[40].mxu1 }
 0x9d4   : > { %v8390_v20 = vpop.f32.mrb[41].mxu1  ;;  %8408 = vmatprep.mubr.msk.f32.mxu0 %vm951_vm2, %v3529_v19 }
 0x9d5   : > { %v3602_v49 = vpop.f32.mrb[40].mxu0 }
 0x9d6   : > { %v8395_v2 = vpop.f32.mrb[41].mxu0  ;;  %8409 = vmatmul.mubr.msk.f32.vlgmr.msra.gmra.mrb[28].mxu0 %vm951_vm2, %v3602_v49 }
 0x9d7   : > { %8587 = vmatpush3.bf16.msra.mxu0 %v8584_v15  ;;  %v8932_v15 = vld [vmem:[%s10458_s23] sm:$0xff] }
 0x9d8   : > { %8589 = vmatprep.subr.bf16.mxu0 %v8588_v55 }
 0x9d9   : > { %v3675_v53 = vpop.f32.mrb[42].mxu1 }
 0x9da   : > { %v8400_v56 = vpop.f32.mrb[43].mxu1  ;;  %8411 = vmatprep.mubr.msk.f32.mxu0 %vm951_vm2, %v3675_v53 }
 0x9db   : > { %8591 = vmatpush3.bf16.msra.mxu0 %v8588_v55 }
 0x9dc   : > { %8456 = vmatprep.subr.mxu0 %v8941_v22 }
 0x9dd   : > { %v3748_v39 = vpop.f32.mrb[42].mxu0 }
 0x9de   : > { %v8405_v58 = vpop.f32.mrb[43].mxu0  ;;  %8412 = vmatmul.mubr.msk.f32.gmra.mrb[30].mxu0 %vm951_vm2, %v3748_v39 }
 0x9df   : > { %8436 = vmatprep.mubr.msk.f32.mxu0 %vm649_vm0, %v9425_v31 }
 0x9e2   : > { %8437 = vmatmul.mubr.msk.f32.vlgmr.msra.gmra.mrb[44].mxu0 %vm649_vm0, %v9431_v38 }
 0x9e3   : > { %8439 = vmatprep.mubr.msk.f32.mxu0 %vm649_vm0, %v9436_v16 }
 0x9e4   : > { %v8424_v24 = vpop.f32.mrb[44].mxu1 }
 0x9e5   : > { %v3949_v25 = vpop.f32.mrb[45].mxu1  ;;  %v3955_v60 = vadd.f32 %v8424_v24, %v3881_v62  ;;  %v7535_v24 = vld [vmem:[%s10435_s8] ss:$0 sm:$0xff] }
 0x9e6   : > { %8440 = vmatmul.mubr.msk.f32.gmra.mrb[46].mxu0 %vm649_vm0, %v9441_v18  ;;  %v3950_v7 = vadd.f32 %v3949_v25, %v3881_v62 }
 0x9e7   : > { %8458 = vmatprep.mubr.msk.f32.mxu0 %vm8942_vm1, %v8941_v22 }
 0x9e8   : > { %v8427_v27 = vpop.f32.mrb[46].mxu1 }
 0x9e9   : > { %v3959_v26 = vpop.f32.mrb[47].mxu1  ;;  %v3965_v51 = vadd.f32 %v8427_v27, %v3881_v62 }
 0x9ea   : > { %v3960_v33 = vadd.f32 %v3959_v26, %v3881_v62 }
 0x9ec   : > { %v9633_v30 = vpop.f32.mrb[48].mxu1 }
 0x9ed   : > { %v9637_v32 = vpop.f32.mrb[49].mxu1 }
 0x9f0   : > { %v9646_v34 = vpop.f32.mrb[50].mxu1 }
 0x9f1   : > { %v9650_v35 = vpop.f32.mrb[51].mxu1 }
 0xab5   : > { %v8438_v3 = vpop.f32.mrb[44].mxu0 }
 0xab6   : > { %v4069_v50 = vadd.f32 %v8438_v3, %v3995_v12  ;;  %v4063_v63 = vpop.f32.mrb[45].mxu0 }
 0xab7   : > { %v4064_v14 = vadd.f32 %v4063_v63, %v3995_v12 }
 0xab8   : > { %8462 = vmatpush3.xpose.msk.msra.mxu1 %vm951_vm2, %v4069_v50 }
 0xab9   : > { %v8441_v8 = vpop.f32.mrb[46].mxu0  ;;  %8457 = vmatpush3.xpose.msk.msra.mxu0 %vm951_vm2, %v4064_v14  ;;  %8471 = vmatprep.subr.mxu1 %v8941_v22 }
 0xaba   : > { %v4079_v61 = vadd.f32 %v8441_v8, %v3995_v12  ;;  %v4073_v21 = vpop.f32.mrb[47].mxu0  ;;  %8466 = vmatprep.subr.mxu0 %v8941_v22 }
 0xabb   : > { %v4074_v28 = vadd.f32 %v4073_v21, %v3995_v12  ;;  %8464 = vmatmul.mubr.msk.f32.vlgmr.msra.gmra.mrb[52].mxu1 %vm951_vm2, %v3955_v60 }
 0xabc   : > { %8459 = vmatmul.mubr.msk.f32.vlgmr.msra.gmra.mrb[48].mxu0 %vm951_vm2, %v3950_v7  ;;  %8472 = vmatpush3.xpose.msk.msra.mxu1 %vm951_vm2, %v4079_v61 }
 0xabd   : > { %8467 = vmatpush3.xpose.msk.msra.mxu0 %vm951_vm2, %v4074_v28  ;;  %8473 = vmatprep.mubr.msk.f32.mxu1 %vm8942_vm1, %v8941_v22 }
 0xabe   : > { %8468 = vmatprep.mubr.msk.f32.mxu0 %vm8942_vm1, %v8941_v22  ;;  %8476 = vmatprep.subr.mxu0 %v8941_v22 }
 0xabf   : > { %8474 = vmatmul.mubr.msk.f32.vlgmr.msra.gmra.mrb[54].mxu1 %vm951_vm2, %v3965_v51  ;;  %8481 = vmatprep.subr.mxu1 %v8941_v22  ;;  %v4836_v51 = vld [vmem:[%s10436_s9 + $0x18] sm:$0xff] }
 0xac0   : > { %8469 = vmatmul.mubr.msk.f32.vlgmr.msra.gmra.mrb[50].mxu0 %vm951_vm2, %v3960_v33  ;;  %8483 = vmatprep.mubr.msk.f32.mxu1 %vm8942_vm1, %v8941_v22 }
 0xac1   : > { %8478 = vmatprep.mubr.msk.f32.mxu0 %vm8942_vm1, %v8941_v22 }
 0xb8e   : > { %v4344_v36 = vpop.f32.mrb[52].mxu1 }
 0xb8f   : > { %v4345_v37 = vadd.f32 %v8932_v15, %v4344_v36  ;;  %v4268_v41 = vpop.f32.mrb[48].mxu0  ;;  %v8465_v42 = vpop.f32.mrb[53].mxu1 }
 0xb90   : > { %v4269_v44 = vadd.f32 %v8932_v15, %v4268_v41  ;;  %v8460_v45 = vpop.f32.mrb[49].mxu0  ;;  %v7556_v42 = vld [vmem:[%s10437_s10] ss:$0 sm:$0xff] }
 0xb91   : > { %v4503_v47 = vsel %vm951_vm2, %v4345_v37, -inf }
 0xb92   : > { %4504 = vmax.xlane.f32.xlu1 %v4503_v47  ;;  %v4496_v48 = vpop.f32.mrb[54].mxu1  ;;  %v4500_v4 = vsel %vm951_vm2, %v4269_v44, -inf }
 0xb93   : > { %v8475_v5 = vpop.f32.mrb[55].mxu1  ;;  %4501 = vmax.xlane.f32.xlu0 %v4500_v4  ;;  %v4420_v6 = vpop.f32.mrb[50].mxu0  ;;  %v4497_v10 = vadd.f32 %v8932_v15, %v4496_v48 }
 0xb94   : > { %v4421_v54 = vadd.f32 %v8932_v15, %v4420_v6  ;;  %v8470_v9 = vpop.f32.mrb[51].mxu0 }
 0xb95   : > { %v4509_v13 = vsel %vm951_vm2, %v4497_v10, -inf }
 0xb96   : > { %v4506_v11 = vsel %vm951_vm2, %v4421_v54, -inf }
 0xb97   : > { %4507 = vmax.xlane.f32.xlu0 %v4506_v11 }
 0xb9b   : > { %4510 = vmax.xlane.f32.xlu0 %v4509_v13 }
 0xc1f   : > { %v4505_v19 = vpop.xlane.xlu1 %4504 }
 0xc20   : > { %v4513_v20 = vsub.f32 %v4345_v37, %v4505_v19  ;;  %v4502_v55 = vpop.xlane.xlu0 %4501 }
 0xc21   : > { %v4512_v49 = vsub.f32 %v4269_v44, %v4502_v55 }
 0xc22   : > { %v4518_v2 = vmul.f32 1.442695, %v4513_v20 }
 0xc23   : > { %v4516_v53 = vmul.f32 1.442695, %v4512_v49 }
 0xc24   : > { %8892 = vpow2.f32 %v4518_v2  ;;  %v4508_v56 = vpop.xlane.xlu0 %4507 }
 0xc25   : > { %8894 = vpow2.f32 %v4516_v53  ;;  %v4514_v52 = vsub.f32 %v4421_v54, %v4508_v56 }
 0xc27   : > { %v4520_v57 = vmul.f32 1.442695, %v4514_v52 }
 0xc28   : > { %v4511_v1 = vpop.xlane.xlu0 %4510 }
 0xc29   : > { %8896 = vpow2.f32 %v4520_v57  ;;  %v4515_v46 = vsub.f32 %v4497_v10, %v4511_v1 }
 0xc2b   : > { %v4522_v39 = vmul.f32 1.442695, %v4515_v46 }
 0xc2d   : > { %8898 = vpow2.f32 %v4522_v39 }
 0xc2e   : > { %v8893_v0 = vpop.eup %8892 }
 0xc2f   : > { %v8895_v17 = vpop.eup %8894  ;;  %v4527_v58 = vsel %vm951_vm2, %v8893_v0, 0.0 }
 0xc30   : > { %4528 = vadd.xlane.f32.xlu1 %v4527_v58  ;;  %v4524_v43 = vsel %vm951_vm2, %v8895_v17, 0.0 }
 0xc31   : > { %4525 = vadd.xlane.f32.xlu0 %v4524_v43 }
 0xc33   : > { %v8897_v59 = vpop.eup %8896 }
 0xc34   : > { %v4530_v40 = vsel %vm951_vm2, %v8897_v59, 0.0 }
 0xc35   : > { %4531 = vadd.xlane.f32.xlu0 %v4530_v40 }
 0xc37   : > { %v8899_v29 = vpop.eup %8898 }
 0xc38   : > { %v4533_v23 = vsel %vm951_vm2, %v8899_v29, 0.0 }
 0xc39   : > { %4534 = vadd.xlane.f32.xlu1 %v4533_v23 }
 0xc4b   : > { %4108 = vrot.lane.b32.xlu0 %v7535_v24, %s8945_s1  ;;  %v5030_v24 = vld [vmem:[%s10440_s13] sm:$0xff] }
 0xcbd   : > { %v4529_v25 = vpop.xlane.xlu1 %4528 }
 0xcbe   : > { %8900 = vrcp.f32 %v4529_v25  ;;  %v4526_v27 = vpop.xlane.xlu0 %4525  ;;  %v5032_v25 = vld [vmem:[%s10440_s13 + $0x40] sm:$0xff] }
 0xcbf   : > { %8902 = vrcp.f32 %v4526_v27  ;;  %v5031_v27 = vld [vmem:[%s10440_s13 + $0x8] sm:$0xff] }
 0xcc2   : > { %v4532_v26 = vpop.xlane.xlu0 %4531 }
 0xcc3   : > { %8904 = vrcp.f32 %v4532_v26  ;;  %v7560_v26 = vcombine.high %v5030_v24, %v5032_v25 }
 0xcc6   : > { %v4535_v12 = vpop.xlane.xlu1 %4534  ;;  %v4109_v62 = vpop.permute.xlu0 %4108 }
 0xcc7   : > { %8906 = vrcp.f32 %v4535_v12  ;;  %v4178_v3 = vadd.f32 %v9637_v32, %v4109_v62  ;;  %v4183_v50 = vadd.f32 %v9633_v30, %v4109_v62  ;;  %v4193_v8 = vadd.f32 %v9646_v34, %v4109_v62  ;;  %v5033_v12 = vld [vmem:[%s10440_s13 + $0x48] sm:$0xff] }
 0xcc8   : > { %v8901_v63 = vpop.eup %8900  ;;  %v4188_v61 = vadd.f32 %v9650_v35, %v4109_v62  ;;  %v7559_v62 = vcombine.low %v5030_v24, %v5032_v25  ;;  %v8717_v24 = vld [vmem:[%s10442_s15 + $0x1c0] sm:$0xff]  }
 0xcc9   : > { %v8903_v14 = vpop.eup %8902  ;;  %v4541_v60 = vmul.f32 %v8901_v63, %v8893_v0  ;;  %8477 = vmatpush3.msra.mxu0 %v4178_v3  ;;  %8482 = vmatpush3.msra.mxu1 %v4183_v50  ;;  %v7561_v3 = vcombine.low %v5031_v27, %v5033_v12  ;;  %v7562_v50 = vcombine.high %v5031_v27, %v5033_v12  ;;  %v5034_v63 = vld [vmem:[%s10440_s13 + $0x80] sm:$0xff] }
 0xcca   : > { %v4540_v7 = vmul.f32 %v8903_v14, %v8895_v17  ;;  %8491 = vmatprep.subr.mxu1 %v8941_v22  ;;  %8486 = vmatprep.subr.mxu0 %v8941_v22  ;;  %v5036_v14 = vld [vmem:[%s10440_s13 + $0xc0] sm:$0xff] }
 0xccb   : > { %8484 = vmatmul.mubr.msk.f32.vlgmr.msra.gmra.mrb[56].mxu1 %vm951_vm2, %v4541_v60  ;;  %v5035_v60 = vld [vmem:[%s10440_s13 + $0x88] sm:$0xff]  ;;  %v8719_v12 = vld [vmem:[%s10442_s15 + $0x180] sm:$0xff]  }
 0xccc   : > { %8492 = vmatpush3.msra.mxu1 %v4193_v8  ;;  %8479 = vmatmul.mubr.msk.f32.vlgmr.msra.gmra.mrb[52].mxu0 %vm951_vm2, %v4540_v7  ;;  %v7564_v7 = vcombine.high %v5034_v63, %v5036_v14  ;;  %v5037_v8 = vld [vmem:[%s10440_s13 + $0xc8] sm:$0xff] }
 0xccd   : > { %v8905_v21 = vpop.eup %8904  ;;  %8487 = vmatpush3.msra.mxu0 %v4188_v61  ;;  %8488 = vmatprep.mubr.msk.f32.mxu0 %vm8942_vm1, %v8941_v22  ;;  %v7563_v61 = vcombine.low %v5034_v63, %v5036_v14  ;;  %v8723_v63 = vld [vmem:[%s10442_s15 + $0x188] sm:$0xff]   ;;  %v8724_v14 = vld [vmem:[%s10442_s15 + $0x150] sm:$0xff]  }
 0xcce   : > { %v4542_v28 = vmul.f32 %v8905_v21, %v8897_v59  ;;  %8493 = vmatprep.mubr.msk.f32.mxu1 %vm8942_vm1, %v8941_v22  ;;  %8496 = vmatprep.subr.mxu0 %v4836_v51  ;;  %v7565_v21 = vcombine.low %v5035_v60, %v5037_v8 }
 0xccf   : > { %5106 = vmatprep.subr.bf16.mxu1 %v7560_v26  ;;  %v8718_v26 = vld [vmem:[%s10442_s15 + $0x100] sm:$0xff]  }
 0xcd0   : > { %8489 = vmatmul.mubr.msk.f32.vlgmr.msra.gmra.mrb[54].mxu0 %vm951_vm2, %v4542_v28  ;;  %v7566_v28 = vcombine.high %v5035_v60, %v5037_v8  ;;  %v8725_v60 = vld [vmem:[%s10442_s15 + $0x1d0] sm:$0xff]  }
 0xcd1   : > { %v8907_v30 = vpop.eup %8906  ;;  %8497 = vmatpush3.msra.mxu0 %v4836_v51  ;;  %v5302_v51 = vld [vmem:[%s10440_s13 + $0x50] sm:$0xff] }
 0xcd2   : > { %v4543_v32 = vmul.f32 %v8907_v30, %v8899_v29  ;;  %5159 = vmatprep.subr.bf16.mxu0 %v7562_v50  ;;  %v8946_v30 = vmov 0   ;;  %v8722_v50 = vld [vmem:[%s10442_s15 + $0x108] sm:$0xff]   ;;  %v8727_v8 = vld [vmem:[%s10442_s15 + $0x190] sm:$0xff]  }
 0xcd4   : > { %8494 = vmatmul.mubr.msk.f32.vlgmr.msra.gmra.mrb[58].mxu1 %vm951_vm2, %v4543_v32  ;;  %v5300_v32 = vld [vmem:[%s10440_s13 + $0x10] sm:$0xff] }
 0xcd5   : > { %5107 = vmatpush1.bf16.msra.mxu1 %v7559_v62  ;;  %5138 = vmatprep.mubr.bf16.mxu1 %v8946_v30  ;;  %v8720_v62 = vld [vmem:[%s10442_s15 + $0x148] sm:$0xff]  }
 0xcd6   : > { %5108 = vmatprep.subr.bf16.mxu1 %v7564_v7  ;;  %v8726_v7 = vld [vmem:[%s10442_s15 + $0x110] sm:$0xff]  }
 0xcd9   : > { %5109 = vmatpush1.bf16.msra.mxu1 %v7563_v61  ;;  %v8728_v61 = vld [vmem:[%s10442_s15 + $0x158] sm:$0xff]  }
 0xd9e   : > { %v4686_v33 = vpop.f32.mrb[56].mxu1 }
 0xd9f   : > { %v4613_v34 = vpop.f32.mrb[52].mxu0  ;;  %v8485_v35 = vpop.f32.mrb[57].mxu1 }
 0xda0   : > { %v8480_v36 = vpop.f32.mrb[53].mxu0  ;;  %8498 = vmatprep.mubr.msk.f32.mxu0 %vm951_vm2, %v4613_v34  ;;  %v7571_v34 = vcombine.low %v5300_v32, %v5302_v51  ;;  %v7572_v35 = vcombine.high %v5300_v32, %v5302_v51  ;;  %v8731_v32 = vld [vmem:[%s10442_s15 + $0x198] sm:$0xff]   ;;  %v8732_v51 = vld [vmem:[%s10442_s15 + $0x160] sm:$0xff]  }
 0xda1   : > { %8499 = vmatmul.mubr.msk.f32.vlgmr.msra.gmra.mrb[28].mxu0 %vm951_vm2, %v4686_v33  ;;  %v5301_v33 = vld [vmem:[%s10440_s13 + $0x18] sm:$0xff] }
 0xda2   : > { %5160 = vmatpush1.bf16.msra.mxu0 %v7561_v3  ;;  %v5303_v36 = vld [vmem:[%s10440_s13 + $0x58] sm:$0xff]  ;;  %5370 = vmatprep.subr.bf16.mxu1 %v7572_v35  ;;  %v8721_v3 = vld [vmem:[%s10442_s15 + $0x1c8] sm:$0xff]   ;;  %v8735_v35 = vld [vmem:[%s10442_s15 + $0x1a0] sm:$0xff]  }
 0xda3   : > { %v4759_v22 = vpop.f32.mrb[54].mxu0  ;;  %5161 = vmatprep.subr.bf16.mxu0 %v7566_v28  ;;  %v8730_v28 = vld [vmem:[%s10442_s15 + $0x118] sm:$0xff]  }
 0xda4   : > { %v8490_v15 = vpop.f32.mrb[55].mxu0  ;;  %8501 = vmatprep.mubr.msk.f32.mxu0 %vm951_vm2, %v4759_v22  ;;  %v7573_v22 = vcombine.low %v5301_v33, %v5303_v36 }
 0xda5   : > { %v7574_v15 = vcombine.high %v5301_v33, %v5303_v36  ;;  %v8733_v33 = vld [vmem:[%s10442_s15 + $0x1e0] sm:$0xff]   ;;  %v8736_v36 = vld [vmem:[%s10442_s15 + $0x168] sm:$0xff]  }
 0xda6   : > { %5162 = vmatpush1.bf16.msra.mxu0 %v7565_v21  ;;  %v8729_v21 = vld [vmem:[%s10442_s15 + $0x1d8] sm:$0xff]  }
 0xda7   : > { %v4832_v37 = vpop.f32.mrb[58].mxu1  ;;  %5423 = vmatprep.subr.bf16.mxu0 %v7574_v15  ;;  %v8738_v15 = vld [vmem:[%s10442_s15 + $0x128] sm:$0xff]  }
 0xda8   : > { %v8495_v41 = vpop.f32.mrb[59].mxu1  ;;  %8502 = vmatmul.mubr.msk.f32.gmra.mrb[30].mxu0 %vm951_vm2, %v4832_v37 }
 0xda9   : > { %5191 = vmatprep.mubr.bf16.mxu0 %v8946_v30 }
 0xe74   : > { %v8500_v44 = vpop.f32.mrb[28].mxu0 }
 0xe75   : > { %v4946_v45 = vadd.f32 %v8500_v44, %v7556_v42  ;;  %v4915_v47 = vpop.f32.mrb[29].mxu0 }
 0xe76   : > { %v4945_v48 = vadd.f32 %v7556_v42, %v4915_v47 }
 0xe77   : > { %v4950_v4 = vadd.f32 %v9431_v38, %v4946_v45 }
 0xe78   : > { %v4949_v6 = vadd.f32 %v9425_v31, %v4945_v48 }
 0xe79   : > { %v4958_v5 = vsel %vm649_vm0, %v4950_v4, 0.0 }
 0xe7a   : > { %4959 = vadd.xlane.f32.xlu1 %v4958_v5  ;;  %v4955_v13 = vsel %vm649_vm0, %v4949_v6, 0.0 }
 0xe7b   : > { %v8503_v54 = vpop.f32.mrb[30].mxu0 }
 0xe7c   : > { %v4925_v9 = vpop.f32.mrb[31].mxu0  ;;  %v4948_v10 = vadd.f32 %v8503_v54, %v7556_v42 }
 0xe7d   : > { %v4947_v11 = vadd.f32 %v7556_v42, %v4925_v9 }
 0xe7e   : > { %4956 = vadd.xlane.f32.xlu1 %v4955_v13  ;;  %v4952_v55 = vadd.f32 %v9441_v18, %v4948_v10  ;;  %v7557_v13 = vld [vmem:[%s10438_s11] ss:$0 sm:$0xff] }
 0xe7f   : > { %v4951_v19 = vadd.f32 %v9436_v16, %v4947_v11 }
 0xe80   : > { %v4964_v38 = vsel %vm649_vm0, %v4952_v55, 0.0 }
 0xe81   : > { %v4961_v20 = vsel %vm649_vm0, %v4951_v19, 0.0 }
 0xe82   : > { %4962 = vadd.xlane.f32.xlu1 %v4961_v20 }
 0xe86   : > { %4965 = vadd.xlane.f32.xlu1 %v4964_v38 }
 0xf07   : > { %v4960_v49 = vpop.xlane.xlu1 %4959 }
 0xf08   : > { %v4969_v31 = vmul.f32 0.03125, %v4960_v49  ;;  %v7558_v49 = vld [vmem:[%s10439_s12] ss:$0 sm:$0xff] }
 0xf0a   : > { %v9703_v56 = vsub.f32 %v4950_v4, %v4969_v31 }
 0xf0b   : > { %v4957_v2 = vpop.xlane.xlu1 %4956 }
 0xf0c   : > { %v4968_v53 = vmul.f32 0.03125, %v4957_v2  ;;  %v4977_v39 = vmul.f32 %v9703_v56, %v9703_v56 }
 0xf0e   : > { %v9705_v52 = vsub.f32 %v4949_v6, %v4968_v53  ;;  %v4983_v59 = vsel %vm649_vm0, %v4977_v39, 0.0  ;;  %v5307_v39 = vld [vmem:[%s10440_s13 + $0xd8] sm:$0xff] }
 0xf0f   : > { %v4963_v57 = vpop.xlane.xlu1 %4962 }
 0xf10   : > { %v4970_v1 = vmul.f32 0.03125, %v4963_v57  ;;  %v4976_v16 = vmul.f32 %v9705_v52, %v9705_v52 }
 0xf12   : > { %v9709_v46 = vsub.f32 %v4951_v19, %v4970_v1  ;;  %v4980_v18 = vsel %vm649_vm0, %v4976_v16, 0.0 }
 0xf13   : > { %4981 = vadd.xlane.f32.xlu1 %v4980_v18  ;;  %v4966_v0 = vpop.xlane.xlu1 %4965  ;;  %v5305_v18 = vld [vmem:[%s10440_s13 + $0x98] sm:$0xff] }
 0xf14   : > { %v4971_v17 = vmul.f32 0.03125, %v4966_v0  ;;  %v4978_v58 = vmul.f32 %v9709_v46, %v9709_v46 }
 0xf16   : > { %v9716_v43 = vsub.f32 %v4952_v55, %v4971_v17  ;;  %v4986_v40 = vsel %vm649_vm0, %v4978_v58, 0.0  ;;  %v7578_v58 = vcombine.high %v5305_v18, %v5307_v39 }
 0xf17   : > { %4984 = vadd.xlane.f32.xlu1 %v4983_v59  ;;  %4987 = vadd.xlane.f32.xlu0 %v4986_v40  ;;  %v7577_v40 = vcombine.low %v5305_v18, %v5307_v39 }
 0xf18   : > { %v4979_v29 = vmul.f32 %v9716_v43, %v9716_v43 }
 0xf1a   : > { %v4989_v23 = vsel %vm649_vm0, %v4979_v29, 0.0 }
 0xf1b   : > { %4990 = vadd.xlane.f32.xlu1 %v4989_v23  ;;  %v8716_v23 = vld [vmem:[%s10442_s15 + $0x140] sm:$0xff]  }
 0xfa0   : > { %v4982_v37 = vpop.xlane.xlu1 %4981 }
 0xfa1   : > { %v4992_v41 = vmul.f32 0.03125, %v4982_v37  ;;  %v8739_v37 = vld [vmem:[%s10442_s15 + $0x1a8] sm:$0xff]  }
 0xfa3   : > { %v4996_v42 = vadd.f32 1e-05, %v4992_v41  ;;  %v8740_v41 = vld [vmem:[%s10442_s15 + $0x170] sm:$0xff]  }
 0xfa4   : > { %v4988_v44 = vpop.xlane.xlu0 %4987  ;;  %v4985_v45 = vpop.xlane.xlu1 %4984 }
 0xfa5   : > { %8908 = vrsqrt.f32 %v4996_v42  ;;  %v4994_v47 = vmul.f32 0.03125, %v4988_v44  ;;  %v4993_v48 = vmul.f32 0.03125, %v4985_v45  ;;  %v8741_v42 = vld [vmem:[%s10442_s15 + $0x1f0] sm:$0xff]  }
 0xfa6   : > { %v8742_v44 = vld [vmem:[%s10442_s15 + $0x130] sm:$0xff]  }
 0xfa7   : > { %v4997_v4 = vadd.f32 1e-05, %v4993_v48  ;;  %v4998_v5 = vadd.f32 1e-05, %v4994_v47  ;;  %v8743_v45 = vld [vmem:[%s10442_s15 + $0x1b0] sm:$0xff]   ;;  %v8744_v47 = vld [vmem:[%s10442_s15 + $0x178] sm:$0xff]  }
 0xfa8   : > { %v4991_v6 = vpop.xlane.xlu1 %4990  ;;  %v8745_v48 = vld [vmem:[%s10442_s15 + $0x1f8] sm:$0xff]  }
 0xfa9   : > { %v4995_v54 = vmul.f32 0.03125, %v4991_v6  ;;  %8910 = vrsqrt.f32 %v4997_v4  ;;  %v8746_v4 = vld [vmem:[%s10442_s15 + $0x138] sm:$0xff]   ;;  %v8748_v6 = vld [vmem:[%s10442_s15 + $0x40] sm:$0xff]  }
 0xfaa   : > { %8912 = vrsqrt.f32 %v4998_v5  ;;  %v8747_v5 = vld [vmem:[%s10442_s15 + $0x1b8] sm:$0xff]  }
 0xfab   : > { %v4999_v9 = vadd.f32 1e-05, %v4995_v54  ;;  %v8749_v54 = vld [vmem:[%s10442_s15 + $0xc0] sm:$0xff]  }
 0xfad   : > { %8914 = vrsqrt.f32 %v4999_v9  ;;  %v5040_v9 = vlaneseq }
 0xfaf   : > { %v8909_v10 = vpop.eup %8908 }
 0xfb0   : > { %v5004_v11 = vmul.f32 %v8909_v10, %v9705_v52  ;;  %v5304_v52 = vld [vmem:[%s10440_s13 + $0x90] sm:$0xff]  ;;  %v5041_v10 = vshrl.u32 %v5040_v9, 7 }
 0xfb2   : > { %v5014_v20 = vmul.f32 %v7557_v13, %v5004_v11  ;;  %v9923_v11 = vsub.s32 0, %v5041_v10 }
 0xfb3   : > { %v8911_v19 = vpop.eup %8910 }
 0xfb4   : > { %v5005_v55 = vmul.f32 %v8911_v19, %v9703_v56  ;;  %v8913_v38 = vpop.eup %8912  ;;  %v9773_v57 = vadd.f32 %v7558_v49, %v5014_v20  ;;  %v5306_v56 = vld [vmem:[%s10440_s13 + $0xd0] sm:$0xff]  ;;  %v5038_v19 = vld [vmem:[%s10441_s14] sm:$0xf]  ;;  %v9930_v20 = vsub.s32 1, %v5041_v10 }
 0xfb5   : > { %v5006_v1 = vmul.f32 %v8913_v38, %v9709_v46  ;;  %v7576_v46 = vcombine.high %v5304_v52, %v5306_v56  ;;  %v7575_v59 = vcombine.low %v5304_v52, %v5306_v56  ;;  %v5043_v38 = vrot.slane %v5038_v19, %v9923_v11 }
 0xfb6   : > { %v5015_v2 = vmul.f32 %v7557_v13, %v5005_v55  ;;  %v9932_v55 = vsub.s32 3, %v5041_v10 }
 0xfb7   : > { %v8915_v31 = vpop.eup %8914 }
 0xfb8   : > { %v5007_v53 = vmul.f32 %v8915_v31, %v9716_v43  ;;  %v9776_v16 = vadd.f32 %v7558_v49, %v5015_v2  ;;  %v5016_v43 = vmul.f32 %v7557_v13, %v5006_v1  ;;  %v5047_v31 = vrot.slane %v5038_v19, %v9930_v20 }
 0xfb9   : > { %v5055_v2 = vrot.slane %v5038_v19, %v9932_v55 }
 0xfba   : > { %v9789_v0 = vpack.c.bf16 %v9776_v16, %v9773_v57  ;;  %v5017_v17 = vmul.f32 %v7557_v13, %v5007_v53  ;;  %v9805_v25 = vadd.f32 %v7558_v49, %v5016_v43  ;;  %v9925_v13 = vsub.s32 2, %v5041_v10 }
 0xfbc   : > { %7567 = vmatmul.mubr.msk.bf16.vlgmr.msra.gmra.mrb[60].mxu1 %vm649_vm0, %v9789_v0  ;;  %7569 = vmatmul.mubr.msk.bf16.vlgmr.msra.gmra.mrb[56].mxu0 %vm649_vm0, %v9789_v0  ;;  %v9795_v29 = vadd.f32 %v7558_v49, %v5017_v17  ;;  %v5051_v49 = vrot.slane %v5038_v19, %v9925_v13 }
 0xfbd   : > { %5371 = vmatpush1.bf16.msra.mxu1 %v7571_v34  ;;  %5424 = vmatpush1.bf16.msra.mxu0 %v7573_v22  ;;  %v8734_v34 = vld [vmem:[%s10442_s15 + $0x120] sm:$0xff]   ;;  %v8737_v22 = vld [vmem:[%s10442_s15 + $0x1e8] sm:$0xff]  }
 0xfbe   : > { %5148 = vmatprep.mubr.bf16.mxu1 %v8946_v30  ;;  %5201 = vmatprep.mubr.bf16.mxu0 %v8946_v30  ;;  %v9809_v27 = vpack.c.bf16 %v9795_v29, %v9805_v25 }
 0xfbf   : > { %5372 = vmatprep.subr.bf16.mxu1 %v7576_v46  ;;  %5425 = vmatprep.subr.bf16.mxu0 %v7578_v58 }
 0xfc1   : > { %5373 = vmatpush1.bf16.msra.mxu1 %v7575_v59  ;;  %5426 = vmatpush1.bf16.msra.mxu0 %v7577_v40 }
 0xfc2   : > { %7920 = vmatprep.subr.bf16.mxu1 %v8716_v23  ;;  %7948 = vmatprep.subr.bf16.mxu0 %v8717_v24 }
 0xfc4   : > { %7568 = vmatmul.mubr.msk.bf16.gmra.mrb[64].mxu1 %vm649_vm0, %v9809_v27  ;;  %7570 = vmatmul.mubr.msk.bf16.gmra.mrb[60].mxu0 %vm649_vm0, %v9809_v27 }
 0xfc5   : > { %5402 = vmatprep.mubr.bf16.mxu1 %v8946_v30  ;;  %5455 = vmatprep.mubr.bf16.mxu0 %v8946_v30 }
 0xfcc   : > { %7579 = vmatmul.mubr.msk.bf16.vlgmr.msra.gmra.mrb[68].mxu1 %vm649_vm0, %v9789_v0  ;;  %7581 = vmatmul.mubr.msk.bf16.vlgmr.msra.gmra.mrb[64].mxu0 %vm649_vm0, %v9789_v0 }
 0xfcd   : > { %5412 = vmatprep.mubr.bf16.mxu1 %v8946_v30  ;;  %5465 = vmatprep.mubr.bf16.mxu0 %v8946_v30 }
 0xfce   : > { %7921 = vmatpush3.bf16.msra.mxu1 %v8718_v26  ;;  %7949 = vmatpush3.bf16.msra.mxu0 %v8719_v12 }
 0xfcf   : > { %7922 = vmatprep.subr.bf16.mxu1 %v8720_v62  ;;  %7950 = vmatprep.subr.bf16.mxu0 %v8721_v3 }
 0xfd2   : > { %7923 = vmatpush3.bf16.msra.mxu1 %v8722_v50  ;;  %7951 = vmatpush3.bf16.msra.mxu0 %v8723_v63 }
 0xfd3   : > { %7924 = vmatprep.subr.bf16.mxu1 %v8724_v14  ;;  %7952 = vmatprep.subr.bf16.mxu0 %v8725_v60 }
 0xfd4   : > { %7580 = vmatmul.mubr.msk.bf16.gmra.mrb[72].mxu1 %vm649_vm0, %v9809_v27  ;;  %7582 = vmatmul.mubr.msk.bf16.gmra.mrb[68].mxu0 %vm649_vm0, %v9809_v27 }
 0xfd6   : > { %7925 = vmatpush3.bf16.msra.mxu1 %v8726_v7  ;;  %7953 = vmatpush3.bf16.msra.mxu0 %v8727_v8 }
 0xfd7   : > { %7926 = vmatprep.subr.bf16.mxu1 %v8728_v61  ;;  %7954 = vmatprep.subr.bf16.mxu0 %v8729_v21 }
 0xfda   : > { %7927 = vmatpush3.bf16.msra.mxu1 %v8730_v28  ;;  %7955 = vmatpush3.bf16.msra.mxu0 %v8731_v32 }
 0xfdb   : > { %7928 = vmatprep.subr.bf16.mxu1 %v8732_v51  ;;  %7956 = vmatprep.subr.bf16.mxu0 %v8733_v33 }
 0xfde   : > { %7929 = vmatpush3.bf16.msra.mxu1 %v8734_v34  ;;  %7957 = vmatpush3.bf16.msra.mxu0 %v8735_v35  ;;  %v5308_v34 = vld [vmem:[%s10441_s14 + $0x4] sm:$0xf] }
 0xfdf   : > { %7930 = vmatprep.subr.bf16.mxu1 %v8736_v36  ;;  %7958 = vmatprep.subr.bf16.mxu0 %v8737_v22  ;;  %v9952_v10 = vrot.slane %v5308_v34, %v9930_v20  ;;  %v9955_v19 = vrot.slane %v5308_v34, %v9932_v55 }
 0xfe2   : > { %7931 = vmatpush3.bf16.msra.mxu1 %v8738_v15  ;;  %7959 = vmatpush3.bf16.msra.mxu0 %v8739_v37 }
 0xfe3   : > { %7932 = vmatprep.subr.bf16.mxu1 %v8740_v41  ;;  %7960 = vmatprep.subr.bf16.mxu0 %v8741_v42 }
 0xfe6   : > { %7933 = vmatpush3.bf16.msra.mxu1 %v8742_v44  ;;  %7961 = vmatpush3.bf16.msra.mxu0 %v8743_v45 }
 0xfe7   : > { %7934 = vmatprep.subr.bf16.mxu1 %v8744_v47  ;;  %7962 = vmatprep.subr.bf16.mxu0 %v8745_v48 }
 0xfea   : > { %7935 = vmatpush3.bf16.msra.mxu1 %v8746_v4  ;;  %7963 = vmatpush3.bf16.msra.mxu0 %v8747_v5  ;;  %v5313_v5 = vrot.slane %v5308_v34, %v9923_v11 }
 0xfeb   : > { %7976 = vmatprep.subr.bf16.mxu1 %v8748_v6  ;;  %8004 = vmatprep.subr.bf16.mxu0 %v8749_v54  ;;  %v5321_v6 = vrot.slane %v5308_v34, %v9925_v13 }
0x108f   : > { %v5140_v53 = vpop.f32.mrb[60].mxu1  ;;  %v5193_v52 = vpop.f32.mrb[56].mxu0 }
0x1090   : > { %v5141_v1 = vadd.f32 %v5140_v53, %v5043_v38  ;;  %v5194_v56 = vadd.f32 %v5193_v52, %v5051_v49  ;;  %v5142_v18 = vpop.f32.mrb[61].mxu1  ;;  %v5195_v39 = vpop.f32.mrb[57].mxu0 }
0x1091   : > { %v5143_v17 = vadd.f32 %v5142_v18, %v5047_v31  ;;  %v5196_v46 = vadd.f32 %v5195_v39, %v5055_v2  ;;  %v5144_v58 = vpop.f32.mrb[62].mxu1  ;;  %v5197_v43 = vpop.f32.mrb[58].mxu0 }
0x1092   : > { %v5145_v59 = vadd.f32 %v5144_v58, %v5043_v38  ;;  %v5198_v40 = vadd.f32 %v5197_v43, %v5051_v49  ;;  %v5146_v23 = vpop.f32.mrb[63].mxu1  ;;  %v5199_v24 = vpop.f32.mrb[59].mxu0  ;;  %v5212_v62 = vmax.f32 %v5141_v1, 0.0  ;;  %v5214_v3 = vmax.f32 %v5194_v56, 0.0 }
0x1093   : > { %v5147_v26 = vadd.f32 %v5146_v23, %v5047_v31  ;;  %v5200_v12 = vadd.f32 %v5199_v24, %v5055_v2  ;;  %v5213_v14 = vmax.f32 %v5143_v17, 0.0  ;;  %v5215_v60 = vmax.f32 %v5196_v46, 0.0 }
0x1094   : > { %v5216_v50 = vmax.f32 %v5145_v59, 0.0  ;;  %v5218_v63 = vmax.f32 %v5198_v40, 0.0 }
0x1095   : > { %v5217_v7 = vmax.f32 %v5147_v26, 0.0  ;;  %v5219_v8 = vmax.f32 %v5200_v12, 0.0 }
0x1096   : > { %v9938_v61 = vpack.c.bf16 %v5216_v50, %v5212_v62  ;;  %v9940_v21 = vpack.c.bf16 %v5218_v63, %v5214_v3 }
0x1097   : > { %v9942_v28 = vpack.c.bf16 %v5217_v7, %v5213_v14  ;;  %v9944_v32 = vpack.c.bf16 %v5219_v8, %v5215_v60  ;;  %v5150_v51 = vpop.f32.mrb[64].mxu1  ;;  %v5203_v33 = vpop.f32.mrb[60].mxu0 }
0x1098   : > { %v5151_v35 = vadd.f32 %v5150_v51, %v5043_v38  ;;  %v5204_v36 = vadd.f32 %v5203_v33, %v5051_v49  ;;  %v5152_v22 = vpop.f32.mrb[65].mxu1  ;;  %v5205_v15 = vpop.f32.mrb[61].mxu0 }
0x1099   : > { %v5153_v37 = vadd.f32 %v5152_v22, %v5047_v31  ;;  %v5206_v41 = vadd.f32 %v5205_v15, %v5055_v2  ;;  %v5154_v42 = vpop.f32.mrb[66].mxu1  ;;  %v5207_v44 = vpop.f32.mrb[62].mxu0 }
0x109a   : > { %v5155_v45 = vadd.f32 %v5154_v42, %v5043_v38  ;;  %v5208_v47 = vadd.f32 %v5207_v44, %v5051_v49  ;;  %v5156_v48 = vpop.f32.mrb[67].mxu1  ;;  %v5209_v4 = vpop.f32.mrb[63].mxu0  ;;  %v5220_v53 = vmax.f32 %v5151_v35, 0.0  ;;  %v5222_v52 = vmax.f32 %v5204_v36, 0.0 }
0x109b   : > { %v5157_v54 = vadd.f32 %v5156_v48, %v5047_v31  ;;  %v5210_v9 = vadd.f32 %v5209_v4, %v5055_v2  ;;  %v5221_v38 = vmax.f32 %v5153_v37, 0.0  ;;  %v5223_v49 = vmax.f32 %v5206_v41, 0.0  ;;  %v8750_v4 = vld [vmem:[%s10442_s15] sm:$0xff]  }
0x109c   : > { %v5224_v1 = vmax.f32 %v5155_v45, 0.0  ;;  %v5226_v56 = vmax.f32 %v5208_v47, 0.0 }
0x109d   : > { %v5225_v18 = vmax.f32 %v5157_v54, 0.0  ;;  %v5227_v39 = vmax.f32 %v5210_v9, 0.0  ;;  %v8751_v54 = vld [vmem:[%s10442_s15 + $0x80] sm:$0xff]  }
0x109e   : > { %v9957_v17 = vpack.c.bf16 %v5224_v1, %v5220_v53  ;;  %v9959_v46 = vpack.c.bf16 %v5226_v56, %v5222_v52  ;;  %v8752_v56 = vld [vmem:[%s10442_s15 + $0x48] sm:$0xff]  }
0x109f   : > { %v9961_v31 = vpack.c.bf16 %v5225_v18, %v5221_v38  ;;  %v9963_v2 = vpack.c.bf16 %v5227_v39, %v5223_v49  ;;  %v5404_v58 = vpop.f32.mrb[68].mxu1  ;;  %v5457_v43 = vpop.f32.mrb[64].mxu0  ;;  %v8753_v38 = vld [vmem:[%s10442_s15 + $0xc8] sm:$0xff]  }
0x10a0   : > { %v5405_v59 = vadd.f32 %v5404_v58, %v5313_v5  ;;  %v5458_v40 = vadd.f32 %v5457_v43, %v5321_v6  ;;  %v5406_v23 = vpop.f32.mrb[69].mxu1  ;;  %v5459_v24 = vpop.f32.mrb[65].mxu0 }
0x10a1   : > { %v5407_v26 = vadd.f32 %v5406_v23, %v9952_v10  ;;  %v5460_v12 = vadd.f32 %v5459_v24, %v9955_v19  ;;  %v5408_v62 = vpop.f32.mrb[70].mxu1  ;;  %v5461_v3 = vpop.f32.mrb[66].mxu0 }
0x10a2   : > { %v5409_v50 = vadd.f32 %v5408_v62, %v5313_v5  ;;  %v5462_v63 = vadd.f32 %v5461_v3, %v5321_v6  ;;  %v5410_v14 = vpop.f32.mrb[71].mxu1  ;;  %v5463_v60 = vpop.f32.mrb[67].mxu0  ;;  %v5476_v51 = vmax.f32 %v5405_v59, 0.0  ;;  %v5478_v33 = vmax.f32 %v5458_v40, 0.0  ;;  %v8755_v62 = vld [vmem:[%s10442_s15 + $0x88] sm:$0xff]  }
0x10a3   : > { %v5411_v7 = vadd.f32 %v5410_v14, %v9952_v10  ;;  %v5464_v8 = vadd.f32 %v5463_v60, %v9955_v19  ;;  %v5477_v36 = vmax.f32 %v5407_v26, 0.0  ;;  %v5479_v22 = vmax.f32 %v5460_v12, 0.0  ;;  %v8754_v12 = vld [vmem:[%s10442_s15 + $0x8] sm:$0xff]  }
0x10a4   : > { %v5480_v34 = vmax.f32 %v5409_v50, 0.0  ;;  %v5482_v35 = vmax.f32 %v5462_v63, 0.0 }
0x10a5   : > { %v5481_v15 = vmax.f32 %v5411_v7, 0.0  ;;  %v5483_v37 = vmax.f32 %v5464_v8, 0.0 }
0x10a6   : > { %v5492_v41 = vpack.c.bf16 %v5480_v34, %v5476_v51  ;;  %v5494_v42 = vpack.c.bf16 %v5482_v35, %v5478_v33  ;;  %v8758_v35 = vld [vmem:[%s10442_s15 + $0x10] sm:$0xff]  }
0x10a7   : > { %v5493_v44 = vpack.c.bf16 %v5481_v15, %v5477_v36  ;;  %v5495_v45 = vpack.c.bf16 %v5483_v37, %v5479_v22  ;;  %v5414_v47 = vpop.f32.mrb[72].mxu1  ;;  %v5467_v48 = vpop.f32.mrb[68].mxu0  ;;  %v8759_v36 = vld [vmem:[%s10442_s15 + $0x90] sm:$0xff]   ;;  %v8760_v22 = vld [vmem:[%s10442_s15 + $0x58] sm:$0xff]  }
0x10a8   : > { %v5415_v9 = vadd.f32 %v5414_v47, %v5313_v5  ;;  %v5468_v53 = vadd.f32 %v5467_v48, %v5321_v6  ;;  %v5416_v52 = vpop.f32.mrb[73].mxu1  ;;  %v5469_v1 = vpop.f32.mrb[69].mxu0  ;;  %v8761_v15 = vld [vmem:[%s10442_s15 + $0xd8] sm:$0xff]   ;;  %v8769_v47 = vld [vmem:[%s10442_s15 + $0xe8] sm:$0xff]  }
0x10a9   : > { %v5417_v49 = vadd.f32 %v5416_v52, %v9952_v10  ;;  %v5470_v18 = vadd.f32 %v5469_v1, %v9955_v19  ;;  %v5418_v39 = vpop.f32.mrb[74].mxu1  ;;  %v5471_v58 = vpop.f32.mrb[70].mxu0  ;;  %5788 = vmatprep.mubr.bf16.mxu1 %v5493_v44  ;;  %5837 = vmatprep.mubr.bf16.mxu0 %v5495_v45  ;;  %v8762_v37 = vld [vmem:[%s10442_s15 + $0x18] sm:$0xff]   ;;  %v8765_v44 = vld [vmem:[%s10442_s15 + $0xe0] sm:$0xff]   ;;  %v8770_v48 = vld [vmem:[%s10442_s15 + $0x28] sm:$0xff]  }
0x10aa   : > { %v5419_v43 = vadd.f32 %v5418_v39, %v5313_v5  ;;  %v5472_v59 = vadd.f32 %v5471_v58, %v5321_v6  ;;  %v5420_v40 = vpop.f32.mrb[75].mxu1  ;;  %v5473_v23 = vpop.f32.mrb[71].mxu0  ;;  %5789 = vmatmul.mubr.bf16.vlgmr.msra.gmra.mrb[76].mxu1 %v5492_v41  ;;  %5838 = vmatmul.mubr.bf16.vlgmr.msra.gmra.mrb[72].mxu0 %v5494_v42  ;;  %v5484_v5 = vmax.f32 %v5415_v9, 0.0  ;;  %v5486_v6 = vmax.f32 %v5468_v53, 0.0  ;;  %v8763_v41 = vld [vmem:[%s10442_s15 + $0x98] sm:$0xff]   ;;  %v8764_v42 = vld [vmem:[%s10442_s15 + $0x60] sm:$0xff]  }
0x10ab   : > { %v5421_v24 = vadd.f32 %v5420_v40, %v9952_v10  ;;  %v5474_v26 = vadd.f32 %v5473_v23, %v9955_v19  ;;  %7977 = vmatpush3.bf16.msra.mxu1 %v8750_v4  ;;  %8005 = vmatpush3.bf16.msra.mxu0 %v8751_v54  ;;  %v8756_v10 = vld [vmem:[%s10442_s15 + $0x50] sm:$0xff]   ;;  %v5485_v63 = vmax.f32 %v5417_v49, 0.0  ;;  %v5487_v14 = vmax.f32 %v5470_v18, 0.0  ;;  %v8766_v45 = vld [vmem:[%s10442_s15 + $0x20] sm:$0xff]   ;;  %v8771_v4 = vld [vmem:[%s10442_s15 + $0xa8] sm:$0xff]  }
0x10ac   : > { %v5488_v3 = vmax.f32 %v5419_v43, 0.0  ;;  %v5490_v50 = vmax.f32 %v5472_v59, 0.0  ;;  %7978 = vmatprep.subr.bf16.mxu1 %v8752_v56  ;;  %8006 = vmatprep.subr.bf16.mxu0 %v8753_v38  ;;  %v8757_v19 = vld [vmem:[%s10442_s15 + $0xd0] sm:$0xff]   ;;  %v8776_v1 = vld [vmem:[%s10442_s15 + $0x78] sm:$0xff]   ;;  %v6144_v38 = vld [vmem:[%s10440_s13 + $0x20] sm:$0xff] }
0x10ad   : > { %v5489_v60 = vmax.f32 %v5421_v24, 0.0  ;;  %v5491_v7 = vmax.f32 %v5474_v26, 0.0  ;;  %v8772_v54 = vld [vmem:[%s10442_s15 + $0x70] sm:$0xff]   ;;  %v8777_v56 = vld [vmem:[%s10442_s15 + $0xf8] sm:$0xff]   ;;  %v6146_v49 = vld [vmem:[%s10440_s13 + $0x60] sm:$0xff] }
0x10ae   : > { %v5496_v8 = vpack.c.bf16 %v5488_v3, %v5484_v5  ;;  %v5498_v51 = vpack.c.bf16 %v5490_v50, %v5486_v6  ;;  %v8773_v9 = vld [vmem:[%s10442_s15 + $0xf0] sm:$0xff]   ;;  %v6145_v18 = vld [vmem:[%s10440_s13 + $0x28] sm:$0xff]  ;;  %v8778_v58 = vld [vmem:[%s10442_s15 + $0x38] sm:$0xff]   ;;  %v7648_v59 = vcombine.high %v6144_v38, %v6146_v49 }
0x10af   : > { %v5497_v33 = vpack.c.bf16 %v5489_v60, %v5485_v63  ;;  %v5499_v34 = vpack.c.bf16 %v5491_v7, %v5487_v14  ;;  %7979 = vmatpush3.bf16.msra.mxu1 %v8754_v12  ;;  %8007 = vmatpush3.bf16.msra.mxu0 %v8755_v62  ;;  %v8774_v53 = vld [vmem:[%s10442_s15 + $0x30] sm:$0xff]   ;;  %v6147_v39 = vld [vmem:[%s10440_s13 + $0x68] sm:$0xff]  ;;  %v8779_v43 = vld [vmem:[%s10442_s15 + $0xb8] sm:$0xff]   ;;  %v7647_v62 = vcombine.low %v6144_v38, %v6146_v49 }
0x10b0   : > { %7980 = vmatprep.subr.bf16.mxu1 %v8756_v10  ;;  %8008 = vmatprep.subr.bf16.mxu0 %v8757_v19  ;;  %v8775_v52 = vld [vmem:[%s10442_s15 + $0xb0] sm:$0xff]   ;;  %v7650_v40 = vcombine.high %v6145_v18, %v6147_v39  ;;  %v6148_v23 = vld [vmem:[%s10440_s13 + $0xa0] sm:$0xff]  ;;  %v6149_v26 = vld [vmem:[%s10440_s13 + $0xa8] sm:$0xff]  ;;  %v7649_v5 = vcombine.low %v6145_v18, %v6147_v39 }
0x10b1   : > { %5796 = vmatprep.mubr.bf16.mxu1 %v5497_v33  ;;  %5845 = vmatprep.mubr.bf16.mxu0 %v5499_v34  ;;  %v6150_v24 = vld [vmem:[%s10440_s13 + $0xe0] sm:$0xff]  ;;  %v6151_v12 = vld [vmem:[%s10440_s13 + $0xe8] sm:$0xff]  ;;  %v8788_v14 = vld [vmem:[%s10442_s15 + $0x250] sm:$0xff]  }
0x10b2   : > { %5797 = vmatmul.mubr.bf16.gmra.mrb[80].mxu1 %v5496_v8  ;;  %5846 = vmatmul.mubr.bf16.gmra.mrb[76].mxu0 %v5498_v51  ;;  %v7652_v6 = vcombine.high %v6148_v23, %v6150_v24  ;;  %v7654_v3 = vcombine.high %v6149_v26, %v6151_v12  ;;  %v7651_v50 = vcombine.low %v6148_v23, %v6150_v24  ;;  %v8786_v19 = vld [vmem:[%s10442_s15 + $0x208] sm:$0xff]   ;;  %v8789_v60 = vld [vmem:[%s10442_s15 + $0x2d0] sm:$0xff]   ;;  %v8792_v51 = vld [vmem:[%s10442_s15 + $0x258] sm:$0xff]  }
0x10b3   : > { %7981 = vmatpush3.bf16.msra.mxu1 %v8758_v35  ;;  %8009 = vmatpush3.bf16.msra.mxu0 %v8759_v36  ;;  %v7653_v10 = vcombine.low %v6149_v26, %v6151_v12  ;;  %v8787_v63 = vld [vmem:[%s10442_s15 + $0x288] sm:$0xff]   ;;  %v8790_v7 = vld [vmem:[%s10442_s15 + $0x210] sm:$0xff]   ;;  %v8793_v33 = vld [vmem:[%s10442_s15 + $0x2d8] sm:$0xff]  }
0x10b4   : > { %6078 = vmatprep.mubr.bf16.mxu1 %v9942_v28  ;;  %6127 = vmatprep.mubr.bf16.mxu0 %v9944_v32  ;;  %v8767_v28 = vld [vmem:[%s10442_s15 + $0xa0] sm:$0xff]   ;;  %v8768_v32 = vld [vmem:[%s10442_s15 + $0x68] sm:$0xff]   ;;  %v8791_v8 = vld [vmem:[%s10442_s15 + $0x290] sm:$0xff]  }
0x10b5   : > { %7982 = vmatprep.subr.bf16.mxu1 %v8760_v22  ;;  %8010 = vmatprep.subr.bf16.mxu0 %v8761_v15  ;;  %v8794_v34 = vld [vmem:[%s10442_s15 + $0x218] sm:$0xff]   ;;  %v8796_v36 = vld [vmem:[%s10442_s15 + $0x260] sm:$0xff]  }
0x10b6   : > { %v8795_v35 = vld [vmem:[%s10442_s15 + $0x298] sm:$0xff]   ;;  %v8797_v22 = vld [vmem:[%s10442_s15 + $0x2e0] sm:$0xff]  }
0x10b7   : > { %7983 = vmatpush3.bf16.msra.mxu1 %v8762_v37  ;;  %8011 = vmatpush3.bf16.msra.mxu0 %v8763_v41  ;;  %v8798_v15 = vld [vmem:[%s10442_s15 + $0x220] sm:$0xff]   ;;  %v8800_v41 = vld [vmem:[%s10442_s15 + $0x268] sm:$0xff]   ;;  %v10225_v18 = vld [vmem:[%s10440_s13 + $0x78] sm:$0xff] }
0x10b8   : > { %7984 = vmatprep.subr.bf16.mxu1 %v8764_v42  ;;  %8012 = vmatprep.subr.bf16.mxu0 %v8765_v44  ;;  %v8799_v37 = vld [vmem:[%s10442_s15 + $0x2a0] sm:$0xff]   ;;  %v8801_v42 = vld [vmem:[%s10442_s15 + $0x2e8] sm:$0xff]  }
0x10b9   : > { %v8802_v44 = vld [vmem:[%s10442_s15 + $0x228] sm:$0xff]  }
0x10bb   : > { %7985 = vmatpush3.bf16.msra.mxu1 %v8766_v45  ;;  %8013 = vmatpush3.bf16.msra.mxu0 %v8767_v28  ;;  %v8803_v45 = vld [vmem:[%s10442_s15 + $0x2a8] sm:$0xff]   ;;  %v8804_v28 = vld [vmem:[%s10442_s15 + $0x270] sm:$0xff]  }
0x10bc   : > { %7986 = vmatprep.subr.bf16.mxu1 %v8768_v32  ;;  %8014 = vmatprep.subr.bf16.mxu0 %v8769_v47  ;;  %v8805_v32 = vld [vmem:[%s10442_s15 + $0x2f0] sm:$0xff]  }
0x10bd   : > { %v8806_v47 = vld [vmem:[%s10442_s15 + $0x230] sm:$0xff]  }
0x10bf   : > { %7987 = vmatpush3.bf16.msra.mxu1 %v8770_v48  ;;  %8015 = vmatpush3.bf16.msra.mxu0 %v8771_v4  ;;  %v8807_v48 = vld [vmem:[%s10442_s15 + $0x2b0] sm:$0xff]   ;;  %v8808_v4 = vld [vmem:[%s10442_s15 + $0x278] sm:$0xff]  }
0x10c0   : > { %7988 = vmatprep.subr.bf16.mxu1 %v8772_v54  ;;  %8016 = vmatprep.subr.bf16.mxu0 %v8773_v9  ;;  %v8809_v54 = vld [vmem:[%s10442_s15 + $0x2f8] sm:$0xff]  }
0x10c1   : > { %v8810_v9 = vld [vmem:[%s10442_s15 + $0x238] sm:$0xff]  }
0x10c3   : > { %7989 = vmatpush3.bf16.msra.mxu1 %v8774_v53  ;;  %8017 = vmatpush3.bf16.msra.mxu0 %v8775_v52  ;;  %v8811_v53 = vld [vmem:[%s10442_s15 + $0x2b8] sm:$0xff]   ;;  %v10206_v52 = vld [vmem:[%s10440_s13 + $0x30] sm:$0xff] }
0x10c4   : > { %7990 = vmatprep.subr.bf16.mxu1 %v8776_v1  ;;  %8018 = vmatprep.subr.bf16.mxu0 %v8777_v56  ;;  %v10211_v1 = vld [vmem:[%s10440_s13 + $0x70] sm:$0xff]  ;;  %v10216_v56 = vld [vmem:[%s10440_s13 + $0x38] sm:$0xff] }
0x10c5   : > { %v7691_v38 = vcombine.low %v10206_v52, %v10211_v1  ;;  %v7692_v49 = vcombine.high %v10206_v52, %v10211_v1  ;;  %v7693_v39 = vcombine.low %v10216_v56, %v10225_v18  ;;  %v8813_v52 = vld [vmem:[%s10442_s15 + $0x3c0] sm:$0xff]  }
0x10c7   : > { %7991 = vmatpush3.bf16.msra.mxu1 %v8778_v58  ;;  %8019 = vmatpush3.bf16.msra.mxu0 %v8779_v43  ;;  %v7694_v58 = vcombine.high %v10216_v56, %v10225_v18 }
0x10c8   : > { %6214 = vmatprep.subr.bf16.mxu1 %v7648_v59  ;;  %6267 = vmatprep.subr.bf16.mxu0 %v7650_v40 }
0x10ca   : > { %6079 = vmatmul.mubr.bf16.vlgmr.msra.gmra.mrb[84].mxu1 %v9938_v61  ;;  %6128 = vmatmul.mubr.bf16.vlgmr.msra.gmra.mrb[80].mxu0 %v9940_v21  ;;  %v8780_v61 = vld [vmem:[%s10442_s15 + $0x240] sm:$0xff]  }
0x10cb   : > { %6086 = vmatprep.mubr.bf16.mxu1 %v9961_v31  ;;  %6135 = vmatprep.mubr.bf16.mxu0 %v9963_v2  ;;  %v8781_v21 = vld [vmem:[%s10442_s15 + $0x2c0] sm:$0xff]   ;;  %v8784_v31 = vld [vmem:[%s10442_s15 + $0x248] sm:$0xff]  }
0x10cc   : > { %6215 = vmatpush1.bf16.msra.mxu1 %v7647_v62  ;;  %6268 = vmatpush1.bf16.msra.mxu0 %v7649_v5  ;;  %v8785_v2 = vld [vmem:[%s10442_s15 + $0x2c8] sm:$0xff]  }
0x10cd   : > { %6216 = vmatprep.subr.bf16.mxu1 %v7652_v6  ;;  %6269 = vmatprep.subr.bf16.mxu0 %v7654_v3 }
0x10d0   : > { %6217 = vmatpush1.bf16.msra.mxu1 %v7651_v50  ;;  %6270 = vmatpush1.bf16.msra.mxu0 %v7653_v10 }
0x10d1   : > { %8032 = vmatprep.subr.bf16.mxu1 %v8780_v61  ;;  %8060 = vmatprep.subr.bf16.mxu0 %v8781_v21 }
0x10d2   : > { %6087 = vmatmul.mubr.bf16.gmra.mrb[88].mxu1 %v9957_v17  ;;  %6136 = vmatmul.mubr.bf16.gmra.mrb[84].mxu0 %v9959_v46  ;;  %v8782_v17 = vld [vmem:[%s10442_s15 + $0x200] sm:$0xff]  }
0x10d3   : > { %6246 = vmatprep.mubr.bf16.mxu1 %v8946_v30  ;;  %6299 = vmatprep.mubr.bf16.mxu0 %v8946_v30  ;;  %v8783_v46 = vld [vmem:[%s10442_s15 + $0x280] sm:$0xff]  }
0x10da   : > { %7655 = vmatmul.mubr.msk.bf16.vlgmr.msra.gmra.mrb[92].mxu1 %vm649_vm0, %v9789_v0  ;;  %7657 = vmatmul.mubr.msk.bf16.vlgmr.msra.gmra.mrb[88].mxu0 %vm649_vm0, %v9789_v0 }
0x10db   : > { %6256 = vmatprep.mubr.bf16.mxu1 %v8946_v30  ;;  %6309 = vmatprep.mubr.bf16.mxu0 %v8946_v30 }
0x10dc   : > { %8033 = vmatpush3.bf16.msra.mxu1 %v8782_v17  ;;  %8061 = vmatpush3.bf16.msra.mxu0 %v8783_v46 }
0x10dd   : > { %8034 = vmatprep.subr.bf16.mxu1 %v8784_v31  ;;  %8062 = vmatprep.subr.bf16.mxu0 %v8785_v2 }
0x10e0   : > { %8035 = vmatpush3.bf16.msra.mxu1 %v8786_v19  ;;  %8063 = vmatpush3.bf16.msra.mxu0 %v8787_v63 }
0x10e1   : > { %8036 = vmatprep.subr.bf16.mxu1 %v8788_v14  ;;  %8064 = vmatprep.subr.bf16.mxu0 %v8789_v60 }
0x10e2   : > { %7656 = vmatmul.mubr.msk.bf16.gmra.mrb[96].mxu1 %vm649_vm0, %v9809_v27  ;;  %7658 = vmatmul.mubr.msk.bf16.gmra.mrb[92].mxu0 %vm649_vm0, %v9809_v27 }
0x10e4   : > { %8037 = vmatpush3.bf16.msra.mxu1 %v8790_v7  ;;  %8065 = vmatpush3.bf16.msra.mxu0 %v8791_v8 }
0x10e5   : > { %8038 = vmatprep.subr.bf16.mxu1 %v8792_v51  ;;  %8066 = vmatprep.subr.bf16.mxu0 %v8793_v33 }
0x10e8   : > { %8039 = vmatpush3.bf16.msra.mxu1 %v8794_v34  ;;  %8067 = vmatpush3.bf16.msra.mxu0 %v8795_v35 }
0x10e9   : > { %8040 = vmatprep.subr.bf16.mxu1 %v8796_v36  ;;  %8068 = vmatprep.subr.bf16.mxu0 %v8797_v22 }
0x10ec   : > { %8041 = vmatpush3.bf16.msra.mxu1 %v8798_v15  ;;  %8069 = vmatpush3.bf16.msra.mxu0 %v8799_v37 }
0x10ed   : > { %8042 = vmatprep.subr.bf16.mxu1 %v8800_v41  ;;  %8070 = vmatprep.subr.bf16.mxu0 %v8801_v42 }
0x10f0   : > { %8043 = vmatpush3.bf16.msra.mxu1 %v8802_v44  ;;  %8071 = vmatpush3.bf16.msra.mxu0 %v8803_v45 }
0x10f1   : > { %8044 = vmatprep.subr.bf16.mxu1 %v8804_v28  ;;  %8072 = vmatprep.subr.bf16.mxu0 %v8805_v32 }
0x10f4   : > { %8045 = vmatpush3.bf16.msra.mxu1 %v8806_v47  ;;  %8073 = vmatpush3.bf16.msra.mxu0 %v8807_v48 }
0x10f5   : > { %8046 = vmatprep.subr.bf16.mxu1 %v8808_v4  ;;  %8074 = vmatprep.subr.bf16.mxu0 %v8809_v54 }
0x10f8   : > { %8047 = vmatpush3.bf16.msra.mxu1 %v8810_v9  ;;  %8075 = vmatpush3.bf16.msra.mxu0 %v8811_v53 }
0x10f9   : > { %6772 = vmatprep.subr.bf16.mxu1 %v7692_v49  ;;  %6825 = vmatprep.subr.bf16.mxu0 %v7694_v58 }
0x117d   : > { %v7936_v43 = vpop.f32.mrb[76].mxu1  ;;  %v7964_v59 = vpop.f32.mrb[72].mxu0 }
0x117e   : > { %v7937_v40 = vpop.f32.mrb[77].mxu1  ;;  %v7965_v23 = vpop.f32.mrb[73].mxu0 }
0x117f   : > { %v7938_v24 = vadd.f32 %v7937_v40, %v7936_v43  ;;  %v7966_v26 = vadd.f32 %v7965_v23, %v7964_v59  ;;  %v7939_v12 = vpop.f32.mrb[78].mxu1  ;;  %v7967_v62 = vpop.f32.mrb[74].mxu0 }
0x1180   : > { %v7940_v5 = vpop.f32.mrb[79].mxu1  ;;  %v7968_v6 = vpop.f32.mrb[75].mxu0 }
0x1181   : > { %v5840_v3 = vadd.f32 %v7966_v26, %v7938_v24  ;;  %v7941_v50 = vadd.f32 %v7940_v5, %v7939_v12  ;;  %v7969_v10 = vadd.f32 %v7968_v6, %v7967_v62  ;;  %v6152_v26 = vld [vmem:[%s10441_s14 + $0x8] sm:$0xf] }
0x1183   : > { %v5843_v61 = vadd.f32 %v7969_v10, %v7941_v50  ;;  %v6157_v50 = vrot.slane %v6152_v26, %v9923_v11  ;;  %v6165_v10 = vrot.slane %v6152_v26, %v9925_v13 }
0x1185   : > { %v7942_v21 = vpop.f32.mrb[80].mxu1  ;;  %v7970_v17 = vpop.f32.mrb[76].mxu0 }
0x1186   : > { %v7943_v46 = vpop.f32.mrb[81].mxu1  ;;  %v7971_v31 = vpop.f32.mrb[77].mxu0 }
0x1187   : > { %v7944_v2 = vadd.f32 %v7943_v46, %v7942_v21  ;;  %v7972_v19 = vadd.f32 %v7971_v31, %v7970_v17  ;;  %v7945_v63 = vpop.f32.mrb[82].mxu1  ;;  %v7973_v14 = vpop.f32.mrb[78].mxu0  ;;  %v6161_v17 = vrot.slane %v6152_v26, %v9930_v20  ;;  %v6169_v46 = vrot.slane %v6152_v26, %v9932_v55 }
0x1188   : > { %v7946_v60 = vpop.f32.mrb[83].mxu1  ;;  %v7974_v7 = vpop.f32.mrb[79].mxu0 }
0x1189   : > { %v5848_v8 = vadd.f32 %v7972_v19, %v7944_v2  ;;  %v7947_v51 = vadd.f32 %v7946_v60, %v7945_v63  ;;  %v7975_v33 = vadd.f32 %v7974_v7, %v7973_v14 }
0x118b   : > { %v5851_v34 = vadd.f32 %v7975_v33, %v7947_v51 }
0x119d   : > { %v7992_v35 = vpop.f32.mrb[84].mxu1  ;;  %v8020_v36 = vpop.f32.mrb[80].mxu0 }
0x119e   : > { %v7993_v22 = vpop.f32.mrb[85].mxu1  ;;  %v8021_v15 = vpop.f32.mrb[81].mxu0 }
0x119f   : > { %v7994_v37 = vadd.f32 %v7993_v22, %v7992_v35  ;;  %v8022_v41 = vadd.f32 %v8021_v15, %v8020_v36  ;;  %v7995_v42 = vpop.f32.mrb[86].mxu1  ;;  %v8023_v44 = vpop.f32.mrb[82].mxu0 }
0x11a0   : > { %v7996_v45 = vpop.f32.mrb[87].mxu1  ;;  %v8024_v28 = vpop.f32.mrb[83].mxu0 }
0x11a1   : > { %v6081_v32 = vadd.f32 %v7994_v37, %v5840_v3  ;;  %v7997_v47 = vadd.f32 %v7996_v45, %v7995_v42  ;;  %v8025_v48 = vadd.f32 %v8024_v28, %v8023_v44 }
0x11a3   : > { %v10231_v4 = vadd.f32 %v8022_v41, %v6081_v32  ;;  %v6084_v54 = vadd.f32 %v7997_v47, %v5843_v61  ;;  %v6706_v32 = vld [vmem:[%s10440_s13 + $0xb0] sm:$0xff] }
0x11a4   : > { %v6708_v47 = vld [vmem:[%s10440_s13 + $0xf0] sm:$0xff] }
0x11a5   : > { %v10233_v9 = vadd.f32 %v8025_v48, %v6084_v54  ;;  %v7998_v53 = vpop.f32.mrb[88].mxu1  ;;  %v8026_v49 = vpop.f32.mrb[84].mxu0 }
0x11a6   : > { %v7999_v58 = vpop.f32.mrb[89].mxu1  ;;  %v8027_v43 = vpop.f32.mrb[85].mxu0 }
0x11a7   : > { %v8000_v59 = vadd.f32 %v7999_v58, %v7998_v53  ;;  %v8028_v40 = vadd.f32 %v8027_v43, %v8026_v49  ;;  %v8001_v23 = vpop.f32.mrb[90].mxu1  ;;  %v8029_v24 = vpop.f32.mrb[86].mxu0  ;;  %v6707_v58 = vld [vmem:[%s10440_s13 + $0xb8] sm:$0xff] }
0x11a8   : > { %v8002_v12 = vpop.f32.mrb[91].mxu1  ;;  %v8030_v62 = vpop.f32.mrb[87].mxu0  ;;  %v6709_v43 = vld [vmem:[%s10440_s13 + $0xf8] sm:$0xff] }
0x11a9   : > { %v6089_v5 = vadd.f32 %v8000_v59, %v5848_v8  ;;  %v8003_v6 = vadd.f32 %v8002_v12, %v8001_v23  ;;  %v8031_v3 = vadd.f32 %v8030_v62, %v8029_v24 }
0x11ab   : > { %v10240_v61 = vadd.f32 %v8028_v40, %v6089_v5  ;;  %v6092_v21 = vadd.f32 %v8003_v6, %v5851_v34 }
0x11ad   : > { %v10244_v31 = vadd.f32 %v8031_v3, %v6092_v21  ;;  %v6248_v2 = vpop.f32.mrb[92].mxu1  ;;  %v6301_v19 = vpop.f32.mrb[88].mxu0  ;;  %v7696_v21 = vcombine.high %v6706_v32, %v6708_v47 }
0x11ae   : > { %v6249_v63 = vadd.f32 %v6248_v2, %v6157_v50  ;;  %v6302_v14 = vadd.f32 %v6301_v19, %v6165_v10  ;;  %v6250_v60 = vpop.f32.mrb[93].mxu1  ;;  %v6303_v7 = vpop.f32.mrb[89].mxu0  ;;  %v7698_v2 = vcombine.high %v6707_v58, %v6709_v43 }
0x11af   : > { %v6251_v8 = vadd.f32 %v6250_v60, %v6161_v17  ;;  %v6304_v51 = vadd.f32 %v6303_v7, %v6169_v46  ;;  %v6252_v33 = vpop.f32.mrb[94].mxu1  ;;  %v6305_v35 = vpop.f32.mrb[90].mxu0 }
0x11b0   : > { %v6253_v36 = vadd.f32 %v6252_v33, %v6157_v50  ;;  %v6306_v22 = vadd.f32 %v6305_v35, %v6165_v10  ;;  %v6254_v15 = vpop.f32.mrb[95].mxu1  ;;  %v6307_v34 = vpop.f32.mrb[91].mxu0  ;;  %v6320_v42 = vmax.f32 %v6249_v63, 0.0  ;;  %v6322_v44 = vmax.f32 %v6302_v14, 0.0 }
0x11b1   : > { %v6255_v37 = vadd.f32 %v6254_v15, %v6161_v17  ;;  %v6308_v41 = vadd.f32 %v6307_v34, %v6169_v46  ;;  %v6321_v48 = vmax.f32 %v6251_v8, 0.0  ;;  %v6323_v54 = vmax.f32 %v6304_v51, 0.0 }
0x11b2   : > { %v6324_v45 = vmax.f32 %v6253_v36, 0.0  ;;  %v6326_v28 = vmax.f32 %v6306_v22, 0.0  ;;  %v7695_v35 = vcombine.low %v6706_v32, %v6708_v47  ;;  %v7697_v15 = vcombine.low %v6707_v58, %v6709_v43  ;;  %v8817_v32 = vld [vmem:[%s10442_s15 + $0x3c8] sm:$0xff]   ;;  %v8826_v58 = vld [vmem:[%s10442_s15 + $0x318] sm:$0xff]  }
0x11b3   : > { %v6325_v53 = vmax.f32 %v6255_v37, 0.0  ;;  %v6327_v49 = vmax.f32 %v6308_v41, 0.0  ;;  %v8818_v47 = vld [vmem:[%s10442_s15 + $0x308] sm:$0xff]   ;;  %v8827_v43 = vld [vmem:[%s10442_s15 + $0x398] sm:$0xff]  }
0x11b4   : > { %v6336_v59 = vpack.c.bf16 %v6324_v45, %v6320_v42  ;;  %v6338_v40 = vpack.c.bf16 %v6326_v28, %v6322_v44  ;;  %v8814_v44 = vld [vmem:[%s10442_s15 + $0x300] sm:$0xff]   ;;  %v8816_v28 = vld [vmem:[%s10442_s15 + $0x348] sm:$0xff]  }
0x11b5   : > { %v6337_v23 = vpack.c.bf16 %v6325_v53, %v6321_v48  ;;  %v6339_v24 = vpack.c.bf16 %v6327_v49, %v6323_v54  ;;  %v6258_v26 = vpop.f32.mrb[96].mxu1  ;;  %v6311_v12 = vpop.f32.mrb[92].mxu0  ;;  %v8815_v45 = vld [vmem:[%s10442_s15 + $0x380] sm:$0xff]   ;;  %v8821_v48 = vld [vmem:[%s10442_s15 + $0x3d0] sm:$0xff]   ;;  %v8824_v53 = vld [vmem:[%s10442_s15 + $0x358] sm:$0xff]  }
0x11b6   : > { %v6259_v62 = vadd.f32 %v6258_v26, %v6157_v50  ;;  %v6312_v5 = vadd.f32 %v6311_v12, %v6165_v10  ;;  %v6260_v6 = vpop.f32.mrb[97].mxu1  ;;  %v6313_v3 = vpop.f32.mrb[93].mxu0  ;;  %v8823_v54 = vld [vmem:[%s10442_s15 + $0x390] sm:$0xff]   ;;  %v8825_v49 = vld [vmem:[%s10442_s15 + $0x3d8] sm:$0xff]   ;;  %v8832_v26 = vld [vmem:[%s10442_s15 + $0x368] sm:$0xff]  }
0x11b7   : > { %v6261_v19 = vadd.f32 %v6260_v6, %v6161_v17  ;;  %v6314_v63 = vadd.f32 %v6313_v3, %v6169_v46  ;;  %v6262_v14 = vpop.f32.mrb[98].mxu1  ;;  %v6315_v60 = vpop.f32.mrb[94].mxu0  ;;  %6632 = vmatprep.mubr.bf16.mxu1 %v6337_v23  ;;  %6681 = vmatprep.mubr.bf16.mxu0 %v6339_v24  ;;  %v8830_v23 = vld [vmem:[%s10442_s15 + $0x320] sm:$0xff]   ;;  %v8833_v12 = vld [vmem:[%s10442_s15 + $0x3e8] sm:$0xff]   ;;  %v8836_v6 = vld [vmem:[%s10442_s15 + $0x370] sm:$0xff]  }
0x11b8   : > { %v6263_v7 = vadd.f32 %v6262_v14, %v6157_v50  ;;  %v6316_v8 = vadd.f32 %v6315_v60, %v6165_v10  ;;  %v6264_v51 = vpop.f32.mrb[99].mxu1  ;;  %v6317_v33 = vpop.f32.mrb[95].mxu0  ;;  %6633 = vmatmul.mubr.bf16.vlgmr.msra.gmra.mrb[100].mxu1 %v6336_v59  ;;  %6682 = vmatmul.mubr.bf16.vlgmr.msra.gmra.mrb[96].mxu0 %v6338_v40  ;;  %v6328_v34 = vmax.f32 %v6259_v62, 0.0  ;;  %v6330_v37 = vmax.f32 %v6312_v5, 0.0  ;;  %v8828_v59 = vld [vmem:[%s10442_s15 + $0x360] sm:$0xff]   ;;  %v8834_v62 = vld [vmem:[%s10442_s15 + $0x328] sm:$0xff]  }
0x11b9   : > { %v6265_v36 = vadd.f32 %v6264_v51, %v6161_v17  ;;  %v6318_v22 = vadd.f32 %v6317_v33, %v6169_v46  ;;  %6773 = vmatpush1.bf16.msra.mxu1 %v7691_v38  ;;  %6826 = vmatpush1.bf16.msra.mxu0 %v7693_v39  ;;  %v8812_v17 = vld [vmem:[%s10442_s15 + $0x340] sm:$0xff]   ;;  %v6329_v1 = vmax.f32 %v6261_v19, 0.0  ;;  %v6331_v38 = vmax.f32 %v6314_v63, 0.0  ;;  %v8835_v5 = vld [vmem:[%s10442_s15 + $0x3a8] sm:$0xff]   ;;  %v8837_v3 = vld [vmem:[%s10442_s15 + $0x3f0] sm:$0xff]  }
0x11ba   : > { %v6332_v50 = vmax.f32 %v6263_v7, 0.0  ;;  %v6334_v10 = vmax.f32 %v6316_v8, 0.0  ;;  %6774 = vmatprep.subr.bf16.mxu1 %v7696_v21  ;;  %6827 = vmatprep.subr.bf16.mxu0 %v7698_v2  ;;  %v8829_v40 = vld [vmem:[%s10442_s15 + $0x3e0] sm:$0xff]   ;;  %v8838_v21 = vld [vmem:[%s10442_s15 + $0x330] sm:$0xff]   ;;  %v8840_v19 = vld [vmem:[%s10442_s15 + $0x378] sm:$0xff]  }
0x11bb   : > { %v6333_v46 = vmax.f32 %v6265_v36, 0.0  ;;  %v6335_v56 = vmax.f32 %v6318_v22, 0.0  ;;  %v8831_v24 = vld [vmem:[%s10442_s15 + $0x3a0] sm:$0xff]   ;;  %v8839_v2 = vld [vmem:[%s10442_s15 + $0x3b0] sm:$0xff]   ;;  %v8841_v63 = vld [vmem:[%s10442_s15 + $0x3f8] sm:$0xff]  }
0x11bc   : > { %v6340_v18 = vpack.c.bf16 %v6332_v50, %v6328_v34  ;;  %v6342_v39 = vpack.c.bf16 %v6334_v10, %v6330_v37  ;;  %v8842_v14 = vld [vmem:[%s10442_s15 + $0x338] sm:$0xff]  }
0x11bd   : > { %v6341_v41 = vpack.c.bf16 %v6333_v46, %v6329_v1  ;;  %v6343_v42 = vpack.c.bf16 %v6335_v56, %v6331_v38  ;;  %6775 = vmatpush1.bf16.msra.mxu1 %v7695_v35  ;;  %6828 = vmatpush1.bf16.msra.mxu0 %v7697_v15  ;;  %v8843_v60 = vld [vmem:[%s10442_s15 + $0x3b8] sm:$0xff]  }
0x11be   : > { %8088 = vmatprep.subr.bf16.mxu1 %v8812_v17  ;;  %8116 = vmatprep.subr.bf16.mxu0 %v8813_v52 }
0x11bf   : > { %6640 = vmatprep.mubr.bf16.mxu1 %v6341_v41  ;;  %6689 = vmatprep.mubr.bf16.mxu0 %v6343_v42 }
0x11c0   : > { %6641 = vmatmul.mubr.bf16.gmra.mrb[104].mxu1 %v6340_v18  ;;  %6690 = vmatmul.mubr.bf16.gmra.mrb[100].mxu0 %v6342_v39 }
0x11c1   : > { %6804 = vmatprep.mubr.bf16.mxu1 %v8946_v30  ;;  %6857 = vmatprep.mubr.bf16.mxu0 %v8946_v30 }
0x11c8   : > { %7699 = vmatmul.mubr.msk.bf16.vlgmr.msra.gmra.mrb[108].mxu1 %vm649_vm0, %v9789_v0  ;;  %7701 = vmatmul.mubr.msk.bf16.vlgmr.msra.gmra.mrb[104].mxu0 %vm649_vm0, %v9789_v0  ;;  %v8819_v0 = vld [vmem:[%s10442_s15 + $0x388] sm:$0xff]  }
0x11c9   : > { %6814 = vmatprep.mubr.bf16.mxu1 %v8946_v30  ;;  %6867 = vmatprep.mubr.bf16.mxu0 %v8946_v30  ;;  %v8820_v30 = vld [vmem:[%s10442_s15 + $0x350] sm:$0xff]  }
0x11ca   : > { %8089 = vmatpush3.bf16.msra.mxu1 %v8814_v44  ;;  %8117 = vmatpush3.bf16.msra.mxu0 %v8815_v45 }
0x11cb   : > { %8090 = vmatprep.subr.bf16.mxu1 %v8816_v28  ;;  %8118 = vmatprep.subr.bf16.mxu0 %v8817_v32  ;;  %v6710_v28 = vld [vmem:[%s10441_s14 + $0xc] sm:$0xf] }
0x11ce   : > { %8091 = vmatpush3.bf16.msra.mxu1 %v8818_v47  ;;  %8119 = vmatpush3.bf16.msra.mxu0 %v8819_v0 }
0x11cf   : > { %8092 = vmatprep.subr.bf16.mxu1 %v8820_v30  ;;  %8120 = vmatprep.subr.bf16.mxu0 %v8821_v48  ;;  %v6723_v48 = vrot.slane %v6710_v28, %v9925_v13 }
0x11d0   : > { %7700 = vmatmul.mubr.msk.bf16.gmra.mrb[112].mxu1 %vm649_vm0, %v9809_v27  ;;  %7702 = vmatmul.mubr.msk.bf16.gmra.mrb[108].mxu0 %vm649_vm0, %v9809_v27  ;;  %v8822_v27 = vld [vmem:[%s10442_s15 + $0x310] sm:$0xff]  }
0x11d2   : > { %8093 = vmatpush3.bf16.msra.mxu1 %v8822_v27  ;;  %8121 = vmatpush3.bf16.msra.mxu0 %v8823_v54 }
0x11d3   : > { %8094 = vmatprep.subr.bf16.mxu1 %v8824_v53  ;;  %8122 = vmatprep.subr.bf16.mxu0 %v8825_v49  ;;  %v6719_v53 = vrot.slane %v6710_v28, %v9930_v20  ;;  %v6727_v49 = vrot.slane %v6710_v28, %v9932_v55 }
0x11d6   : > { %8095 = vmatpush3.bf16.msra.mxu1 %v8826_v58  ;;  %8123 = vmatpush3.bf16.msra.mxu0 %v8827_v43 }
0x11d7   : > { %8096 = vmatprep.subr.bf16.mxu1 %v8828_v59  ;;  %8124 = vmatprep.subr.bf16.mxu0 %v8829_v40 }
0x11da   : > { %8097 = vmatpush3.bf16.msra.mxu1 %v8830_v23  ;;  %8125 = vmatpush3.bf16.msra.mxu0 %v8831_v24 }
0x11db   : > { %8098 = vmatprep.subr.bf16.mxu1 %v8832_v26  ;;  %8126 = vmatprep.subr.bf16.mxu0 %v8833_v12 }
0x11de   : > { %8099 = vmatpush3.bf16.msra.mxu1 %v8834_v62  ;;  %8127 = vmatpush3.bf16.msra.mxu0 %v8835_v5 }
0x11df   : > { %8100 = vmatprep.subr.bf16.mxu1 %v8836_v6  ;;  %8128 = vmatprep.subr.bf16.mxu0 %v8837_v3 }
0x11e2   : > { %8101 = vmatpush3.bf16.msra.mxu1 %v8838_v21  ;;  %8129 = vmatpush3.bf16.msra.mxu0 %v8839_v2 }
0x11e3   : > { %8102 = vmatprep.subr.bf16.mxu1 %v8840_v19  ;;  %8130 = vmatprep.subr.bf16.mxu0 %v8841_v63 }
0x11e6   : > { %8103 = vmatpush3.bf16.msra.mxu1 %v8842_v14  ;;  %8131 = vmatpush3.bf16.msra.mxu0 %v8843_v60 }
0x128b   : > { %v8048_v7 = vpop.f32.mrb[100].mxu1  ;;  %v8076_v8 = vpop.f32.mrb[96].mxu0 }
0x128c   : > { %v8049_v51 = vpop.f32.mrb[101].mxu1  ;;  %v8077_v33 = vpop.f32.mrb[97].mxu0 }
0x128d   : > { %v8050_v35 = vadd.f32 %v8049_v51, %v8048_v7  ;;  %v8078_v36 = vadd.f32 %v8077_v33, %v8076_v8  ;;  %v8051_v22 = vpop.f32.mrb[102].mxu1  ;;  %v8079_v15 = vpop.f32.mrb[98].mxu0 }
0x128e   : > { %v8052_v34 = vpop.f32.mrb[103].mxu1  ;;  %v8080_v37 = vpop.f32.mrb[99].mxu0 }
0x128f   : > { %v6684_v50 = vadd.f32 %v8078_v36, %v8050_v35  ;;  %v8053_v10 = vadd.f32 %v8052_v34, %v8051_v22  ;;  %v8081_v17 = vadd.f32 %v8080_v37, %v8079_v15 }
0x1291   : > { %v10373_v52 = vadd.f32 %v6684_v50, %v10231_v4  ;;  %v6687_v1 = vadd.f32 %v8081_v17, %v8053_v10 }
0x1293   : > { %v10376_v38 = vadd.f32 %v6687_v1, %v10233_v9  ;;  %v8054_v46 = vpop.f32.mrb[104].mxu1  ;;  %v8082_v56 = vpop.f32.mrb[100].mxu0  ;;  %v6715_v9 = vrot.slane %v6710_v28, %v9923_v11 }
0x1294   : > { %v8055_v18 = vpop.f32.mrb[105].mxu1  ;;  %v8083_v39 = vpop.f32.mrb[101].mxu0 }
0x1295   : > { %v8056_v41 = vadd.f32 %v8055_v18, %v8054_v46  ;;  %v8084_v42 = vadd.f32 %v8083_v39, %v8082_v56  ;;  %v8057_v44 = vpop.f32.mrb[106].mxu1  ;;  %v8085_v45 = vpop.f32.mrb[102].mxu0 }
0x1296   : > { %v8058_v32 = vpop.f32.mrb[107].mxu1  ;;  %v8086_v47 = vpop.f32.mrb[103].mxu0 }
0x1297   : > { %v6692_v4 = vadd.f32 %v8084_v42, %v8056_v41  ;;  %v8059_v0 = vadd.f32 %v8058_v32, %v8057_v44  ;;  %v8087_v30 = vadd.f32 %v8086_v47, %v8085_v45 }
0x1299   : > { %v10384_v27 = vadd.f32 %v6692_v4, %v10240_v61  ;;  %v6695_v54 = vadd.f32 %v8087_v30, %v8059_v0 }
0x129b   : > { %v10389_v58 = vadd.f32 %v6695_v54, %v10244_v31  ;;  %v6806_v43 = vpop.f32.mrb[108].mxu1  ;;  %v6859_v59 = vpop.f32.mrb[104].mxu0 }
0x129c   : > { %v6807_v40 = vadd.f32 %v6806_v43, %v6715_v9  ;;  %v6860_v23 = vadd.f32 %v6859_v59, %v6723_v48  ;;  %v6808_v24 = vpop.f32.mrb[109].mxu1  ;;  %v6861_v26 = vpop.f32.mrb[105].mxu0 }
0x129d   : > { %v6809_v11 = vadd.f32 %v6808_v24, %v6719_v53  ;;  %v6862_v12 = vadd.f32 %v6861_v26, %v6727_v49  ;;  %v6810_v13 = vpop.f32.mrb[110].mxu1  ;;  %v6863_v62 = vpop.f32.mrb[106].mxu0 }
0x129e   : > { %v6811_v61 = vadd.f32 %v6810_v13, %v6715_v9  ;;  %v6864_v5 = vadd.f32 %v6863_v62, %v6723_v48  ;;  %v6812_v6 = vpop.f32.mrb[111].mxu1  ;;  %v6865_v3 = vpop.f32.mrb[107].mxu0  ;;  %v6878_v55 = vmax.f32 %v6807_v40, 0.0  ;;  %v6880_v2 = vmax.f32 %v6860_v23, 0.0 }
0x129f   : > { %v6813_v20 = vadd.f32 %v6812_v6, %v6719_v53  ;;  %v6866_v21 = vadd.f32 %v6865_v3, %v6727_v49  ;;  %v6879_v63 = vmax.f32 %v6809_v11, 0.0  ;;  %v6881_v14 = vmax.f32 %v6862_v12, 0.0  ;;  %v7735_v3 = vld [vmem:[%s10443_s16] ss:$0 sm:$0xff] }
0x12a0   : > { %v6882_v31 = vmax.f32 %v6811_v61, 0.0  ;;  %v6884_v19 = vmax.f32 %v6864_v5, 0.0 }
0x12a1   : > { %v6883_v60 = vmax.f32 %v6813_v20, 0.0  ;;  %v6885_v7 = vmax.f32 %v6866_v21, 0.0 }
0x12a2   : > { %v6894_v8 = vpack.c.bf16 %v6882_v31, %v6878_v55  ;;  %v6896_v51 = vpack.c.bf16 %v6884_v19, %v6880_v2 }
0x12a3   : > { %v6895_v33 = vpack.c.bf16 %v6883_v60, %v6879_v63  ;;  %v6897_v35 = vpack.c.bf16 %v6885_v7, %v6881_v14  ;;  %v6816_v36 = vpop.f32.mrb[112].mxu1  ;;  %v6869_v22 = vpop.f32.mrb[108].mxu0 }
0x12a4   : > { %v6817_v15 = vadd.f32 %v6816_v36, %v6715_v9  ;;  %v6870_v34 = vadd.f32 %v6869_v22, %v6723_v48  ;;  %v6818_v37 = vpop.f32.mrb[113].mxu1  ;;  %v6871_v50 = vpop.f32.mrb[109].mxu0 }
0x12a5   : > { %v6819_v10 = vadd.f32 %v6818_v37, %v6719_v53  ;;  %v6872_v17 = vadd.f32 %v6871_v50, %v6727_v49  ;;  %v6820_v1 = vpop.f32.mrb[114].mxu1  ;;  %v6873_v46 = vpop.f32.mrb[110].mxu0  ;;  %7190 = vmatprep.mubr.bf16.mxu1 %v6895_v33  ;;  %7239 = vmatprep.mubr.bf16.mxu0 %v6897_v35 }
0x12a6   : > { %v6821_v56 = vadd.f32 %v6820_v1, %v6715_v9  ;;  %v6874_v18 = vadd.f32 %v6873_v46, %v6723_v48  ;;  %v6822_v39 = vpop.f32.mrb[115].mxu1  ;;  %v6875_v41 = vpop.f32.mrb[111].mxu0  ;;  %7191 = vmatmul.mubr.bf16.vlgmr.msra.gmra.mrb[116].mxu1 %v6894_v8  ;;  %7240 = vmatmul.mubr.bf16.vlgmr.msra.gmra.mrb[112].mxu0 %v6896_v51  ;;  %v6886_v45 = vmax.f32 %v6817_v15, 0.0  ;;  %v6888_v28 = vmax.f32 %v6870_v34, 0.0 }
0x12a7   : > { %v6823_v42 = vadd.f32 %v6822_v39, %v6719_v53  ;;  %v6876_v44 = vadd.f32 %v6875_v41, %v6727_v49  ;;  %v6887_v4 = vmax.f32 %v6819_v10, 0.0  ;;  %v6889_v0 = vmax.f32 %v6872_v17, 0.0 }
0x12a8   : > { %v6890_v32 = vmax.f32 %v6821_v56, 0.0  ;;  %v6892_v47 = vmax.f32 %v6874_v18, 0.0 }
0x12a9   : > { %v6891_v30 = vmax.f32 %v6823_v42, 0.0  ;;  %v6893_v54 = vmax.f32 %v6876_v44, 0.0 }
0x12aa   : > { %v6898_v43 = vpack.c.bf16 %v6890_v32, %v6886_v45  ;;  %v6900_v59 = vpack.c.bf16 %v6892_v47, %v6888_v28 }
0x12ab   : > { %v6899_v40 = vpack.c.bf16 %v6891_v30, %v6887_v4  ;;  %v6901_v23 = vpack.c.bf16 %v6893_v54, %v6889_v0 }
0x12ad   : > { %7198 = vmatprep.mubr.bf16.mxu1 %v6899_v40  ;;  %7247 = vmatprep.mubr.bf16.mxu0 %v6901_v23 }
0x12ae   : > { %7199 = vmatmul.mubr.bf16.gmra.mrb[120].mxu1 %v6898_v43  ;;  %7248 = vmatmul.mubr.bf16.gmra.mrb[116].mxu0 %v6900_v59 }
0x1379   : > { %v8104_v9 = vpop.f32.mrb[116].mxu1  ;;  %v8132_v48 = vpop.f32.mrb[112].mxu0 }
0x137a   : > { %v8105_v53 = vpop.f32.mrb[117].mxu1  ;;  %v8133_v49 = vpop.f32.mrb[113].mxu0 }
0x137b   : > { %v8106_v24 = vadd.f32 %v8105_v53, %v8104_v9  ;;  %v8134_v26 = vadd.f32 %v8133_v49, %v8132_v48  ;;  %v8107_v11 = vpop.f32.mrb[118].mxu1  ;;  %v8135_v12 = vpop.f32.mrb[114].mxu0 }
0x137c   : > { %v8108_v13 = vpop.f32.mrb[119].mxu1  ;;  %v8136_v62 = vpop.f32.mrb[115].mxu0 }
0x137d   : > { %v7242_v61 = vadd.f32 %v8134_v26, %v8106_v24  ;;  %v8109_v5 = vadd.f32 %v8108_v13, %v8107_v11  ;;  %v8137_v6 = vadd.f32 %v8136_v62, %v8135_v12 }
0x137f   : > { %v7256_v20 = vadd.f32 %v7242_v61, %v10373_v52  ;;  %v7245_v21 = vadd.f32 %v8137_v6, %v8109_v5 }
0x1381   : > { %v7257_v55 = vadd.f32 %v7245_v21, %v10376_v38  ;;  %v8110_v2 = vpop.f32.mrb[120].mxu1  ;;  %v8138_v31 = vpop.f32.mrb[116].mxu0  ;;  %v7267_v19 = vadd.f32 %v7735_v3, %v7256_v20 }
0x1382   : > { %v8111_v63 = vpop.f32.mrb[121].mxu1  ;;  %v8139_v14 = vpop.f32.mrb[117].mxu0 }
0x1383   : > { %v8112_v60 = vadd.f32 %v8111_v63, %v8110_v2  ;;  %v8140_v7 = vadd.f32 %v8139_v14, %v8138_v31  ;;  %v8113_v8 = vpop.f32.mrb[122].mxu1  ;;  %v8141_v51 = vpop.f32.mrb[118].mxu0  ;;  %v7271_v33 = vadd.f32 %v7267_v19, %v9773_v57  ;;  %v7268_v35 = vadd.f32 %v7735_v3, %v7257_v55  ;;  %v7737_v55 = vld [vmem:[%s10445_s18] ss:$0 sm:$0xff] }
0x1384   : > { %v8114_v36 = vpop.f32.mrb[123].mxu1  ;;  %v8142_v22 = vpop.f32.mrb[119].mxu0 }
0x1385   : > { %v7250_v15 = vadd.f32 %v8140_v7, %v8112_v60  ;;  %v8115_v34 = vadd.f32 %v8114_v36, %v8113_v8  ;;  %v8143_v52 = vadd.f32 %v8142_v22, %v8141_v51  ;;  %v7277_v37 = vsel %vm649_vm0, %v7271_v33, 0.0 }
0x1386   : > { %7278 = vadd.xlane.f32.xlu1 %v7277_v37  ;;  %v7272_v38 = vadd.f32 %v7268_v35, %v9776_v16 }
0x1387   : > { %v7258_v50 = vadd.f32 %v7250_v15, %v10384_v27  ;;  %v7253_v10 = vadd.f32 %v8143_v52, %v8115_v34 }
0x1388   : > { %v7280_v1 = vsel %vm649_vm0, %v7272_v38, 0.0 }
0x1389   : > { %v7259_v17 = vadd.f32 %v7253_v10, %v10389_v58  ;;  %v7269_v46 = vadd.f32 %v7735_v3, %v7258_v50 }
0x138a   : > { %7281 = vadd.xlane.f32.xlu1 %v7280_v1 }
0x138b   : > { %v7273_v57 = vadd.f32 %v7269_v46, %v9805_v25  ;;  %v7270_v56 = vadd.f32 %v7735_v3, %v7259_v17  ;;  %v7736_v3 = vld [vmem:[%s10444_s17] ss:$0 sm:$0xff] }
0x138d   : > { %v7283_v18 = vsel %vm649_vm0, %v7273_v57, 0.0  ;;  %v7274_v39 = vadd.f32 %v7270_v56, %v9795_v29 }
0x138e   : > { %7284 = vadd.xlane.f32.xlu1 %v7283_v18 }
0x138f   : > { %v7286_v41 = vsel %vm649_vm0, %v7274_v39, 0.0 }
0x1392   : > { %7287 = vadd.xlane.f32.xlu1 %v7286_v41 }
0x1413   : > { %v7279_v16 = vpop.xlane.xlu1 %7278 }
0x1414   : > { %v7289_v27 = vmul.f32 0.03125, %v7279_v16 }
0x1416   : > { %v7293_v42 = vsub.f32 %v7271_v33, %v7289_v27 }
0x1417   : > { %v7282_v44 = vpop.xlane.xlu1 %7281 }
0x1418   : > { %v7290_v58 = vmul.f32 0.03125, %v7282_v44  ;;  %v7297_v45 = vmul.f32 %v7293_v42, %v7293_v42 }
0x141a   : > { %v7294_v28 = vsub.f32 %v7272_v38, %v7290_v58  ;;  %v7301_v32 = vsel %vm649_vm0, %v7297_v45, 0.0 }
0x141b   : > { %7302 = vadd.xlane.f32.xlu1 %v7301_v32  ;;  %v7285_v25 = vpop.xlane.xlu1 %7284 }
0x141c   : > { %v7291_v47 = vmul.f32 0.03125, %v7285_v25  ;;  %v7298_v4 = vmul.f32 %v7294_v28, %v7294_v28 }
0x141e   : > { %v7295_v0 = vsub.f32 %v7273_v57, %v7291_v47  ;;  %v7304_v29 = vsel %vm649_vm0, %v7298_v4, 0.0 }
0x141f   : > { %7305 = vadd.xlane.f32.xlu1 %v7304_v29  ;;  %v7288_v30 = vpop.xlane.xlu1 %7287 }
0x1420   : > { %v7292_v54 = vmul.f32 0.03125, %v7288_v30  ;;  %v7299_v43 = vmul.f32 %v7295_v0, %v7295_v0 }
0x1422   : > { %v7296_v59 = vsub.f32 %v7274_v39, %v7292_v54  ;;  %v7307_v40 = vsel %vm649_vm0, %v7299_v43, 0.0 }
0x1423   : > { %7308 = vadd.xlane.f32.xlu1 %v7307_v40 }
0x1424   : > { %v7300_v23 = vmul.f32 %v7296_v59, %v7296_v59 }
0x1426   : > { %v7310_v9 = vsel %vm649_vm0, %v7300_v23, 0.0 }
0x1427   : > { %7311 = vadd.xlane.f32.xlu0 %v7310_v9 }
0x14a8   : > { %v7303_v48 = vpop.xlane.xlu1 %7302 }
0x14a9   : > { %v7313_v53 = vmul.f32 0.03125, %v7303_v48 }
0x14ab   : > { %v7317_v49 = vadd.f32 1e-05, %v7313_v53 }
0x14ac   : > { %v7306_v24 = vpop.xlane.xlu1 %7305 }
0x14ad   : > { %8916 = vrsqrt.f32 %v7317_v49  ;;  %v7314_v26 = vmul.f32 0.03125, %v7306_v24 }
0x14af   : > { %v7318_v11 = vadd.f32 1e-05, %v7314_v26 }
0x14b0   : > { %v7309_v12 = vpop.xlane.xlu1 %7308 }
0x14b1   : > { %8918 = vrsqrt.f32 %v7318_v11  ;;  %v7315_v13 = vmul.f32 0.03125, %v7309_v12 }
0x14b3   : > { %v7319_v62 = vadd.f32 1e-05, %v7315_v13 }
0x14b4   : > { %v7312_v61 = vpop.xlane.xlu0 %7311 }
0x14b5   : > { %8920 = vrsqrt.f32 %v7319_v62  ;;  %v7316_v5 = vmul.f32 0.03125, %v7312_v61 }
0x14b7   : > { %v8917_v6 = vpop.eup %8916  ;;  %v7320_v20 = vadd.f32 1e-05, %v7316_v5 }
0x14b8   : > { %v7325_v21 = vmul.f32 %v8917_v6, %v7293_v42 }
0x14b9   : > { %8922 = vrsqrt.f32 %v7320_v20 }
0x14ba   : > { %v7335_v2 = vmul.f32 %v7736_v3, %v7325_v21 }
0x14bb   : > { %v8919_v31 = vpop.eup %8918 }
0x14bc   : > { %v7345_v19 = vadd.f32 %v7737_v55, %v7335_v2  ;;  %v7326_v63 = vmul.f32 %v8919_v31, %v7294_v28 }
0x14be   : > { %7349 = vst.msk [vmem:[%s626_s26] sm:$0xff] %vm649_vm0, %v7345_v19  ;;  %v7336_v14 = vmul.f32 %v7736_v3, %v7326_v63 }
0x14bf   : > { %v8921_v60 = vpop.eup %8920 }
0x14c0   : > { %v7346_v7 = vadd.f32 %v7737_v55, %v7336_v14  ;;  %v7327_v8 = vmul.f32 %v8921_v60, %v7295_v0 }
0x14c2   : > { %7350 = vst.msk [vmem:[%s626_s26 + $0x8] sm:$0xff] %vm649_vm0, %v7346_v7  ;;  %v7337_v51 = vmul.f32 %v7736_v3, %v7327_v8 }
0x14c3   : > { %v8923_v33 = vpop.eup %8922 }
0x14c4   : > { %v7347_v35 = vadd.f32 %v7737_v55, %v7337_v51  ;;  %v7328_v36 = vmul.f32 %v8923_v33, %v7296_v59 }
0x14c6   : > { %7351 = vst.msk [vmem:[%s626_s26 + $0x10] sm:$0xff] %vm649_vm0, %v7347_v35  ;;  %v7338_v22 = vmul.f32 %v7736_v3, %v7328_v36 }
0x14c8   : > { %v7348_v15 = vadd.f32 %v7737_v55, %v7338_v22 }
0x14ca   : > { %7352 = vst.msk [vmem:[%s626_s26 + $0x18] sm:$0xff] %vm649_vm0, %v7348_v15 }
0x14cb PF: > { %s10459_s27 = sld [smem:[#allocation2_spill]] }
0x14d1   : > { %s29_s0 = sadd.s32 1, %s10459_s27  }
0x14d2   : > { %p26_p4 = scmp.ge.s32.totalorder %s29_s0, 4  }
0x14d4   :  { %28 = sbr.rel (!%p26_p4) target bundleno = 5 (0x5), region = 129 }

</bundles_post_ra>
